<compile_context>
chip_gen: v7x
topology: tpu7x:2x2x1
jax: 0.10.0
libtpu: 0.0.40
codegen_flags: <defaults>
</compile_context>

<pallas_src>
import functools
import math

import numpy as np
import jax
import jax.numpy as jnp
from jax.experimental import pallas as pl
from jax.experimental.pallas import tpu as pltpu


# ----------------------------------------------------------------------------- tiling helpers

def _pick_tile(dim, pref=512):
    """Largest tile <= pref that is a multiple of 128 and divides dim; else the full dim."""
    if dim % 128 != 0:
        return dim
    t = min(pref, dim)
    while dim % t != 0:
        t -= 128
    return t


def _leading_tile(dim, pref=128):
    t = min(pref, dim)
    while dim % t != 0:
        t -= 1
    return t


# ----------------------------------------------------------------------------- matmul kernels
# out (Cout, M) = W (Cout, K) @ P (K, M); epilogue: + bias (Cout,1) [+ residual] [ReLU].
# f32 accumulation; bf16 operands; bf16 (or f32) output.

def _mm_kernel_single(w_ref, p_ref, b_ref, o_ref, *, relu):
    out = jnp.dot(w_ref[...], p_ref[...], preferred_element_type=jnp.float32)
    out = out + b_ref[...]
    if relu:
        out = jnp.maximum(out, 0.0)
    o_ref[...] = out.astype(o_ref.dtype)


def _mm_res_kernel_single(w_ref, p_ref, b_ref, r_ref, o_ref, *, relu):
    out = jnp.dot(w_ref[...], p_ref[...], preferred_element_type=jnp.float32)
    out = out + b_ref[...] + r_ref[...].astype(jnp.float32)
    if relu:
        out = jnp.maximum(out, 0.0)
    o_ref[...] = out.astype(o_ref.dtype)


def _mm_kernel_acc(w_ref, p_ref, b_ref, o_ref, acc_ref, *, relu):
    @pl.when(pl.program_id(1) == 0)
    def _():
        acc_ref[...] = jnp.zeros_like(acc_ref)

    acc_ref[...] += jnp.dot(w_ref[...], p_ref[...], preferred_element_type=jnp.float32)

    @pl.when(pl.program_id(1) == pl.num_programs(1) - 1)
    def _():
        out = acc_ref[...] + b_ref[...]
        if relu:
            out = jnp.maximum(out, 0.0)
        o_ref[...] = out.astype(o_ref.dtype)


def _mm_res_kernel_acc(w_ref, p_ref, b_ref, r_ref, o_ref, acc_ref, *, relu):
    @pl.when(pl.program_id(1) == 0)
    def _():
        acc_ref[...] = jnp.zeros_like(acc_ref)

    acc_ref[...] += jnp.dot(w_ref[...], p_ref[...], preferred_element_type=jnp.float32)

    @pl.when(pl.program_id(1) == pl.num_programs(1) - 1)
    def _():
        out = acc_ref[...] + b_ref[...] + r_ref[...].astype(jnp.float32)
        if relu:
            out = jnp.maximum(out, 0.0)
        o_ref[...] = out.astype(o_ref.dtype)


def matmul_bias(w, p, bias, residual=None, relu=False, out_dtype=jnp.bfloat16,
                tm_pref=512, tk_pref=512):
    """out = relu?( w @ p + bias [+ residual] );  w:(Cout,K) bf16, p:(K,M) bf16."""
    cout, K = w.shape
    _, M = p.shape
    tm = _pick_tile(M, tm_pref)
    tk = _pick_tile(K, tk_pref)
    nm, nk = M // tm, K // tk
    bias = bias.reshape(cout, 1).astype(jnp.float32)

    cparams = pltpu.CompilerParams(
        dimension_semantics=("parallel",) if nk == 1 else ("parallel", "arbitrary"),
        vmem_limit_bytes=48 * 1024 * 1024,
    )

    if nk == 1:
        # Fast path: whole K resident, no accumulator round-trip.
        in_specs = [
            pl.BlockSpec((cout, K), lambda m: (0, 0)),    # weights (BN scale folded in)
            pl.BlockSpec((K, tm), lambda m: (0, m)),      # im2col patches (lane = spatial)
            pl.BlockSpec((cout, 1), lambda m: (0, 0)),    # BN bias
        ]
        args = [w, p, bias]
        if residual is not None:
            in_specs.append(pl.BlockSpec((cout, tm), lambda m: (0, m)))
            args.append(residual)
            kernel = functools.partial(_mm_res_kernel_single, relu=relu)
        else:
            kernel = functools.partial(_mm_kernel_single, relu=relu)
        return pl.pallas_call(
            kernel,
            out_shape=jax.ShapeDtypeStruct((cout, M), out_dtype),
            grid=(nm,),
            in_specs=in_specs,
            out_specs=pl.BlockSpec((cout, tm), lambda m: (0, m)),
            compiler_params=cparams,
        )(*args)

    # General path: K-tiled grid with an f32 VMEM accumulator.
    in_specs = [
        pl.BlockSpec((cout, tk), lambda m, k: (0, k)),
        pl.BlockSpec((tk, tm), lambda m, k: (k, m)),
        pl.BlockSpec((cout, 1), lambda m, k: (0, 0)),
    ]
    args = [w, p, bias]
    if residual is not None:
        in_specs.append(pl.BlockSpec((cout, tm), lambda m, k: (0, m)))
        args.append(residual)
        kernel = functools.partial(_mm_res_kernel_acc, relu=relu)
    else:
        kernel = functools.partial(_mm_kernel_acc, relu=relu)
    return pl.pallas_call(
        kernel,
        out_shape=jax.ShapeDtypeStruct((cout, M), out_dtype),
        grid=(nm, nk),
        in_specs=in_specs,
        out_specs=pl.BlockSpec((cout, tm), lambda m, k: (0, m)),
        scratch_shapes=[pltpu.VMEM((cout, tm), jnp.float32)],
        compiler_params=cparams,
    )(*args)


# ----------------------------------------------------------------------------- conv (im2col) + BN

def _im2col_cnhw(x, kh, kw, pad):
    """x: (C, N, H, W) -> (C*KH*KW, N*H*W); contiguous reshapes only (no transpose)."""
    c, n, h, w = x.shape
    xp = jnp.pad(x, ((0, 0), (0, 0), (pad, pad), (pad, pad)))
    taps = [xp[:, :, i:i + h, j:j + w] for i in range(kh) for j in range(kw)]
    patches = jnp.stack(taps, axis=1)                 # (C, KH*KW, N, H, W)
    return patches.reshape(c * kh * kw, n * h * w)


def conv_bn(x, w_oihw, scale, bias, relu=False, residual=None, out_dtype=jnp.bfloat16):
    """x: (C, N, H, W) bf16; w_oihw: PyTorch (Cout, Cin, KH, KW); 'same' pad, stride 1, no bias."""
    c, n, h, w = x.shape
    cout, cin, kh, kw = w_oihw.shape
    pad = kh // 2
    if kh == 1 and kw == 1:
        patches = x.reshape(c, n * h * w)
    else:
        patches = _im2col_cnhw(x, kh, kw, pad)
    # Fold the BN scale into the weight rows (per output channel), keep bias for the epilogue.
    wmat = (w_oihw.reshape(cout, cin * kh * kw) * scale[:, None]).astype(jnp.bfloat16)
    res = None if residual is None else residual.reshape(cout, n * h * w)
    y = matmul_bias(wmat, patches.astype(jnp.bfloat16), bias,
                    residual=res, relu=relu, out_dtype=out_dtype)
    return y.reshape(cout, n, h, w)


# ----------------------------------------------------------------------------- bilinear upsample

def _interp_coeffs(out_size, in_size):
    scale = in_size / out_size
    src = (np.arange(out_size) + 0.5) * scale - 0.5
    src = np.maximum(src, 0.0)                           # PyTorch clamps negatives
    i0 = np.minimum(np.floor(src), in_size - 1).astype(np.int32)
    i1 = np.minimum(i0 + 1, in_size - 1).astype(np.int32)
    frac = (src - i0).astype(np.float32)
    return i0, i1, frac


def _bilerp_kernel(x00_ref, x01_ref, x10_ref, x11_ref, w_ref, o_ref):
    w = w_ref[...]                                       # (4, OH, OW) f32
    acc = (x00_ref[...].astype(jnp.float32) * w[0]
           + x01_ref[...].astype(jnp.float32) * w[1]
           + x10_ref[...].astype(jnp.float32) * w[2]
           + x11_ref[...].astype(jnp.float32) * w[3])
    o_ref[...] = acc.astype(o_ref.dtype)


def upsample_bilinear(x, out_h, out_w):
    """x: (C, N, H, W) -> (C, N, out_h, out_w); matches F.interpolate(mode='bilinear',
    align_corners=False). Corner gathers use static indices; the lerp runs on the VPU."""
    c, n, h, w = x.shape
    if (out_h, out_w) == (h, w):
        return x
    iy0, iy1, fy = _interp_coeffs(out_h, h)
    ix0, ix1, fx = _interp_coeffs(out_w, w)
    wts = jnp.asarray(np.stack([
        np.outer(1.0 - fy, 1.0 - fx), np.outer(1.0 - fy, fx),
        np.outer(fy, 1.0 - fx), np.outer(fy, fx)], axis=0).astype(np.float32))

    xf = x.reshape(c * n, h, w)
    ry0, ry1 = iy0[:, None], iy1[:, None]
    cx0, cx1 = ix0[None, :], ix1[None, :]
    corners = (xf[:, ry0, cx0], xf[:, ry0, cx1], xf[:, ry1, cx0], xf[:, ry1, cx1])

    cn = c * n
    tc = _leading_tile(cn, 128)
    spec_x = pl.BlockSpec((tc, out_h, out_w), lambda i: (i, 0, 0))
    spec_w = pl.BlockSpec((4, out_h, out_w), lambda i: (0, 0, 0))
    out = pl.pallas_call(
        _bilerp_kernel,
        out_shape=jax.ShapeDtypeStruct((cn, out_h, out_w), x.dtype),
        grid=(cn // tc,),
        in_specs=[spec_x, spec_x, spec_x, spec_x, spec_w],
        out_specs=spec_x,
        compiler_params=pltpu.CompilerParams(dimension_semantics=("parallel",)),
    )(*corners, wts)
    return out.reshape(c, n, out_h, out_w)


# ----------------------------------------------------------------------------- module forward

def up_projection(x, out_h, out_w, p):
    x = upsample_bilinear(x, out_h, out_w)
    x_conv1 = conv_bn(x, p['conv1_w'], p['bn1_s'], p['bn1_b'], relu=True)       # relu(bn1(conv1(x)))
    bran2 = conv_bn(x, p['conv2_w'], p['bn2_s'], p['bn2_b'], relu=False)        # bn2(conv2(x))
    # relu(bn1_2(conv1_2(x_conv1)) + bran2): add + relu fused into the matmul epilogue
    return conv_bn(x_conv1, p['conv1_2_w'], p['bn1_2_s'], p['bn1_2_b'],
                   relu=True, residual=bran2)


def d_forward(params, x_block1, x_block2, x_block3, x_block4):
    # Inputs are NCHW like PyTorch; internally channel-first (C, N, H, W) with bf16 activations.
    x = jnp.transpose(x_block4, (1, 0, 2, 3)).astype(jnp.bfloat16)
    x_d0 = conv_bn(x, params['conv_w'], params['bn_s'], params['bn_b'], relu=True)
    x_d1 = up_projection(x_d0, x_block3.shape[2], x_block3.shape[3], params['up1'])
    x_d2 = up_projection(x_d1, x_block2.shape[2], x_block2.shape[3], params['up2'])
    x_d3 = up_projection(x_d2, x_block1.shape[2], x_block1.shape[3], params['up3'])
    x_d4 = up_projection(x_d3, x_block1.shape[2] * 2, x_block1.shape[3] * 2, params['up4'])
    return jnp.transpose(x_d4, (1, 0, 2, 3)).astype(jnp.float32)    # back to NCHW, f32


# ----------------------------------------------------------------------------- deterministic parameter init

def _init_conv(key, cout, cin, kh, kw):
    fan_in = cin * kh * kw
    return jax.random.normal(key, (cout, cin, kh, kw), jnp.float32) / math.sqrt(fan_in)


def _init_bn(key, c, eps=1e-5):
    k1, k2, k3, k4 = jax.random.split(key, 4)
    gamma = 1.0 + 0.1 * jax.random.normal(k1, (c,), jnp.float32)
    beta = 0.1 * jax.random.normal(k2, (c,), jnp.float32)
    mean = 0.1 * jax.random.normal(k3, (c,), jnp.float32)
    var = 0.5 + jax.random.uniform(k4, (c,), jnp.float32)
    s = gamma / jnp.sqrt(var + eps)
    b = beta - mean * s
    return s, b


def init_params(key, num_features=32):
    ks = iter(jax.random.split(key, 64))
    p = {}
    nf = num_features
    p['conv_w'] = _init_conv(next(ks), nf // 2, nf, 1, 1)
    p['bn_s'], p['bn_b'] = _init_bn(next(ks), nf // 2)
    nf //= 2
    for name in ('up1', 'up2', 'up3', 'up4'):
        cin, cout = nf, nf // 2
        up = {
            'conv1_w': _init_conv(next(ks), cout, cin, 5, 5),
            'conv1_2_w': _init_conv(next(ks), cout, cout, 3, 3),
            'conv2_w': _init_conv(next(ks), cout, cin, 5, 5),
        }
        up['bn1_s'], up['bn1_b'] = _init_bn(next(ks), cout)
        up['bn1_2_s'], up['bn1_2_b'] = _init_bn(next(ks), cout)
        up['bn2_s'], up['bn2_b'] = _init_bn(next(ks), cout)
        p[name] = up
        nf //= 2
    return p


# ----------------------------------------------------------------------------- main

if __name__ == "__main__":
    key = jax.random.PRNGKey(0)
    kp, k1, k2, k3, k4 = jax.random.split(key, 5)

    num_features = 32  # small stand-in for 2048; same structure (halved at every stage)
    params = init_params(kp, num_features=num_features)

    # Typical encoder pyramid: block1 highest resolution, block4 lowest (fed to the decoder).
    x_block1 = jax.random.normal(k1, (2, 4, 32, 32), jnp.float32)
    x_block2 = jax.random.normal(k2, (2, 4, 16, 16), jnp.float32)
    x_block3 = jax.random.normal(k3, (2, 4, 8, 8), jnp.float32)
    x_block4 = jax.random.normal(k4, (2, num_features, 4, 4), jnp.float32)

    out = jax.jit(d_forward)(params, x_block1, x_block2, x_block3, x_block4)
    out = jax.block_until_ready(out)

    expected = (2, num_features // 32, 2 * x_block1.shape[2], 2 * x_block1.shape[3])  # (2, 1, 64, 64)
    assert out.shape == expected, (out.shape, expected)
    assert bool(jnp.all(jnp.isfinite(out)))
    print("KERNEL_OK")
</pallas_src>

<mosaic_0001>
module attributes {stable_mosaic.version = 11 : i64} {
  func.func @_mm_kernel_single(%arg0: i32, %arg1: memref<16x32xbf16, #tpu.memory_space<vmem>>, %arg2: memref<32x32xbf16, #tpu.memory_space<vmem>>, %arg3: memref<16x1xf32, #tpu.memory_space<vmem>>, %arg4: memref<16x32xbf16, #tpu.memory_space<vmem>>) attributes {dimension_semantics = [#tpu.dimension_semantics<parallel>], iteration_bounds = array<i64: 1>, scalar_prefetch = 0 : i64, scratch_operands = 0 : i64, tpu.core_type = #tpu.core_type<tc>, window_params = [{pipeline_mode = #tpu.pipeline_mode<synchronous>, transform_indices = @transform_0, window_bounds = array<i64: 16, 32>}, {transform_indices = @transform_1, window_bounds = array<i64: 32, 32>}, {pipeline_mode = #tpu.pipeline_mode<synchronous>, transform_indices = @transform_2, window_bounds = array<i64: 16, 1>}, {transform_indices = @transform_3, window_bounds = array<i64: 16, 32>}]} {
    %c0 = arith.constant 0 : index
    %c0_0 = arith.constant 0 : index
    %0 = vector.load %arg1[%c0, %c0_0] : memref<16x32xbf16, #tpu.memory_space<vmem>>, vector<16x32xbf16>
    %c0_1 = arith.constant 0 : index
    %c0_2 = arith.constant 0 : index
    %1 = vector.load %arg2[%c0_1, %c0_2] : memref<32x32xbf16, #tpu.memory_space<vmem>>, vector<32x32xbf16>
    %cst = arith.constant dense<0.000000e+00> : vector<16x32xf32>
    %2 = tpu.matmul %0, %1, %cst {dimension_numbers = #tpu.dot_dimension_numbers<[1], [0], [0], [1], [0, 0, 1, 1], [], []>} : vector<16x32xbf16>, vector<32x32xbf16>, vector<16x32xf32> -> vector<16x32xf32>
    %c0_3 = arith.constant 0 : index
    %c0_4 = arith.constant 0 : index
    %3 = vector.load %arg3[%c0_3, %c0_4] : memref<16x1xf32, #tpu.memory_space<vmem>>, vector<16x1xf32>
    %4 = vector.broadcast %3 : vector<16x1xf32> to vector<16x32xf32>
    %5 = arith.addf %2, %4 : vector<16x32xf32>
    %cst_5 = arith.constant 0.000000e+00 : f32
    %6 = vector.broadcast %cst_5 : f32 to vector<16x32xf32>
    %7 = arith.maximumf %5, %6 : vector<16x32xf32>
    %8 = arith.truncf %7 : vector<16x32xf32> to vector<16x32xbf16>
    %c0_6 = arith.constant 0 : index
    %c0_7 = arith.constant 0 : index
    %9 = vector.load %arg4[%c0_6, %c0_7] : memref<16x32xbf16, #tpu.memory_space<vmem>>, vector<16x32xbf16>
    tpu.vector_store %arg4[%c0_6, %c0_7], %8 {strides = array<i32>} : memref<16x32xbf16, #tpu.memory_space<vmem>>, vector<16x32xbf16>,
    return
  }
  func.func @transform_0(%arg0: i32) -> (i32, i32) {
    %c0_i32 = arith.constant 0 : i32
    %c0_i32_0 = arith.constant 0 : i32
    %c0_i32_1 = arith.constant 0 : i32
    return %c0_i32, %c0_i32_0 : i32, i32
  }
  func.func @transform_1(%arg0: i32) -> (i32, i32) {
    %c0_i32 = arith.constant 0 : i32
    %c0_i32_0 = arith.constant 0 : i32
    return %c0_i32, %arg0 : i32, i32
  }
  func.func @transform_2(%arg0: i32) -> (i32, i32) {
    %c0_i32 = arith.constant 0 : i32
    %c0_i32_0 = arith.constant 0 : i32
    %c0_i32_1 = arith.constant 0 : i32
    return %c0_i32, %c0_i32_0 : i32, i32
  }
  func.func @transform_3(%arg0: i32) -> (i32, i32) {
    %c0_i32 = arith.constant 0 : i32
    %c0_i32_0 = arith.constant 0 : i32
    return %c0_i32, %arg0 : i32, i32
  }
}

module attributes {stable_mosaic.version = 11 : i64} {
  func.func @_bilerp_kernel(%arg0: i32, %arg1: memref<32x8x8xbf16, #tpu.memory_space<vmem>>, %arg2: memref<32x8x8xbf16, #tpu.memory_space<vmem>>, %arg3: memref<32x8x8xbf16, #tpu.memory_space<vmem>>, %arg4: memref<32x8x8xbf16, #tpu.memory_space<vmem>>, %arg5: memref<4x8x8xf32, #tpu.memory_space<vmem>>, %arg6: memref<32x8x8xbf16, #tpu.memory_space<vmem>>) attributes {dimension_semantics = [#tpu.dimension_semantics<parallel>], iteration_bounds = array<i64: 1>, scalar_prefetch = 0 : i64, scratch_operands = 0 : i64, tpu.core_type = #tpu.core_type<tc>, window_params = [{transform_indices = @transform_0, window_bounds = array<i64: 32, 8, 8>}, {transform_indices = @transform_1, window_bounds = array<i64: 32, 8, 8>}, {transform_indices = @transform_2, window_bounds = array<i64: 32, 8, 8>}, {transform_indices = @transform_3, window_bounds = array<i64: 32, 8, 8>}, {pipeline_mode = #tpu.pipeline_mode<synchronous>, transform_indices = @transform_4, window_bounds = array<i64: 4, 8, 8>}, {transform_indices = @transform_5, window_bounds = array<i64: 32, 8, 8>}]} {
    %c0 = arith.constant 0 : index
    %c0_0 = arith.constant 0 : index
    %c0_1 = arith.constant 0 : index
    %0 = vector.load %arg5[%c0, %c0_0, %c0_1] : memref<4x8x8xf32, #tpu.memory_space<vmem>>, vector<4x8x8xf32>
    %c0_2 = arith.constant 0 : index
    %c0_3 = arith.constant 0 : index
    %c0_4 = arith.constant 0 : index
    %1 = vector.load %arg1[%c0_2, %c0_3, %c0_4] : memref<32x8x8xbf16, #tpu.memory_space<vmem>>, vector<32x8x8xbf16>
    %2 = arith.extf %1 : vector<32x8x8xbf16> to vector<32x8x8xf32>
    %3 = vector.extract_strided_slice %0 {offsets = [0, 0, 0], sizes = [1, 8, 8], strides = [1, 1, 1]} : vector<4x8x8xf32> to vector<1x8x8xf32>
    %4 = vector.shape_cast %3 : vector<1x8x8xf32> to vector<8x8xf32>
    %5 = vector.shape_cast %4 : vector<8x8xf32> to vector<1x8x8xf32>
    %6 = vector.broadcast %5 : vector<1x8x8xf32> to vector<32x8x8xf32>
    %7 = arith.mulf %2, %6 : vector<32x8x8xf32>
    %c0_5 = arith.constant 0 : index
    %c0_6 = arith.constant 0 : index
    %c0_7 = arith.constant 0 : index
    %8 = vector.load %arg2[%c0_5, %c0_6, %c0_7] : memref<32x8x8xbf16, #tpu.memory_space<vmem>>, vector<32x8x8xbf16>
    %9 = arith.extf %8 : vector<32x8x8xbf16> to vector<32x8x8xf32>
    %10 = vector.extract_strided_slice %0 {offsets = [1, 0, 0], sizes = [1, 8, 8], strides = [1, 1, 1]} : vector<4x8x8xf32> to vector<1x8x8xf32>
    %11 = vector.shape_cast %10 : vector<1x8x8xf32> to vector<8x8xf32>
    %12 = vector.shape_cast %11 : vector<8x8xf32> to vector<1x8x8xf32>
    %13 = vector.broadcast %12 : vector<1x8x8xf32> to vector<32x8x8xf32>
    %14 = arith.mulf %9, %13 : vector<32x8x8xf32>
    %15 = arith.addf %7, %14 : vector<32x8x8xf32>
    %c0_8 = arith.constant 0 : index
    %c0_9 = arith.constant 0 : index
    %c0_10 = arith.constant 0 : index
    %16 = vector.load %arg3[%c0_8, %c0_9, %c0_10] : memref<32x8x8xbf16, #tpu.memory_space<vmem>>, vector<32x8x8xbf16>
    %17 = arith.extf %16 : vector<32x8x8xbf16> to vector<32x8x8xf32>
    %18 = vector.extract_strided_slice %0 {offsets = [2, 0, 0], sizes = [1, 8, 8], strides = [1, 1, 1]} : vector<4x8x8xf32> to vector<1x8x8xf32>
    %19 = vector.shape_cast %18 : vector<1x8x8xf32> to vector<8x8xf32>
    %20 = vector.shape_cast %19 : vector<8x8xf32> to vector<1x8x8xf32>
    %21 = vector.broadcast %20 : vector<1x8x8xf32> to vector<32x8x8xf32>
    %22 = arith.mulf %17, %21 : vector<32x8x8xf32>
    %23 = arith.addf %15, %22 : vector<32x8x8xf32>
    %c0_11 = arith.constant 0 : index
    %c0_12 = arith.constant 0 : index
    %c0_13 = arith.constant 0 : index
    %24 = vector.load %arg4[%c0_11, %c0_12, %c0_13] : memref<32x8x8xbf16, #tpu.memory_space<vmem>>, vector<32x8x8xbf16>
    %25 = arith.extf %24 : vector<32x8x8xbf16> to vector<32x8x8xf32>
    %26 = vector.extract_strided_slice %0 {offsets = [3, 0, 0], sizes = [1, 8, 8], strides = [1, 1, 1]} : vector<4x8x8xf32> to vector<1x8x8xf32>
    %27 = vector.shape_cast %26 : vector<1x8x8xf32> to vector<8x8xf32>
    %28 = vector.shape_cast %27 : vector<8x8xf32> to vector<1x8x8xf32>
    %29 = vector.broadcast %28 : vector<1x8x8xf32> to vector<32x8x8xf32>
    %30 = arith.mulf %25, %29 : vector<32x8x8xf32>
    %31 = arith.addf %23, %30 : vector<32x8x8xf32>
    %32 = arith.truncf %31 : vector<32x8x8xf32> to vector<32x8x8xbf16>
    %c0_14 = arith.constant 0 : index
    %c0_15 = arith.constant 0 : index
    %c0_16 = arith.constant 0 : index
    %33 = vector.load %arg6[%c0_14, %c0_15, %c0_16] : memref<32x8x8xbf16, #tpu.memory_space<vmem>>, vector<32x8x8xbf16>
    tpu.vector_store %arg6[%c0_14, %c0_15, %c0_16], %32 {strides = array<i32>} : memref<32x8x8xbf16, #tpu.memory_space<vmem>>, vector<32x8x8xbf16>,
    return
  }
  func.func @transform_0(%arg0: i32) -> (i32, i32, i32) {
    %c0_i32 = arith.constant 0 : i32
    %c0_i32_0 = arith.constant 0 : i32
    %c0_i32_1 = arith.constant 0 : i32
    return %arg0, %c0_i32, %c0_i32_0 : i32, i32, i32
  }
  func.func @transform_1(%arg0: i32) -> (i32, i32, i32) {
    %c0_i32 = arith.constant 0 : i32
    %c0_i32_0 = arith.constant 0 : i32
    %c0_i32_1 = arith.constant 0 : i32
    return %arg0, %c0_i32, %c0_i32_0 : i32, i32, i32
  }
  func.func @transform_2(%arg0: i32) -> (i32, i32, i32) {
    %c0_i32 = arith.constant 0 : i32
    %c0_i32_0 = arith.constant 0 : i32
    %c0_i32_1 = arith.constant 0 : i32
    return %arg0, %c0_i32, %c0_i32_0 : i32, i32, i32
  }
  func.func @transform_3(%arg0: i32) -> (i32, i32, i32) {
    %c0_i32 = arith.constant 0 : i32
    %c0_i32_0 = arith.constant 0 : i32
    %c0_i32_1 = arith.constant 0 : i32
    return %arg0, %c0_i32, %c0_i32_0 : i32, i32, i32
  }
  func.func @transform_4(%arg0: i32) -> (i32, i32, i32) {
    %c0_i32 = arith.constant 0 : i32
    %c0_i32_0 = arith.constant 0 : i32
    %c0_i32_1 = arith.constant 0 : i32
    %c0_i32_2 = arith.constant 0 : i32
    return %c0_i32, %c0_i32_0, %c0_i32_1 : i32, i32, i32
  }
  func.func @transform_5(%arg0: i32) -> (i32, i32, i32) {
    %c0_i32 = arith.constant 0 : i32
    %c0_i32_0 = arith.constant 0 : i32
    %c0_i32_1 = arith.constant 0 : i32
    return %arg0, %c0_i32, %c0_i32_0 : i32, i32, i32
  }
}

module attributes {stable_mosaic.version = 11 : i64} {
  func.func @_mm_kernel_single(%arg0: i32, %arg1: memref<8x400xbf16, #tpu.memory_space<vmem>>, %arg2: memref<400x128xbf16, #tpu.memory_space<vmem>>, %arg3: memref<8x1xf32, #tpu.memory_space<vmem>>, %arg4: memref<8x128xbf16, #tpu.memory_space<vmem>>) attributes {dimension_semantics = [#tpu.dimension_semantics<parallel>], iteration_bounds = array<i64: 1>, scalar_prefetch = 0 : i64, scratch_operands = 0 : i64, tpu.core_type = #tpu.core_type<tc>, window_params = [{pipeline_mode = #tpu.pipeline_mode<synchronous>, transform_indices = @transform_0, window_bounds = array<i64: 8, 400>}, {transform_indices = @transform_1, window_bounds = array<i64: 400, 128>}, {pipeline_mode = #tpu.pipeline_mode<synchronous>, transform_indices = @transform_2, window_bounds = array<i64: 8, 1>}, {transform_indices = @transform_3, window_bounds = array<i64: 8, 128>}]} {
    %c0 = arith.constant 0 : index
    %c0_0 = arith.constant 0 : index
    %0 = vector.load %arg1[%c0, %c0_0] : memref<8x400xbf16, #tpu.memory_space<vmem>>, vector<8x400xbf16>
    %c0_1 = arith.constant 0 : index
    %c0_2 = arith.constant 0 : index
    %1 = vector.load %arg2[%c0_1, %c0_2] : memref<400x128xbf16, #tpu.memory_space<vmem>>, vector<400x128xbf16>
    %cst = arith.constant dense<0.000000e+00> : vector<8x128xf32>
    %2 = tpu.matmul %0, %1, %cst {dimension_numbers = #tpu.dot_dimension_numbers<[1], [0], [0], [1], [0, 0, 1, 1], [], []>} : vector<8x400xbf16>, vector<400x128xbf16>, vector<8x128xf32> -> vector<8x128xf32>
    %c0_3 = arith.constant 0 : index
    %c0_4 = arith.constant 0 : index
    %3 = vector.load %arg3[%c0_3, %c0_4] : memref<8x1xf32, #tpu.memory_space<vmem>>, vector<8x1xf32>
    %4 = vector.broadcast %3 : vector<8x1xf32> to vector<8x128xf32>
    %5 = arith.addf %2, %4 : vector<8x128xf32>
    %cst_5 = arith.constant 0.000000e+00 : f32
    %6 = vector.broadcast %cst_5 : f32 to vector<8x128xf32>
    %7 = arith.maximumf %5, %6 : vector<8x128xf32>
    %8 = arith.truncf %7 : vector<8x128xf32> to vector<8x128xbf16>
    %c0_6 = arith.constant 0 : index
    %c0_7 = arith.constant 0 : index
    %9 = vector.load %arg4[%c0_6, %c0_7] : memref<8x128xbf16, #tpu.memory_space<vmem>>, vector<8x128xbf16>
    tpu.vector_store %arg4[%c0_6, %c0_7], %8 {strides = array<i32>} : memref<8x128xbf16, #tpu.memory_space<vmem>>, vector<8x128xbf16>,
    return
  }
  func.func @transform_0(%arg0: i32) -> (i32, i32) {
    %c0_i32 = arith.constant 0 : i32
    %c0_i32_0 = arith.constant 0 : i32
    %c0_i32_1 = arith.constant 0 : i32
    return %c0_i32, %c0_i32_0 : i32, i32
  }
  func.func @transform_1(%arg0: i32) -> (i32, i32) {
    %c0_i32 = arith.constant 0 : i32
    %c0_i32_0 = arith.constant 0 : i32
    return %c0_i32, %arg0 : i32, i32
  }
  func.func @transform_2(%arg0: i32) -> (i32, i32) {
    %c0_i32 = arith.constant 0 : i32
    %c0_i32_0 = arith.constant 0 : i32
    %c0_i32_1 = arith.constant 0 : i32
    return %c0_i32, %c0_i32_0 : i32, i32
  }
  func.func @transform_3(%arg0: i32) -> (i32, i32) {
    %c0_i32 = arith.constant 0 : i32
    %c0_i32_0 = arith.constant 0 : i32
    return %c0_i32, %arg0 : i32, i32
  }
}

module attributes {stable_mosaic.version = 11 : i64} {
  func.func @_mm_kernel_single(%arg0: i32, %arg1: memref<8x400xbf16, #tpu.memory_space<vmem>>, %arg2: memref<400x128xbf16, #tpu.memory_space<vmem>>, %arg3: memref<8x1xf32, #tpu.memory_space<vmem>>, %arg4: memref<8x128xbf16, #tpu.memory_space<vmem>>) attributes {dimension_semantics = [#tpu.dimension_semantics<parallel>], iteration_bounds = array<i64: 1>, scalar_prefetch = 0 : i64, scratch_operands = 0 : i64, tpu.core_type = #tpu.core_type<tc>, window_params = [{pipeline_mode = #tpu.pipeline_mode<synchronous>, transform_indices = @transform_0, window_bounds = array<i64: 8, 400>}, {transform_indices = @transform_1, window_bounds = array<i64: 400, 128>}, {pipeline_mode = #tpu.pipeline_mode<synchronous>, transform_indices = @transform_2, window_bounds = array<i64: 8, 1>}, {transform_indices = @transform_3, window_bounds = array<i64: 8, 128>}]} {
    %c0 = arith.constant 0 : index
    %c0_0 = arith.constant 0 : index
    %0 = vector.load %arg1[%c0, %c0_0] : memref<8x400xbf16, #tpu.memory_space<vmem>>, vector<8x400xbf16>
    %c0_1 = arith.constant 0 : index
    %c0_2 = arith.constant 0 : index
    %1 = vector.load %arg2[%c0_1, %c0_2] : memref<400x128xbf16, #tpu.memory_space<vmem>>, vector<400x128xbf16>
    %cst = arith.constant dense<0.000000e+00> : vector<8x128xf32>
    %2 = tpu.matmul %0, %1, %cst {dimension_numbers = #tpu.dot_dimension_numbers<[1], [0], [0], [1], [0, 0, 1, 1], [], []>} : vector<8x400xbf16>, vector<400x128xbf16>, vector<8x128xf32> -> vector<8x128xf32>
    %c0_3 = arith.constant 0 : index
    %c0_4 = arith.constant 0 : index
    %3 = vector.load %arg3[%c0_3, %c0_4] : memref<8x1xf32, #tpu.memory_space<vmem>>, vector<8x1xf32>
    %4 = vector.broadcast %3 : vector<8x1xf32> to vector<8x128xf32>
    %5 = arith.addf %2, %4 : vector<8x128xf32>
    %6 = arith.truncf %5 : vector<8x128xf32> to vector<8x128xbf16>
    %c0_5 = arith.constant 0 : index
    %c0_6 = arith.constant 0 : index
    %7 = vector.load %arg4[%c0_5, %c0_6] : memref<8x128xbf16, #tpu.memory_space<vmem>>, vector<8x128xbf16>
    tpu.vector_store %arg4[%c0_5, %c0_6], %6 {strides = array<i32>} : memref<8x128xbf16, #tpu.memory_space<vmem>>, vector<8x128xbf16>,
    return
  }
  func.func @transform_0(%arg0: i32) -> (i32, i32) {
    %c0_i32 = arith.constant 0 : i32
    %c0_i32_0 = arith.constant 0 : i32
    %c0_i32_1 = arith.constant 0 : i32
    return %c0_i32, %c0_i32_0 : i32, i32
  }
  func.func @transform_1(%arg0: i32) -> (i32, i32) {
    %c0_i32 = arith.constant 0 : i32
    %c0_i32_0 = arith.constant 0 : i32
    return %c0_i32, %arg0 : i32, i32
  }
  func.func @transform_2(%arg0: i32) -> (i32, i32) {
    %c0_i32 = arith.constant 0 : i32
    %c0_i32_0 = arith.constant 0 : i32
    %c0_i32_1 = arith.constant 0 : i32
    return %c0_i32, %c0_i32_0 : i32, i32
  }
  func.func @transform_3(%arg0: i32) -> (i32, i32) {
    %c0_i32 = arith.constant 0 : i32
    %c0_i32_0 = arith.constant 0 : i32
    return %c0_i32, %arg0 : i32, i32
  }
}

module attributes {stable_mosaic.version = 11 : i64} {
  func.func @_mm_res_kernel_single(%arg0: i32, %arg1: memref<8x72xbf16, #tpu.memory_space<vmem>>, %arg2: memref<72x128xbf16, #tpu.memory_space<vmem>>, %arg3: memref<8x1xf32, #tpu.memory_space<vmem>>, %arg4: memref<8x128xbf16, #tpu.memory_space<vmem>>, %arg5: memref<8x128xbf16, #tpu.memory_space<vmem>>) attributes {dimension_semantics = [#tpu.dimension_semantics<parallel>], iteration_bounds = array<i64: 1>, scalar_prefetch = 0 : i64, scratch_operands = 0 : i64, tpu.core_type = #tpu.core_type<tc>, window_params = [{pipeline_mode = #tpu.pipeline_mode<synchronous>, transform_indices = @transform_0, window_bounds = array<i64: 8, 72>}, {transform_indices = @transform_1, window_bounds = array<i64: 72, 128>}, {pipeline_mode = #tpu.pipeline_mode<synchronous>, transform_indices = @transform_2, window_bounds = array<i64: 8, 1>}, {transform_indices = @transform_3, window_bounds = array<i64: 8, 128>}, {transform_indices = @transform_4, window_bounds = array<i64: 8, 128>}]} {
    %c0 = arith.constant 0 : index
    %c0_0 = arith.constant 0 : index
    %0 = vector.load %arg1[%c0, %c0_0] : memref<8x72xbf16, #tpu.memory_space<vmem>>, vector<8x72xbf16>
    %c0_1 = arith.constant 0 : index
    %c0_2 = arith.constant 0 : index
    %1 = vector.load %arg2[%c0_1, %c0_2] : memref<72x128xbf16, #tpu.memory_space<vmem>>, vector<72x128xbf16>
    %cst = arith.constant dense<0.000000e+00> : vector<8x128xf32>
    %2 = tpu.matmul %0, %1, %cst {dimension_numbers = #tpu.dot_dimension_numbers<[1], [0], [0], [1], [0, 0, 1, 1], [], []>} : vector<8x72xbf16>, vector<72x128xbf16>, vector<8x128xf32> -> vector<8x128xf32>
    %c0_3 = arith.constant 0 : index
    %c0_4 = arith.constant 0 : index
    %3 = vector.load %arg3[%c0_3, %c0_4] : memref<8x1xf32, #tpu.memory_space<vmem>>, vector<8x1xf32>
    %4 = vector.broadcast %3 : vector<8x1xf32> to vector<8x128xf32>
    %5 = arith.addf %2, %4 : vector<8x128xf32>
    %c0_5 = arith.constant 0 : index
    %c0_6 = arith.constant 0 : index
    %6 = vector.load %arg4[%c0_5, %c0_6] : memref<8x128xbf16, #tpu.memory_space<vmem>>, vector<8x128xbf16>
    %7 = arith.extf %6 : vector<8x128xbf16> to vector<8x128xf32>
    %8 = arith.addf %5, %7 : vector<8x128xf32>
    %cst_7 = arith.constant 0.000000e+00 : f32
    %9 = vector.broadcast %cst_7 : f32 to vector<8x128xf32>
    %10 = arith.maximumf %8, %9 : vector<8x128xf32>
    %11 = arith.truncf %10 : vector<8x128xf32> to vector<8x128xbf16>
    %c0_8 = arith.constant 0 : index
    %c0_9 = arith.constant 0 : index
    %12 = vector.load %arg5[%c0_8, %c0_9] : memref<8x128xbf16, #tpu.memory_space<vmem>>, vector<8x128xbf16>
    tpu.vector_store %arg5[%c0_8, %c0_9], %11 {strides = array<i32>} : memref<8x128xbf16, #tpu.memory_space<vmem>>, vector<8x128xbf16>,
    return
  }
  func.func @transform_0(%arg0: i32) -> (i32, i32) {
    %c0_i32 = arith.constant 0 : i32
    %c0_i32_0 = arith.constant 0 : i32
    %c0_i32_1 = arith.constant 0 : i32
    return %c0_i32, %c0_i32_0 : i32, i32
  }
  func.func @transform_1(%arg0: i32) -> (i32, i32) {
    %c0_i32 = arith.constant 0 : i32
    %c0_i32_0 = arith.constant 0 : i32
    return %c0_i32, %arg0 : i32, i32
  }
  func.func @transform_2(%arg0: i32) -> (i32, i32) {
    %c0_i32 = arith.constant 0 : i32
    %c0_i32_0 = arith.constant 0 : i32
    %c0_i32_1 = arith.constant 0 : i32
    return %c0_i32, %c0_i32_0 : i32, i32
  }
  func.func @transform_3(%arg0: i32) -> (i32, i32) {
    %c0_i32 = arith.constant 0 : i32
    %c0_i32_0 = arith.constant 0 : i32
    return %c0_i32, %arg0 : i32, i32
  }
  func.func @transform_4(%arg0: i32) -> (i32, i32) {
    %c0_i32 = arith.constant 0 : i32
    %c0_i32_0 = arith.constant 0 : i32
    return %c0_i32, %arg0 : i32, i32
  }
}

module attributes {stable_mosaic.version = 11 : i64} {
  func.func @_bilerp_kernel(%arg0: i32, %arg1: memref<16x16x16xbf16, #tpu.memory_space<vmem>>, %arg2: memref<16x16x16xbf16, #tpu.memory_space<vmem>>, %arg3: memref<16x16x16xbf16, #tpu.memory_space<vmem>>, %arg4: memref<16x16x16xbf16, #tpu.memory_space<vmem>>, %arg5: memref<4x16x16xf32, #tpu.memory_space<vmem>>, %arg6: memref<16x16x16xbf16, #tpu.memory_space<vmem>>) attributes {dimension_semantics = [#tpu.dimension_semantics<parallel>], iteration_bounds = array<i64: 1>, scalar_prefetch = 0 : i64, scratch_operands = 0 : i64, tpu.core_type = #tpu.core_type<tc>, window_params = [{transform_indices = @transform_0, window_bounds = array<i64: 16, 16, 16>}, {transform_indices = @transform_1, window_bounds = array<i64: 16, 16, 16>}, {transform_indices = @transform_2, window_bounds = array<i64: 16, 16, 16>}, {transform_indices = @transform_3, window_bounds = array<i64: 16, 16, 16>}, {pipeline_mode = #tpu.pipeline_mode<synchronous>, transform_indices = @transform_4, window_bounds = array<i64: 4, 16, 16>}, {transform_indices = @transform_5, window_bounds = array<i64: 16, 16, 16>}]} {
    %c0 = arith.constant 0 : index
    %c0_0 = arith.constant 0 : index
    %c0_1 = arith.constant 0 : index
    %0 = vector.load %arg5[%c0, %c0_0, %c0_1] : memref<4x16x16xf32, #tpu.memory_space<vmem>>, vector<4x16x16xf32>
    %c0_2 = arith.constant 0 : index
    %c0_3 = arith.constant 0 : index
    %c0_4 = arith.constant 0 : index
    %1 = vector.load %arg1[%c0_2, %c0_3, %c0_4] : memref<16x16x16xbf16, #tpu.memory_space<vmem>>, vector<16x16x16xbf16>
    %2 = arith.extf %1 : vector<16x16x16xbf16> to vector<16x16x16xf32>
    %3 = vector.extract_strided_slice %0 {offsets = [0, 0, 0], sizes = [1, 16, 16], strides = [1, 1, 1]} : vector<4x16x16xf32> to vector<1x16x16xf32>
    %4 = vector.shape_cast %3 : vector<1x16x16xf32> to vector<16x16xf32>
    %5 = vector.shape_cast %4 : vector<16x16xf32> to vector<1x16x16xf32>
    %6 = vector.broadcast %5 : vector<1x16x16xf32> to vector<16x16x16xf32>
    %7 = arith.mulf %2, %6 : vector<16x16x16xf32>
    %c0_5 = arith.constant 0 : index
    %c0_6 = arith.constant 0 : index
    %c0_7 = arith.constant 0 : index
    %8 = vector.load %arg2[%c0_5, %c0_6, %c0_7] : memref<16x16x16xbf16, #tpu.memory_space<vmem>>, vector<16x16x16xbf16>
    %9 = arith.extf %8 : vector<16x16x16xbf16> to vector<16x16x16xf32>
    %10 = vector.extract_strided_slice %0 {offsets = [1, 0, 0], sizes = [1, 16, 16], strides = [1, 1, 1]} : vector<4x16x16xf32> to vector<1x16x16xf32>
    %11 = vector.shape_cast %10 : vector<1x16x16xf32> to vector<16x16xf32>
    %12 = vector.shape_cast %11 : vector<16x16xf32> to vector<1x16x16xf32>
    %13 = vector.broadcast %12 : vector<1x16x16xf32> to vector<16x16x16xf32>
    %14 = arith.mulf %9, %13 : vector<16x16x16xf32>
    %15 = arith.addf %7, %14 : vector<16x16x16xf32>
    %c0_8 = arith.constant 0 : index
    %c0_9 = arith.constant 0 : index
    %c0_10 = arith.constant 0 : index
    %16 = vector.load %arg3[%c0_8, %c0_9, %c0_10] : memref<16x16x16xbf16, #tpu.memory_space<vmem>>, vector<16x16x16xbf16>
    %17 = arith.extf %16 : vector<16x16x16xbf16> to vector<16x16x16xf32>
    %18 = vector.extract_strided_slice %0 {offsets = [2, 0, 0], sizes = [1, 16, 16], strides = [1, 1, 1]} : vector<4x16x16xf32> to vector<1x16x16xf32>
    %19 = vector.shape_cast %18 : vector<1x16x16xf32> to vector<16x16xf32>
    %20 = vector.shape_cast %19 : vector<16x16xf32> to vector<1x16x16xf32>
    %21 = vector.broadcast %20 : vector<1x16x16xf32> to vector<16x16x16xf32>
    %22 = arith.mulf %17, %21 : vector<16x16x16xf32>
    %23 = arith.addf %15, %22 : vector<16x16x16xf32>
    %c0_11 = arith.constant 0 : index
    %c0_12 = arith.constant 0 : index
    %c0_13 = arith.constant 0 : index
    %24 = vector.load %arg4[%c0_11, %c0_12, %c0_13] : memref<16x16x16xbf16, #tpu.memory_space<vmem>>, vector<16x16x16xbf16>
    %25 = arith.extf %24 : vector<16x16x16xbf16> to vector<16x16x16xf32>
    %26 = vector.extract_strided_slice %0 {offsets = [3, 0, 0], sizes = [1, 16, 16], strides = [1, 1, 1]} : vector<4x16x16xf32> to vector<1x16x16xf32>
    %27 = vector.shape_cast %26 : vector<1x16x16xf32> to vector<16x16xf32>
    %28 = vector.shape_cast %27 : vector<16x16xf32> to vector<1x16x16xf32>
    %29 = vector.broadcast %28 : vector<1x16x16xf32> to vector<16x16x16xf32>
    %30 = arith.mulf %25, %29 : vector<16x16x16xf32>
    %31 = arith.addf %23, %30 : vector<16x16x16xf32>
    %32 = arith.truncf %31 : vector<16x16x16xf32> to vector<16x16x16xbf16>
    %c0_14 = arith.constant 0 : index
    %c0_15 = arith.constant 0 : index
    %c0_16 = arith.constant 0 : index
    %33 = vector.load %arg6[%c0_14, %c0_15, %c0_16] : memref<16x16x16xbf16, #tpu.memory_space<vmem>>, vector<16x16x16xbf16>
    tpu.vector_store %arg6[%c0_14, %c0_15, %c0_16], %32 {strides = array<i32>} : memref<16x16x16xbf16, #tpu.memory_space<vmem>>, vector<16x16x16xbf16>,
    return
  }
  func.func @transform_0(%arg0: i32) -> (i32, i32, i32) {
    %c0_i32 = arith.constant 0 : i32
    %c0_i32_0 = arith.constant 0 : i32
    %c0_i32_1 = arith.constant 0 : i32
    return %arg0, %c0_i32, %c0_i32_0 : i32, i32, i32
  }
  func.func @transform_1(%arg0: i32) -> (i32, i32, i32) {
    %c0_i32 = arith.constant 0 : i32
    %c0_i32_0 = arith.constant 0 : i32
    %c0_i32_1 = arith.constant 0 : i32
    return %arg0, %c0_i32, %c0_i32_0 : i32, i32, i32
  }
  func.func @transform_2(%arg0: i32) -> (i32, i32, i32) {
    %c0_i32 = arith.constant 0 : i32
    %c0_i32_0 = arith.constant 0 : i32
    %c0_i32_1 = arith.constant 0 : i32
    return %arg0, %c0_i32, %c0_i32_0 : i32, i32, i32
  }
  func.func @transform_3(%arg0: i32) -> (i32, i32, i32) {
    %c0_i32 = arith.constant 0 : i32
    %c0_i32_0 = arith.constant 0 : i32
    %c0_i32_1 = arith.constant 0 : i32
    return %arg0, %c0_i32, %c0_i32_0 : i32, i32, i32
  }
  func.func @transform_4(%arg0: i32) -> (i32, i32, i32) {
    %c0_i32 = arith.constant 0 : i32
    %c0_i32_0 = arith.constant 0 : i32
    %c0_i32_1 = arith.constant 0 : i32
    %c0_i32_2 = arith.constant 0 : i32
    return %c0_i32, %c0_i32_0, %c0_i32_1 : i32, i32, i32
  }
  func.func @transform_5(%arg0: i32) -> (i32, i32, i32) {
    %c0_i32 = arith.constant 0 : i32
    %c0_i32_0 = arith.constant 0 : i32
    %c0_i32_1 = arith.constant 0 : i32
    return %arg0, %c0_i32, %c0_i32_0 : i32, i32, i32
  }
}

module attributes {stable_mosaic.version = 11 : i64} {
  func.func @_mm_kernel_single(%arg0: i32, %arg1: memref<4x200xbf16, #tpu.memory_space<vmem>>, %arg2: memref<200x512xbf16, #tpu.memory_space<vmem>>, %arg3: memref<4x1xf32, #tpu.memory_space<vmem>>, %arg4: memref<4x512xbf16, #tpu.memory_space<vmem>>) attributes {dimension_semantics = [#tpu.dimension_semantics<parallel>], iteration_bounds = array<i64: 1>, scalar_prefetch = 0 : i64, scratch_operands = 0 : i64, tpu.core_type = #tpu.core_type<tc>, window_params = [{pipeline_mode = #tpu.pipeline_mode<synchronous>, transform_indices = @transform_0, window_bounds = array<i64: 4, 200>}, {transform_indices = @transform_1, window_bounds = array<i64: 200, 512>}, {pipeline_mode = #tpu.pipeline_mode<synchronous>, transform_indices = @transform_2, window_bounds = array<i64: 4, 1>}, {transform_indices = @transform_3, window_bounds = array<i64: 4, 512>}]} {
    %c0 = arith.constant 0 : index
    %c0_0 = arith.constant 0 : index
    %0 = vector.load %arg1[%c0, %c0_0] : memref<4x200xbf16, #tpu.memory_space<vmem>>, vector<4x200xbf16>
    %c0_1 = arith.constant 0 : index
    %c0_2 = arith.constant 0 : index
    %1 = vector.load %arg2[%c0_1, %c0_2] : memref<200x512xbf16, #tpu.memory_space<vmem>>, vector<200x512xbf16>
    %cst = arith.constant dense<0.000000e+00> : vector<4x512xf32>
    %2 = tpu.matmul %0, %1, %cst {dimension_numbers = #tpu.dot_dimension_numbers<[1], [0], [0], [1], [0, 0, 1, 1], [], []>} : vector<4x200xbf16>, vector<200x512xbf16>, vector<4x512xf32> -> vector<4x512xf32>
    %c0_3 = arith.constant 0 : index
    %c0_4 = arith.constant 0 : index
    %3 = vector.load %arg3[%c0_3, %c0_4] : memref<4x1xf32, #tpu.memory_space<vmem>>, vector<4x1xf32>
    %4 = vector.broadcast %3 : vector<4x1xf32> to vector<4x512xf32>
    %5 = arith.addf %2, %4 : vector<4x512xf32>
    %cst_5 = arith.constant 0.000000e+00 : f32
    %6 = vector.broadcast %cst_5 : f32 to vector<4x512xf32>
    %7 = arith.maximumf %5, %6 : vector<4x512xf32>
    %8 = arith.truncf %7 : vector<4x512xf32> to vector<4x512xbf16>
    %c0_6 = arith.constant 0 : index
    %c0_7 = arith.constant 0 : index
    %9 = vector.load %arg4[%c0_6, %c0_7] : memref<4x512xbf16, #tpu.memory_space<vmem>>, vector<4x512xbf16>
    tpu.vector_store %arg4[%c0_6, %c0_7], %8 {strides = array<i32>} : memref<4x512xbf16, #tpu.memory_space<vmem>>, vector<4x512xbf16>,
    return
  }
  func.func @transform_0(%arg0: i32) -> (i32, i32) {
    %c0_i32 = arith.constant 0 : i32
    %c0_i32_0 = arith.constant 0 : i32
    %c0_i32_1 = arith.constant 0 : i32
    return %c0_i32, %c0_i32_0 : i32, i32
  }
  func.func @transform_1(%arg0: i32) -> (i32, i32) {
    %c0_i32 = arith.constant 0 : i32
    %c0_i32_0 = arith.constant 0 : i32
    return %c0_i32, %arg0 : i32, i32
  }
  func.func @transform_2(%arg0: i32) -> (i32, i32) {
    %c0_i32 = arith.constant 0 : i32
    %c0_i32_0 = arith.constant 0 : i32
    %c0_i32_1 = arith.constant 0 : i32
    return %c0_i32, %c0_i32_0 : i32, i32
  }
  func.func @transform_3(%arg0: i32) -> (i32, i32) {
    %c0_i32 = arith.constant 0 : i32
    %c0_i32_0 = arith.constant 0 : i32
    return %c0_i32, %arg0 : i32, i32
  }
}

module attributes {stable_mosaic.version = 11 : i64} {
  func.func @_mm_kernel_single(%arg0: i32, %arg1: memref<4x200xbf16, #tpu.memory_space<vmem>>, %arg2: memref<200x512xbf16, #tpu.memory_space<vmem>>, %arg3: memref<4x1xf32, #tpu.memory_space<vmem>>, %arg4: memref<4x512xbf16, #tpu.memory_space<vmem>>) attributes {dimension_semantics = [#tpu.dimension_semantics<parallel>], iteration_bounds = array<i64: 1>, scalar_prefetch = 0 : i64, scratch_operands = 0 : i64, tpu.core_type = #tpu.core_type<tc>, window_params = [{pipeline_mode = #tpu.pipeline_mode<synchronous>, transform_indices = @transform_0, window_bounds = array<i64: 4, 200>}, {transform_indices = @transform_1, window_bounds = array<i64: 200, 512>}, {pipeline_mode = #tpu.pipeline_mode<synchronous>, transform_indices = @transform_2, window_bounds = array<i64: 4, 1>}, {transform_indices = @transform_3, window_bounds = array<i64: 4, 512>}]} {
    %c0 = arith.constant 0 : index
    %c0_0 = arith.constant 0 : index
    %0 = vector.load %arg1[%c0, %c0_0] : memref<4x200xbf16, #tpu.memory_space<vmem>>, vector<4x200xbf16>
    %c0_1 = arith.constant 0 : index
    %c0_2 = arith.constant 0 : index
    %1 = vector.load %arg2[%c0_1, %c0_2] : memref<200x512xbf16, #tpu.memory_space<vmem>>, vector<200x512xbf16>
    %cst = arith.constant dense<0.000000e+00> : vector<4x512xf32>
    %2 = tpu.matmul %0, %1, %cst {dimension_numbers = #tpu.dot_dimension_numbers<[1], [0], [0], [1], [0, 0, 1, 1], [], []>} : vector<4x200xbf16>, vector<200x512xbf16>, vector<4x512xf32> -> vector<4x512xf32>
    %c0_3 = arith.constant 0 : index
    %c0_4 = arith.constant 0 : index
    %3 = vector.load %arg3[%c0_3, %c0_4] : memref<4x1xf32, #tpu.memory_space<vmem>>, vector<4x1xf32>
    %4 = vector.broadcast %3 : vector<4x1xf32> to vector<4x512xf32>
    %5 = arith.addf %2, %4 : vector<4x512xf32>
    %6 = arith.truncf %5 : vector<4x512xf32> to vector<4x512xbf16>
    %c0_5 = arith.constant 0 : index
    %c0_6 = arith.constant 0 : index
    %7 = vector.load %arg4[%c0_5, %c0_6] : memref<4x512xbf16, #tpu.memory_space<vmem>>, vector<4x512xbf16>
    tpu.vector_store %arg4[%c0_5, %c0_6], %6 {strides = array<i32>} : memref<4x512xbf16, #tpu.memory_space<vmem>>, vector<4x512xbf16>,
    return
  }
  func.func @transform_0(%arg0: i32) -> (i32, i32) {
    %c0_i32 = arith.constant 0 : i32
    %c0_i32_0 = arith.constant 0 : i32
    %c0_i32_1 = arith.constant 0 : i32
    return %c0_i32, %c0_i32_0 : i32, i32
  }
  func.func @transform_1(%arg0: i32) -> (i32, i32) {
    %c0_i32 = arith.constant 0 : i32
    %c0_i32_0 = arith.constant 0 : i32
    return %c0_i32, %arg0 : i32, i32
  }
  func.func @transform_2(%arg0: i32) -> (i32, i32) {
    %c0_i32 = arith.constant 0 : i32
    %c0_i32_0 = arith.constant 0 : i32
    %c0_i32_1 = arith.constant 0 : i32
    return %c0_i32, %c0_i32_0 : i32, i32
  }
  func.func @transform_3(%arg0: i32) -> (i32, i32) {
    %c0_i32 = arith.constant 0 : i32
    %c0_i32_0 = arith.constant 0 : i32
    return %c0_i32, %arg0 : i32, i32
  }
}

module attributes {stable_mosaic.version = 11 : i64} {
  func.func @_mm_res_kernel_single(%arg0: i32, %arg1: memref<4x36xbf16, #tpu.memory_space<vmem>>, %arg2: memref<36x512xbf16, #tpu.memory_space<vmem>>, %arg3: memref<4x1xf32, #tpu.memory_space<vmem>>, %arg4: memref<4x512xbf16, #tpu.memory_space<vmem>>, %arg5: memref<4x512xbf16, #tpu.memory_space<vmem>>) attributes {dimension_semantics = [#tpu.dimension_semantics<parallel>], iteration_bounds = array<i64: 1>, scalar_prefetch = 0 : i64, scratch_operands = 0 : i64, tpu.core_type = #tpu.core_type<tc>, window_params = [{pipeline_mode = #tpu.pipeline_mode<synchronous>, transform_indices = @transform_0, window_bounds = array<i64: 4, 36>}, {transform_indices = @transform_1, window_bounds = array<i64: 36, 512>}, {pipeline_mode = #tpu.pipeline_mode<synchronous>, transform_indices = @transform_2, window_bounds = array<i64: 4, 1>}, {transform_indices = @transform_3, window_bounds = array<i64: 4, 512>}, {transform_indices = @transform_4, window_bounds = array<i64: 4, 512>}]} {
    %c0 = arith.constant 0 : index
    %c0_0 = arith.constant 0 : index
    %0 = vector.load %arg1[%c0, %c0_0] : memref<4x36xbf16, #tpu.memory_space<vmem>>, vector<4x36xbf16>
    %c0_1 = arith.constant 0 : index
    %c0_2 = arith.constant 0 : index
    %1 = vector.load %arg2[%c0_1, %c0_2] : memref<36x512xbf16, #tpu.memory_space<vmem>>, vector<36x512xbf16>
    %cst = arith.constant dense<0.000000e+00> : vector<4x512xf32>
    %2 = tpu.matmul %0, %1, %cst {dimension_numbers = #tpu.dot_dimension_numbers<[1], [0], [0], [1], [0, 0, 1, 1], [], []>} : vector<4x36xbf16>, vector<36x512xbf16>, vector<4x512xf32> -> vector<4x512xf32>
    %c0_3 = arith.constant 0 : index
    %c0_4 = arith.constant 0 : index
    %3 = vector.load %arg3[%c0_3, %c0_4] : memref<4x1xf32, #tpu.memory_space<vmem>>, vector<4x1xf32>
    %4 = vector.broadcast %3 : vector<4x1xf32> to vector<4x512xf32>
    %5 = arith.addf %2, %4 : vector<4x512xf32>
    %c0_5 = arith.constant 0 : index
    %c0_6 = arith.constant 0 : index
    %6 = vector.load %arg4[%c0_5, %c0_6] : memref<4x512xbf16, #tpu.memory_space<vmem>>, vector<4x512xbf16>
    %7 = arith.extf %6 : vector<4x512xbf16> to vector<4x512xf32>
    %8 = arith.addf %5, %7 : vector<4x512xf32>
    %cst_7 = arith.constant 0.000000e+00 : f32
    %9 = vector.broadcast %cst_7 : f32 to vector<4x512xf32>
    %10 = arith.maximumf %8, %9 : vector<4x512xf32>
    %11 = arith.truncf %10 : vector<4x512xf32> to vector<4x512xbf16>
    %c0_8 = arith.constant 0 : index
    %c0_9 = arith.constant 0 : index
    %12 = vector.load %arg5[%c0_8, %c0_9] : memref<4x512xbf16, #tpu.memory_space<vmem>>, vector<4x512xbf16>
    tpu.vector_store %arg5[%c0_8, %c0_9], %11 {strides = array<i32>} : memref<4x512xbf16, #tpu.memory_space<vmem>>, vector<4x512xbf16>,
    return
  }
  func.func @transform_0(%arg0: i32) -> (i32, i32) {
    %c0_i32 = arith.constant 0 : i32
    %c0_i32_0 = arith.constant 0 : i32
    %c0_i32_1 = arith.constant 0 : i32
    return %c0_i32, %c0_i32_0 : i32, i32
  }
  func.func @transform_1(%arg0: i32) -> (i32, i32) {
    %c0_i32 = arith.constant 0 : i32
    %c0_i32_0 = arith.constant 0 : i32
    return %c0_i32, %arg0 : i32, i32
  }
  func.func @transform_2(%arg0: i32) -> (i32, i32) {
    %c0_i32 = arith.constant 0 : i32
    %c0_i32_0 = arith.constant 0 : i32
    %c0_i32_1 = arith.constant 0 : i32
    return %c0_i32, %c0_i32_0 : i32, i32
  }
  func.func @transform_3(%arg0: i32) -> (i32, i32) {
    %c0_i32 = arith.constant 0 : i32
    %c0_i32_0 = arith.constant 0 : i32
    return %c0_i32, %arg0 : i32, i32
  }
  func.func @transform_4(%arg0: i32) -> (i32, i32) {
    %c0_i32 = arith.constant 0 : i32
    %c0_i32_0 = arith.constant 0 : i32
    return %c0_i32, %arg0 : i32, i32
  }
}

module attributes {stable_mosaic.version = 11 : i64} {
  func.func @_bilerp_kernel(%arg0: i32, %arg1: memref<8x32x32xbf16, #tpu.memory_space<vmem>>, %arg2: memref<8x32x32xbf16, #tpu.memory_space<vmem>>, %arg3: memref<8x32x32xbf16, #tpu.memory_space<vmem>>, %arg4: memref<8x32x32xbf16, #tpu.memory_space<vmem>>, %arg5: memref<4x32x32xf32, #tpu.memory_space<vmem>>, %arg6: memref<8x32x32xbf16, #tpu.memory_space<vmem>>) attributes {dimension_semantics = [#tpu.dimension_semantics<parallel>], iteration_bounds = array<i64: 1>, scalar_prefetch = 0 : i64, scratch_operands = 0 : i64, tpu.core_type = #tpu.core_type<tc>, window_params = [{transform_indices = @transform_0, window_bounds = array<i64: 8, 32, 32>}, {transform_indices = @transform_1, window_bounds = array<i64: 8, 32, 32>}, {transform_indices = @transform_2, window_bounds = array<i64: 8, 32, 32>}, {transform_indices = @transform_3, window_bounds = array<i64: 8, 32, 32>}, {pipeline_mode = #tpu.pipeline_mode<synchronous>, transform_indices = @transform_4, window_bounds = array<i64: 4, 32, 32>}, {transform_indices = @transform_5, window_bounds = array<i64: 8, 32, 32>}]} {
    %c0 = arith.constant 0 : index
    %c0_0 = arith.constant 0 : index
    %c0_1 = arith.constant 0 : index
    %0 = vector.load %arg5[%c0, %c0_0, %c0_1] : memref<4x32x32xf32, #tpu.memory_space<vmem>>, vector<4x32x32xf32>
    %c0_2 = arith.constant 0 : index
    %c0_3 = arith.constant 0 : index
    %c0_4 = arith.constant 0 : index
    %1 = vector.load %arg1[%c0_2, %c0_3, %c0_4] : memref<8x32x32xbf16, #tpu.memory_space<vmem>>, vector<8x32x32xbf16>
    %2 = arith.extf %1 : vector<8x32x32xbf16> to vector<8x32x32xf32>
    %3 = vector.extract_strided_slice %0 {offsets = [0, 0, 0], sizes = [1, 32, 32], strides = [1, 1, 1]} : vector<4x32x32xf32> to vector<1x32x32xf32>
    %4 = vector.shape_cast %3 : vector<1x32x32xf32> to vector<32x32xf32>
    %5 = vector.shape_cast %4 : vector<32x32xf32> to vector<1x32x32xf32>
    %6 = vector.broadcast %5 : vector<1x32x32xf32> to vector<8x32x32xf32>
    %7 = arith.mulf %2, %6 : vector<8x32x32xf32>
    %c0_5 = arith.constant 0 : index
    %c0_6 = arith.constant 0 : index
    %c0_7 = arith.constant 0 : index
    %8 = vector.load %arg2[%c0_5, %c0_6, %c0_7] : memref<8x32x32xbf16, #tpu.memory_space<vmem>>, vector<8x32x32xbf16>
    %9 = arith.extf %8 : vector<8x32x32xbf16> to vector<8x32x32xf32>
    %10 = vector.extract_strided_slice %0 {offsets = [1, 0, 0], sizes = [1, 32, 32], strides = [1, 1, 1]} : vector<4x32x32xf32> to vector<1x32x32xf32>
    %11 = vector.shape_cast %10 : vector<1x32x32xf32> to vector<32x32xf32>
    %12 = vector.shape_cast %11 : vector<32x32xf32> to vector<1x32x32xf32>
    %13 = vector.broadcast %12 : vector<1x32x32xf32> to vector<8x32x32xf32>
    %14 = arith.mulf %9, %13 : vector<8x32x32xf32>
    %15 = arith.addf %7, %14 : vector<8x32x32xf32>
    %c0_8 = arith.constant 0 : index
    %c0_9 = arith.constant 0 : index
    %c0_10 = arith.constant 0 : index
    %16 = vector.load %arg3[%c0_8, %c0_9, %c0_10] : memref<8x32x32xbf16, #tpu.memory_space<vmem>>, vector<8x32x32xbf16>
    %17 = arith.extf %16 : vector<8x32x32xbf16> to vector<8x32x32xf32>
    %18 = vector.extract_strided_slice %0 {offsets = [2, 0, 0], sizes = [1, 32, 32], strides = [1, 1, 1]} : vector<4x32x32xf32> to vector<1x32x32xf32>
    %19 = vector.shape_cast %18 : vector<1x32x32xf32> to vector<32x32xf32>
    %20 = vector.shape_cast %19 : vector<32x32xf32> to vector<1x32x32xf32>
    %21 = vector.broadcast %20 : vector<1x32x32xf32> to vector<8x32x32xf32>
    %22 = arith.mulf %17, %21 : vector<8x32x32xf32>
    %23 = arith.addf %15, %22 : vector<8x32x32xf32>
    %c0_11 = arith.constant 0 : index
    %c0_12 = arith.constant 0 : index
    %c0_13 = arith.constant 0 : index
    %24 = vector.load %arg4[%c0_11, %c0_12, %c0_13] : memref<8x32x32xbf16, #tpu.memory_space<vmem>>, vector<8x32x32xbf16>
    %25 = arith.extf %24 : vector<8x32x32xbf16> to vector<8x32x32xf32>
    %26 = vector.extract_strided_slice %0 {offsets = [3, 0, 0], sizes = [1, 32, 32], strides = [1, 1, 1]} : vector<4x32x32xf32> to vector<1x32x32xf32>
    %27 = vector.shape_cast %26 : vector<1x32x32xf32> to vector<32x32xf32>
    %28 = vector.shape_cast %27 : vector<32x32xf32> to vector<1x32x32xf32>
    %29 = vector.broadcast %28 : vector<1x32x32xf32> to vector<8x32x32xf32>
    %30 = arith.mulf %25, %29 : vector<8x32x32xf32>
    %31 = arith.addf %23, %30 : vector<8x32x32xf32>
    %32 = arith.truncf %31 : vector<8x32x32xf32> to vector<8x32x32xbf16>
    %c0_14 = arith.constant 0 : index
    %c0_15 = arith.constant 0 : index
    %c0_16 = arith.constant 0 : index
    %33 = vector.load %arg6[%c0_14, %c0_15, %c0_16] : memref<8x32x32xbf16, #tpu.memory_space<vmem>>, vector<8x32x32xbf16>
    tpu.vector_store %arg6[%c0_14, %c0_15, %c0_16], %32 {strides = array<i32>} : memref<8x32x32xbf16, #tpu.memory_space<vmem>>, vector<8x32x32xbf16>,
    return
  }
  func.func @transform_0(%arg0: i32) -> (i32, i32, i32) {
    %c0_i32 = arith.constant 0 : i32
    %c0_i32_0 = arith.constant 0 : i32
    %c0_i32_1 = arith.constant 0 : i32
    return %arg0, %c0_i32, %c0_i32_0 : i32, i32, i32
  }
  func.func @transform_1(%arg0: i32) -> (i32, i32, i32) {
    %c0_i32 = arith.constant 0 : i32
    %c0_i32_0 = arith.constant 0 : i32
    %c0_i32_1 = arith.constant 0 : i32
    return %arg0, %c0_i32, %c0_i32_0 : i32, i32, i32
  }
  func.func @transform_2(%arg0: i32) -> (i32, i32, i32) {
    %c0_i32 = arith.constant 0 : i32
    %c0_i32_0 = arith.constant 0 : i32
    %c0_i32_1 = arith.constant 0 : i32
    return %arg0, %c0_i32, %c0_i32_0 : i32, i32, i32
  }
  func.func @transform_3(%arg0: i32) -> (i32, i32, i32) {
    %c0_i32 = arith.constant 0 : i32
    %c0_i32_0 = arith.constant 0 : i32
    %c0_i32_1 = arith.constant 0 : i32
    return %arg0, %c0_i32, %c0_i32_0 : i32, i32, i32
  }
  func.func @transform_4(%arg0: i32) -> (i32, i32, i32) {
    %c0_i32 = arith.constant 0 : i32
    %c0_i32_0 = arith.constant 0 : i32
    %c0_i32_1 = arith.constant 0 : i32
    %c0_i32_2 = arith.constant 0 : i32
    return %c0_i32, %c0_i32_0, %c0_i32_1 : i32, i32, i32
  }
  func.func @transform_5(%arg0: i32) -> (i32, i32, i32) {
    %c0_i32 = arith.constant 0 : i32
    %c0_i32_0 = arith.constant 0 : i32
    %c0_i32_1 = arith.constant 0 : i32
    return %arg0, %c0_i32, %c0_i32_0 : i32, i32, i32
  }
}

module attributes {stable_mosaic.version = 11 : i64} {
  func.func @_mm_kernel_single(%arg0: i32, %arg1: memref<2x100xbf16, #tpu.memory_space<vmem>>, %arg2: memref<100x512xbf16, #tpu.memory_space<vmem>>, %arg3: memref<2x1xf32, #tpu.memory_space<vmem>>, %arg4: memref<2x512xbf16, #tpu.memory_space<vmem>>) attributes {dimension_semantics = [#tpu.dimension_semantics<parallel>], iteration_bounds = array<i64: 4>, scalar_prefetch = 0 : i64, scratch_operands = 0 : i64, tpu.core_type = #tpu.core_type<tc>, window_params = [{pipeline_mode = #tpu.pipeline_mode<synchronous>, transform_indices = @transform_0, window_bounds = array<i64: 2, 100>}, {transform_indices = @transform_1, window_bounds = array<i64: 100, 512>}, {pipeline_mode = #tpu.pipeline_mode<synchronous>, transform_indices = @transform_2, window_bounds = array<i64: 2, 1>}, {transform_indices = @transform_3, window_bounds = array<i64: 2, 512>}]} {
    %c0 = arith.constant 0 : index
    %c0_0 = arith.constant 0 : index
    %0 = vector.load %arg1[%c0, %c0_0] : memref<2x100xbf16, #tpu.memory_space<vmem>>, vector<2x100xbf16>
    %c0_1 = arith.constant 0 : index
    %c0_2 = arith.constant 0 : index
    %1 = vector.load %arg2[%c0_1, %c0_2] : memref<100x512xbf16, #tpu.memory_space<vmem>>, vector<100x512xbf16>
    %cst = arith.constant dense<0.000000e+00> : vector<2x512xf32>
    %2 = tpu.matmul %0, %1, %cst {dimension_numbers = #tpu.dot_dimension_numbers<[1], [0], [0], [1], [0, 0, 1, 1], [], []>} : vector<2x100xbf16>, vector<100x512xbf16>, vector<2x512xf32> -> vector<2x512xf32>
    %c0_3 = arith.constant 0 : index
    %c0_4 = arith.constant 0 : index
    %3 = vector.load %arg3[%c0_3, %c0_4] : memref<2x1xf32, #tpu.memory_space<vmem>>, vector<2x1xf32>
    %4 = vector.broadcast %3 : vector<2x1xf32> to vector<2x512xf32>
    %5 = arith.addf %2, %4 : vector<2x512xf32>
    %cst_5 = arith.constant 0.000000e+00 : f32
    %6 = vector.broadcast %cst_5 : f32 to vector<2x512xf32>
    %7 = arith.maximumf %5, %6 : vector<2x512xf32>
    %8 = arith.truncf %7 : vector<2x512xf32> to vector<2x512xbf16>
    %c0_6 = arith.constant 0 : index
    %c0_7 = arith.constant 0 : index
    %9 = vector.load %arg4[%c0_6, %c0_7] : memref<2x512xbf16, #tpu.memory_space<vmem>>, vector<2x512xbf16>
    tpu.vector_store %arg4[%c0_6, %c0_7], %8 {strides = array<i32>} : memref<2x512xbf16, #tpu.memory_space<vmem>>, vector<2x512xbf16>,
    return
  }
  func.func @transform_0(%arg0: i32) -> (i32, i32) {
    %c0_i32 = arith.constant 0 : i32
    %c0_i32_0 = arith.constant 0 : i32
    %c0_i32_1 = arith.constant 0 : i32
    return %c0_i32, %c0_i32_0 : i32, i32
  }
  func.func @transform_1(%arg0: i32) -> (i32, i32) {
    %c0_i32 = arith.constant 0 : i32
    %c0_i32_0 = arith.constant 0 : i32
    return %c0_i32, %arg0 : i32, i32
  }
  func.func @transform_2(%arg0: i32) -> (i32, i32) {
    %c0_i32 = arith.constant 0 : i32
    %c0_i32_0 = arith.constant 0 : i32
    %c0_i32_1 = arith.constant 0 : i32
    return %c0_i32, %c0_i32_0 : i32, i32
  }
  func.func @transform_3(%arg0: i32) -> (i32, i32) {
    %c0_i32 = arith.constant 0 : i32
    %c0_i32_0 = arith.constant 0 : i32
    return %c0_i32, %arg0 : i32, i32
  }
}

module attributes {stable_mosaic.version = 11 : i64} {
  func.func @_mm_kernel_single(%arg0: i32, %arg1: memref<2x100xbf16, #tpu.memory_space<vmem>>, %arg2: memref<100x512xbf16, #tpu.memory_space<vmem>>, %arg3: memref<2x1xf32, #tpu.memory_space<vmem>>, %arg4: memref<2x512xbf16, #tpu.memory_space<vmem>>) attributes {dimension_semantics = [#tpu.dimension_semantics<parallel>], iteration_bounds = array<i64: 4>, scalar_prefetch = 0 : i64, scratch_operands = 0 : i64, tpu.core_type = #tpu.core_type<tc>, window_params = [{pipeline_mode = #tpu.pipeline_mode<synchronous>, transform_indices = @transform_0, window_bounds = array<i64: 2, 100>}, {transform_indices = @transform_1, window_bounds = array<i64: 100, 512>}, {pipeline_mode = #tpu.pipeline_mode<synchronous>, transform_indices = @transform_2, window_bounds = array<i64: 2, 1>}, {transform_indices = @transform_3, window_bounds = array<i64: 2, 512>}]} {
    %c0 = arith.constant 0 : index
    %c0_0 = arith.constant 0 : index
    %0 = vector.load %arg1[%c0, %c0_0] : memref<2x100xbf16, #tpu.memory_space<vmem>>, vector<2x100xbf16>
    %c0_1 = arith.constant 0 : index
    %c0_2 = arith.constant 0 : index
    %1 = vector.load %arg2[%c0_1, %c0_2] : memref<100x512xbf16, #tpu.memory_space<vmem>>, vector<100x512xbf16>
    %cst = arith.constant dense<0.000000e+00> : vector<2x512xf32>
    %2 = tpu.matmul %0, %1, %cst {dimension_numbers = #tpu.dot_dimension_numbers<[1], [0], [0], [1], [0, 0, 1, 1], [], []>} : vector<2x100xbf16>, vector<100x512xbf16>, vector<2x512xf32> -> vector<2x512xf32>
    %c0_3 = arith.constant 0 : index
    %c0_4 = arith.constant 0 : index
    %3 = vector.load %arg3[%c0_3, %c0_4] : memref<2x1xf32, #tpu.memory_space<vmem>>, vector<2x1xf32>
    %4 = vector.broadcast %3 : vector<2x1xf32> to vector<2x512xf32>
    %5 = arith.addf %2, %4 : vector<2x512xf32>
    %6 = arith.truncf %5 : vector<2x512xf32> to vector<2x512xbf16>
    %c0_5 = arith.constant 0 : index
    %c0_6 = arith.constant 0 : index
    %7 = vector.load %arg4[%c0_5, %c0_6] : memref<2x512xbf16, #tpu.memory_space<vmem>>, vector<2x512xbf16>
    tpu.vector_store %arg4[%c0_5, %c0_6], %6 {strides = array<i32>} : memref<2x512xbf16, #tpu.memory_space<vmem>>, vector<2x512xbf16>,
    return
  }
  func.func @transform_0(%arg0: i32) -> (i32, i32) {
    %c0_i32 = arith.constant 0 : i32
    %c0_i32_0 = arith.constant 0 : i32
    %c0_i32_1 = arith.constant 0 : i32
    return %c0_i32, %c0_i32_0 : i32, i32
  }
  func.func @transform_1(%arg0: i32) -> (i32, i32) {
    %c0_i32 = arith.constant 0 : i32
    %c0_i32_0 = arith.constant 0 : i32
    return %c0_i32, %arg0 : i32, i32
  }
  func.func @transform_2(%arg0: i32) -> (i32, i32) {
    %c0_i32 = arith.constant 0 : i32
    %c0_i32_0 = arith.constant 0 : i32
    %c0_i32_1 = arith.constant 0 : i32
    return %c0_i32, %c0_i32_0 : i32, i32
  }
  func.func @transform_3(%arg0: i32) -> (i32, i32) {
    %c0_i32 = arith.constant 0 : i32
    %c0_i32_0 = arith.constant 0 : i32
    return %c0_i32, %arg0 : i32, i32
  }
}

module attributes {stable_mosaic.version = 11 : i64} {
  func.func @_mm_res_kernel_single(%arg0: i32, %arg1: memref<2x18xbf16, #tpu.memory_space<vmem>>, %arg2: memref<18x512xbf16, #tpu.memory_space<vmem>>, %arg3: memref<2x1xf32, #tpu.memory_space<vmem>>, %arg4: memref<2x512xbf16, #tpu.memory_space<vmem>>, %arg5: memref<2x512xbf16, #tpu.memory_space<vmem>>) attributes {dimension_semantics = [#tpu.dimension_semantics<parallel>], iteration_bounds = array<i64: 4>, scalar_prefetch = 0 : i64, scratch_operands = 0 : i64, tpu.core_type = #tpu.core_type<tc>, window_params = [{pipeline_mode = #tpu.pipeline_mode<synchronous>, transform_indices = @transform_0, window_bounds = array<i64: 2, 18>}, {transform_indices = @transform_1, window_bounds = array<i64: 18, 512>}, {pipeline_mode = #tpu.pipeline_mode<synchronous>, transform_indices = @transform_2, window_bounds = array<i64: 2, 1>}, {transform_indices = @transform_3, window_bounds = array<i64: 2, 512>}, {transform_indices = @transform_4, window_bounds = array<i64: 2, 512>}]} {
    %c0 = arith.constant 0 : index
    %c0_0 = arith.constant 0 : index
    %0 = vector.load %arg1[%c0, %c0_0] : memref<2x18xbf16, #tpu.memory_space<vmem>>, vector<2x18xbf16>
    %c0_1 = arith.constant 0 : index
    %c0_2 = arith.constant 0 : index
    %1 = vector.load %arg2[%c0_1, %c0_2] : memref<18x512xbf16, #tpu.memory_space<vmem>>, vector<18x512xbf16>
    %cst = arith.constant dense<0.000000e+00> : vector<2x512xf32>
    %2 = tpu.matmul %0, %1, %cst {dimension_numbers = #tpu.dot_dimension_numbers<[1], [0], [0], [1], [0, 0, 1, 1], [], []>} : vector<2x18xbf16>, vector<18x512xbf16>, vector<2x512xf32> -> vector<2x512xf32>
    %c0_3 = arith.constant 0 : index
    %c0_4 = arith.constant 0 : index
    %3 = vector.load %arg3[%c0_3, %c0_4] : memref<2x1xf32, #tpu.memory_space<vmem>>, vector<2x1xf32>
    %4 = vector.broadcast %3 : vector<2x1xf32> to vector<2x512xf32>
    %5 = arith.addf %2, %4 : vector<2x512xf32>
    %c0_5 = arith.constant 0 : index
    %c0_6 = arith.constant 0 : index
    %6 = vector.load %arg4[%c0_5, %c0_6] : memref<2x512xbf16, #tpu.memory_space<vmem>>, vector<2x512xbf16>
    %7 = arith.extf %6 : vector<2x512xbf16> to vector<2x512xf32>
    %8 = arith.addf %5, %7 : vector<2x512xf32>
    %cst_7 = arith.constant 0.000000e+00 : f32
    %9 = vector.broadcast %cst_7 : f32 to vector<2x512xf32>
    %10 = arith.maximumf %8, %9 : vector<2x512xf32>
    %11 = arith.truncf %10 : vector<2x512xf32> to vector<2x512xbf16>
    %c0_8 = arith.constant 0 : index
    %c0_9 = arith.constant 0 : index
    %12 = vector.load %arg5[%c0_8, %c0_9] : memref<2x512xbf16, #tpu.memory_space<vmem>>, vector<2x512xbf16>
    tpu.vector_store %arg5[%c0_8, %c0_9], %11 {strides = array<i32>} : memref<2x512xbf16, #tpu.memory_space<vmem>>, vector<2x512xbf16>,
    return
  }
  func.func @transform_0(%arg0: i32) -> (i32, i32) {
    %c0_i32 = arith.constant 0 : i32
    %c0_i32_0 = arith.constant 0 : i32
    %c0_i32_1 = arith.constant 0 : i32
    return %c0_i32, %c0_i32_0 : i32, i32
  }
  func.func @transform_1(%arg0: i32) -> (i32, i32) {
    %c0_i32 = arith.constant 0 : i32
    %c0_i32_0 = arith.constant 0 : i32
    return %c0_i32, %arg0 : i32, i32
  }
  func.func @transform_2(%arg0: i32) -> (i32, i32) {
    %c0_i32 = arith.constant 0 : i32
    %c0_i32_0 = arith.constant 0 : i32
    %c0_i32_1 = arith.constant 0 : i32
    return %c0_i32, %c0_i32_0 : i32, i32
  }
  func.func @transform_3(%arg0: i32) -> (i32, i32) {
    %c0_i32 = arith.constant 0 : i32
    %c0_i32_0 = arith.constant 0 : i32
    return %c0_i32, %arg0 : i32, i32
  }
  func.func @transform_4(%arg0: i32) -> (i32, i32) {
    %c0_i32 = arith.constant 0 : i32
    %c0_i32_0 = arith.constant 0 : i32
    return %c0_i32, %arg0 : i32, i32
  }
}

module attributes {stable_mosaic.version = 11 : i64} {
  func.func @_bilerp_kernel(%arg0: i32, %arg1: memref<4x64x64xbf16, #tpu.memory_space<vmem>>, %arg2: memref<4x64x64xbf16, #tpu.memory_space<vmem>>, %arg3: memref<4x64x64xbf16, #tpu.memory_space<vmem>>, %arg4: memref<4x64x64xbf16, #tpu.memory_space<vmem>>, %arg5: memref<4x64x64xf32, #tpu.memory_space<vmem>>, %arg6: memref<4x64x64xbf16, #tpu.memory_space<vmem>>) attributes {dimension_semantics = [#tpu.dimension_semantics<parallel>], iteration_bounds = array<i64: 1>, scalar_prefetch = 0 : i64, scratch_operands = 0 : i64, tpu.core_type = #tpu.core_type<tc>, window_params = [{transform_indices = @transform_0, window_bounds = array<i64: 4, 64, 64>}, {transform_indices = @transform_1, window_bounds = array<i64: 4, 64, 64>}, {transform_indices = @transform_2, window_bounds = array<i64: 4, 64, 64>}, {transform_indices = @transform_3, window_bounds = array<i64: 4, 64, 64>}, {pipeline_mode = #tpu.pipeline_mode<synchronous>, transform_indices = @transform_4, window_bounds = array<i64: 4, 64, 64>}, {transform_indices = @transform_5, window_bounds = array<i64: 4, 64, 64>}]} {
    %c0 = arith.constant 0 : index
    %c0_0 = arith.constant 0 : index
    %c0_1 = arith.constant 0 : index
    %0 = vector.load %arg5[%c0, %c0_0, %c0_1] : memref<4x64x64xf32, #tpu.memory_space<vmem>>, vector<4x64x64xf32>
    %c0_2 = arith.constant 0 : index
    %c0_3 = arith.constant 0 : index
    %c0_4 = arith.constant 0 : index
    %1 = vector.load %arg1[%c0_2, %c0_3, %c0_4] : memref<4x64x64xbf16, #tpu.memory_space<vmem>>, vector<4x64x64xbf16>
    %2 = arith.extf %1 : vector<4x64x64xbf16> to vector<4x64x64xf32>
    %3 = vector.extract_strided_slice %0 {offsets = [0, 0, 0], sizes = [1, 64, 64], strides = [1, 1, 1]} : vector<4x64x64xf32> to vector<1x64x64xf32>
    %4 = vector.shape_cast %3 : vector<1x64x64xf32> to vector<64x64xf32>
    %5 = vector.shape_cast %4 : vector<64x64xf32> to vector<1x64x64xf32>
    %6 = vector.broadcast %5 : vector<1x64x64xf32> to vector<4x64x64xf32>
    %7 = arith.mulf %2, %6 : vector<4x64x64xf32>
    %c0_5 = arith.constant 0 : index
    %c0_6 = arith.constant 0 : index
    %c0_7 = arith.constant 0 : index
    %8 = vector.load %arg2[%c0_5, %c0_6, %c0_7] : memref<4x64x64xbf16, #tpu.memory_space<vmem>>, vector<4x64x64xbf16>
    %9 = arith.extf %8 : vector<4x64x64xbf16> to vector<4x64x64xf32>
    %10 = vector.extract_strided_slice %0 {offsets = [1, 0, 0], sizes = [1, 64, 64], strides = [1, 1, 1]} : vector<4x64x64xf32> to vector<1x64x64xf32>
    %11 = vector.shape_cast %10 : vector<1x64x64xf32> to vector<64x64xf32>
    %12 = vector.shape_cast %11 : vector<64x64xf32> to vector<1x64x64xf32>
    %13 = vector.broadcast %12 : vector<1x64x64xf32> to vector<4x64x64xf32>
    %14 = arith.mulf %9, %13 : vector<4x64x64xf32>
    %15 = arith.addf %7, %14 : vector<4x64x64xf32>
    %c0_8 = arith.constant 0 : index
    %c0_9 = arith.constant 0 : index
    %c0_10 = arith.constant 0 : index
    %16 = vector.load %arg3[%c0_8, %c0_9, %c0_10] : memref<4x64x64xbf16, #tpu.memory_space<vmem>>, vector<4x64x64xbf16>
    %17 = arith.extf %16 : vector<4x64x64xbf16> to vector<4x64x64xf32>
    %18 = vector.extract_strided_slice %0 {offsets = [2, 0, 0], sizes = [1, 64, 64], strides = [1, 1, 1]} : vector<4x64x64xf32> to vector<1x64x64xf32>
    %19 = vector.shape_cast %18 : vector<1x64x64xf32> to vector<64x64xf32>
    %20 = vector.shape_cast %19 : vector<64x64xf32> to vector<1x64x64xf32>
    %21 = vector.broadcast %20 : vector<1x64x64xf32> to vector<4x64x64xf32>
    %22 = arith.mulf %17, %21 : vector<4x64x64xf32>
    %23 = arith.addf %15, %22 : vector<4x64x64xf32>
    %c0_11 = arith.constant 0 : index
    %c0_12 = arith.constant 0 : index
    %c0_13 = arith.constant 0 : index
    %24 = vector.load %arg4[%c0_11, %c0_12, %c0_13] : memref<4x64x64xbf16, #tpu.memory_space<vmem>>, vector<4x64x64xbf16>
    %25 = arith.extf %24 : vector<4x64x64xbf16> to vector<4x64x64xf32>
    %26 = vector.extract_strided_slice %0 {offsets = [3, 0, 0], sizes = [1, 64, 64], strides = [1, 1, 1]} : vector<4x64x64xf32> to vector<1x64x64xf32>
    %27 = vector.shape_cast %26 : vector<1x64x64xf32> to vector<64x64xf32>
    %28 = vector.shape_cast %27 : vector<64x64xf32> to vector<1x64x64xf32>
    %29 = vector.broadcast %28 : vector<1x64x64xf32> to vector<4x64x64xf32>
    %30 = arith.mulf %25, %29 : vector<4x64x64xf32>
    %31 = arith.addf %23, %30 : vector<4x64x64xf32>
    %32 = arith.truncf %31 : vector<4x64x64xf32> to vector<4x64x64xbf16>
    %c0_14 = arith.constant 0 : index
    %c0_15 = arith.constant 0 : index
    %c0_16 = arith.constant 0 : index
    %33 = vector.load %arg6[%c0_14, %c0_15, %c0_16] : memref<4x64x64xbf16, #tpu.memory_space<vmem>>, vector<4x64x64xbf16>
    tpu.vector_store %arg6[%c0_14, %c0_15, %c0_16], %32 {strides = array<i32>} : memref<4x64x64xbf16, #tpu.memory_space<vmem>>, vector<4x64x64xbf16>,
    return
  }
  func.func @transform_0(%arg0: i32) -> (i32, i32, i32) {
    %c0_i32 = arith.constant 0 : i32
    %c0_i32_0 = arith.constant 0 : i32
    %c0_i32_1 = arith.constant 0 : i32
    return %arg0, %c0_i32, %c0_i32_0 : i32, i32, i32
  }
  func.func @transform_1(%arg0: i32) -> (i32, i32, i32) {
    %c0_i32 = arith.constant 0 : i32
    %c0_i32_0 = arith.constant 0 : i32
    %c0_i32_1 = arith.constant 0 : i32
    return %arg0, %c0_i32, %c0_i32_0 : i32, i32, i32
  }
  func.func @transform_2(%arg0: i32) -> (i32, i32, i32) {
    %c0_i32 = arith.constant 0 : i32
    %c0_i32_0 = arith.constant 0 : i32
    %c0_i32_1 = arith.constant 0 : i32
    return %arg0, %c0_i32, %c0_i32_0 : i32, i32, i32
  }
  func.func @transform_3(%arg0: i32) -> (i32, i32, i32) {
    %c0_i32 = arith.constant 0 : i32
    %c0_i32_0 = arith.constant 0 : i32
    %c0_i32_1 = arith.constant 0 : i32
    return %arg0, %c0_i32, %c0_i32_0 : i32, i32, i32
  }
  func.func @transform_4(%arg0: i32) -> (i32, i32, i32) {
    %c0_i32 = arith.constant 0 : i32
    %c0_i32_0 = arith.constant 0 : i32
    %c0_i32_1 = arith.constant 0 : i32
    %c0_i32_2 = arith.constant 0 : i32
    return %c0_i32, %c0_i32_0, %c0_i32_1 : i32, i32, i32
  }
  func.func @transform_5(%arg0: i32) -> (i32, i32, i32) {
    %c0_i32 = arith.constant 0 : i32
    %c0_i32_0 = arith.constant 0 : i32
    %c0_i32_1 = arith.constant 0 : i32
    return %arg0, %c0_i32, %c0_i32_0 : i32, i32, i32
  }
}

module attributes {stable_mosaic.version = 11 : i64} {
  func.func @_mm_kernel_single(%arg0: i32, %arg1: memref<1x50xbf16, #tpu.memory_space<vmem>>, %arg2: memref<50x512xbf16, #tpu.memory_space<vmem>>, %arg3: memref<1x1xf32, #tpu.memory_space<vmem>>, %arg4: memref<1x512xbf16, #tpu.memory_space<vmem>>) attributes {dimension_semantics = [#tpu.dimension_semantics<parallel>], iteration_bounds = array<i64: 16>, scalar_prefetch = 0 : i64, scratch_operands = 0 : i64, tpu.core_type = #tpu.core_type<tc>, window_params = [{pipeline_mode = #tpu.pipeline_mode<synchronous>, transform_indices = @transform_0, window_bounds = array<i64: 1, 50>}, {transform_indices = @transform_1, window_bounds = array<i64: 50, 512>}, {pipeline_mode = #tpu.pipeline_mode<synchronous>, transform_indices = @transform_2, window_bounds = array<i64: 1, 1>}, {transform_indices = @transform_3, window_bounds = array<i64: 1, 512>}]} {
    %c0 = arith.constant 0 : index
    %c0_0 = arith.constant 0 : index
    %0 = vector.load %arg1[%c0, %c0_0] : memref<1x50xbf16, #tpu.memory_space<vmem>>, vector<1x50xbf16>
    %c0_1 = arith.constant 0 : index
    %c0_2 = arith.constant 0 : index
    %1 = vector.load %arg2[%c0_1, %c0_2] : memref<50x512xbf16, #tpu.memory_space<vmem>>, vector<50x512xbf16>
    %cst = arith.constant dense<0.000000e+00> : vector<1x512xf32>
    %2 = tpu.matmul %0, %1, %cst {dimension_numbers = #tpu.dot_dimension_numbers<[1], [0], [0], [1], [0, 0, 1, 1], [], []>} : vector<1x50xbf16>, vector<50x512xbf16>, vector<1x512xf32> -> vector<1x512xf32>
    %c0_3 = arith.constant 0 : index
    %c0_4 = arith.constant 0 : index
    %3 = vector.load %arg3[%c0_3, %c0_4] : memref<1x1xf32, #tpu.memory_space<vmem>>, vector<1x1xf32>
    %4 = vector.broadcast %3 : vector<1x1xf32> to vector<1x512xf32>
    %5 = arith.addf %2, %4 : vector<1x512xf32>
    %cst_5 = arith.constant 0.000000e+00 : f32
    %6 = vector.broadcast %cst_5 : f32 to vector<1x512xf32>
    %7 = arith.maximumf %5, %6 : vector<1x512xf32>
    %8 = arith.truncf %7 : vector<1x512xf32> to vector<1x512xbf16>
    %c0_6 = arith.constant 0 : index
    %c0_7 = arith.constant 0 : index
    %9 = vector.load %arg4[%c0_6, %c0_7] : memref<1x512xbf16, #tpu.memory_space<vmem>>, vector<1x512xbf16>
    tpu.vector_store %arg4[%c0_6, %c0_7], %8 {strides = array<i32>} : memref<1x512xbf16, #tpu.memory_space<vmem>>, vector<1x512xbf16>,
    return
  }
  func.func @transform_0(%arg0: i32) -> (i32, i32) {
    %c0_i32 = arith.constant 0 : i32
    %c0_i32_0 = arith.constant 0 : i32
    %c0_i32_1 = arith.constant 0 : i32
    return %c0_i32, %c0_i32_0 : i32, i32
  }
  func.func @transform_1(%arg0: i32) -> (i32, i32) {
    %c0_i32 = arith.constant 0 : i32
    %c0_i32_0 = arith.constant 0 : i32
    return %c0_i32, %arg0 : i32, i32
  }
  func.func @transform_2(%arg0: i32) -> (i32, i32) {
    %c0_i32 = arith.constant 0 : i32
    %c0_i32_0 = arith.constant 0 : i32
    %c0_i32_1 = arith.constant 0 : i32
    return %c0_i32, %c0_i32_0 : i32, i32
  }
  func.func @transform_3(%arg0: i32) -> (i32, i32) {
    %c0_i32 = arith.constant 0 : i32
    %c0_i32_0 = arith.constant 0 : i32
    return %c0_i32, %arg0 : i32, i32
  }
}

module attributes {stable_mosaic.version = 11 : i64} {
  func.func @_mm_kernel_single(%arg0: i32, %arg1: memref<1x50xbf16, #tpu.memory_space<vmem>>, %arg2: memref<50x512xbf16, #tpu.memory_space<vmem>>, %arg3: memref<1x1xf32, #tpu.memory_space<vmem>>, %arg4: memref<1x512xbf16, #tpu.memory_space<vmem>>) attributes {dimension_semantics = [#tpu.dimension_semantics<parallel>], iteration_bounds = array<i64: 16>, scalar_prefetch = 0 : i64, scratch_operands = 0 : i64, tpu.core_type = #tpu.core_type<tc>, window_params = [{pipeline_mode = #tpu.pipeline_mode<synchronous>, transform_indices = @transform_0, window_bounds = array<i64: 1, 50>}, {transform_indices = @transform_1, window_bounds = array<i64: 50, 512>}, {pipeline_mode = #tpu.pipeline_mode<synchronous>, transform_indices = @transform_2, window_bounds = array<i64: 1, 1>}, {transform_indices = @transform_3, window_bounds = array<i64: 1, 512>}]} {
    %c0 = arith.constant 0 : index
    %c0_0 = arith.constant 0 : index
    %0 = vector.load %arg1[%c0, %c0_0] : memref<1x50xbf16, #tpu.memory_space<vmem>>, vector<1x50xbf16>
    %c0_1 = arith.constant 0 : index
    %c0_2 = arith.constant 0 : index
    %1 = vector.load %arg2[%c0_1, %c0_2] : memref<50x512xbf16, #tpu.memory_space<vmem>>, vector<50x512xbf16>
    %cst = arith.constant dense<0.000000e+00> : vector<1x512xf32>
    %2 = tpu.matmul %0, %1, %cst {dimension_numbers = #tpu.dot_dimension_numbers<[1], [0], [0], [1], [0, 0, 1, 1], [], []>} : vector<1x50xbf16>, vector<50x512xbf16>, vector<1x512xf32> -> vector<1x512xf32>
    %c0_3 = arith.constant 0 : index
    %c0_4 = arith.constant 0 : index
    %3 = vector.load %arg3[%c0_3, %c0_4] : memref<1x1xf32, #tpu.memory_space<vmem>>, vector<1x1xf32>
    %4 = vector.broadcast %3 : vector<1x1xf32> to vector<1x512xf32>
    %5 = arith.addf %2, %4 : vector<1x512xf32>
    %6 = arith.truncf %5 : vector<1x512xf32> to vector<1x512xbf16>
    %c0_5 = arith.constant 0 : index
    %c0_6 = arith.constant 0 : index
    %7 = vector.load %arg4[%c0_5, %c0_6] : memref<1x512xbf16, #tpu.memory_space<vmem>>, vector<1x512xbf16>
    tpu.vector_store %arg4[%c0_5, %c0_6], %6 {strides = array<i32>} : memref<1x512xbf16, #tpu.memory_space<vmem>>, vector<1x512xbf16>,
    return
  }
  func.func @transform_0(%arg0: i32) -> (i32, i32) {
    %c0_i32 = arith.constant 0 : i32
    %c0_i32_0 = arith.constant 0 : i32
    %c0_i32_1 = arith.constant 0 : i32
    return %c0_i32, %c0_i32_0 : i32, i32
  }
  func.func @transform_1(%arg0: i32) -> (i32, i32) {
    %c0_i32 = arith.constant 0 : i32
    %c0_i32_0 = arith.constant 0 : i32
    return %c0_i32, %arg0 : i32, i32
  }
  func.func @transform_2(%arg0: i32) -> (i32, i32) {
    %c0_i32 = arith.constant 0 : i32
    %c0_i32_0 = arith.constant 0 : i32
    %c0_i32_1 = arith.constant 0 : i32
    return %c0_i32, %c0_i32_0 : i32, i32
  }
  func.func @transform_3(%arg0: i32) -> (i32, i32) {
    %c0_i32 = arith.constant 0 : i32
    %c0_i32_0 = arith.constant 0 : i32
    return %c0_i32, %arg0 : i32, i32
  }
}

module attributes {stable_mosaic.version = 11 : i64} {
  func.func @_mm_res_kernel_single(%arg0: i32, %arg1: memref<1x9xbf16, #tpu.memory_space<vmem>>, %arg2: memref<9x512xbf16, #tpu.memory_space<vmem>>, %arg3: memref<1x1xf32, #tpu.memory_space<vmem>>, %arg4: memref<1x512xbf16, #tpu.memory_space<vmem>>, %arg5: memref<1x512xbf16, #tpu.memory_space<vmem>>) attributes {dimension_semantics = [#tpu.dimension_semantics<parallel>], iteration_bounds = array<i64: 16>, scalar_prefetch = 0 : i64, scratch_operands = 0 : i64, tpu.core_type = #tpu.core_type<tc>, window_params = [{pipeline_mode = #tpu.pipeline_mode<synchronous>, transform_indices = @transform_0, window_bounds = array<i64: 1, 9>}, {transform_indices = @transform_1, window_bounds = array<i64: 9, 512>}, {pipeline_mode = #tpu.pipeline_mode<synchronous>, transform_indices = @transform_2, window_bounds = array<i64: 1, 1>}, {transform_indices = @transform_3, window_bounds = array<i64: 1, 512>}, {transform_indices = @transform_4, window_bounds = array<i64: 1, 512>}]} {
    %c0 = arith.constant 0 : index
    %c0_0 = arith.constant 0 : index
    %0 = vector.load %arg1[%c0, %c0_0] : memref<1x9xbf16, #tpu.memory_space<vmem>>, vector<1x9xbf16>
    %c0_1 = arith.constant 0 : index
    %c0_2 = arith.constant 0 : index
    %1 = vector.load %arg2[%c0_1, %c0_2] : memref<9x512xbf16, #tpu.memory_space<vmem>>, vector<9x512xbf16>
    %cst = arith.constant dense<0.000000e+00> : vector<1x512xf32>
    %2 = tpu.matmul %0, %1, %cst {dimension_numbers = #tpu.dot_dimension_numbers<[1], [0], [0], [1], [0, 0, 1, 1], [], []>} : vector<1x9xbf16>, vector<9x512xbf16>, vector<1x512xf32> -> vector<1x512xf32>
    %c0_3 = arith.constant 0 : index
    %c0_4 = arith.constant 0 : index
    %3 = vector.load %arg3[%c0_3, %c0_4] : memref<1x1xf32, #tpu.memory_space<vmem>>, vector<1x1xf32>
    %4 = vector.broadcast %3 : vector<1x1xf32> to vector<1x512xf32>
    %5 = arith.addf %2, %4 : vector<1x512xf32>
    %c0_5 = arith.constant 0 : index
    %c0_6 = arith.constant 0 : index
    %6 = vector.load %arg4[%c0_5, %c0_6] : memref<1x512xbf16, #tpu.memory_space<vmem>>, vector<1x512xbf16>
    %7 = arith.extf %6 : vector<1x512xbf16> to vector<1x512xf32>
    %8 = arith.addf %5, %7 : vector<1x512xf32>
    %cst_7 = arith.constant 0.000000e+00 : f32
    %9 = vector.broadcast %cst_7 : f32 to vector<1x512xf32>
    %10 = arith.maximumf %8, %9 : vector<1x512xf32>
    %11 = arith.truncf %10 : vector<1x512xf32> to vector<1x512xbf16>
    %c0_8 = arith.constant 0 : index
    %c0_9 = arith.constant 0 : index
    %12 = vector.load %arg5[%c0_8, %c0_9] : memref<1x512xbf16, #tpu.memory_space<vmem>>, vector<1x512xbf16>
    tpu.vector_store %arg5[%c0_8, %c0_9], %11 {strides = array<i32>} : memref<1x512xbf16, #tpu.memory_space<vmem>>, vector<1x512xbf16>,
    return
  }
  func.func @transform_0(%arg0: i32) -> (i32, i32) {
    %c0_i32 = arith.constant 0 : i32
    %c0_i32_0 = arith.constant 0 : i32
    %c0_i32_1 = arith.constant 0 : i32
    return %c0_i32, %c0_i32_0 : i32, i32
  }
  func.func @transform_1(%arg0: i32) -> (i32, i32) {
    %c0_i32 = arith.constant 0 : i32
    %c0_i32_0 = arith.constant 0 : i32
    return %c0_i32, %arg0 : i32, i32
  }
  func.func @transform_2(%arg0: i32) -> (i32, i32) {
    %c0_i32 = arith.constant 0 : i32
    %c0_i32_0 = arith.constant 0 : i32
    %c0_i32_1 = arith.constant 0 : i32
    return %c0_i32, %c0_i32_0 : i32, i32
  }
  func.func @transform_3(%arg0: i32) -> (i32, i32) {
    %c0_i32 = arith.constant 0 : i32
    %c0_i32_0 = arith.constant 0 : i32
    return %c0_i32, %arg0 : i32, i32
  }
  func.func @transform_4(%arg0: i32) -> (i32, i32) {
    %c0_i32 = arith.constant 0 : i32
    %c0_i32_0 = arith.constant 0 : i32
    return %c0_i32, %arg0 : i32, i32
  }
}

</mosaic_0001>

<bundles_post_ra>
// kernel: d_forward.17
= control target key start
LH: loop header
LB: loop body
LE: loop exit
PB: predicated region body
PF: predicated region fallthrough
CT: control target
= control target key end

     0   :  { %v138_v0 = vmov 0.0   ;;  %vm139_vm0 = vmmov 0   ;;  %v140_v2 = vmov 0   ;;  %vm50_vm1 = vcmask 261120   ;;  %s182_s1 = inlined_call_operand.vmem [shape: bf16[32,32], index: 1, kind: input, shape index: {}]   ;;  %s183_s2 = inlined_call_operand.vmem [shape: f32[16,1], index: 2, kind: input, shape index: {}]   ;;  %s184_s0 = inlined_call_operand.vmem [shape: bf16[16,32], index: 0, kind: input, shape index: {}]   ;;  %s185_s3 = inlined_call_operand.vmem [shape: bf16[16,32], index: 3, kind: output, shape index: {}]  }
   0x1   :  { %123 = vmatprep.subr.bf16.mxu0 %v138_v0  ;;  %v135_v1 = vld [vmem:[%s182_s1] sm:$0xff]   ;;  %127 = vmatprep.mubr.msk.bf16.mxu0 %vm139_vm0, %v138_v0  ;;  %v136_v3 = vld [vmem:[%s182_s1 + $0x8] sm:$0xff]   ;;  %vm105_vm2 = vcmask 257024  }
   0x2   :  { %134 = vset.pattern.permute.xlu0 %v140_v2  ;;  %124 = vmatpush3.bf16.msra.mxu0 %v135_v1  ;;  %v21_v4 = vld [vmem:[%s183_s2] sm:$0xff]  ;;  %v22_v6 = vld [vmem:[%s183_s2 + $0x8] sm:$0xff] }
   0x3   :  { %125 = vmatprep.subr.bf16.mxu0 %v138_v0  ;;  %25 = vperm.xlu0 %134, %v21_v4   ;;  %v137_v5 = vld [vmem:[%s184_s0] sm:$0xff]  }
   0x6   :  { %126 = vmatpush3.bf16.msra.mxu0 %v136_v3 }
   0x7   :  { %30 = vperm.xlu0 %134, %v22_v6  }
   0x9   :  { %128 = vmatmul.mubr.msk.bf16.vlgmr.msra.gmra.mrb[0].mxu0 %vm50_vm1, %v137_v5 }
  0x82   :  { %v26_v7 = vpop.permute.xlu0 %25 }
  0x86   :  { %v31_v11 = vpop.permute.xlu0 %30 }
  0xdc   :  { %v88_v8 = vpop.f32.mrb[0].mxu0 }
  0xdd   :  { %v89_v9 = vadd.f32 %v88_v8, %v26_v7  ;;  %v129_v10 = vpop.f32.mrb[1].mxu0 }
  0xde   :  { %v91_v12 = vpop.f32.mrb[2].mxu0 }
  0xdf   :  { %v95_v13 = vmax.f32 %v89_v9, 0.0  ;;  %v92_v14 = vadd.f32 %v91_v12, %v31_v11  ;;  %v130_v15 = vpop.f32.mrb[3].mxu0 }
  0xe1   :  { %v118_v16 = vpack.c.bf16 %v95_v13, %v95_v13  ;;  %v96_v17 = vmax.f32 %v92_v14, 0.0 }
  0xe3   :  { %106 = vst.msk [vmem:[%s185_s3] sm:$0xf] %vm105_vm2, %v118_v16  ;;  %v119_v18 = vpack.c.bf16 %v96_v17, %v96_v17 }
  0xe5   :  { %107 = vst.msk [vmem:[%s185_s3 + $0x4] sm:$0xf] %vm105_vm2, %v119_v18 }

// kernel: d_forward.18
= control target key start
LH: loop header
LB: loop body
LE: loop exit
PB: predicated region body
PF: predicated region fallthrough
CT: control target
= control target key end

     0   :  { %vm536_vm0 = vcmask 60416   ;;  %s1387_s0 = inlined_call_operand.vmem [shape: bf16[32,8,8], index: 0, kind: input, shape index: {}]   ;;  %s1388_s1 = inlined_call_operand.vmem [shape: bf16[32,8,8], index: 1, kind: input, shape index: {}]   ;;  %s1389_s2 = inlined_call_operand.vmem [shape: bf16[32,8,8], index: 2, kind: input, shape index: {}]   ;;  %s1390_s3 = inlined_call_operand.vmem [shape: bf16[32,8,8], index: 3, kind: input, shape index: {}]   ;;  %s1391_s4 = inlined_call_operand.vmem [shape: f32[4,8,8], index: 4, kind: input, shape index: {}]   ;;  %s1392_s5 = inlined_call_operand.vmem [shape: bf16[32,8,8], index: 5, kind: output, shape index: {}]  }
   0x1   :  { %v922_v0 = vld [vmem:[%s1391_s4] sm:$0xff]  ;;  %v927_v1 = vld [vmem:[%s1391_s4 + $0x8] sm:$0xff]  ;;  %v932_v2 = vld [vmem:[%s1391_s4 + $0x10] sm:$0xff] }
   0x2   :  { %v574_v3 = vld [vmem:[%s1387_s0] sm:$0xff]   ;;  %v943_v5 = vld [vmem:[%s1391_s4 + $0x18] sm:$0xff]  ;;  %v829_v16 = vld [vmem:[%s1387_s0 + $0x8] sm:$0xff]  }
   0x3   :  { %v638_v4 = vld [vmem:[%s1388_s1] sm:$0xff]   ;;  %v575_v6 = vunpack.c.l.bf16 %v574_v3  ;;  %v576_v10 = vunpack.c.h.bf16 %v574_v3  ;;  %v844_v17 = vld [vmem:[%s1388_s1 + $0x8] sm:$0xff]   ;;  %v579_v30 = vunpack.c.l.bf16 %v829_v16  ;;  %v580_v34 = vunpack.c.h.bf16 %v829_v16  ;;  %v830_v40 = vld [vmem:[%s1387_s0 + $0x10] sm:$0xff]  }
   0x4   :  { %v639_v7 = vunpack.c.l.bf16 %v638_v4  ;;  %v702_v8 = vld [vmem:[%s1389_s2] sm:$0xff]   ;;  %v640_v11 = vunpack.c.h.bf16 %v638_v4  ;;  %v859_v22 = vld [vmem:[%s1389_s2 + $0x8] sm:$0xff]   ;;  %v643_v31 = vunpack.c.l.bf16 %v844_v17  ;;  %v644_v35 = vunpack.c.h.bf16 %v844_v17  ;;  %v845_v41 = vld [vmem:[%s1388_s1 + $0x10] sm:$0xff]  }
   0x5   :  { %v766_v9 = vld [vmem:[%s1390_s3] sm:$0xff]   ;;  %v703_v12 = vunpack.c.l.bf16 %v702_v8  ;;  %v704_v14 = vunpack.c.h.bf16 %v702_v8  ;;  %v88_v18 = vmul.f32 %v575_v6, %v922_v0  ;;  %v89_v20 = vmul.f32 %v576_v10, %v922_v0  ;;  %v874_v23 = vld [vmem:[%s1390_s3 + $0x8] sm:$0xff]   ;;  %v860_v50 = vld [vmem:[%s1389_s2 + $0x10] sm:$0xff]  }
   0x6   :  { %v767_v13 = vunpack.c.l.bf16 %v766_v9  ;;  %v768_v15 = vunpack.c.h.bf16 %v766_v9  ;;  %v184_v19 = vmul.f32 %v639_v7, %v927_v1  ;;  %v185_v21 = vmul.f32 %v640_v11, %v927_v1  ;;  %v875_v55 = vld [vmem:[%s1390_s3 + $0x10] sm:$0xff]  }
   0x7   :  { %v312_v24 = vmul.f32 %v703_v12, %v932_v2  ;;  %v313_v26 = vmul.f32 %v704_v14, %v932_v2  ;;  %v707_v32 = vunpack.c.l.bf16 %v859_v22  ;;  %v771_v33 = vunpack.c.l.bf16 %v874_v23  ;;  %v831_v12 = vld [vmem:[%s1387_s0 + $0x18] sm:$0xff]  }
   0x8   :  { %v440_v25 = vmul.f32 %v767_v13, %v943_v5  ;;  %v441_v27 = vmul.f32 %v768_v15, %v943_v5  ;;  %v216_v28 = vadd.f32 %v184_v19, %v88_v18  ;;  %v217_v29 = vadd.f32 %v185_v21, %v89_v20  ;;  %v846_v13 = vld [vmem:[%s1388_s1 + $0x18] sm:$0xff]  }
   0x9   :  { %v90_v38 = vmul.f32 %v579_v30, %v922_v0  ;;  %v186_v39 = vmul.f32 %v643_v31, %v927_v1  ;;  %v314_v42 = vmul.f32 %v707_v32, %v932_v2  ;;  %v442_v43 = vmul.f32 %v771_v33, %v943_v5  ;;  %v861_v14 = vld [vmem:[%s1389_s2 + $0x18] sm:$0xff]  }
   0xa   :  { %v344_v36 = vadd.f32 %v312_v24, %v216_v28  ;;  %v345_v37 = vadd.f32 %v313_v26, %v217_v29  ;;  %v91_v44 = vmul.f32 %v580_v34, %v922_v0  ;;  %v187_v45 = vmul.f32 %v644_v35, %v927_v1  ;;  %v876_v19 = vld [vmem:[%s1390_s3 + $0x18] sm:$0xff]  }
   0xb   :  { %v218_v48 = vadd.f32 %v186_v39, %v90_v38  ;;  %v708_v49 = vunpack.c.h.bf16 %v859_v22  ;;  %v772_v52 = vunpack.c.h.bf16 %v874_v23  ;;  %v583_v53 = vunpack.c.l.bf16 %v830_v40 }
   0xc   :  { %v472_v46 = vadd.f32 %v440_v25, %v344_v36  ;;  %v473_v47 = vadd.f32 %v441_v27, %v345_v37  ;;  %v219_v51 = vadd.f32 %v187_v45, %v91_v44  ;;  %v647_v54 = vunpack.c.l.bf16 %v845_v41  ;;  %v832_v36 = vld [vmem:[%s1387_s0 + $0x20] sm:$0xff]  }
   0xd   :  { %v346_v58 = vadd.f32 %v314_v42, %v218_v48  ;;  %v315_v59 = vmul.f32 %v708_v49, %v932_v2  ;;  %v443_v60 = vmul.f32 %v772_v52, %v943_v5  ;;  %v92_v61 = vmul.f32 %v583_v53, %v922_v0  ;;  %v847_v37 = vld [vmem:[%s1388_s1 + $0x20] sm:$0xff]  }
   0xe   :  { %v504_v56 = vpack.c.bf16 %v472_v46, %v472_v46  ;;  %v505_v57 = vpack.c.bf16 %v473_v47, %v473_v47  ;;  %v188_v62 = vmul.f32 %v647_v54, %v927_v1  ;;  %v711_v63 = vunpack.c.l.bf16 %v860_v50  ;;  %v862_v42 = vld [vmem:[%s1389_s2 + $0x20] sm:$0xff]  }
   0xf   :  { %v474_v3 = vadd.f32 %v442_v43, %v346_v58  ;;  %v347_v4 = vadd.f32 %v315_v59, %v219_v51  ;;  %v775_v6 = vunpack.c.l.bf16 %v875_v55  ;;  %v584_v7 = vunpack.c.h.bf16 %v830_v40  ;;  %v877_v51 = vld [vmem:[%s1390_s3 + $0x20] sm:$0xff]  }
  0x10   :  { %537 = vst.msk [vmem:[%s1392_s5] sm:$0xf] %vm536_vm0, %v504_v56  ;;  %538 = vst.msk [vmem:[%s1392_s5 + $0x4] sm:$0xf] %vm536_vm0, %v505_v57  ;;  %v220_v8 = vadd.f32 %v188_v62, %v92_v61  ;;  %v316_v9 = vmul.f32 %v711_v63, %v932_v2  ;;  %v648_v10 = vunpack.c.h.bf16 %v845_v41  ;;  %v712_v11 = vunpack.c.h.bf16 %v860_v50 }
  0x11   :  { %v506_v15 = vpack.c.bf16 %v474_v3, %v474_v3  ;;  %v475_v16 = vadd.f32 %v443_v60, %v347_v4  ;;  %v444_v17 = vmul.f32 %v775_v6, %v943_v5  ;;  %v93_v18 = vmul.f32 %v584_v7, %v922_v0 }
  0x12   :  { %v348_v20 = vadd.f32 %v316_v9, %v220_v8  ;;  %v189_v21 = vmul.f32 %v648_v10, %v927_v1  ;;  %v317_v22 = vmul.f32 %v712_v11, %v932_v2  ;;  %v776_v23 = vunpack.c.h.bf16 %v875_v55  ;;  %v833_v8 = vld [vmem:[%s1387_s0 + $0x28] sm:$0xff]  }
  0x13   :  { %539 = vst.msk [vmem:[%s1392_s5 + $0x8] sm:$0xf] %vm536_vm0, %v506_v15  ;;  %v507_v24 = vpack.c.bf16 %v475_v16, %v475_v16  ;;  %v587_v25 = vunpack.c.l.bf16 %v831_v12  ;;  %v651_v26 = vunpack.c.l.bf16 %v846_v13  ;;  %v715_v27 = vunpack.c.l.bf16 %v861_v14  ;;  %v848_v9 = vld [vmem:[%s1388_s1 + $0x28] sm:$0xff]  }
  0x14   :  { %v476_v28 = vadd.f32 %v444_v17, %v348_v20  ;;  %v221_v29 = vadd.f32 %v189_v21, %v93_v18  ;;  %v445_v30 = vmul.f32 %v776_v23, %v943_v5  ;;  %v779_v31 = vunpack.c.l.bf16 %v876_v19  ;;  %v863_v10 = vld [vmem:[%s1389_s2 + $0x28] sm:$0xff]  }
  0x15   :  { %540 = vst.msk [vmem:[%s1392_s5 + $0xc] sm:$0xf] %vm536_vm0, %v507_v24  ;;  %v94_v32 = vmul.f32 %v587_v25, %v922_v0  ;;  %v190_v33 = vmul.f32 %v651_v26, %v927_v1  ;;  %v318_v34 = vmul.f32 %v715_v27, %v932_v2  ;;  %v588_v35 = vunpack.c.h.bf16 %v831_v12  ;;  %v878_v15 = vld [vmem:[%s1390_s3 + $0x28] sm:$0xff]  }
  0x16   :  { %v508_v38 = vpack.c.bf16 %v476_v28, %v476_v28  ;;  %v349_v39 = vadd.f32 %v317_v22, %v221_v29  ;;  %v446_v40 = vmul.f32 %v779_v31, %v943_v5  ;;  %v652_v41 = vunpack.c.h.bf16 %v846_v13 }
  0x17   :  { %v222_v43 = vadd.f32 %v190_v33, %v94_v32  ;;  %v95_v44 = vmul.f32 %v588_v35, %v922_v0  ;;  %v716_v45 = vunpack.c.h.bf16 %v861_v14  ;;  %v780_v46 = vunpack.c.h.bf16 %v876_v19  ;;  %v834_v32 = vld [vmem:[%s1387_s0 + $0x30] sm:$0xff]  }
  0x18   :  { %541 = vst.msk [vmem:[%s1392_s5 + $0x10] sm:$0xf] %vm536_vm0, %v508_v38  ;;  %v477_v47 = vadd.f32 %v445_v30, %v349_v39  ;;  %v191_v48 = vmul.f32 %v652_v41, %v927_v1  ;;  %v591_v49 = vunpack.c.l.bf16 %v832_v36  ;;  %v655_v50 = vunpack.c.l.bf16 %v847_v37  ;;  %v849_v33 = vld [vmem:[%s1388_s1 + $0x30] sm:$0xff]  }
  0x19   :  { %v350_v52 = vadd.f32 %v318_v34, %v222_v43  ;;  %v319_v53 = vmul.f32 %v716_v45, %v932_v2  ;;  %v447_v54 = vmul.f32 %v780_v46, %v943_v5  ;;  %v719_v55 = vunpack.c.l.bf16 %v862_v42  ;;  %v864_v38 = vld [vmem:[%s1389_s2 + $0x30] sm:$0xff]  }
  0x1a   :  { %v509_v56 = vpack.c.bf16 %v477_v47, %v477_v47  ;;  %v223_v57 = vadd.f32 %v191_v48, %v95_v44  ;;  %v96_v58 = vmul.f32 %v591_v49, %v922_v0  ;;  %v192_v59 = vmul.f32 %v655_v50, %v927_v1  ;;  %v879_v47 = vld [vmem:[%s1390_s3 + $0x30] sm:$0xff]  }
  0x1b   :  { %v478_v60 = vadd.f32 %v446_v40, %v350_v52  ;;  %v320_v61 = vmul.f32 %v719_v55, %v932_v2  ;;  %v783_v62 = vunpack.c.l.bf16 %v877_v51  ;;  %v592_v63 = vunpack.c.h.bf16 %v832_v36 }
  0x1c   :  { %542 = vst.msk [vmem:[%s1392_s5 + $0x14] sm:$0xf] %vm536_vm0, %v509_v56  ;;  %v351_v3 = vadd.f32 %v319_v53, %v223_v57  ;;  %v224_v4 = vadd.f32 %v192_v59, %v96_v58  ;;  %v656_v6 = vunpack.c.h.bf16 %v847_v37  ;;  %v720_v7 = vunpack.c.h.bf16 %v862_v42 }
  0x1d   :  { %v510_v11 = vpack.c.bf16 %v478_v60, %v478_v60  ;;  %v448_v12 = vmul.f32 %v783_v62, %v943_v5  ;;  %v97_v13 = vmul.f32 %v592_v63, %v922_v0  ;;  %v784_v14 = vunpack.c.h.bf16 %v877_v51 }
  0x1e   :  { %v479_v16 = vadd.f32 %v447_v54, %v351_v3  ;;  %v352_v17 = vadd.f32 %v320_v61, %v224_v4  ;;  %v193_v18 = vmul.f32 %v656_v6, %v927_v1  ;;  %v321_v19 = vmul.f32 %v720_v7, %v932_v2  ;;  %v835_v3 = vld [vmem:[%s1387_s0 + $0x38] sm:$0xff]  }
  0x1f   :  { %543 = vst.msk [vmem:[%s1392_s5 + $0x18] sm:$0xf] %vm536_vm0, %v510_v11  ;;  %v449_v20 = vmul.f32 %v784_v14, %v943_v5  ;;  %v595_v21 = vunpack.c.l.bf16 %v833_v8  ;;  %v659_v22 = vunpack.c.l.bf16 %v848_v9  ;;  %v723_v23 = vunpack.c.l.bf16 %v863_v10  ;;  %v850_v4 = vld [vmem:[%s1388_s1 + $0x38] sm:$0xff]  }
  0x20   :  { %v511_v24 = vpack.c.bf16 %v479_v16, %v479_v16  ;;  %v480_v25 = vadd.f32 %v448_v12, %v352_v17  ;;  %v225_v26 = vadd.f32 %v193_v18, %v97_v13  ;;  %v787_v27 = vunpack.c.l.bf16 %v878_v15  ;;  %v865_v6 = vld [vmem:[%s1389_s2 + $0x38] sm:$0xff]  }
  0x21   :  { %v98_v28 = vmul.f32 %v595_v21, %v922_v0  ;;  %v194_v29 = vmul.f32 %v659_v22, %v927_v1  ;;  %v322_v30 = vmul.f32 %v723_v23, %v932_v2  ;;  %v596_v31 = vunpack.c.h.bf16 %v833_v8  ;;  %v880_v11 = vld [vmem:[%s1390_s3 + $0x38] sm:$0xff]  }
  0x22   :  { %544 = vst.msk [vmem:[%s1392_s5 + $0x1c] sm:$0xf] %vm536_vm0, %v511_v24  ;;  %v512_v34 = vpack.c.bf16 %v480_v25, %v480_v25  ;;  %v353_v35 = vadd.f32 %v321_v19, %v225_v26  ;;  %v450_v36 = vmul.f32 %v787_v27, %v943_v5  ;;  %v660_v37 = vunpack.c.h.bf16 %v848_v9 }
  0x23   :  { %v226_v39 = vadd.f32 %v194_v29, %v98_v28  ;;  %v99_v40 = vmul.f32 %v596_v31, %v922_v0  ;;  %v724_v41 = vunpack.c.h.bf16 %v863_v10  ;;  %v788_v42 = vunpack.c.h.bf16 %v878_v15  ;;  %v836_v28 = vld [vmem:[%s1387_s0 + $0x40] sm:$0xff]  }
  0x24   :  { %545 = vst.msk [vmem:[%s1392_s5 + $0x20] sm:$0xf] %vm536_vm0, %v512_v34  ;;  %v481_v43 = vadd.f32 %v449_v20, %v353_v35  ;;  %v195_v44 = vmul.f32 %v660_v37, %v927_v1  ;;  %v599_v45 = vunpack.c.l.bf16 %v834_v32  ;;  %v663_v46 = vunpack.c.l.bf16 %v849_v33  ;;  %v851_v29 = vld [vmem:[%s1388_s1 + $0x40] sm:$0xff]  }
  0x25   :  { %v354_v48 = vadd.f32 %v322_v30, %v226_v39  ;;  %v323_v49 = vmul.f32 %v724_v41, %v932_v2  ;;  %v451_v50 = vmul.f32 %v788_v42, %v943_v5  ;;  %v727_v51 = vunpack.c.l.bf16 %v864_v38  ;;  %v866_v34 = vld [vmem:[%s1389_s2 + $0x40] sm:$0xff]  }
  0x26   :  { %v513_v52 = vpack.c.bf16 %v481_v43, %v481_v43  ;;  %v227_v53 = vadd.f32 %v195_v44, %v99_v40  ;;  %v100_v54 = vmul.f32 %v599_v45, %v922_v0  ;;  %v196_v55 = vmul.f32 %v663_v46, %v927_v1  ;;  %v881_v43 = vld [vmem:[%s1390_s3 + $0x40] sm:$0xff]  }
  0x27   :  { %v482_v56 = vadd.f32 %v450_v36, %v354_v48  ;;  %v324_v57 = vmul.f32 %v727_v51, %v932_v2  ;;  %v791_v58 = vunpack.c.l.bf16 %v879_v47  ;;  %v600_v59 = vunpack.c.h.bf16 %v834_v32 }
  0x28   :  { %546 = vst.msk [vmem:[%s1392_s5 + $0x24] sm:$0xf] %vm536_vm0, %v513_v52  ;;  %v355_v60 = vadd.f32 %v323_v49, %v227_v53  ;;  %v228_v61 = vadd.f32 %v196_v55, %v100_v54  ;;  %v664_v62 = vunpack.c.h.bf16 %v849_v33  ;;  %v728_v63 = vunpack.c.h.bf16 %v864_v38 }
  0x29   :  { %v514_v7 = vpack.c.bf16 %v482_v56, %v482_v56  ;;  %v452_v8 = vmul.f32 %v791_v58, %v943_v5  ;;  %v101_v9 = vmul.f32 %v600_v59, %v922_v0  ;;  %v792_v10 = vunpack.c.h.bf16 %v879_v47 }
  0x2a   :  { %v483_v12 = vadd.f32 %v451_v50, %v355_v60  ;;  %v356_v13 = vadd.f32 %v324_v57, %v228_v61  ;;  %v197_v14 = vmul.f32 %v664_v62, %v927_v1  ;;  %v325_v15 = vmul.f32 %v728_v63, %v932_v2  ;;  %v837_v60 = vld [vmem:[%s1387_s0 + $0x48] sm:$0xff]  }
  0x2b   :  { %547 = vst.msk [vmem:[%s1392_s5 + $0x28] sm:$0xf] %vm536_vm0, %v514_v7  ;;  %v453_v16 = vmul.f32 %v792_v10, %v943_v5  ;;  %v603_v17 = vunpack.c.l.bf16 %v835_v3  ;;  %v667_v18 = vunpack.c.l.bf16 %v850_v4  ;;  %v731_v19 = vunpack.c.l.bf16 %v865_v6  ;;  %v852_v61 = vld [vmem:[%s1388_s1 + $0x48] sm:$0xff]  }
  0x2c   :  { %v515_v20 = vpack.c.bf16 %v483_v12, %v483_v12  ;;  %v484_v21 = vadd.f32 %v452_v8, %v356_v13  ;;  %v229_v22 = vadd.f32 %v197_v14, %v101_v9  ;;  %v795_v23 = vunpack.c.l.bf16 %v880_v11  ;;  %v867_v62 = vld [vmem:[%s1389_s2 + $0x48] sm:$0xff]  }
  0x2d   :  { %v102_v24 = vmul.f32 %v603_v17, %v922_v0  ;;  %v198_v25 = vmul.f32 %v667_v18, %v927_v1  ;;  %v326_v26 = vmul.f32 %v731_v19, %v932_v2  ;;  %v604_v27 = vunpack.c.h.bf16 %v835_v3  ;;  %v882_v7 = vld [vmem:[%s1390_s3 + $0x48] sm:$0xff]  }
  0x2e   :  { %548 = vst.msk [vmem:[%s1392_s5 + $0x2c] sm:$0xf] %vm536_vm0, %v515_v20  ;;  %v516_v30 = vpack.c.bf16 %v484_v21, %v484_v21  ;;  %v357_v31 = vadd.f32 %v325_v15, %v229_v22  ;;  %v454_v32 = vmul.f32 %v795_v23, %v943_v5  ;;  %v668_v33 = vunpack.c.h.bf16 %v850_v4 }
  0x2f   :  { %v230_v35 = vadd.f32 %v198_v25, %v102_v24  ;;  %v103_v36 = vmul.f32 %v604_v27, %v922_v0  ;;  %v732_v37 = vunpack.c.h.bf16 %v865_v6  ;;  %v796_v38 = vunpack.c.h.bf16 %v880_v11  ;;  %v838_v24 = vld [vmem:[%s1387_s0 + $0x50] sm:$0xff]  }
  0x30   :  { %549 = vst.msk [vmem:[%s1392_s5 + $0x30] sm:$0xf] %vm536_vm0, %v516_v30  ;;  %v485_v39 = vadd.f32 %v453_v16, %v357_v31  ;;  %v199_v40 = vmul.f32 %v668_v33, %v927_v1  ;;  %v607_v41 = vunpack.c.l.bf16 %v836_v28  ;;  %v671_v42 = vunpack.c.l.bf16 %v851_v29  ;;  %v853_v25 = vld [vmem:[%s1388_s1 + $0x50] sm:$0xff]  }
  0x31   :  { %v358_v44 = vadd.f32 %v326_v26, %v230_v35  ;;  %v327_v45 = vmul.f32 %v732_v37, %v932_v2  ;;  %v455_v46 = vmul.f32 %v796_v38, %v943_v5  ;;  %v735_v47 = vunpack.c.l.bf16 %v866_v34  ;;  %v868_v30 = vld [vmem:[%s1389_s2 + $0x50] sm:$0xff]  }
  0x32   :  { %v517_v48 = vpack.c.bf16 %v485_v39, %v485_v39  ;;  %v231_v49 = vadd.f32 %v199_v40, %v103_v36  ;;  %v104_v50 = vmul.f32 %v607_v41, %v922_v0  ;;  %v200_v51 = vmul.f32 %v671_v42, %v927_v1  ;;  %v883_v39 = vld [vmem:[%s1390_s3 + $0x50] sm:$0xff]  }
  0x33   :  { %v486_v52 = vadd.f32 %v454_v32, %v358_v44  ;;  %v328_v53 = vmul.f32 %v735_v47, %v932_v2  ;;  %v799_v54 = vunpack.c.l.bf16 %v881_v43  ;;  %v608_v55 = vunpack.c.h.bf16 %v836_v28 }
  0x34   :  { %550 = vst.msk [vmem:[%s1392_s5 + $0x34] sm:$0xf] %vm536_vm0, %v517_v48  ;;  %v359_v56 = vadd.f32 %v327_v45, %v231_v49  ;;  %v232_v57 = vadd.f32 %v200_v51, %v104_v50  ;;  %v672_v58 = vunpack.c.h.bf16 %v851_v29  ;;  %v736_v59 = vunpack.c.h.bf16 %v866_v34 }
  0x35   :  { %v518_v63 = vpack.c.bf16 %v486_v52, %v486_v52  ;;  %v456_v3 = vmul.f32 %v799_v54, %v943_v5  ;;  %v105_v4 = vmul.f32 %v608_v55, %v922_v0  ;;  %v800_v6 = vunpack.c.h.bf16 %v881_v43 }
  0x36   :  { %v487_v8 = vadd.f32 %v455_v46, %v359_v56  ;;  %v360_v9 = vadd.f32 %v328_v53, %v232_v57  ;;  %v201_v10 = vmul.f32 %v672_v58, %v927_v1  ;;  %v329_v11 = vmul.f32 %v736_v59, %v932_v2  ;;  %v839_v56 = vld [vmem:[%s1387_s0 + $0x58] sm:$0xff]  }
  0x37   :  { %551 = vst.msk [vmem:[%s1392_s5 + $0x38] sm:$0xf] %vm536_vm0, %v518_v63  ;;  %v457_v12 = vmul.f32 %v800_v6, %v943_v5  ;;  %v611_v13 = vunpack.c.l.bf16 %v837_v60  ;;  %v675_v14 = vunpack.c.l.bf16 %v852_v61  ;;  %v739_v15 = vunpack.c.l.bf16 %v867_v62  ;;  %v854_v57 = vld [vmem:[%s1388_s1 + $0x58] sm:$0xff]  }
  0x38   :  { %v519_v16 = vpack.c.bf16 %v487_v8, %v487_v8  ;;  %v488_v17 = vadd.f32 %v456_v3, %v360_v9  ;;  %v233_v18 = vadd.f32 %v201_v10, %v105_v4  ;;  %v803_v19 = vunpack.c.l.bf16 %v882_v7  ;;  %v869_v58 = vld [vmem:[%s1389_s2 + $0x58] sm:$0xff]  }
  0x39   :  { %v106_v20 = vmul.f32 %v611_v13, %v922_v0  ;;  %v202_v21 = vmul.f32 %v675_v14, %v927_v1  ;;  %v330_v22 = vmul.f32 %v739_v15, %v932_v2  ;;  %v612_v23 = vunpack.c.h.bf16 %v837_v60  ;;  %v884_v63 = vld [vmem:[%s1390_s3 + $0x58] sm:$0xff]  }
  0x3a   :  { %552 = vst.msk [vmem:[%s1392_s5 + $0x3c] sm:$0xf] %vm536_vm0, %v519_v16  ;;  %v520_v26 = vpack.c.bf16 %v488_v17, %v488_v17  ;;  %v361_v27 = vadd.f32 %v329_v11, %v233_v18  ;;  %v458_v28 = vmul.f32 %v803_v19, %v943_v5  ;;  %v676_v29 = vunpack.c.h.bf16 %v852_v61 }
  0x3b   :  { %v234_v31 = vadd.f32 %v202_v21, %v106_v20  ;;  %v107_v32 = vmul.f32 %v612_v23, %v922_v0  ;;  %v740_v33 = vunpack.c.h.bf16 %v867_v62  ;;  %v804_v34 = vunpack.c.h.bf16 %v882_v7  ;;  %v840_v20 = vld [vmem:[%s1387_s0 + $0x60] sm:$0xff]  }
  0x3c   :  { %553 = vst.msk [vmem:[%s1392_s5 + $0x40] sm:$0xf] %vm536_vm0, %v520_v26  ;;  %v489_v35 = vadd.f32 %v457_v12, %v361_v27  ;;  %v203_v36 = vmul.f32 %v676_v29, %v927_v1  ;;  %v615_v37 = vunpack.c.l.bf16 %v838_v24  ;;  %v679_v38 = vunpack.c.l.bf16 %v853_v25  ;;  %v855_v21 = vld [vmem:[%s1388_s1 + $0x60] sm:$0xff]  }
  0x3d   :  { %v362_v40 = vadd.f32 %v330_v22, %v234_v31  ;;  %v331_v41 = vmul.f32 %v740_v33, %v932_v2  ;;  %v459_v42 = vmul.f32 %v804_v34, %v943_v5  ;;  %v743_v43 = vunpack.c.l.bf16 %v868_v30  ;;  %v870_v26 = vld [vmem:[%s1389_s2 + $0x60] sm:$0xff]  }
  0x3e   :  { %v521_v44 = vpack.c.bf16 %v489_v35, %v489_v35  ;;  %v235_v45 = vadd.f32 %v203_v36, %v107_v32  ;;  %v108_v46 = vmul.f32 %v615_v37, %v922_v0  ;;  %v204_v47 = vmul.f32 %v679_v38, %v927_v1  ;;  %v885_v35 = vld [vmem:[%s1390_s3 + $0x60] sm:$0xff]  }
  0x3f   :  { %v490_v48 = vadd.f32 %v458_v28, %v362_v40  ;;  %v332_v49 = vmul.f32 %v743_v43, %v932_v2  ;;  %v807_v50 = vunpack.c.l.bf16 %v883_v39  ;;  %v616_v51 = vunpack.c.h.bf16 %v838_v24 }
  0x40   :  { %554 = vst.msk [vmem:[%s1392_s5 + $0x44] sm:$0xf] %vm536_vm0, %v521_v44  ;;  %v363_v52 = vadd.f32 %v331_v41, %v235_v45  ;;  %v236_v53 = vadd.f32 %v204_v47, %v108_v46  ;;  %v680_v54 = vunpack.c.h.bf16 %v853_v25  ;;  %v744_v55 = vunpack.c.h.bf16 %v868_v30 }
  0x41   :  { %v522_v59 = vpack.c.bf16 %v490_v48, %v490_v48  ;;  %v460_v60 = vmul.f32 %v807_v50, %v943_v5  ;;  %v109_v61 = vmul.f32 %v616_v51, %v922_v0  ;;  %v808_v62 = vunpack.c.h.bf16 %v883_v39 }
  0x42   :  { %v491_v3 = vadd.f32 %v459_v42, %v363_v52  ;;  %v364_v4 = vadd.f32 %v332_v49, %v236_v53  ;;  %v205_v6 = vmul.f32 %v680_v54, %v927_v1  ;;  %v333_v7 = vmul.f32 %v744_v55, %v932_v2  ;;  %v841_v52 = vld [vmem:[%s1387_s0 + $0x68] sm:$0xff]  }
  0x43   :  { %555 = vst.msk [vmem:[%s1392_s5 + $0x48] sm:$0xf] %vm536_vm0, %v522_v59  ;;  %v461_v8 = vmul.f32 %v808_v62, %v943_v5  ;;  %v619_v9 = vunpack.c.l.bf16 %v839_v56  ;;  %v683_v10 = vunpack.c.l.bf16 %v854_v57  ;;  %v747_v11 = vunpack.c.l.bf16 %v869_v58  ;;  %v856_v53 = vld [vmem:[%s1388_s1 + $0x68] sm:$0xff]  }
  0x44   :  { %v523_v12 = vpack.c.bf16 %v491_v3, %v491_v3  ;;  %v492_v13 = vadd.f32 %v460_v60, %v364_v4  ;;  %v237_v14 = vadd.f32 %v205_v6, %v109_v61  ;;  %v811_v15 = vunpack.c.l.bf16 %v884_v63  ;;  %v871_v54 = vld [vmem:[%s1389_s2 + $0x68] sm:$0xff]  }
  0x45   :  { %v110_v16 = vmul.f32 %v619_v9, %v922_v0  ;;  %v206_v17 = vmul.f32 %v683_v10, %v927_v1  ;;  %v334_v18 = vmul.f32 %v747_v11, %v932_v2  ;;  %v620_v19 = vunpack.c.h.bf16 %v839_v56  ;;  %v886_v59 = vld [vmem:[%s1390_s3 + $0x68] sm:$0xff]  }
  0x46   :  { %556 = vst.msk [vmem:[%s1392_s5 + $0x4c] sm:$0xf] %vm536_vm0, %v523_v12  ;;  %v524_v22 = vpack.c.bf16 %v492_v13, %v492_v13  ;;  %v365_v23 = vadd.f32 %v333_v7, %v237_v14  ;;  %v462_v24 = vmul.f32 %v811_v15, %v943_v5  ;;  %v684_v25 = vunpack.c.h.bf16 %v854_v57 }
  0x47   :  { %v238_v27 = vadd.f32 %v206_v17, %v110_v16  ;;  %v111_v28 = vmul.f32 %v620_v19, %v922_v0  ;;  %v748_v29 = vunpack.c.h.bf16 %v869_v58  ;;  %v812_v30 = vunpack.c.h.bf16 %v884_v63  ;;  %v842_v16 = vld [vmem:[%s1387_s0 + $0x70] sm:$0xff]  }
  0x48   :  { %557 = vst.msk [vmem:[%s1392_s5 + $0x50] sm:$0xf] %vm536_vm0, %v524_v22  ;;  %v493_v31 = vadd.f32 %v461_v8, %v365_v23  ;;  %v207_v32 = vmul.f32 %v684_v25, %v927_v1  ;;  %v623_v33 = vunpack.c.l.bf16 %v840_v20  ;;  %v687_v34 = vunpack.c.l.bf16 %v855_v21  ;;  %v857_v17 = vld [vmem:[%s1388_s1 + $0x70] sm:$0xff]  }
  0x49   :  { %v366_v36 = vadd.f32 %v334_v18, %v238_v27  ;;  %v335_v37 = vmul.f32 %v748_v29, %v932_v2  ;;  %v463_v38 = vmul.f32 %v812_v30, %v943_v5  ;;  %v751_v39 = vunpack.c.l.bf16 %v870_v26  ;;  %v872_v22 = vld [vmem:[%s1389_s2 + $0x70] sm:$0xff]  }
  0x4a   :  { %v525_v40 = vpack.c.bf16 %v493_v31, %v493_v31  ;;  %v239_v41 = vadd.f32 %v207_v32, %v111_v28  ;;  %v112_v42 = vmul.f32 %v623_v33, %v922_v0  ;;  %v208_v43 = vmul.f32 %v687_v34, %v927_v1  ;;  %v887_v31 = vld [vmem:[%s1390_s3 + $0x70] sm:$0xff]  }
  0x4b   :  { %v494_v44 = vadd.f32 %v462_v24, %v366_v36  ;;  %v336_v45 = vmul.f32 %v751_v39, %v932_v2  ;;  %v815_v46 = vunpack.c.l.bf16 %v885_v35  ;;  %v624_v47 = vunpack.c.h.bf16 %v840_v20 }
  0x4c   :  { %558 = vst.msk [vmem:[%s1392_s5 + $0x54] sm:$0xf] %vm536_vm0, %v525_v40  ;;  %v367_v48 = vadd.f32 %v335_v37, %v239_v41  ;;  %v240_v49 = vadd.f32 %v208_v43, %v112_v42  ;;  %v688_v50 = vunpack.c.h.bf16 %v855_v21  ;;  %v752_v51 = vunpack.c.h.bf16 %v870_v26 }
  0x4d   :  { %v526_v55 = vpack.c.bf16 %v494_v44, %v494_v44  ;;  %v464_v56 = vmul.f32 %v815_v46, %v943_v5  ;;  %v113_v57 = vmul.f32 %v624_v47, %v922_v0  ;;  %v816_v58 = vunpack.c.h.bf16 %v885_v35 }
  0x4e   :  { %v495_v60 = vadd.f32 %v463_v38, %v367_v48  ;;  %v368_v61 = vadd.f32 %v336_v45, %v240_v49  ;;  %v209_v62 = vmul.f32 %v688_v50, %v927_v1  ;;  %v337_v63 = vmul.f32 %v752_v51, %v932_v2  ;;  %v843_v48 = vld [vmem:[%s1387_s0 + $0x78] sm:$0xff]  }
  0x4f   :  { %559 = vst.msk [vmem:[%s1392_s5 + $0x58] sm:$0xf] %vm536_vm0, %v526_v55  ;;  %v465_v3 = vmul.f32 %v816_v58, %v943_v5  ;;  %v627_v4 = vunpack.c.l.bf16 %v841_v52  ;;  %v691_v6 = vunpack.c.l.bf16 %v856_v53  ;;  %v755_v7 = vunpack.c.l.bf16 %v871_v54  ;;  %v858_v49 = vld [vmem:[%s1388_s1 + $0x78] sm:$0xff]  }
  0x50   :  { %v527_v8 = vpack.c.bf16 %v495_v60, %v495_v60  ;;  %v496_v9 = vadd.f32 %v464_v56, %v368_v61  ;;  %v241_v10 = vadd.f32 %v209_v62, %v113_v57  ;;  %v819_v11 = vunpack.c.l.bf16 %v886_v59  ;;  %v873_v50 = vld [vmem:[%s1389_s2 + $0x78] sm:$0xff]  }
  0x51   :  { %v114_v12 = vmul.f32 %v627_v4, %v922_v0  ;;  %v210_v13 = vmul.f32 %v691_v6, %v927_v1  ;;  %v338_v14 = vmul.f32 %v755_v7, %v932_v2  ;;  %v628_v15 = vunpack.c.h.bf16 %v841_v52  ;;  %v888_v55 = vld [vmem:[%s1390_s3 + $0x78] sm:$0xff]  }
  0x52   :  { %560 = vst.msk [vmem:[%s1392_s5 + $0x5c] sm:$0xf] %vm536_vm0, %v527_v8  ;;  %v528_v18 = vpack.c.bf16 %v496_v9, %v496_v9  ;;  %v369_v19 = vadd.f32 %v337_v63, %v241_v10  ;;  %v466_v20 = vmul.f32 %v819_v11, %v943_v5  ;;  %v692_v21 = vunpack.c.h.bf16 %v856_v53 }
  0x53   :  { %v242_v23 = vadd.f32 %v210_v13, %v114_v12  ;;  %v115_v24 = vmul.f32 %v628_v15, %v922_v0  ;;  %v756_v25 = vunpack.c.h.bf16 %v871_v54  ;;  %v820_v26 = vunpack.c.h.bf16 %v886_v59 }
  0x54   :  { %561 = vst.msk [vmem:[%s1392_s5 + $0x60] sm:$0xf] %vm536_vm0, %v528_v18  ;;  %v497_v27 = vadd.f32 %v465_v3, %v369_v19  ;;  %v211_v28 = vmul.f32 %v692_v21, %v927_v1  ;;  %v631_v29 = vunpack.c.l.bf16 %v842_v16  ;;  %v695_v30 = vunpack.c.l.bf16 %v857_v17 }
  0x55   :  { %v370_v32 = vadd.f32 %v338_v14, %v242_v23  ;;  %v339_v33 = vmul.f32 %v756_v25, %v932_v2  ;;  %v467_v34 = vmul.f32 %v820_v26, %v943_v5  ;;  %v759_v35 = vunpack.c.l.bf16 %v872_v22 }
  0x56   :  { %v529_v36 = vpack.c.bf16 %v497_v27, %v497_v27  ;;  %v243_v37 = vadd.f32 %v211_v28, %v115_v24  ;;  %v116_v38 = vmul.f32 %v631_v29, %v922_v0  ;;  %v212_v39 = vmul.f32 %v695_v30, %v927_v1 }
  0x57   :  { %v498_v40 = vadd.f32 %v466_v20, %v370_v32  ;;  %v340_v41 = vmul.f32 %v759_v35, %v932_v2  ;;  %v823_v42 = vunpack.c.l.bf16 %v887_v31  ;;  %v632_v43 = vunpack.c.h.bf16 %v842_v16 }
  0x58   :  { %562 = vst.msk [vmem:[%s1392_s5 + $0x64] sm:$0xf] %vm536_vm0, %v529_v36  ;;  %v371_v44 = vadd.f32 %v339_v33, %v243_v37  ;;  %v244_v45 = vadd.f32 %v212_v39, %v116_v38  ;;  %v696_v46 = vunpack.c.h.bf16 %v857_v17  ;;  %v760_v47 = vunpack.c.h.bf16 %v872_v22 }
  0x59   :  { %v530_v51 = vpack.c.bf16 %v498_v40, %v498_v40  ;;  %v468_v52 = vmul.f32 %v823_v42, %v943_v5  ;;  %v117_v53 = vmul.f32 %v632_v43, %v922_v0  ;;  %v824_v54 = vunpack.c.h.bf16 %v887_v31 }
  0x5a   :  { %v499_v56 = vadd.f32 %v467_v34, %v371_v44  ;;  %v372_v57 = vadd.f32 %v340_v41, %v244_v45  ;;  %v213_v58 = vmul.f32 %v696_v46, %v927_v1  ;;  %v341_v59 = vmul.f32 %v760_v47, %v932_v2 }
  0x5b   :  { %563 = vst.msk [vmem:[%s1392_s5 + $0x68] sm:$0xf] %vm536_vm0, %v530_v51  ;;  %v469_v60 = vmul.f32 %v824_v54, %v943_v5  ;;  %v635_v61 = vunpack.c.l.bf16 %v843_v48  ;;  %v699_v62 = vunpack.c.l.bf16 %v858_v49  ;;  %v763_v63 = vunpack.c.l.bf16 %v873_v50 }
  0x5c   :  { %v531_v3 = vpack.c.bf16 %v499_v56, %v499_v56  ;;  %v500_v4 = vadd.f32 %v468_v52, %v372_v57  ;;  %v245_v6 = vadd.f32 %v213_v58, %v117_v53  ;;  %v827_v7 = vunpack.c.l.bf16 %v888_v55 }
  0x5d   :  { %v118_v8 = vmul.f32 %v635_v61, %v922_v0  ;;  %v214_v9 = vmul.f32 %v699_v62, %v927_v1  ;;  %v342_v10 = vmul.f32 %v763_v63, %v932_v2  ;;  %v636_v11 = vunpack.c.h.bf16 %v843_v48 }
  0x5e   :  { %564 = vst.msk [vmem:[%s1392_s5 + $0x6c] sm:$0xf] %vm536_vm0, %v531_v3  ;;  %v532_v12 = vpack.c.bf16 %v500_v4, %v500_v4  ;;  %v373_v13 = vadd.f32 %v341_v59, %v245_v6  ;;  %v470_v14 = vmul.f32 %v827_v7, %v943_v5  ;;  %v700_v15 = vunpack.c.h.bf16 %v858_v49 }
  0x5f   :  { %v246_v16 = vadd.f32 %v214_v9, %v118_v8  ;;  %v119_v17 = vmul.f32 %v636_v11, %v922_v0  ;;  %v764_v18 = vunpack.c.h.bf16 %v873_v50  ;;  %v828_v19 = vunpack.c.h.bf16 %v888_v55 }
  0x60   :  { %565 = vst.msk [vmem:[%s1392_s5 + $0x70] sm:$0xf] %vm536_vm0, %v532_v12  ;;  %v501_v20 = vadd.f32 %v469_v60, %v373_v13  ;;  %v215_v21 = vmul.f32 %v700_v15, %v927_v1 }
  0x61   :  { %v374_v22 = vadd.f32 %v342_v10, %v246_v16  ;;  %v343_v23 = vmul.f32 %v764_v18, %v932_v2  ;;  %v471_v26 = vmul.f32 %v828_v19, %v943_v5 }
  0x62   :  { %v533_v24 = vpack.c.bf16 %v501_v20, %v501_v20  ;;  %v247_v25 = vadd.f32 %v215_v21, %v119_v17 }
  0x63   :  { %v502_v27 = vadd.f32 %v470_v14, %v374_v22 }
  0x64   :  { %566 = vst.msk [vmem:[%s1392_s5 + $0x74] sm:$0xf] %vm536_vm0, %v533_v24  ;;  %v375_v0 = vadd.f32 %v343_v23, %v247_v25 }
  0x65   :  { %v534_v28 = vpack.c.bf16 %v502_v27, %v502_v27 }
  0x66   :  { %v503_v29 = vadd.f32 %v471_v26, %v375_v0 }
  0x67   :  { %567 = vst.msk [vmem:[%s1392_s5 + $0x78] sm:$0xf] %vm536_vm0, %v534_v28 }
  0x68   :  { %v535_v1 = vpack.c.bf16 %v503_v29, %v503_v29 }
  0x6a   :  { %568 = vst.msk [vmem:[%s1392_s5 + $0x7c] sm:$0xf] %vm536_vm0, %v535_v1 }

// kernel: d_forward.19
= control target key start
LH: loop header
LB: loop body
LE: loop exit
PB: predicated region body
PF: predicated region fallthrough
CT: control target
= control target key end

     0   :  { %v410_v0 = vmov 0   ;;  %vm236_vm0 = vcmask 130048   ;;  %s528_s1 = inlined_call_operand.vmem [shape: bf16[400,128], index: 1, kind: input, shape index: {}]   ;;  %s529_s0 = inlined_call_operand.vmem [shape: bf16[8,400], index: 0, kind: input, shape index: {}]   ;;  %s530_s2 = inlined_call_operand.vmem [shape: f32[8,1], index: 2, kind: input, shape index: {}]   ;;  %s531_s3 = inlined_call_operand.vmem [shape: bf16[8,128], index: 3, kind: output, shape index: {}]  }
   0x1   :  { %280 = vmatprep.subr.bf16.mxu1 %v410_v0  ;;  %v381_v1 = vld [vmem:[%s528_s1 + $0x40] sm:$0xff]   ;;  %380 = vset.pattern.permute.xlu0 %v410_v0  ;;  %v384_v4 = vld [vmem:[%s528_s1 + $0x48] sm:$0xff]   ;;  %v387_v7 = vld [vmem:[%s528_s1 + $0x50] sm:$0xff]  }
   0x2   :  { %v382_v2 = vld [vmem:[%s528_s1 + $0x80] sm:$0xff]   ;;  %357 = vmatprep.subr.bf16.mxu0 %v381_v1  ;;  %v385_v5 = vld [vmem:[%s528_s1 + $0x88] sm:$0xff]   ;;  %v388_v8 = vld [vmem:[%s528_s1 + $0x90] sm:$0xff]  }
   0x3   :  { %v383_v3 = vld [vmem:[%s528_s1] sm:$0xff]   ;;  %281 = vmatpush1.bf16.msra.mxu1 %v382_v2  ;;  %v386_v6 = vld [vmem:[%s528_s1 + $0x8] sm:$0xff]   ;;  %v389_v9 = vld [vmem:[%s528_s1 + $0x10] sm:$0xff]  }
   0x4   :  { %358 = vmatpush3.bf16.msra.mxu0 %v383_v3  ;;  %282 = vmatprep.subr.bf16.mxu1 %v410_v0  ;;  %v390_v10 = vld [vmem:[%s528_s1 + $0x58] sm:$0xff]   ;;  %v393_v13 = vld [vmem:[%s528_s1 + $0x60] sm:$0xff]   ;;  %v396_v16 = vld [vmem:[%s528_s1 + $0x68] sm:$0xff]  }
   0x5   :  { %359 = vmatprep.subr.bf16.mxu0 %v384_v4  ;;  %v391_v11 = vld [vmem:[%s528_s1 + $0x98] sm:$0xff]   ;;  %v394_v14 = vld [vmem:[%s528_s1 + $0xa0] sm:$0xff]   ;;  %v397_v17 = vld [vmem:[%s528_s1 + $0xa8] sm:$0xff]  }
   0x6   :  { %v392_v12 = vld [vmem:[%s528_s1 + $0x18] sm:$0xff]   ;;  %v395_v15 = vld [vmem:[%s528_s1 + $0x20] sm:$0xff]   ;;  %v398_v18 = vld [vmem:[%s528_s1 + $0x28] sm:$0xff]  }
   0x7   :  { %283 = vmatpush1.bf16.msra.mxu1 %v385_v5  ;;  %v399_v19 = vld [vmem:[%s528_s1 + $0x70] sm:$0xff]   ;;  %v15_v22 = vld [vmem:[%s529_s0] sm:$0xff]  ;;  %v402_v23 = vld [vmem:[%s528_s1 + $0x78] sm:$0xff]  }
   0x8   :  { %360 = vmatpush3.bf16.msra.mxu0 %v386_v6  ;;  %284 = vmatprep.subr.bf16.mxu1 %v410_v0  ;;  %v400_v20 = vld [vmem:[%s528_s1 + $0xb0] sm:$0xff]   ;;  %v328_v24 = vcombine.high %v15_v22, %v15_v22  ;;  %v16_v25 = vld [vmem:[%s529_s0 + $0x8] sm:$0xff]  ;;  %v67_v26 = vld [vmem:[%s530_s2] sm:$0xff]  ;;  %v327_v30 = vcombine.low %v15_v22, %v15_v22 }
   0x9   :  { %361 = vmatprep.subr.bf16.mxu0 %v387_v7  ;;  %v401_v21 = vld [vmem:[%s528_s1 + $0x30] sm:$0xff]   ;;  %v330_v27 = vcombine.high %v16_v25, %v16_v25  ;;  %70 = vperm.xlu0 %380, %v67_v26   ;;  %v403_v28 = vld [vmem:[%s528_s1 + $0xb8] sm:$0xff]   ;;  %v407_v31 = vld [vmem:[%s528_s1 + $0xc0] sm:$0xff]   ;;  %v329_v32 = vcombine.low %v16_v25, %v16_v25 }
   0xa   :  { %272 = vmatprep.mubr.bf16.mxu0 %v328_v24  ;;  %v404_v29 = vld [vmem:[%s528_s1 + $0x38] sm:$0xff]  }
   0xb   :  { %285 = vmatpush1.bf16.msra.mxu1 %v388_v8  ;;  %356 = vmatprep.mubr.msk.bf16.mxu1 %vm236_vm0, %v330_v27 }
   0xc   :  { %362 = vmatpush3.bf16.msra.mxu0 %v389_v9  ;;  %286 = vmatprep.subr.bf16.mxu1 %v410_v0 }
   0xd   :  { %363 = vmatprep.subr.bf16.mxu0 %v390_v10 }
   0xf   :  { %287 = vmatpush1.bf16.msra.mxu1 %v391_v11 }
  0x10   :  { %364 = vmatpush3.bf16.msra.mxu0 %v392_v12  ;;  %288 = vmatprep.subr.bf16.mxu1 %v410_v0 }
  0x11   :  { %365 = vmatprep.subr.bf16.mxu0 %v393_v13 }
  0x13   :  { %289 = vmatpush1.bf16.msra.mxu1 %v394_v14 }
  0x14   :  { %366 = vmatpush3.bf16.msra.mxu0 %v395_v15  ;;  %290 = vmatprep.subr.bf16.mxu1 %v410_v0 }
  0x15   :  { %367 = vmatprep.subr.bf16.mxu0 %v396_v16 }
  0x17   :  { %291 = vmatpush1.bf16.msra.mxu1 %v397_v17 }
  0x18   :  { %368 = vmatpush3.bf16.msra.mxu0 %v398_v18  ;;  %292 = vmatprep.subr.bf16.mxu1 %v410_v0 }
  0x19   :  { %369 = vmatprep.subr.bf16.mxu0 %v399_v19 }
  0x1b   :  { %293 = vmatpush1.bf16.msra.mxu1 %v400_v20 }
  0x1c   :  { %370 = vmatpush3.bf16.msra.mxu0 %v401_v21  ;;  %294 = vmatprep.subr.bf16.mxu1 %v410_v0 }
  0x1d   :  { %371 = vmatprep.subr.bf16.mxu0 %v402_v23 }
  0x1f   :  { %295 = vmatpush1.bf16.msra.mxu1 %v403_v28 }
  0x20   :  { %372 = vmatpush3.bf16.msra.mxu0 %v404_v29  ;;  %296 = vmatprep.subr.bf16.mxu1 %v410_v0 }
  0x23   :  { %273 = vmatmul.mubr.bf16.vlgmr.msra.gmra.mrb[0].mxu0 %v327_v30  ;;  %297 = vmatpush1.bf16.msra.mxu1 %v407_v31 }
  0x26   :  { %313 = vmatmul.mubr.bf16.vlgmr.msra.gmra.mrb[0].mxu1 %v329_v32 }
  0x88   :  { %v71_v35 = vpop.permute.xlu0 %70 }
  0xf6   :  { %v373_v33 = vpop.f32.mrb[0].mxu0 }
  0xf7   :  { %v374_v34 = vpop.f32.mrb[1].mxu0 }
  0xf8   :  { %v375_v36 = vadd.f32 %v374_v34, %v373_v33  ;;  %v376_v37 = vpop.f32.mrb[2].mxu0 }
  0xf9   :  { %v377_v38 = vpop.f32.mrb[3].mxu0  ;;  %v314_v39 = vpop.f32.mrb[0].mxu1 }
  0xfa   :  { %v275_v40 = vadd.f32 %v375_v36, %v71_v35  ;;  %v316_v41 = vpop.f32.mrb[1].mxu1 }
  0xfb   :  { %v317_v42 = vpop.f32.mrb[2].mxu1 }
  0xfc   :  { %v315_v43 = vadd.f32 %v314_v39, %v275_v40  ;;  %v318_v44 = vpop.f32.mrb[3].mxu1 }
  0xfe   :  { %v320_v45 = vmax.f32 %v315_v43, 0.0 }
 0x100   :  { %v321_v46 = vpack.c.bf16 %v320_v45, %v320_v45 }
 0x102   :  { %322 = vst [vmem:[%s531_s3] sm:$0xf] %v321_v46 }

// kernel: d_forward.20
= control target key start
LH: loop header
LB: loop body
LE: loop exit
PB: predicated region body
PF: predicated region fallthrough
CT: control target
= control target key end

     0   :  { %v409_v0 = vmov 0   ;;  %vm236_vm0 = vcmask 130048   ;;  %s527_s1 = inlined_call_operand.vmem [shape: bf16[400,128], index: 1, kind: input, shape index: {}]   ;;  %s528_s0 = inlined_call_operand.vmem [shape: bf16[8,400], index: 0, kind: input, shape index: {}]   ;;  %s529_s2 = inlined_call_operand.vmem [shape: f32[8,1], index: 2, kind: input, shape index: {}]   ;;  %s530_s3 = inlined_call_operand.vmem [shape: bf16[8,128], index: 3, kind: output, shape index: {}]  }
   0x1   :  { %280 = vmatprep.subr.bf16.mxu1 %v409_v0  ;;  %v380_v1 = vld [vmem:[%s527_s1 + $0x40] sm:$0xff]   ;;  %379 = vset.pattern.permute.xlu0 %v409_v0  ;;  %v383_v4 = vld [vmem:[%s527_s1 + $0x48] sm:$0xff]   ;;  %v386_v7 = vld [vmem:[%s527_s1 + $0x50] sm:$0xff]  }
   0x2   :  { %v381_v2 = vld [vmem:[%s527_s1 + $0x80] sm:$0xff]   ;;  %356 = vmatprep.subr.bf16.mxu0 %v380_v1  ;;  %v384_v5 = vld [vmem:[%s527_s1 + $0x88] sm:$0xff]   ;;  %v387_v8 = vld [vmem:[%s527_s1 + $0x90] sm:$0xff]  }
   0x3   :  { %v382_v3 = vld [vmem:[%s527_s1] sm:$0xff]   ;;  %281 = vmatpush1.bf16.msra.mxu1 %v381_v2  ;;  %v385_v6 = vld [vmem:[%s527_s1 + $0x8] sm:$0xff]   ;;  %v388_v9 = vld [vmem:[%s527_s1 + $0x10] sm:$0xff]  }
   0x4   :  { %357 = vmatpush3.bf16.msra.mxu0 %v382_v3  ;;  %282 = vmatprep.subr.bf16.mxu1 %v409_v0  ;;  %v389_v10 = vld [vmem:[%s527_s1 + $0x58] sm:$0xff]   ;;  %v392_v13 = vld [vmem:[%s527_s1 + $0x60] sm:$0xff]   ;;  %v395_v16 = vld [vmem:[%s527_s1 + $0x68] sm:$0xff]  }
   0x5   :  { %358 = vmatprep.subr.bf16.mxu0 %v383_v4  ;;  %v390_v11 = vld [vmem:[%s527_s1 + $0x98] sm:$0xff]   ;;  %v393_v14 = vld [vmem:[%s527_s1 + $0xa0] sm:$0xff]   ;;  %v396_v17 = vld [vmem:[%s527_s1 + $0xa8] sm:$0xff]  }
   0x6   :  { %v391_v12 = vld [vmem:[%s527_s1 + $0x18] sm:$0xff]   ;;  %v394_v15 = vld [vmem:[%s527_s1 + $0x20] sm:$0xff]   ;;  %v397_v18 = vld [vmem:[%s527_s1 + $0x28] sm:$0xff]  }
   0x7   :  { %283 = vmatpush1.bf16.msra.mxu1 %v384_v5  ;;  %v398_v19 = vld [vmem:[%s527_s1 + $0x70] sm:$0xff]   ;;  %v15_v22 = vld [vmem:[%s528_s0] sm:$0xff]  ;;  %v401_v23 = vld [vmem:[%s527_s1 + $0x78] sm:$0xff]  }
   0x8   :  { %359 = vmatpush3.bf16.msra.mxu0 %v385_v6  ;;  %284 = vmatprep.subr.bf16.mxu1 %v409_v0  ;;  %v399_v20 = vld [vmem:[%s527_s1 + $0xb0] sm:$0xff]   ;;  %v327_v24 = vcombine.high %v15_v22, %v15_v22  ;;  %v16_v25 = vld [vmem:[%s528_s0 + $0x8] sm:$0xff]  ;;  %v67_v26 = vld [vmem:[%s529_s2] sm:$0xff]  ;;  %v326_v30 = vcombine.low %v15_v22, %v15_v22 }
   0x9   :  { %360 = vmatprep.subr.bf16.mxu0 %v386_v7  ;;  %v400_v21 = vld [vmem:[%s527_s1 + $0x30] sm:$0xff]   ;;  %v329_v27 = vcombine.high %v16_v25, %v16_v25  ;;  %70 = vperm.xlu0 %379, %v67_v26   ;;  %v402_v28 = vld [vmem:[%s527_s1 + $0xb8] sm:$0xff]   ;;  %v406_v31 = vld [vmem:[%s527_s1 + $0xc0] sm:$0xff]   ;;  %v328_v32 = vcombine.low %v16_v25, %v16_v25 }
   0xa   :  { %272 = vmatprep.mubr.bf16.mxu0 %v327_v24  ;;  %v403_v29 = vld [vmem:[%s527_s1 + $0x38] sm:$0xff]  }
   0xb   :  { %285 = vmatpush1.bf16.msra.mxu1 %v387_v8  ;;  %355 = vmatprep.mubr.msk.bf16.mxu1 %vm236_vm0, %v329_v27 }
   0xc   :  { %361 = vmatpush3.bf16.msra.mxu0 %v388_v9  ;;  %286 = vmatprep.subr.bf16.mxu1 %v409_v0 }
   0xd   :  { %362 = vmatprep.subr.bf16.mxu0 %v389_v10 }
   0xf   :  { %287 = vmatpush1.bf16.msra.mxu1 %v390_v11 }
  0x10   :  { %363 = vmatpush3.bf16.msra.mxu0 %v391_v12  ;;  %288 = vmatprep.subr.bf16.mxu1 %v409_v0 }
  0x11   :  { %364 = vmatprep.subr.bf16.mxu0 %v392_v13 }
  0x13   :  { %289 = vmatpush1.bf16.msra.mxu1 %v393_v14 }
  0x14   :  { %365 = vmatpush3.bf16.msra.mxu0 %v394_v15  ;;  %290 = vmatprep.subr.bf16.mxu1 %v409_v0 }
  0x15   :  { %366 = vmatprep.subr.bf16.mxu0 %v395_v16 }
  0x17   :  { %291 = vmatpush1.bf16.msra.mxu1 %v396_v17 }
  0x18   :  { %367 = vmatpush3.bf16.msra.mxu0 %v397_v18  ;;  %292 = vmatprep.subr.bf16.mxu1 %v409_v0 }
  0x19   :  { %368 = vmatprep.subr.bf16.mxu0 %v398_v19 }
  0x1b   :  { %293 = vmatpush1.bf16.msra.mxu1 %v399_v20 }
  0x1c   :  { %369 = vmatpush3.bf16.msra.mxu0 %v400_v21  ;;  %294 = vmatprep.subr.bf16.mxu1 %v409_v0 }
  0x1d   :  { %370 = vmatprep.subr.bf16.mxu0 %v401_v23 }
  0x1f   :  { %295 = vmatpush1.bf16.msra.mxu1 %v402_v28 }
  0x20   :  { %371 = vmatpush3.bf16.msra.mxu0 %v403_v29  ;;  %296 = vmatprep.subr.bf16.mxu1 %v409_v0 }
  0x23   :  { %273 = vmatmul.mubr.bf16.vlgmr.msra.gmra.mrb[0].mxu0 %v326_v30  ;;  %297 = vmatpush1.bf16.msra.mxu1 %v406_v31 }
  0x26   :  { %313 = vmatmul.mubr.bf16.vlgmr.msra.gmra.mrb[0].mxu1 %v328_v32 }
  0x88   :  { %v71_v35 = vpop.permute.xlu0 %70 }
  0xf6   :  { %v372_v33 = vpop.f32.mrb[0].mxu0 }
  0xf7   :  { %v373_v34 = vpop.f32.mrb[1].mxu0 }
  0xf8   :  { %v374_v36 = vadd.f32 %v373_v34, %v372_v33  ;;  %v375_v37 = vpop.f32.mrb[2].mxu0 }
  0xf9   :  { %v376_v38 = vpop.f32.mrb[3].mxu0  ;;  %v314_v39 = vpop.f32.mrb[0].mxu1 }
  0xfa   :  { %v275_v40 = vadd.f32 %v374_v36, %v71_v35  ;;  %v316_v41 = vpop.f32.mrb[1].mxu1 }
  0xfb   :  { %v317_v42 = vpop.f32.mrb[2].mxu1 }
  0xfc   :  { %v315_v43 = vadd.f32 %v314_v39, %v275_v40  ;;  %v318_v44 = vpop.f32.mrb[3].mxu1 }
  0xfe   :  { %v320_v45 = vpack.c.bf16 %v315_v43, %v315_v43 }
 0x100   :  { %321 = vst [vmem:[%s530_s3] sm:$0xf] %v320_v45 }

// kernel: d_forward.21
= control target key start
LH: loop header
LB: loop body
LE: loop exit
PB: predicated region body
PF: predicated region fallthrough
CT: control target
= control target key end

     0   :  { %v154_v0 = vmov 0.0   ;;  %vm155_vm0 = vmmov 0   ;;  %v156_v2 = vmov 0   ;;  %vm65_vm1 = vcmask 1043456   ;;  %s209_s1 = inlined_call_operand.vmem [shape: bf16[72,128], index: 1, kind: input, shape index: {}]   ;;  %s210_s2 = inlined_call_operand.vmem [shape: f32[8,1], index: 2, kind: input, shape index: {}]   ;;  %s211_s0 = inlined_call_operand.vmem [shape: bf16[8,72], index: 0, kind: input, shape index: {}]   ;;  %s212_s3 = inlined_call_operand.vmem [shape: bf16[8,128], index: 3, kind: input, shape index: {}]   ;;  %s213_s4 = inlined_call_operand.vmem [shape: bf16[8,128], index: 4, kind: output, shape index: {}]  }
   0x1   :  { %131 = vmatprep.subr.bf16.mxu0 %v154_v0  ;;  %v149_v1 = vld [vmem:[%s209_s1] sm:$0xff]   ;;  %141 = vmatprep.mubr.msk.bf16.mxu0 %vm155_vm0, %v154_v0  ;;  %v150_v3 = vld [vmem:[%s209_s1 + $0x8] sm:$0xff]   ;;  %v151_v5 = vld [vmem:[%s209_s1 + $0x10] sm:$0xff]   ;;  %vm61_vm2 = vcmask 588800  }
   0x2   :  { %148 = vset.pattern.permute.xlu0 %v156_v2  ;;  %132 = vmatpush3.bf16.msra.mxu0 %v149_v1  ;;  %v28_v4 = vld [vmem:[%s210_s2] sm:$0xff]  ;;  %v152_v6 = vld [vmem:[%s209_s1 + $0x18] sm:$0xff]  }
   0x3   :  { %133 = vmatprep.subr.bf16.mxu0 %v154_v0  ;;  %31 = vperm.xlu0 %148, %v28_v4   ;;  %v153_v7 = vld [vmem:[%s209_s1 + $0x20] ss:$0 sps:$4 sm:$0xff]  }
   0x4   :  { %v67_v8 = vsel %vm65_vm1, %v153_v7, 0  ;;  %v18_v9 = vld [vmem:[%s211_s0] sm:$0xf] }
   0x5   :  { %v109_v10 = vld [vmem:[%s212_s3] sm:$0xf] }
   0x6   :  { %134 = vmatpush3.bf16.msra.mxu0 %v150_v3  ;;  %v110_v12 = vunpack.c.l.bf16 %v109_v10 }
   0x7   :  { %135 = vmatprep.subr.bf16.mxu0 %v154_v0 }
   0xa   :  { %136 = vmatpush3.bf16.msra.mxu0 %v151_v5 }
   0xb   :  { %137 = vmatprep.subr.bf16.mxu0 %v154_v0 }
   0xe   :  { %138 = vmatpush3.bf16.msra.mxu0 %v152_v6 }
   0xf   :  { %139 = vmatprep.subr.bf16.mxu0 %v154_v0 }
  0x12   :  { %140 = vmatpush3.bf16.msra.mxu0 %v67_v8 }
  0x15   :  { %142 = vmatmul.mubr.msk.bf16.vlgmr.msra.gmra.mrb[0].mxu0 %vm61_vm2, %v18_v9 }
  0x82   :  { %v32_v11 = vpop.permute.xlu0 %31 }
  0xe8   :  { %v103_v13 = vpop.f32.mrb[0].mxu0 }
  0xe9   :  { %v104_v14 = vadd.f32 %v103_v13, %v32_v11  ;;  %v143_v15 = vpop.f32.mrb[1].mxu0 }
  0xea   :  { %v106_v16 = vpop.f32.mrb[2].mxu0 }
  0xeb   :  { %v111_v17 = vadd.f32 %v110_v12, %v104_v14  ;;  %v144_v18 = vpop.f32.mrb[3].mxu0 }
  0xed   :  { %v112_v19 = vmax.f32 %v111_v17, 0.0 }
  0xef   :  { %v113_v20 = vpack.c.bf16 %v112_v19, %v112_v19 }
  0xf1   :  { %114 = vst [vmem:[%s213_s4] sm:$0xf] %v113_v20 }

// kernel: d_forward.22
= control target key start
LH: loop header
LB: loop body
LE: loop exit
PB: predicated region body
PF: predicated region fallthrough
CT: control target
= control target key end

     0   :  { %vm636_vm0 = vcmask 125952   ;;  %s1571_s0 = inlined_call_operand.vmem [shape: bf16[16,16,16], index: 0, kind: input, shape index: {}]   ;;  %s1572_s1 = inlined_call_operand.vmem [shape: bf16[16,16,16], index: 1, kind: input, shape index: {}]   ;;  %s1573_s2 = inlined_call_operand.vmem [shape: bf16[16,16,16], index: 2, kind: input, shape index: {}]   ;;  %s1574_s3 = inlined_call_operand.vmem [shape: bf16[16,16,16], index: 3, kind: input, shape index: {}]   ;;  %s1575_s4 = inlined_call_operand.vmem [shape: f32[4,16,16], index: 4, kind: input, shape index: {}]   ;;  %s1576_s5 = inlined_call_operand.vmem [shape: bf16[16,16,16], index: 5, kind: output, shape index: {}]  }
   0x1   :  { %v1086_v0 = vld [vmem:[%s1575_s4] sm:$0xff]  ;;  %v1091_v1 = vld [vmem:[%s1575_s4 + $0x10] sm:$0xff]  ;;  %v1118_v10 = vld [vmem:[%s1575_s4 + $0x8] sm:$0xff] }
   0x2   :  { %v1096_v2 = vld [vmem:[%s1575_s4 + $0x20] sm:$0xff]  ;;  %v1101_v3 = vld [vmem:[%s1575_s4 + $0x30] sm:$0xff]  ;;  %v1123_v15 = vld [vmem:[%s1575_s4 + $0x18] sm:$0xff] }
   0x3   :  { %v738_v4 = vld [vmem:[%s1571_s0] sm:$0xff]   ;;  %v1128_v16 = vld [vmem:[%s1575_s4 + $0x28] sm:$0xff]  ;;  %v1133_v17 = vld [vmem:[%s1575_s4 + $0x38] sm:$0xff] }
   0x4   :  { %v802_v5 = vld [vmem:[%s1572_s1] sm:$0xff]   ;;  %v739_v6 = vunpack.c.l.bf16 %v738_v4  ;;  %v740_v11 = vunpack.c.h.bf16 %v738_v4  ;;  %v993_v24 = vld [vmem:[%s1571_s0 + $0x8] sm:$0xff]   ;;  %v994_v44 = vld [vmem:[%s1571_s0 + $0x10] sm:$0xff]  }
   0x5   :  { %v803_v7 = vunpack.c.l.bf16 %v802_v5  ;;  %v866_v8 = vld [vmem:[%s1573_s2] sm:$0xff]   ;;  %v804_v12 = vunpack.c.h.bf16 %v802_v5  ;;  %v1008_v25 = vld [vmem:[%s1572_s1 + $0x8] sm:$0xff]   ;;  %v743_v34 = vunpack.c.l.bf16 %v993_v24  ;;  %v744_v38 = vunpack.c.h.bf16 %v993_v24  ;;  %v1009_v45 = vld [vmem:[%s1572_s1 + $0x10] sm:$0xff]  }
   0x6   :  { %v930_v9 = vld [vmem:[%s1574_s3] sm:$0xff]   ;;  %v867_v13 = vunpack.c.l.bf16 %v866_v8  ;;  %v868_v18 = vunpack.c.h.bf16 %v866_v8  ;;  %v92_v20 = vmul.f32 %v739_v6, %v1086_v0  ;;  %v93_v22 = vmul.f32 %v740_v11, %v1118_v10  ;;  %v1023_v26 = vld [vmem:[%s1573_s2 + $0x8] sm:$0xff]   ;;  %v1024_v54 = vld [vmem:[%s1573_s2 + $0x10] sm:$0xff]  }
   0x7   :  { %v931_v14 = vunpack.c.l.bf16 %v930_v9  ;;  %v932_v19 = vunpack.c.h.bf16 %v930_v9  ;;  %v188_v21 = vmul.f32 %v803_v7, %v1091_v1  ;;  %v189_v23 = vmul.f32 %v804_v12, %v1123_v15  ;;  %v1038_v31 = vld [vmem:[%s1574_s3 + $0x8] sm:$0xff]   ;;  %v1039_v59 = vld [vmem:[%s1574_s3 + $0x10] sm:$0xff]  }
   0x8   :  { %v316_v27 = vmul.f32 %v867_v13, %v1096_v2  ;;  %v317_v29 = vmul.f32 %v868_v18, %v1128_v16  ;;  %v807_v35 = vunpack.c.l.bf16 %v1008_v25  ;;  %v871_v36 = vunpack.c.l.bf16 %v1023_v26 }
   0x9   :  { %v444_v28 = vmul.f32 %v931_v14, %v1101_v3  ;;  %v445_v30 = vmul.f32 %v932_v19, %v1133_v17  ;;  %v220_v32 = vadd.f32 %v188_v21, %v92_v20  ;;  %v221_v33 = vadd.f32 %v189_v23, %v93_v22  ;;  %v995_v20 = vld [vmem:[%s1571_s0 + $0x18] sm:$0xff]  }
   0xa   :  { %v935_v37 = vunpack.c.l.bf16 %v1038_v31  ;;  %v808_v39 = vunpack.c.h.bf16 %v1008_v25  ;;  %v94_v42 = vmul.f32 %v743_v34, %v1086_v0  ;;  %v190_v43 = vmul.f32 %v807_v35, %v1091_v1  ;;  %v1010_v21 = vld [vmem:[%s1572_s1 + $0x18] sm:$0xff]  }
   0xb   :  { %v348_v40 = vadd.f32 %v316_v27, %v220_v32  ;;  %v349_v41 = vadd.f32 %v317_v29, %v221_v33  ;;  %v318_v46 = vmul.f32 %v871_v36, %v1096_v2  ;;  %v95_v48 = vmul.f32 %v744_v38, %v1118_v10  ;;  %v1025_v22 = vld [vmem:[%s1573_s2 + $0x18] sm:$0xff]  }
   0xc   :  { %v446_v47 = vmul.f32 %v935_v37, %v1101_v3  ;;  %v191_v49 = vmul.f32 %v808_v39, %v1123_v15  ;;  %v222_v52 = vadd.f32 %v190_v43, %v94_v42  ;;  %v872_v53 = vunpack.c.h.bf16 %v1023_v26  ;;  %v1040_v27 = vld [vmem:[%s1574_s3 + $0x18] sm:$0xff]  }
   0xd   :  { %v476_v50 = vadd.f32 %v444_v28, %v348_v40  ;;  %v477_v51 = vadd.f32 %v445_v30, %v349_v41  ;;  %v936_v56 = vunpack.c.h.bf16 %v1038_v31  ;;  %v747_v57 = vunpack.c.l.bf16 %v994_v44 }
   0xe   :  { %v223_v55 = vadd.f32 %v191_v49, %v95_v48  ;;  %v811_v58 = vunpack.c.l.bf16 %v1009_v45  ;;  %v350_v62 = vadd.f32 %v318_v46, %v222_v52  ;;  %v319_v63 = vmul.f32 %v872_v53, %v1128_v16 }
   0xf   :  { %v705_v60 = vpack.c.bf16 %v476_v50, %v476_v50  ;;  %v706_v61 = vpack.c.bf16 %v477_v51, %v477_v51  ;;  %v447_v4 = vmul.f32 %v936_v56, %v1133_v17  ;;  %v96_v5 = vmul.f32 %v747_v57, %v1086_v0  ;;  %v1026_v50 = vld [vmem:[%s1573_s2 + $0x20] sm:$0xff]  }
  0x10   :  { %v192_v6 = vmul.f32 %v811_v58, %v1091_v1  ;;  %v875_v7 = vunpack.c.l.bf16 %v1024_v54  ;;  %v478_v8 = vadd.f32 %v446_v47, %v350_v62  ;;  %v351_v9 = vadd.f32 %v319_v63, %v223_v55 }
  0x11   :  { %637 = vst.msk [vmem:[%s1576_s5] sm:$0xf] %vm636_vm0, %v705_v60  ;;  %638 = vst.msk [vmem:[%s1576_s5 + $0x4] sm:$0xf] %vm636_vm0, %v706_v61  ;;  %v939_v11 = vunpack.c.l.bf16 %v1039_v59  ;;  %v748_v12 = vunpack.c.h.bf16 %v994_v44  ;;  %v812_v18 = vunpack.c.h.bf16 %v1009_v45  ;;  %v876_v19 = vunpack.c.h.bf16 %v1024_v54  ;;  %v996_v44 = vld [vmem:[%s1571_s0 + $0x20] sm:$0xff]  }
  0x12   :  { %v224_v13 = vadd.f32 %v192_v6, %v96_v5  ;;  %v320_v14 = vmul.f32 %v875_v7, %v1096_v2  ;;  %v707_v23 = vpack.c.bf16 %v478_v8, %v478_v8  ;;  %v479_v24 = vadd.f32 %v447_v4, %v351_v9  ;;  %v1011_v45 = vld [vmem:[%s1572_s1 + $0x20] sm:$0xff]  }
  0x13   :  { %v448_v25 = vmul.f32 %v939_v11, %v1101_v3  ;;  %v97_v26 = vmul.f32 %v748_v12, %v1118_v10  ;;  %v193_v29 = vmul.f32 %v812_v18, %v1123_v15  ;;  %v321_v30 = vmul.f32 %v876_v19, %v1128_v16 }
  0x14   :  { %v352_v28 = vadd.f32 %v320_v14, %v224_v13  ;;  %v940_v31 = vunpack.c.h.bf16 %v1039_v59  ;;  %639 = vst.msk [vmem:[%s1576_s5 + $0x8] sm:$0xf] %vm636_vm0, %v707_v23  ;;  %v708_v32 = vpack.c.bf16 %v479_v24, %v479_v24  ;;  %v751_v33 = vunpack.c.l.bf16 %v995_v20  ;;  %v1041_v59 = vld [vmem:[%s1574_s3 + $0x20] sm:$0xff]  }
  0x15   :  { %v815_v34 = vunpack.c.l.bf16 %v1010_v21  ;;  %v879_v35 = vunpack.c.l.bf16 %v1025_v22  ;;  %v225_v37 = vadd.f32 %v193_v29, %v97_v26  ;;  %v943_v39 = vunpack.c.l.bf16 %v1040_v27 }
  0x16   :  { %v480_v36 = vadd.f32 %v448_v25, %v352_v28  ;;  %v449_v38 = vmul.f32 %v940_v31, %v1133_v17  ;;  %640 = vst.msk [vmem:[%s1576_s5 + $0xc] sm:$0xf] %vm636_vm0, %v708_v32  ;;  %v98_v40 = vmul.f32 %v751_v33, %v1086_v0  ;;  %v752_v43 = vunpack.c.h.bf16 %v995_v20  ;;  %v997_v20 = vld [vmem:[%s1571_s0 + $0x28] sm:$0xff]  }
  0x17   :  { %v194_v41 = vmul.f32 %v815_v34, %v1091_v1  ;;  %v322_v42 = vmul.f32 %v879_v35, %v1096_v2  ;;  %v353_v47 = vadd.f32 %v321_v30, %v225_v37  ;;  %v450_v48 = vmul.f32 %v943_v39, %v1101_v3 }
  0x18   :  { %v709_v46 = vpack.c.bf16 %v480_v36, %v480_v36  ;;  %v816_v49 = vunpack.c.h.bf16 %v1010_v21  ;;  %v99_v52 = vmul.f32 %v752_v43, %v1118_v10  ;;  %v880_v53 = vunpack.c.h.bf16 %v1025_v22  ;;  %v1012_v21 = vld [vmem:[%s1572_s1 + $0x28] sm:$0xff]  }
  0x19   :  { %v226_v51 = vadd.f32 %v194_v41, %v98_v40  ;;  %v944_v54 = vunpack.c.h.bf16 %v1040_v27  ;;  %v481_v55 = vadd.f32 %v449_v38, %v353_v47  ;;  %v755_v57 = vunpack.c.l.bf16 %v996_v44  ;;  %v1027_v22 = vld [vmem:[%s1573_s2 + $0x28] sm:$0xff]  }
  0x1a   :  { %641 = vst.msk [vmem:[%s1576_s5 + $0x10] sm:$0xf] %vm636_vm0, %v709_v46  ;;  %v195_v56 = vmul.f32 %v816_v49, %v1123_v15  ;;  %v819_v58 = vunpack.c.l.bf16 %v1011_v45  ;;  %v323_v61 = vmul.f32 %v880_v53, %v1128_v16  ;;  %v883_v63 = vunpack.c.l.bf16 %v1026_v50  ;;  %v1042_v27 = vld [vmem:[%s1574_s3 + $0x28] sm:$0xff]  }
  0x1b   :  { %v354_v60 = vadd.f32 %v322_v42, %v226_v51  ;;  %v451_v62 = vmul.f32 %v944_v54, %v1133_v17  ;;  %v710_v4 = vpack.c.bf16 %v481_v55, %v481_v55  ;;  %v100_v6 = vmul.f32 %v755_v57, %v1086_v0 }
  0x1c   :  { %v227_v5 = vadd.f32 %v195_v56, %v99_v52  ;;  %v196_v7 = vmul.f32 %v819_v58, %v1091_v1  ;;  %v324_v9 = vmul.f32 %v883_v63, %v1096_v2  ;;  %v947_v11 = vunpack.c.l.bf16 %v1041_v59 }
  0x1d   :  { %v482_v8 = vadd.f32 %v450_v48, %v354_v60  ;;  %v756_v12 = vunpack.c.h.bf16 %v996_v44  ;;  %642 = vst.msk [vmem:[%s1576_s5 + $0x14] sm:$0xf] %vm636_vm0, %v710_v4  ;;  %v820_v18 = vunpack.c.h.bf16 %v1011_v45  ;;  %v884_v19 = vunpack.c.h.bf16 %v1026_v50  ;;  %v998_v44 = vld [vmem:[%s1571_s0 + $0x30] sm:$0xff]  }
  0x1e   :  { %v355_v13 = vadd.f32 %v323_v61, %v227_v5  ;;  %v228_v14 = vadd.f32 %v196_v7, %v100_v6  ;;  %v452_v24 = vmul.f32 %v947_v11, %v1101_v3  ;;  %v948_v26 = vunpack.c.h.bf16 %v1041_v59  ;;  %v1013_v45 = vld [vmem:[%s1572_s1 + $0x30] sm:$0xff]  }
  0x1f   :  { %v711_v23 = vpack.c.bf16 %v482_v8, %v482_v8  ;;  %v101_v25 = vmul.f32 %v756_v12, %v1118_v10  ;;  %v197_v30 = vmul.f32 %v820_v18, %v1123_v15  ;;  %v325_v31 = vmul.f32 %v884_v19, %v1128_v16  ;;  %v1028_v50 = vld [vmem:[%s1573_s2 + $0x30] sm:$0xff]  }
  0x20   :  { %v483_v28 = vadd.f32 %v451_v62, %v355_v13  ;;  %v356_v29 = vadd.f32 %v324_v9, %v228_v14  ;;  %v453_v32 = vmul.f32 %v948_v26, %v1133_v17  ;;  %v759_v33 = vunpack.c.l.bf16 %v997_v20  ;;  %v1043_v59 = vld [vmem:[%s1574_s3 + $0x30] sm:$0xff]  }
  0x21   :  { %643 = vst.msk [vmem:[%s1576_s5 + $0x18] sm:$0xf] %vm636_vm0, %v711_v23  ;;  %v823_v34 = vunpack.c.l.bf16 %v1012_v21  ;;  %v887_v35 = vunpack.c.l.bf16 %v1027_v22  ;;  %v229_v38 = vadd.f32 %v197_v30, %v101_v25  ;;  %v951_v39 = vunpack.c.l.bf16 %v1042_v27 }
  0x22   :  { %v712_v36 = vpack.c.bf16 %v483_v28, %v483_v28  ;;  %v484_v37 = vadd.f32 %v452_v24, %v356_v29  ;;  %v102_v40 = vmul.f32 %v759_v33, %v1086_v0  ;;  %v760_v43 = vunpack.c.h.bf16 %v997_v20  ;;  %v999_v20 = vld [vmem:[%s1571_s0 + $0x38] sm:$0xff]  }
  0x23   :  { %v198_v41 = vmul.f32 %v823_v34, %v1091_v1  ;;  %v326_v42 = vmul.f32 %v887_v35, %v1096_v2  ;;  %v357_v47 = vadd.f32 %v325_v31, %v229_v38  ;;  %v454_v48 = vmul.f32 %v951_v39, %v1101_v3 }
  0x24   :  { %644 = vst.msk [vmem:[%s1576_s5 + $0x1c] sm:$0xf] %vm636_vm0, %v712_v36  ;;  %v713_v46 = vpack.c.bf16 %v484_v37, %v484_v37  ;;  %v824_v49 = vunpack.c.h.bf16 %v1012_v21  ;;  %v103_v52 = vmul.f32 %v760_v43, %v1118_v10  ;;  %v888_v53 = vunpack.c.h.bf16 %v1027_v22  ;;  %v1014_v21 = vld [vmem:[%s1572_s1 + $0x38] sm:$0xff]  }
  0x25   :  { %v230_v51 = vadd.f32 %v198_v41, %v102_v40  ;;  %v952_v54 = vunpack.c.h.bf16 %v1042_v27  ;;  %v485_v55 = vadd.f32 %v453_v32, %v357_v47  ;;  %v763_v57 = vunpack.c.l.bf16 %v998_v44  ;;  %v1029_v22 = vld [vmem:[%s1573_s2 + $0x38] sm:$0xff]  }
  0x26   :  { %645 = vst.msk [vmem:[%s1576_s5 + $0x20] sm:$0xf] %vm636_vm0, %v713_v46  ;;  %v199_v56 = vmul.f32 %v824_v49, %v1123_v15  ;;  %v827_v58 = vunpack.c.l.bf16 %v1013_v45  ;;  %v327_v61 = vmul.f32 %v888_v53, %v1128_v16  ;;  %v891_v63 = vunpack.c.l.bf16 %v1028_v50  ;;  %v1044_v27 = vld [vmem:[%s1574_s3 + $0x38] sm:$0xff]  }
  0x27   :  { %v358_v60 = vadd.f32 %v326_v42, %v230_v51  ;;  %v455_v62 = vmul.f32 %v952_v54, %v1133_v17  ;;  %v714_v4 = vpack.c.bf16 %v485_v55, %v485_v55  ;;  %v104_v6 = vmul.f32 %v763_v57, %v1086_v0 }
  0x28   :  { %v231_v5 = vadd.f32 %v199_v56, %v103_v52  ;;  %v200_v7 = vmul.f32 %v827_v58, %v1091_v1  ;;  %v328_v9 = vmul.f32 %v891_v63, %v1096_v2  ;;  %v955_v11 = vunpack.c.l.bf16 %v1043_v59 }
  0x29   :  { %v486_v8 = vadd.f32 %v454_v48, %v358_v60  ;;  %v764_v12 = vunpack.c.h.bf16 %v998_v44  ;;  %646 = vst.msk [vmem:[%s1576_s5 + $0x24] sm:$0xf] %vm636_vm0, %v714_v4  ;;  %v828_v18 = vunpack.c.h.bf16 %v1013_v45  ;;  %v892_v19 = vunpack.c.h.bf16 %v1028_v50  ;;  %v1000_v44 = vld [vmem:[%s1571_s0 + $0x40] sm:$0xff]  }
  0x2a   :  { %v359_v13 = vadd.f32 %v327_v61, %v231_v5  ;;  %v232_v14 = vadd.f32 %v200_v7, %v104_v6  ;;  %v456_v24 = vmul.f32 %v955_v11, %v1101_v3  ;;  %v956_v26 = vunpack.c.h.bf16 %v1043_v59  ;;  %v1015_v45 = vld [vmem:[%s1572_s1 + $0x40] sm:$0xff]  }
  0x2b   :  { %v715_v23 = vpack.c.bf16 %v486_v8, %v486_v8  ;;  %v105_v25 = vmul.f32 %v764_v12, %v1118_v10  ;;  %v201_v30 = vmul.f32 %v828_v18, %v1123_v15  ;;  %v329_v31 = vmul.f32 %v892_v19, %v1128_v16  ;;  %v1030_v50 = vld [vmem:[%s1573_s2 + $0x40] sm:$0xff]  }
  0x2c   :  { %v487_v28 = vadd.f32 %v455_v62, %v359_v13  ;;  %v360_v29 = vadd.f32 %v328_v9, %v232_v14  ;;  %v457_v32 = vmul.f32 %v956_v26, %v1133_v17  ;;  %v767_v33 = vunpack.c.l.bf16 %v999_v20  ;;  %v1045_v59 = vld [vmem:[%s1574_s3 + $0x40] sm:$0xff]  }
  0x2d   :  { %647 = vst.msk [vmem:[%s1576_s5 + $0x28] sm:$0xf] %vm636_vm0, %v715_v23  ;;  %v831_v34 = vunpack.c.l.bf16 %v1014_v21  ;;  %v895_v35 = vunpack.c.l.bf16 %v1029_v22  ;;  %v233_v38 = vadd.f32 %v201_v30, %v105_v25  ;;  %v959_v39 = vunpack.c.l.bf16 %v1044_v27 }
  0x2e   :  { %v716_v36 = vpack.c.bf16 %v487_v28, %v487_v28  ;;  %v488_v37 = vadd.f32 %v456_v24, %v360_v29  ;;  %v106_v40 = vmul.f32 %v767_v33, %v1086_v0  ;;  %v768_v43 = vunpack.c.h.bf16 %v999_v20  ;;  %v1001_v20 = vld [vmem:[%s1571_s0 + $0x48] sm:$0xff]  }
  0x2f   :  { %v202_v41 = vmul.f32 %v831_v34, %v1091_v1  ;;  %v330_v42 = vmul.f32 %v895_v35, %v1096_v2  ;;  %v361_v47 = vadd.f32 %v329_v31, %v233_v38  ;;  %v458_v48 = vmul.f32 %v959_v39, %v1101_v3 }
  0x30   :  { %648 = vst.msk [vmem:[%s1576_s5 + $0x2c] sm:$0xf] %vm636_vm0, %v716_v36  ;;  %v717_v46 = vpack.c.bf16 %v488_v37, %v488_v37  ;;  %v832_v49 = vunpack.c.h.bf16 %v1014_v21  ;;  %v107_v52 = vmul.f32 %v768_v43, %v1118_v10  ;;  %v896_v53 = vunpack.c.h.bf16 %v1029_v22  ;;  %v1016_v21 = vld [vmem:[%s1572_s1 + $0x48] sm:$0xff]  }
  0x31   :  { %v234_v51 = vadd.f32 %v202_v41, %v106_v40  ;;  %v960_v54 = vunpack.c.h.bf16 %v1044_v27  ;;  %v489_v55 = vadd.f32 %v457_v32, %v361_v47  ;;  %v771_v57 = vunpack.c.l.bf16 %v1000_v44  ;;  %v1031_v22 = vld [vmem:[%s1573_s2 + $0x48] sm:$0xff]  }
  0x32   :  { %649 = vst.msk [vmem:[%s1576_s5 + $0x30] sm:$0xf] %vm636_vm0, %v717_v46  ;;  %v203_v56 = vmul.f32 %v832_v49, %v1123_v15  ;;  %v835_v58 = vunpack.c.l.bf16 %v1015_v45  ;;  %v331_v61 = vmul.f32 %v896_v53, %v1128_v16  ;;  %v899_v63 = vunpack.c.l.bf16 %v1030_v50  ;;  %v1046_v27 = vld [vmem:[%s1574_s3 + $0x48] sm:$0xff]  }
  0x33   :  { %v362_v60 = vadd.f32 %v330_v42, %v234_v51  ;;  %v459_v62 = vmul.f32 %v960_v54, %v1133_v17  ;;  %v718_v4 = vpack.c.bf16 %v489_v55, %v489_v55  ;;  %v108_v6 = vmul.f32 %v771_v57, %v1086_v0 }
  0x34   :  { %v235_v5 = vadd.f32 %v203_v56, %v107_v52  ;;  %v204_v7 = vmul.f32 %v835_v58, %v1091_v1  ;;  %v332_v9 = vmul.f32 %v899_v63, %v1096_v2  ;;  %v963_v11 = vunpack.c.l.bf16 %v1045_v59 }
  0x35   :  { %v490_v8 = vadd.f32 %v458_v48, %v362_v60  ;;  %v772_v12 = vunpack.c.h.bf16 %v1000_v44  ;;  %650 = vst.msk [vmem:[%s1576_s5 + $0x34] sm:$0xf] %vm636_vm0, %v718_v4  ;;  %v836_v18 = vunpack.c.h.bf16 %v1015_v45  ;;  %v900_v19 = vunpack.c.h.bf16 %v1030_v50  ;;  %v1002_v44 = vld [vmem:[%s1571_s0 + $0x50] sm:$0xff]  }
  0x36   :  { %v363_v13 = vadd.f32 %v331_v61, %v235_v5  ;;  %v236_v14 = vadd.f32 %v204_v7, %v108_v6  ;;  %v460_v24 = vmul.f32 %v963_v11, %v1101_v3  ;;  %v964_v26 = vunpack.c.h.bf16 %v1045_v59  ;;  %v1017_v45 = vld [vmem:[%s1572_s1 + $0x50] sm:$0xff]  }
  0x37   :  { %v719_v23 = vpack.c.bf16 %v490_v8, %v490_v8  ;;  %v109_v25 = vmul.f32 %v772_v12, %v1118_v10  ;;  %v205_v30 = vmul.f32 %v836_v18, %v1123_v15  ;;  %v333_v31 = vmul.f32 %v900_v19, %v1128_v16  ;;  %v1032_v50 = vld [vmem:[%s1573_s2 + $0x50] sm:$0xff]  }
  0x38   :  { %v491_v28 = vadd.f32 %v459_v62, %v363_v13  ;;  %v364_v29 = vadd.f32 %v332_v9, %v236_v14  ;;  %v461_v32 = vmul.f32 %v964_v26, %v1133_v17  ;;  %v775_v33 = vunpack.c.l.bf16 %v1001_v20  ;;  %v1047_v59 = vld [vmem:[%s1574_s3 + $0x50] sm:$0xff]  }
  0x39   :  { %651 = vst.msk [vmem:[%s1576_s5 + $0x38] sm:$0xf] %vm636_vm0, %v719_v23  ;;  %v839_v34 = vunpack.c.l.bf16 %v1016_v21  ;;  %v903_v35 = vunpack.c.l.bf16 %v1031_v22  ;;  %v237_v38 = vadd.f32 %v205_v30, %v109_v25  ;;  %v967_v39 = vunpack.c.l.bf16 %v1046_v27 }
  0x3a   :  { %v720_v36 = vpack.c.bf16 %v491_v28, %v491_v28  ;;  %v492_v37 = vadd.f32 %v460_v24, %v364_v29  ;;  %v110_v40 = vmul.f32 %v775_v33, %v1086_v0  ;;  %v776_v43 = vunpack.c.h.bf16 %v1001_v20  ;;  %v1003_v20 = vld [vmem:[%s1571_s0 + $0x58] sm:$0xff]  }
  0x3b   :  { %v206_v41 = vmul.f32 %v839_v34, %v1091_v1  ;;  %v334_v42 = vmul.f32 %v903_v35, %v1096_v2  ;;  %v365_v47 = vadd.f32 %v333_v31, %v237_v38  ;;  %v462_v48 = vmul.f32 %v967_v39, %v1101_v3 }
  0x3c   :  { %652 = vst.msk [vmem:[%s1576_s5 + $0x3c] sm:$0xf] %vm636_vm0, %v720_v36  ;;  %v721_v46 = vpack.c.bf16 %v492_v37, %v492_v37  ;;  %v840_v49 = vunpack.c.h.bf16 %v1016_v21  ;;  %v111_v52 = vmul.f32 %v776_v43, %v1118_v10  ;;  %v904_v53 = vunpack.c.h.bf16 %v1031_v22  ;;  %v1018_v21 = vld [vmem:[%s1572_s1 + $0x58] sm:$0xff]  }
  0x3d   :  { %v238_v51 = vadd.f32 %v206_v41, %v110_v40  ;;  %v968_v54 = vunpack.c.h.bf16 %v1046_v27  ;;  %v493_v55 = vadd.f32 %v461_v32, %v365_v47  ;;  %v779_v57 = vunpack.c.l.bf16 %v1002_v44  ;;  %v1033_v22 = vld [vmem:[%s1573_s2 + $0x58] sm:$0xff]  }
  0x3e   :  { %653 = vst.msk [vmem:[%s1576_s5 + $0x40] sm:$0xf] %vm636_vm0, %v721_v46  ;;  %v207_v56 = vmul.f32 %v840_v49, %v1123_v15  ;;  %v843_v58 = vunpack.c.l.bf16 %v1017_v45  ;;  %v335_v61 = vmul.f32 %v904_v53, %v1128_v16  ;;  %v907_v63 = vunpack.c.l.bf16 %v1032_v50  ;;  %v1048_v27 = vld [vmem:[%s1574_s3 + $0x58] sm:$0xff]  }
  0x3f   :  { %v366_v60 = vadd.f32 %v334_v42, %v238_v51  ;;  %v463_v62 = vmul.f32 %v968_v54, %v1133_v17  ;;  %v722_v4 = vpack.c.bf16 %v493_v55, %v493_v55  ;;  %v112_v6 = vmul.f32 %v779_v57, %v1086_v0 }
  0x40   :  { %v239_v5 = vadd.f32 %v207_v56, %v111_v52  ;;  %v208_v7 = vmul.f32 %v843_v58, %v1091_v1  ;;  %v336_v9 = vmul.f32 %v907_v63, %v1096_v2  ;;  %v971_v11 = vunpack.c.l.bf16 %v1047_v59 }
  0x41   :  { %v494_v8 = vadd.f32 %v462_v48, %v366_v60  ;;  %v780_v12 = vunpack.c.h.bf16 %v1002_v44  ;;  %654 = vst.msk [vmem:[%s1576_s5 + $0x44] sm:$0xf] %vm636_vm0, %v722_v4  ;;  %v844_v18 = vunpack.c.h.bf16 %v1017_v45  ;;  %v908_v19 = vunpack.c.h.bf16 %v1032_v50  ;;  %v1004_v44 = vld [vmem:[%s1571_s0 + $0x60] sm:$0xff]  }
  0x42   :  { %v367_v13 = vadd.f32 %v335_v61, %v239_v5  ;;  %v240_v14 = vadd.f32 %v208_v7, %v112_v6  ;;  %v464_v24 = vmul.f32 %v971_v11, %v1101_v3  ;;  %v972_v26 = vunpack.c.h.bf16 %v1047_v59  ;;  %v1019_v45 = vld [vmem:[%s1572_s1 + $0x60] sm:$0xff]  }
  0x43   :  { %v723_v23 = vpack.c.bf16 %v494_v8, %v494_v8  ;;  %v113_v25 = vmul.f32 %v780_v12, %v1118_v10  ;;  %v209_v30 = vmul.f32 %v844_v18, %v1123_v15  ;;  %v337_v31 = vmul.f32 %v908_v19, %v1128_v16  ;;  %v1034_v50 = vld [vmem:[%s1573_s2 + $0x60] sm:$0xff]  }
  0x44   :  { %v495_v28 = vadd.f32 %v463_v62, %v367_v13  ;;  %v368_v29 = vadd.f32 %v336_v9, %v240_v14  ;;  %v465_v32 = vmul.f32 %v972_v26, %v1133_v17  ;;  %v783_v33 = vunpack.c.l.bf16 %v1003_v20  ;;  %v1049_v59 = vld [vmem:[%s1574_s3 + $0x60] sm:$0xff]  }
  0x45   :  { %655 = vst.msk [vmem:[%s1576_s5 + $0x48] sm:$0xf] %vm636_vm0, %v723_v23  ;;  %v847_v34 = vunpack.c.l.bf16 %v1018_v21  ;;  %v911_v35 = vunpack.c.l.bf16 %v1033_v22  ;;  %v241_v38 = vadd.f32 %v209_v30, %v113_v25  ;;  %v975_v39 = vunpack.c.l.bf16 %v1048_v27 }
  0x46   :  { %v724_v36 = vpack.c.bf16 %v495_v28, %v495_v28  ;;  %v496_v37 = vadd.f32 %v464_v24, %v368_v29  ;;  %v114_v40 = vmul.f32 %v783_v33, %v1086_v0  ;;  %v784_v43 = vunpack.c.h.bf16 %v1003_v20  ;;  %v1005_v20 = vld [vmem:[%s1571_s0 + $0x68] sm:$0xff]  }
  0x47   :  { %v210_v41 = vmul.f32 %v847_v34, %v1091_v1  ;;  %v338_v42 = vmul.f32 %v911_v35, %v1096_v2  ;;  %v369_v47 = vadd.f32 %v337_v31, %v241_v38  ;;  %v466_v48 = vmul.f32 %v975_v39, %v1101_v3 }
  0x48   :  { %656 = vst.msk [vmem:[%s1576_s5 + $0x4c] sm:$0xf] %vm636_vm0, %v724_v36  ;;  %v725_v46 = vpack.c.bf16 %v496_v37, %v496_v37  ;;  %v848_v49 = vunpack.c.h.bf16 %v1018_v21  ;;  %v115_v52 = vmul.f32 %v784_v43, %v1118_v10  ;;  %v912_v53 = vunpack.c.h.bf16 %v1033_v22  ;;  %v1020_v21 = vld [vmem:[%s1572_s1 + $0x68] sm:$0xff]  }
  0x49   :  { %v242_v51 = vadd.f32 %v210_v41, %v114_v40  ;;  %v976_v54 = vunpack.c.h.bf16 %v1048_v27  ;;  %v497_v55 = vadd.f32 %v465_v32, %v369_v47  ;;  %v787_v57 = vunpack.c.l.bf16 %v1004_v44  ;;  %v1035_v22 = vld [vmem:[%s1573_s2 + $0x68] sm:$0xff]  }
  0x4a   :  { %657 = vst.msk [vmem:[%s1576_s5 + $0x50] sm:$0xf] %vm636_vm0, %v725_v46  ;;  %v211_v56 = vmul.f32 %v848_v49, %v1123_v15  ;;  %v851_v58 = vunpack.c.l.bf16 %v1019_v45  ;;  %v339_v61 = vmul.f32 %v912_v53, %v1128_v16  ;;  %v915_v63 = vunpack.c.l.bf16 %v1034_v50  ;;  %v1050_v27 = vld [vmem:[%s1574_s3 + $0x68] sm:$0xff]  }
  0x4b   :  { %v370_v60 = vadd.f32 %v338_v42, %v242_v51  ;;  %v467_v62 = vmul.f32 %v976_v54, %v1133_v17  ;;  %v726_v4 = vpack.c.bf16 %v497_v55, %v497_v55  ;;  %v116_v6 = vmul.f32 %v787_v57, %v1086_v0 }
  0x4c   :  { %v243_v5 = vadd.f32 %v211_v56, %v115_v52  ;;  %v212_v7 = vmul.f32 %v851_v58, %v1091_v1  ;;  %v340_v9 = vmul.f32 %v915_v63, %v1096_v2  ;;  %v979_v11 = vunpack.c.l.bf16 %v1049_v59 }
  0x4d   :  { %v498_v8 = vadd.f32 %v466_v48, %v370_v60  ;;  %v788_v12 = vunpack.c.h.bf16 %v1004_v44  ;;  %658 = vst.msk [vmem:[%s1576_s5 + $0x54] sm:$0xf] %vm636_vm0, %v726_v4  ;;  %v852_v18 = vunpack.c.h.bf16 %v1019_v45  ;;  %v916_v19 = vunpack.c.h.bf16 %v1034_v50  ;;  %v1006_v44 = vld [vmem:[%s1571_s0 + $0x70] sm:$0xff]  }
  0x4e   :  { %v371_v13 = vadd.f32 %v339_v61, %v243_v5  ;;  %v244_v14 = vadd.f32 %v212_v7, %v116_v6  ;;  %v468_v24 = vmul.f32 %v979_v11, %v1101_v3  ;;  %v980_v26 = vunpack.c.h.bf16 %v1049_v59  ;;  %v1021_v45 = vld [vmem:[%s1572_s1 + $0x70] sm:$0xff]  }
  0x4f   :  { %v727_v23 = vpack.c.bf16 %v498_v8, %v498_v8  ;;  %v117_v25 = vmul.f32 %v788_v12, %v1118_v10  ;;  %v213_v30 = vmul.f32 %v852_v18, %v1123_v15  ;;  %v341_v31 = vmul.f32 %v916_v19, %v1128_v16  ;;  %v1036_v50 = vld [vmem:[%s1573_s2 + $0x70] sm:$0xff]  }
  0x50   :  { %v499_v28 = vadd.f32 %v467_v62, %v371_v13  ;;  %v372_v29 = vadd.f32 %v340_v9, %v244_v14  ;;  %v469_v32 = vmul.f32 %v980_v26, %v1133_v17  ;;  %v791_v33 = vunpack.c.l.bf16 %v1005_v20  ;;  %v1051_v59 = vld [vmem:[%s1574_s3 + $0x70] sm:$0xff]  }
  0x51   :  { %659 = vst.msk [vmem:[%s1576_s5 + $0x58] sm:$0xf] %vm636_vm0, %v727_v23  ;;  %v855_v34 = vunpack.c.l.bf16 %v1020_v21  ;;  %v919_v35 = vunpack.c.l.bf16 %v1035_v22  ;;  %v245_v38 = vadd.f32 %v213_v30, %v117_v25  ;;  %v983_v39 = vunpack.c.l.bf16 %v1050_v27 }
  0x52   :  { %v728_v36 = vpack.c.bf16 %v499_v28, %v499_v28  ;;  %v500_v37 = vadd.f32 %v468_v24, %v372_v29  ;;  %v118_v40 = vmul.f32 %v791_v33, %v1086_v0  ;;  %v792_v43 = vunpack.c.h.bf16 %v1005_v20  ;;  %v1007_v20 = vld [vmem:[%s1571_s0 + $0x78] sm:$0xff]  }
  0x53   :  { %v214_v41 = vmul.f32 %v855_v34, %v1091_v1  ;;  %v342_v42 = vmul.f32 %v919_v35, %v1096_v2  ;;  %v373_v47 = vadd.f32 %v341_v31, %v245_v38  ;;  %v470_v48 = vmul.f32 %v983_v39, %v1101_v3 }
  0x54   :  { %660 = vst.msk [vmem:[%s1576_s5 + $0x5c] sm:$0xf] %vm636_vm0, %v728_v36  ;;  %v729_v46 = vpack.c.bf16 %v500_v37, %v500_v37  ;;  %v856_v49 = vunpack.c.h.bf16 %v1020_v21  ;;  %v119_v52 = vmul.f32 %v792_v43, %v1118_v10  ;;  %v920_v53 = vunpack.c.h.bf16 %v1035_v22  ;;  %v1022_v21 = vld [vmem:[%s1572_s1 + $0x78] sm:$0xff]  }
  0x55   :  { %v246_v51 = vadd.f32 %v214_v41, %v118_v40  ;;  %v984_v54 = vunpack.c.h.bf16 %v1050_v27  ;;  %v501_v55 = vadd.f32 %v469_v32, %v373_v47  ;;  %v795_v57 = vunpack.c.l.bf16 %v1006_v44  ;;  %v1037_v22 = vld [vmem:[%s1573_s2 + $0x78] sm:$0xff]  }
  0x56   :  { %661 = vst.msk [vmem:[%s1576_s5 + $0x60] sm:$0xf] %vm636_vm0, %v729_v46  ;;  %v215_v56 = vmul.f32 %v856_v49, %v1123_v15  ;;  %v859_v58 = vunpack.c.l.bf16 %v1021_v45  ;;  %v343_v61 = vmul.f32 %v920_v53, %v1128_v16  ;;  %v923_v63 = vunpack.c.l.bf16 %v1036_v50  ;;  %v1052_v27 = vld [vmem:[%s1574_s3 + $0x78] sm:$0xff]  }
  0x57   :  { %v374_v60 = vadd.f32 %v342_v42, %v246_v51  ;;  %v471_v62 = vmul.f32 %v984_v54, %v1133_v17  ;;  %v730_v4 = vpack.c.bf16 %v501_v55, %v501_v55  ;;  %v120_v6 = vmul.f32 %v795_v57, %v1086_v0 }
  0x58   :  { %v247_v5 = vadd.f32 %v215_v56, %v119_v52  ;;  %v216_v7 = vmul.f32 %v859_v58, %v1091_v1  ;;  %v344_v9 = vmul.f32 %v923_v63, %v1096_v2  ;;  %v987_v11 = vunpack.c.l.bf16 %v1051_v59 }
  0x59   :  { %v502_v8 = vadd.f32 %v470_v48, %v374_v60  ;;  %v796_v12 = vunpack.c.h.bf16 %v1006_v44  ;;  %662 = vst.msk [vmem:[%s1576_s5 + $0x64] sm:$0xf] %vm636_vm0, %v730_v4  ;;  %v860_v18 = vunpack.c.h.bf16 %v1021_v45  ;;  %v924_v19 = vunpack.c.h.bf16 %v1036_v50 }
  0x5a   :  { %v375_v13 = vadd.f32 %v343_v61, %v247_v5  ;;  %v248_v14 = vadd.f32 %v216_v7, %v120_v6  ;;  %v472_v24 = vmul.f32 %v987_v11, %v1101_v3  ;;  %v988_v26 = vunpack.c.h.bf16 %v1051_v59 }
  0x5b   :  { %v731_v23 = vpack.c.bf16 %v502_v8, %v502_v8  ;;  %v121_v25 = vmul.f32 %v796_v12, %v1118_v10  ;;  %v217_v30 = vmul.f32 %v860_v18, %v1123_v15  ;;  %v345_v31 = vmul.f32 %v924_v19, %v1128_v16 }
  0x5c   :  { %v503_v28 = vadd.f32 %v471_v62, %v375_v13  ;;  %v376_v29 = vadd.f32 %v344_v9, %v248_v14  ;;  %v473_v32 = vmul.f32 %v988_v26, %v1133_v17  ;;  %v799_v33 = vunpack.c.l.bf16 %v1007_v20 }
  0x5d   :  { %663 = vst.msk [vmem:[%s1576_s5 + $0x68] sm:$0xf] %vm636_vm0, %v731_v23  ;;  %v863_v34 = vunpack.c.l.bf16 %v1022_v21  ;;  %v927_v35 = vunpack.c.l.bf16 %v1037_v22  ;;  %v249_v38 = vadd.f32 %v217_v30, %v121_v25  ;;  %v991_v39 = vunpack.c.l.bf16 %v1052_v27 }
  0x5e   :  { %v732_v36 = vpack.c.bf16 %v503_v28, %v503_v28  ;;  %v504_v37 = vadd.f32 %v472_v24, %v376_v29  ;;  %v122_v40 = vmul.f32 %v799_v33, %v1086_v0  ;;  %v800_v43 = vunpack.c.h.bf16 %v1007_v20 }
  0x5f   :  { %v218_v41 = vmul.f32 %v863_v34, %v1091_v1  ;;  %v346_v42 = vmul.f32 %v927_v35, %v1096_v2  ;;  %v377_v45 = vadd.f32 %v345_v31, %v249_v38  ;;  %v474_v46 = vmul.f32 %v991_v39, %v1101_v3 }
  0x60   :  { %664 = vst.msk [vmem:[%s1576_s5 + $0x6c] sm:$0xf] %vm636_vm0, %v732_v36  ;;  %v733_v44 = vpack.c.bf16 %v504_v37, %v504_v37  ;;  %v864_v47 = vunpack.c.h.bf16 %v1022_v21  ;;  %v123_v49 = vmul.f32 %v800_v43, %v1118_v10  ;;  %v928_v50 = vunpack.c.h.bf16 %v1037_v22 }
  0x61   :  { %v250_v48 = vadd.f32 %v218_v41, %v122_v40  ;;  %v992_v0 = vunpack.c.h.bf16 %v1052_v27  ;;  %v505_v1 = vadd.f32 %v473_v32, %v377_v45 }
  0x62   :  { %665 = vst.msk [vmem:[%s1576_s5 + $0x70] sm:$0xf] %vm636_vm0, %v733_v44  ;;  %v219_v2 = vmul.f32 %v864_v47, %v1123_v15  ;;  %v347_v52 = vmul.f32 %v928_v50, %v1128_v16 }
  0x63   :  { %v378_v51 = vadd.f32 %v346_v42, %v250_v48  ;;  %v734_v53 = vpack.c.bf16 %v505_v1, %v505_v1  ;;  %v475_v3 = vmul.f32 %v992_v0, %v1133_v17 }
  0x64   :  { %v251_v54 = vadd.f32 %v219_v2, %v123_v49 }
  0x65   :  { %v506_v55 = vadd.f32 %v474_v46, %v378_v51  ;;  %666 = vst.msk [vmem:[%s1576_s5 + $0x74] sm:$0xf] %vm636_vm0, %v734_v53 }
  0x66   :  { %v379_v10 = vadd.f32 %v347_v52, %v251_v54 }
  0x67   :  { %v735_v56 = vpack.c.bf16 %v506_v55, %v506_v55 }
  0x68   :  { %v507_v57 = vadd.f32 %v475_v3, %v379_v10 }
  0x69   :  { %667 = vst.msk [vmem:[%s1576_s5 + $0x78] sm:$0xf] %vm636_vm0, %v735_v56 }
  0x6a   :  { %v736_v15 = vpack.c.bf16 %v507_v57, %v507_v57 }
  0x6c   :  { %668 = vst.msk [vmem:[%s1576_s5 + $0x7c] sm:$0xf] %vm636_vm0, %v736_v15 }

// kernel: d_forward.23
= control target key start
LH: loop header
LB: loop body
LE: loop exit
PB: predicated region body
PF: predicated region fallthrough
CT: control target
= control target key end

     0   :  { %v604_v1 = vmov 0   ;;  %vm332_vm0 = vcmask 588800   ;;  %vm336_vm1 = vcmask 1043456   ;;  %v605_v60 = vmov 1983009808   ;;  %s785_s1 = inlined_call_operand.vmem [shape: bf16[200,512], index: 1, kind: input, shape index: {}]   ;;  %s786_s0 = inlined_call_operand.vmem [shape: bf16[4,200], index: 0, kind: input, shape index: {}]   ;;  %s787_s2 = inlined_call_operand.vmem [shape: f32[4,1], index: 2, kind: input, shape index: {}]   ;;  %s788_s3 = inlined_call_operand.vmem [shape: bf16[4,512], index: 3, kind: output, shape index: {}]  }
   0x1   :  { %v528_v0 = vld [vmem:[%s785_s1 + $0x4] ss:$16 sps:$4 sm:$0xff]   ;;  %527 = vset.pattern.permute.xlu0 %v604_v1  ;;  %v530_v2 = vld [vmem:[%s785_s1 + $0xc] ss:$16 sps:$4 sm:$0xff]   ;;  %v532_v3 = vld [vmem:[%s785_s1] ss:$16 sps:$4 sm:$0xff]   ;;  %v446_v61 = vunpack.c.l.s4 %v605_v60  ;;  %v448_v62 = vlaneseq }
   0x2   :  { %349 = vmatprep.subr.bf16.mxu0 %v528_v0  ;;  %v533_v4 = vld [vmem:[%s785_s1 + $0x8] ss:$16 sps:$4 sm:$0xff]   ;;  %390 = vmatprep.subr.bf16.mxu1 %v530_v2  ;;  %v534_v5 = vld [vmem:[%s785_s1 + $0x24] ss:$16 sps:$4 sm:$0xff]   ;;  %v536_v6 = vld [vmem:[%s785_s1 + $0x2c] ss:$16 sps:$4 sm:$0xff]  }
   0x3   :  { %350 = vmatpush1.bf16.msra.mxu0 %v532_v3  ;;  %391 = vmatpush1.bf16.msra.mxu1 %v533_v4  ;;  %v538_v7 = vld [vmem:[%s785_s1 + $0x20] ss:$16 sps:$4 sm:$0xff]   ;;  %v539_v8 = vld [vmem:[%s785_s1 + $0x28] ss:$16 sps:$4 sm:$0xff]   ;;  %v540_v9 = vld [vmem:[%s785_s1 + $0x44] ss:$16 sps:$4 sm:$0xff]   ;;  %v447_v2 = vunpack.c.0.s8 %v446_v61 }
   0x4   :  { %351 = vmatprep.subr.bf16.mxu0 %v534_v5  ;;  %392 = vmatprep.subr.bf16.mxu1 %v536_v6  ;;  %v542_v10 = vld [vmem:[%s785_s1 + $0x4c] ss:$16 sps:$4 sm:$0xff]   ;;  %v544_v11 = vld [vmem:[%s785_s1 + $0x40] ss:$16 sps:$4 sm:$0xff]   ;;  %v545_v12 = vld [vmem:[%s785_s1 + $0x48] ss:$16 sps:$4 sm:$0xff]  }
   0x5   :  { %v546_v13 = vld [vmem:[%s785_s1 + $0x64] ss:$16 sps:$4 sm:$0xff]   ;;  %v548_v14 = vld [vmem:[%s785_s1 + $0x6c] ss:$16 sps:$4 sm:$0xff]   ;;  %v550_v15 = vld [vmem:[%s785_s1 + $0x60] ss:$16 sps:$4 sm:$0xff]  }
   0x6   :  { %v551_v16 = vld [vmem:[%s785_s1 + $0x68] ss:$16 sps:$4 sm:$0xff]   ;;  %v552_v17 = vld [vmem:[%s785_s1 + $0x84] ss:$16 sps:$4 sm:$0xff]   ;;  %v554_v18 = vld [vmem:[%s785_s1 + $0x8c] ss:$16 sps:$4 sm:$0xff]  }
   0x7   :  { %352 = vmatpush1.bf16.msra.mxu0 %v538_v7  ;;  %393 = vmatpush1.bf16.msra.mxu1 %v539_v8  ;;  %v556_v19 = vld [vmem:[%s785_s1 + $0x80] ss:$16 sps:$4 sm:$0xff]   ;;  %v557_v20 = vld [vmem:[%s785_s1 + $0x88] ss:$16 sps:$4 sm:$0xff]   ;;  %v558_v21 = vld [vmem:[%s785_s1 + $0xa4] ss:$16 sps:$4 sm:$0xff]  }
   0x8   :  { %353 = vmatprep.subr.bf16.mxu0 %v540_v9  ;;  %394 = vmatprep.subr.bf16.mxu1 %v542_v10  ;;  %v560_v22 = vld [vmem:[%s785_s1 + $0xac] ss:$16 sps:$4 sm:$0xff]   ;;  %v562_v23 = vld [vmem:[%s785_s1 + $0xa0] ss:$16 sps:$4 sm:$0xff]   ;;  %v563_v24 = vld [vmem:[%s785_s1 + $0xa8] ss:$16 sps:$4 sm:$0xff]  }
   0x9   :  { %v564_v25 = vld [vmem:[%s785_s1 + $0xc4] ss:$16 sps:$4 sm:$0xff]   ;;  %v566_v26 = vld [vmem:[%s785_s1 + $0xcc] ss:$16 sps:$4 sm:$0xff]   ;;  %v568_v27 = vld [vmem:[%s785_s1 + $0xc0] ss:$16 sps:$4 sm:$0xff]  }
   0xa   :  { %v569_v28 = vld [vmem:[%s785_s1 + $0xc8] ss:$16 sps:$4 sm:$0xff]   ;;  %v570_v29 = vld [vmem:[%s785_s1 + $0xe4] ss:$16 sps:$4 sm:$0xff]   ;;  %v572_v30 = vld [vmem:[%s785_s1 + $0xec] ss:$16 sps:$4 sm:$0xff]  }
   0xb   :  { %354 = vmatpush1.bf16.msra.mxu0 %v544_v11  ;;  %395 = vmatpush1.bf16.msra.mxu1 %v545_v12  ;;  %v574_v31 = vld [vmem:[%s785_s1 + $0xe0] ss:$16 sps:$4 sm:$0xff]   ;;  %v575_v32 = vld [vmem:[%s785_s1 + $0xe8] ss:$16 sps:$4 sm:$0xff]   ;;  %v576_v33 = vld [vmem:[%s785_s1 + $0x104] ss:$16 sps:$4 sm:$0xff]  }
   0xc   :  { %355 = vmatprep.subr.bf16.mxu0 %v546_v13  ;;  %396 = vmatprep.subr.bf16.mxu1 %v548_v14  ;;  %v578_v34 = vld [vmem:[%s785_s1 + $0x10c] ss:$16 sps:$4 sm:$0xff]   ;;  %v580_v35 = vld [vmem:[%s785_s1 + $0x100] ss:$16 sps:$4 sm:$0xff]   ;;  %v581_v36 = vld [vmem:[%s785_s1 + $0x108] ss:$16 sps:$4 sm:$0xff]  }
   0xd   :  { %v466_v37 = vld.sshfl [vmem:[%s786_s0] sm:$0x33 pattern:$0x76325410]  ;;  %v582_v38 = vld [vmem:[%s785_s1 + $0x124] ss:$16 sps:$4 sm:$0xff]  }
   0xe   :  { %v584_v39 = vld [vmem:[%s785_s1 + $0x12c] ss:$16 sps:$4 sm:$0xff]   ;;  %v66_v40 = vld [vmem:[%s787_s2] sm:$0xf]  ;;  %v80_v41 = vcombine.high %v466_v37, %v466_v37  ;;  %v587_v43 = vld [vmem:[%s785_s1 + $0x128] ss:$16 sps:$4 sm:$0xff]  }
   0xf   :  { %356 = vmatpush1.bf16.msra.mxu0 %v550_v15  ;;  %397 = vmatpush1.bf16.msra.mxu1 %v551_v16  ;;  %v586_v42 = vld [vmem:[%s785_s1 + $0x120] ss:$16 sps:$4 sm:$0xff]   ;;  %v588_v44 = vld [vmem:[%s785_s1 + $0x144] ss:$16 sps:$4 sm:$0xff]   ;;  %v590_v45 = vld [vmem:[%s785_s1 + $0x14c] ss:$16 sps:$4 sm:$0xff]  }
  0x10   :  { %357 = vmatprep.subr.bf16.mxu0 %v552_v17  ;;  %398 = vmatprep.subr.bf16.mxu1 %v554_v18  ;;  %v592_v46 = vld [vmem:[%s785_s1 + $0x140] ss:$16 sps:$4 sm:$0xff]   ;;  %v593_v47 = vld [vmem:[%s785_s1 + $0x148] ss:$16 sps:$4 sm:$0xff]   ;;  %v594_v48 = vld [vmem:[%s785_s1 + $0x164] ss:$16 sps:$4 sm:$0xff]  }
  0x11   :  { %69 = vperm.xlu0 %527, %v66_v40   ;;  %520 = vmatprep.mubr.msk.bf16.mxu0 %vm332_vm0, %v80_v41  ;;  %v596_v49 = vld [vmem:[%s785_s1 + $0x16c] ss:$16 sps:$4 sm:$0xff]   ;;  %v64_v50 = vld [vmem:[%s785_s1 + $0x180] sm:$0xff]  ;;  %v599_v53 = vld [vmem:[%s785_s1 + $0x168] ss:$16 sps:$4 sm:$0xff]   ;;  %v449_v3 = vshrl.u32 %v448_v62, 7 }
  0x12   :  { %522 = vmatprep.mubr.msk.bf16.mxu1 %vm332_vm0, %v80_v41  ;;  %v65_v51 = vld [vmem:[%s785_s1 + $0x188] sm:$0xff]  ;;  %v598_v52 = vld [vmem:[%s785_s1 + $0x160] ss:$16 sps:$4 sm:$0xff]   ;;  %v516_v54 = vcombine.high %v64_v50, %v64_v50  ;;  %v515_v56 = vcombine.low %v64_v50, %v64_v50 }
  0x13   :  { %358 = vmatpush1.bf16.msra.mxu0 %v556_v19  ;;  %399 = vmatpush1.bf16.msra.mxu1 %v557_v20  ;;  %v518_v55 = vcombine.high %v65_v51, %v65_v51  ;;  %v517_v57 = vcombine.low %v65_v51, %v65_v51  ;;  %v450_v17 = vsub.s32 %v447_v2, %v449_v3 }
  0x14   :  { %359 = vmatprep.subr.bf16.mxu0 %v558_v21  ;;  %400 = vmatprep.subr.bf16.mxu1 %v560_v22  ;;  %v338_v58 = vsel %vm336_vm1, %v515_v56, 0 }
  0x15   :  { %v344_v59 = vsel %vm336_vm1, %v517_v57, 0 }
  0x17   :  { %360 = vmatpush1.bf16.msra.mxu0 %v562_v23  ;;  %401 = vmatpush1.bf16.msra.mxu1 %v563_v24 }
  0x18   :  { %361 = vmatprep.subr.bf16.mxu0 %v564_v25  ;;  %402 = vmatprep.subr.bf16.mxu1 %v566_v26 }
  0x1b   :  { %362 = vmatpush1.bf16.msra.mxu0 %v568_v27  ;;  %403 = vmatpush1.bf16.msra.mxu1 %v569_v28 }
  0x1c   :  { %363 = vmatprep.subr.bf16.mxu0 %v570_v29  ;;  %404 = vmatprep.subr.bf16.mxu1 %v572_v30 }
  0x1f   :  { %364 = vmatpush1.bf16.msra.mxu0 %v574_v31  ;;  %405 = vmatpush1.bf16.msra.mxu1 %v575_v32 }
  0x20   :  { %365 = vmatprep.subr.bf16.mxu0 %v576_v33  ;;  %406 = vmatprep.subr.bf16.mxu1 %v578_v34 }
  0x23   :  { %366 = vmatpush1.bf16.msra.mxu0 %v580_v35  ;;  %407 = vmatpush1.bf16.msra.mxu1 %v581_v36 }
  0x24   :  { %367 = vmatprep.subr.bf16.mxu0 %v582_v38  ;;  %408 = vmatprep.subr.bf16.mxu1 %v584_v39 }
  0x27   :  { %368 = vmatpush1.bf16.msra.mxu0 %v586_v42  ;;  %409 = vmatpush1.bf16.msra.mxu1 %v587_v43 }
  0x28   :  { %369 = vmatprep.subr.bf16.mxu0 %v588_v44  ;;  %410 = vmatprep.subr.bf16.mxu1 %v590_v45 }
  0x2b   :  { %370 = vmatpush1.bf16.msra.mxu0 %v592_v46  ;;  %411 = vmatpush1.bf16.msra.mxu1 %v593_v47 }
  0x2c   :  { %371 = vmatprep.subr.bf16.mxu0 %v594_v48  ;;  %412 = vmatprep.subr.bf16.mxu1 %v596_v49 }
  0x2f   :  { %372 = vmatpush1.bf16.msra.mxu0 %v598_v52  ;;  %413 = vmatpush1.bf16.msra.mxu1 %v599_v53 }
  0x30   :  { %519 = vmatprep.subr.msk.bf16.mxu0 %vm336_vm1, %v516_v54  ;;  %521 = vmatprep.subr.msk.bf16.mxu1 %vm336_vm1, %v518_v55 }
  0x33   :  { %374 = vmatpush1.bf16.msra.mxu0 %v338_v58  ;;  %415 = vmatpush1.bf16.msra.mxu1 %v344_v59 }
  0x36   :  { %382 = vmatmul.mubr.bf16.vlgmr.msra.gmra.mrb[0].mxu0 %v466_v37  ;;  %423 = vmatmul.mubr.bf16.vlgmr.msra.gmra.mrb[0].mxu1 %v466_v37 }
  0x90   :  { %v70_v63 = vpop.permute.xlu0 %69 }
 0x109   :  { %v383_v0 = vpop.f32.mrb[0].mxu0  ;;  %v424_v1 = vpop.f32.mrb[0].mxu1 }
 0x10a   :  { %v384_v4 = vadd.f32 %v383_v0, %v70_v63  ;;  %v425_v5 = vadd.f32 %v424_v1, %v70_v63  ;;  %v385_v6 = vpop.f32.mrb[1].mxu0  ;;  %v426_v7 = vpop.f32.mrb[1].mxu1 }
 0x10b   :  { %v386_v8 = vadd.f32 %v385_v6, %v70_v63  ;;  %v427_v9 = vadd.f32 %v426_v7, %v70_v63  ;;  %v387_v10 = vpop.f32.mrb[2].mxu0  ;;  %v428_v11 = vpop.f32.mrb[2].mxu1 }
 0x10c   :  { %v431_v12 = vmax.f32 %v384_v4, 0.0  ;;  %v433_v13 = vmax.f32 %v425_v5, 0.0  ;;  %v388_v14 = vpop.f32.mrb[3].mxu0  ;;  %v429_v15 = vpop.f32.mrb[3].mxu1 }
 0x10d   :  { %v432_v16 = vmax.f32 %v386_v8, 0.0  ;;  %v434_v18 = vmax.f32 %v427_v9, 0.0 }
 0x10f   :  { %v523_v19 = vpack.c.bf16 %v432_v16, %v431_v12  ;;  %v524_v20 = vpack.c.bf16 %v434_v18, %v433_v13 }
 0x111   :  { %v451_v21 = vrot.slane %v523_v19, %v450_v17  ;;  %v458_v22 = vrot.slane %v524_v20, %v450_v17 }
 0x113   :  { %v459_v23 = vcombine.low %v451_v21, %v458_v22 }
 0x115   :  { %461 = vst [vmem:[%s788_s3] sm:$0xff] %v459_v23 }

// kernel: d_forward.24
= control target key start
LH: loop header
LB: loop body
LE: loop exit
PB: predicated region body
PF: predicated region fallthrough
CT: control target
= control target key end

     0   :  { %v600_v1 = vmov 0   ;;  %vm332_vm0 = vcmask 588800   ;;  %vm336_vm1 = vcmask 1043456   ;;  %v601_v60 = vmov 1983009808   ;;  %s781_s1 = inlined_call_operand.vmem [shape: bf16[200,512], index: 1, kind: input, shape index: {}]   ;;  %s782_s0 = inlined_call_operand.vmem [shape: bf16[4,200], index: 0, kind: input, shape index: {}]   ;;  %s783_s2 = inlined_call_operand.vmem [shape: f32[4,1], index: 2, kind: input, shape index: {}]   ;;  %s784_s3 = inlined_call_operand.vmem [shape: bf16[4,512], index: 3, kind: output, shape index: {}]  }
   0x1   :  { %v524_v0 = vld [vmem:[%s781_s1 + $0x4] ss:$16 sps:$4 sm:$0xff]   ;;  %523 = vset.pattern.permute.xlu0 %v600_v1  ;;  %v526_v2 = vld [vmem:[%s781_s1 + $0xc] ss:$16 sps:$4 sm:$0xff]   ;;  %v528_v3 = vld [vmem:[%s781_s1] ss:$16 sps:$4 sm:$0xff]   ;;  %v442_v61 = vunpack.c.l.s4 %v601_v60  ;;  %v444_v62 = vlaneseq }
   0x2   :  { %349 = vmatprep.subr.bf16.mxu0 %v524_v0  ;;  %v529_v4 = vld [vmem:[%s781_s1 + $0x8] ss:$16 sps:$4 sm:$0xff]   ;;  %390 = vmatprep.subr.bf16.mxu1 %v526_v2  ;;  %v530_v5 = vld [vmem:[%s781_s1 + $0x24] ss:$16 sps:$4 sm:$0xff]   ;;  %v532_v6 = vld [vmem:[%s781_s1 + $0x2c] ss:$16 sps:$4 sm:$0xff]  }
   0x3   :  { %350 = vmatpush1.bf16.msra.mxu0 %v528_v3  ;;  %391 = vmatpush1.bf16.msra.mxu1 %v529_v4  ;;  %v534_v7 = vld [vmem:[%s781_s1 + $0x20] ss:$16 sps:$4 sm:$0xff]   ;;  %v535_v8 = vld [vmem:[%s781_s1 + $0x28] ss:$16 sps:$4 sm:$0xff]   ;;  %v536_v9 = vld [vmem:[%s781_s1 + $0x44] ss:$16 sps:$4 sm:$0xff]   ;;  %v443_v0 = vunpack.c.0.s8 %v442_v61 }
   0x4   :  { %351 = vmatprep.subr.bf16.mxu0 %v530_v5  ;;  %392 = vmatprep.subr.bf16.mxu1 %v532_v6  ;;  %v538_v10 = vld [vmem:[%s781_s1 + $0x4c] ss:$16 sps:$4 sm:$0xff]   ;;  %v540_v11 = vld [vmem:[%s781_s1 + $0x40] ss:$16 sps:$4 sm:$0xff]   ;;  %v541_v12 = vld [vmem:[%s781_s1 + $0x48] ss:$16 sps:$4 sm:$0xff]  }
   0x5   :  { %v542_v13 = vld [vmem:[%s781_s1 + $0x64] ss:$16 sps:$4 sm:$0xff]   ;;  %v544_v14 = vld [vmem:[%s781_s1 + $0x6c] ss:$16 sps:$4 sm:$0xff]   ;;  %v546_v15 = vld [vmem:[%s781_s1 + $0x60] ss:$16 sps:$4 sm:$0xff]  }
   0x6   :  { %v547_v16 = vld [vmem:[%s781_s1 + $0x68] ss:$16 sps:$4 sm:$0xff]   ;;  %v548_v17 = vld [vmem:[%s781_s1 + $0x84] ss:$16 sps:$4 sm:$0xff]   ;;  %v550_v18 = vld [vmem:[%s781_s1 + $0x8c] ss:$16 sps:$4 sm:$0xff]  }
   0x7   :  { %352 = vmatpush1.bf16.msra.mxu0 %v534_v7  ;;  %393 = vmatpush1.bf16.msra.mxu1 %v535_v8  ;;  %v552_v19 = vld [vmem:[%s781_s1 + $0x80] ss:$16 sps:$4 sm:$0xff]   ;;  %v553_v20 = vld [vmem:[%s781_s1 + $0x88] ss:$16 sps:$4 sm:$0xff]   ;;  %v554_v21 = vld [vmem:[%s781_s1 + $0xa4] ss:$16 sps:$4 sm:$0xff]  }
   0x8   :  { %353 = vmatprep.subr.bf16.mxu0 %v536_v9  ;;  %394 = vmatprep.subr.bf16.mxu1 %v538_v10  ;;  %v556_v22 = vld [vmem:[%s781_s1 + $0xac] ss:$16 sps:$4 sm:$0xff]   ;;  %v558_v23 = vld [vmem:[%s781_s1 + $0xa0] ss:$16 sps:$4 sm:$0xff]   ;;  %v559_v24 = vld [vmem:[%s781_s1 + $0xa8] ss:$16 sps:$4 sm:$0xff]  }
   0x9   :  { %v560_v25 = vld [vmem:[%s781_s1 + $0xc4] ss:$16 sps:$4 sm:$0xff]   ;;  %v562_v26 = vld [vmem:[%s781_s1 + $0xcc] ss:$16 sps:$4 sm:$0xff]   ;;  %v564_v27 = vld [vmem:[%s781_s1 + $0xc0] ss:$16 sps:$4 sm:$0xff]  }
   0xa   :  { %v565_v28 = vld [vmem:[%s781_s1 + $0xc8] ss:$16 sps:$4 sm:$0xff]   ;;  %v566_v29 = vld [vmem:[%s781_s1 + $0xe4] ss:$16 sps:$4 sm:$0xff]   ;;  %v568_v30 = vld [vmem:[%s781_s1 + $0xec] ss:$16 sps:$4 sm:$0xff]  }
   0xb   :  { %354 = vmatpush1.bf16.msra.mxu0 %v540_v11  ;;  %395 = vmatpush1.bf16.msra.mxu1 %v541_v12  ;;  %v570_v31 = vld [vmem:[%s781_s1 + $0xe0] ss:$16 sps:$4 sm:$0xff]   ;;  %v571_v32 = vld [vmem:[%s781_s1 + $0xe8] ss:$16 sps:$4 sm:$0xff]   ;;  %v572_v33 = vld [vmem:[%s781_s1 + $0x104] ss:$16 sps:$4 sm:$0xff]  }
   0xc   :  { %355 = vmatprep.subr.bf16.mxu0 %v542_v13  ;;  %396 = vmatprep.subr.bf16.mxu1 %v544_v14  ;;  %v574_v34 = vld [vmem:[%s781_s1 + $0x10c] ss:$16 sps:$4 sm:$0xff]   ;;  %v576_v35 = vld [vmem:[%s781_s1 + $0x100] ss:$16 sps:$4 sm:$0xff]   ;;  %v577_v36 = vld [vmem:[%s781_s1 + $0x108] ss:$16 sps:$4 sm:$0xff]  }
   0xd   :  { %v462_v37 = vld.sshfl [vmem:[%s782_s0] sm:$0x33 pattern:$0x76325410]  ;;  %v578_v38 = vld [vmem:[%s781_s1 + $0x124] ss:$16 sps:$4 sm:$0xff]  }
   0xe   :  { %v580_v39 = vld [vmem:[%s781_s1 + $0x12c] ss:$16 sps:$4 sm:$0xff]   ;;  %v66_v40 = vld [vmem:[%s783_s2] sm:$0xf]  ;;  %v80_v41 = vcombine.high %v462_v37, %v462_v37  ;;  %v583_v43 = vld [vmem:[%s781_s1 + $0x128] ss:$16 sps:$4 sm:$0xff]  }
   0xf   :  { %356 = vmatpush1.bf16.msra.mxu0 %v546_v15  ;;  %397 = vmatpush1.bf16.msra.mxu1 %v547_v16  ;;  %v582_v42 = vld [vmem:[%s781_s1 + $0x120] ss:$16 sps:$4 sm:$0xff]   ;;  %v584_v44 = vld [vmem:[%s781_s1 + $0x144] ss:$16 sps:$4 sm:$0xff]   ;;  %v586_v45 = vld [vmem:[%s781_s1 + $0x14c] ss:$16 sps:$4 sm:$0xff]  }
  0x10   :  { %357 = vmatprep.subr.bf16.mxu0 %v548_v17  ;;  %398 = vmatprep.subr.bf16.mxu1 %v550_v18  ;;  %v588_v46 = vld [vmem:[%s781_s1 + $0x140] ss:$16 sps:$4 sm:$0xff]   ;;  %v589_v47 = vld [vmem:[%s781_s1 + $0x148] ss:$16 sps:$4 sm:$0xff]   ;;  %v590_v48 = vld [vmem:[%s781_s1 + $0x164] ss:$16 sps:$4 sm:$0xff]  }
  0x11   :  { %69 = vperm.xlu0 %523, %v66_v40   ;;  %516 = vmatprep.mubr.msk.bf16.mxu0 %vm332_vm0, %v80_v41  ;;  %v592_v49 = vld [vmem:[%s781_s1 + $0x16c] ss:$16 sps:$4 sm:$0xff]   ;;  %v64_v50 = vld [vmem:[%s781_s1 + $0x180] sm:$0xff]  ;;  %v595_v53 = vld [vmem:[%s781_s1 + $0x168] ss:$16 sps:$4 sm:$0xff]   ;;  %v445_v1 = vshrl.u32 %v444_v62, 7 }
  0x12   :  { %518 = vmatprep.mubr.msk.bf16.mxu1 %vm332_vm0, %v80_v41  ;;  %v65_v51 = vld [vmem:[%s781_s1 + $0x188] sm:$0xff]  ;;  %v594_v52 = vld [vmem:[%s781_s1 + $0x160] ss:$16 sps:$4 sm:$0xff]   ;;  %v512_v54 = vcombine.high %v64_v50, %v64_v50  ;;  %v511_v56 = vcombine.low %v64_v50, %v64_v50 }
  0x13   :  { %358 = vmatpush1.bf16.msra.mxu0 %v552_v19  ;;  %399 = vmatpush1.bf16.msra.mxu1 %v553_v20  ;;  %v514_v55 = vcombine.high %v65_v51, %v65_v51  ;;  %v513_v57 = vcombine.low %v65_v51, %v65_v51  ;;  %v446_v9 = vsub.s32 %v443_v0, %v445_v1 }
  0x14   :  { %359 = vmatprep.subr.bf16.mxu0 %v554_v21  ;;  %400 = vmatprep.subr.bf16.mxu1 %v556_v22  ;;  %v338_v58 = vsel %vm336_vm1, %v511_v56, 0 }
  0x15   :  { %v344_v59 = vsel %vm336_vm1, %v513_v57, 0 }
  0x17   :  { %360 = vmatpush1.bf16.msra.mxu0 %v558_v23  ;;  %401 = vmatpush1.bf16.msra.mxu1 %v559_v24 }
  0x18   :  { %361 = vmatprep.subr.bf16.mxu0 %v560_v25  ;;  %402 = vmatprep.subr.bf16.mxu1 %v562_v26 }
  0x1b   :  { %362 = vmatpush1.bf16.msra.mxu0 %v564_v27  ;;  %403 = vmatpush1.bf16.msra.mxu1 %v565_v28 }
  0x1c   :  { %363 = vmatprep.subr.bf16.mxu0 %v566_v29  ;;  %404 = vmatprep.subr.bf16.mxu1 %v568_v30 }
  0x1f   :  { %364 = vmatpush1.bf16.msra.mxu0 %v570_v31  ;;  %405 = vmatpush1.bf16.msra.mxu1 %v571_v32 }
  0x20   :  { %365 = vmatprep.subr.bf16.mxu0 %v572_v33  ;;  %406 = vmatprep.subr.bf16.mxu1 %v574_v34 }
  0x23   :  { %366 = vmatpush1.bf16.msra.mxu0 %v576_v35  ;;  %407 = vmatpush1.bf16.msra.mxu1 %v577_v36 }
  0x24   :  { %367 = vmatprep.subr.bf16.mxu0 %v578_v38  ;;  %408 = vmatprep.subr.bf16.mxu1 %v580_v39 }
  0x27   :  { %368 = vmatpush1.bf16.msra.mxu0 %v582_v42  ;;  %409 = vmatpush1.bf16.msra.mxu1 %v583_v43 }
  0x28   :  { %369 = vmatprep.subr.bf16.mxu0 %v584_v44  ;;  %410 = vmatprep.subr.bf16.mxu1 %v586_v45 }
  0x2b   :  { %370 = vmatpush1.bf16.msra.mxu0 %v588_v46  ;;  %411 = vmatpush1.bf16.msra.mxu1 %v589_v47 }
  0x2c   :  { %371 = vmatprep.subr.bf16.mxu0 %v590_v48  ;;  %412 = vmatprep.subr.bf16.mxu1 %v592_v49 }
  0x2f   :  { %372 = vmatpush1.bf16.msra.mxu0 %v594_v52  ;;  %413 = vmatpush1.bf16.msra.mxu1 %v595_v53 }
  0x30   :  { %515 = vmatprep.subr.msk.bf16.mxu0 %vm336_vm1, %v512_v54  ;;  %517 = vmatprep.subr.msk.bf16.mxu1 %vm336_vm1, %v514_v55 }
  0x33   :  { %374 = vmatpush1.bf16.msra.mxu0 %v338_v58  ;;  %415 = vmatpush1.bf16.msra.mxu1 %v344_v59 }
  0x36   :  { %382 = vmatmul.mubr.bf16.vlgmr.msra.gmra.mrb[0].mxu0 %v462_v37  ;;  %423 = vmatmul.mubr.bf16.vlgmr.msra.gmra.mrb[0].mxu1 %v462_v37 }
  0x90   :  { %v70_v63 = vpop.permute.xlu0 %69 }
 0x109   :  { %v383_v2 = vpop.f32.mrb[0].mxu0  ;;  %v424_v3 = vpop.f32.mrb[0].mxu1 }
 0x10a   :  { %v384_v4 = vadd.f32 %v383_v2, %v70_v63  ;;  %v425_v5 = vadd.f32 %v424_v3, %v70_v63  ;;  %v385_v6 = vpop.f32.mrb[1].mxu0  ;;  %v426_v7 = vpop.f32.mrb[1].mxu1 }
 0x10b   :  { %v386_v8 = vadd.f32 %v385_v6, %v70_v63  ;;  %v427_v10 = vadd.f32 %v426_v7, %v70_v63  ;;  %v387_v11 = vpop.f32.mrb[2].mxu0  ;;  %v428_v12 = vpop.f32.mrb[2].mxu1 }
 0x10c   :  { %v388_v13 = vpop.f32.mrb[3].mxu0  ;;  %v429_v14 = vpop.f32.mrb[3].mxu1 }
 0x10d   :  { %v519_v15 = vpack.c.bf16 %v386_v8, %v384_v4  ;;  %v520_v16 = vpack.c.bf16 %v427_v10, %v425_v5 }
 0x10f   :  { %v447_v17 = vrot.slane %v519_v15, %v446_v9  ;;  %v454_v18 = vrot.slane %v520_v16, %v446_v9 }
 0x111   :  { %v455_v19 = vcombine.low %v447_v17, %v454_v18 }
 0x113   :  { %457 = vst [vmem:[%s784_s3] sm:$0xff] %v455_v19 }

// kernel: d_forward.25
= control target key start
LH: loop header
LB: loop body
LE: loop exit
PB: predicated region body
PF: predicated region fallthrough
CT: control target
= control target key end

     0   :  { %v269_v1 = vmov 0   ;;  %vm89_vm0 = vcmask 1041408   ;;  %vm85_vm1 = vcmask 293888   ;;  %v270_v23 = vmov 1983009808   ;;  %s342_s1 = inlined_call_operand.vmem [shape: bf16[36,512], index: 1, kind: input, shape index: {}]   ;;  %s343_s2 = inlined_call_operand.vmem [shape: f32[4,1], index: 2, kind: input, shape index: {}]   ;;  %s344_s0 = inlined_call_operand.vmem [shape: bf16[4,36], index: 0, kind: input, shape index: {}]   ;;  %s345_s3 = inlined_call_operand.vmem [shape: bf16[4,512], index: 3, kind: input, shape index: {}]   ;;  %s346_s4 = inlined_call_operand.vmem [shape: bf16[4,512], index: 4, kind: output, shape index: {}]  }
   0x1   :  { %v253_v0 = vld [vmem:[%s342_s1 + $0x4] ss:$16 sps:$4 sm:$0xff]   ;;  %134 = vmatprep.mubr.bf16.mxu0 %v269_v1  ;;  %175 = vmatprep.mubr.bf16.mxu1 %v269_v1  ;;  %v255_v2 = vld [vmem:[%s342_s1 + $0xc] ss:$16 sps:$4 sm:$0xff]   ;;  %v257_v3 = vld [vmem:[%s342_s1] ss:$16 sps:$4 sm:$0xff]   ;;  %v212_v24 = vunpack.c.l.s4 %v270_v23  ;;  %v214_v25 = vlaneseq }
   0x2   :  { %252 = vset.pattern.permute.xlu0 %v269_v1  ;;  %102 = vmatprep.subr.bf16.mxu0 %v253_v0  ;;  %v258_v4 = vld [vmem:[%s342_s1 + $0x8] ss:$16 sps:$4 sm:$0xff]   ;;  %v259_v5 = vld [vmem:[%s342_s1 + $0x24] ss:$16 sps:$4 sm:$0xff]   ;;  %v261_v6 = vld [vmem:[%s342_s1 + $0x2c] ss:$16 sps:$4 sm:$0xff]  }
   0x3   :  { %143 = vmatprep.subr.bf16.mxu1 %v255_v2  ;;  %103 = vmatpush1.bf16.msra.mxu0 %v257_v3  ;;  %v263_v7 = vld [vmem:[%s342_s1 + $0x20] ss:$16 sps:$4 sm:$0xff]   ;;  %v264_v8 = vld [vmem:[%s342_s1 + $0x28] ss:$16 sps:$4 sm:$0xff]   ;;  %v213_v35 = vunpack.c.0.s8 %v212_v24  ;;  %v215_v36 = vshrl.u32 %v214_v25, 7 }
   0x4   :  { %144 = vmatpush1.bf16.msra.mxu1 %v258_v4  ;;  %104 = vmatprep.subr.bf16.mxu0 %v259_v5  ;;  %v27_v9 = vld [vmem:[%s342_s1 + $0x40] sm:$0x33]  ;;  %v28_v10 = vld [vmem:[%s342_s1 + $0x48] sm:$0x33] }
   0x5   :  { %145 = vmatprep.subr.bf16.mxu1 %v261_v6  ;;  %v241_v11 = vcombine.high %v27_v9, %v27_v9  ;;  %v243_v12 = vcombine.high %v28_v10, %v28_v10  ;;  %v240_v13 = vcombine.low %v27_v9, %v27_v9  ;;  %v242_v14 = vcombine.low %v28_v10, %v28_v10  ;;  %v29_v15 = vld [vmem:[%s343_s2] sm:$0xf] }
   0x6   :  { %32 = vperm.xlu0 %252, %v29_v15   ;;  %v18_v18 = vld [vmem:[%s344_s0] sm:$0x3]  ;;  %v216_v49 = vsub.s32 %v213_v35, %v215_v36 }
   0x7   :  { %105 = vmatpush1.bf16.msra.mxu0 %v263_v7  ;;  %v91_v16 = vsel %vm89_vm0, %v240_v13, 0  ;;  %v97_v17 = vsel %vm89_vm0, %v242_v14, 0  ;;  %v184_v19 = vld [vmem:[%s345_s3] sm:$0xff] }
   0x8   :  { %146 = vmatpush1.bf16.msra.mxu1 %v264_v8  ;;  %244 = vmatprep.subr.msk.bf16.mxu0 %vm89_vm0, %v241_v11  ;;  %v185_v20 = vunpack.c.l.bf16 %v184_v19  ;;  %v186_v21 = vunpack.c.h.bf16 %v184_v19 }
   0x9   :  { %246 = vmatprep.subr.msk.bf16.mxu1 %vm89_vm0, %v243_v12 }
   0xa   :  { %v189_v28 = vcombine.high %v185_v20, %v185_v20  ;;  %v190_v29 = vcombine.high %v186_v21, %v186_v21 }
   0xb   :  { %107 = vmatpush1.bf16.msra.mxu0 %v91_v16 }
   0xc   :  { %148 = vmatpush1.bf16.msra.mxu1 %v97_v17 }
   0xe   :  { %245 = vmatmul.mubr.msk.bf16.vlgmr.msra.gmra.mrb[0].mxu0 %vm85_vm1, %v18_v18 }
   0xf   :  { %247 = vmatmul.mubr.msk.bf16.vlgmr.msra.gmra.mrb[0].mxu1 %vm85_vm1, %v18_v18 }
  0x85   :  { %v33_v22 = vpop.permute.xlu0 %32 }
  0xe1   :  { %v136_v26 = vpop.f32.mrb[0].mxu0 }
  0xe2   :  { %v177_v27 = vpop.f32.mrb[0].mxu1  ;;  %v137_v30 = vadd.f32 %v136_v26, %v33_v22  ;;  %v138_v32 = vpop.f32.mrb[1].mxu0 }
  0xe3   :  { %v178_v31 = vadd.f32 %v177_v27, %v33_v22  ;;  %v179_v33 = vpop.f32.mrb[1].mxu1  ;;  %v139_v34 = vadd.f32 %v138_v32, %v33_v22  ;;  %v140_v38 = vpop.f32.mrb[2].mxu0 }
  0xe4   :  { %v180_v37 = vadd.f32 %v179_v33, %v33_v22  ;;  %v181_v39 = vpop.f32.mrb[2].mxu1  ;;  %v193_v40 = vadd.f32 %v185_v20, %v137_v30  ;;  %v141_v42 = vpop.f32.mrb[3].mxu0 }
  0xe5   :  { %v195_v41 = vadd.f32 %v186_v21, %v178_v31  ;;  %v182_v43 = vpop.f32.mrb[3].mxu1  ;;  %v194_v44 = vadd.f32 %v189_v28, %v139_v34 }
  0xe6   :  { %v196_v45 = vadd.f32 %v190_v29, %v180_v37  ;;  %v197_v46 = vmax.f32 %v193_v40, 0.0 }
  0xe7   :  { %v199_v47 = vmax.f32 %v195_v41, 0.0  ;;  %v198_v48 = vmax.f32 %v194_v44, 0.0 }
  0xe8   :  { %v200_v50 = vmax.f32 %v196_v45, 0.0 }
  0xe9   :  { %v248_v51 = vpack.c.bf16 %v198_v48, %v197_v46 }
  0xea   :  { %v249_v52 = vpack.c.bf16 %v200_v50, %v199_v47 }
  0xeb   :  { %v217_v53 = vrot.slane %v248_v51, %v216_v49 }
  0xec   :  { %v224_v54 = vrot.slane %v249_v52, %v216_v49 }
  0xee   :  { %v225_v55 = vcombine.low %v217_v53, %v224_v54 }
  0xf0   :  { %227 = vst [vmem:[%s346_s4] sm:$0xff] %v225_v55 }

// kernel: d_forward.26
= control target key start
LH: loop header
LB: loop body
LE: loop exit
PB: predicated region body
PF: predicated region fallthrough
CT: control target
= control target key end

     0   :  { %vm644_vm0 = vcmask 257024   ;;  %s1619_s0 = inlined_call_operand.vmem [shape: bf16[8,32,32], index: 0, kind: input, shape index: {}]   ;;  %s1620_s1 = inlined_call_operand.vmem [shape: bf16[8,32,32], index: 1, kind: input, shape index: {}]   ;;  %s1621_s2 = inlined_call_operand.vmem [shape: bf16[8,32,32], index: 2, kind: input, shape index: {}]   ;;  %s1622_s3 = inlined_call_operand.vmem [shape: bf16[8,32,32], index: 3, kind: input, shape index: {}]   ;;  %s1623_s4 = inlined_call_operand.vmem [shape: f32[4,32,32], index: 4, kind: input, shape index: {}]   ;;  %s1624_s5 = inlined_call_operand.vmem [shape: bf16[8,32,32], index: 5, kind: output, shape index: {}]  }
   0x1   :  { %v1094_v0 = vld [vmem:[%s1623_s4] sm:$0xff]  ;;  %v1126_v10 = vld [vmem:[%s1623_s4 + $0x8] sm:$0xff]  ;;  %v1150_v24 = vld [vmem:[%s1623_s4 + $0x10] sm:$0xff] }
   0x2   :  { %v1099_v1 = vld [vmem:[%s1623_s4 + $0x20] sm:$0xff]  ;;  %v1131_v15 = vld [vmem:[%s1623_s4 + $0x28] sm:$0xff]  ;;  %v1155_v25 = vld [vmem:[%s1623_s4 + $0x30] sm:$0xff] }
   0x3   :  { %v1104_v2 = vld [vmem:[%s1623_s4 + $0x40] sm:$0xff]  ;;  %v1136_v16 = vld [vmem:[%s1623_s4 + $0x48] sm:$0xff]  ;;  %v1160_v26 = vld [vmem:[%s1623_s4 + $0x50] sm:$0xff] }
   0x4   :  { %v1109_v3 = vld [vmem:[%s1623_s4 + $0x60] sm:$0xff]  ;;  %v1141_v17 = vld [vmem:[%s1623_s4 + $0x68] sm:$0xff]  ;;  %v1169_v31 = vld [vmem:[%s1623_s4 + $0x70] sm:$0xff] }
   0x5   :  { %v746_v4 = vld [vmem:[%s1619_s0] sm:$0xff]   ;;  %v1001_v32 = vld [vmem:[%s1619_s0 + $0x8] sm:$0xff]   ;;  %v1186_v40 = vld [vmem:[%s1623_s4 + $0x18] sm:$0xff] }
   0x6   :  { %v810_v5 = vld [vmem:[%s1620_s1] sm:$0xff]   ;;  %v747_v6 = vunpack.c.l.bf16 %v746_v4  ;;  %v748_v11 = vunpack.c.h.bf16 %v746_v4  ;;  %v1016_v33 = vld [vmem:[%s1620_s1 + $0x8] sm:$0xff]   ;;  %v751_v36 = vunpack.c.l.bf16 %v1001_v32  ;;  %v1191_v43 = vld [vmem:[%s1623_s4 + $0x38] sm:$0xff]  ;;  %v752_v44 = vunpack.c.h.bf16 %v1001_v32 }
   0x7   :  { %v811_v7 = vunpack.c.l.bf16 %v810_v5  ;;  %v874_v8 = vld [vmem:[%s1621_s2] sm:$0xff]   ;;  %v812_v12 = vunpack.c.h.bf16 %v810_v5  ;;  %v815_v37 = vunpack.c.l.bf16 %v1016_v33  ;;  %v1031_v38 = vld [vmem:[%s1621_s2 + $0x8] sm:$0xff]   ;;  %v816_v45 = vunpack.c.h.bf16 %v1016_v33  ;;  %v1002_v50 = vld [vmem:[%s1619_s0 + $0x10] sm:$0xff]  }
   0x8   :  { %v938_v9 = vld [vmem:[%s1622_s3] sm:$0xff]   ;;  %v875_v13 = vunpack.c.l.bf16 %v874_v8  ;;  %v876_v18 = vunpack.c.h.bf16 %v874_v8  ;;  %v100_v20 = vmul.f32 %v747_v6, %v1094_v0  ;;  %v101_v22 = vmul.f32 %v748_v11, %v1126_v10  ;;  %v1046_v39 = vld [vmem:[%s1622_s3 + $0x8] sm:$0xff]   ;;  %v1017_v51 = vld [vmem:[%s1620_s1 + $0x10] sm:$0xff]  }
   0x9   :  { %v939_v14 = vunpack.c.l.bf16 %v938_v9  ;;  %v940_v19 = vunpack.c.h.bf16 %v938_v9  ;;  %v196_v21 = vmul.f32 %v811_v7, %v1099_v1  ;;  %v197_v23 = vmul.f32 %v812_v12, %v1131_v15  ;;  %v1206_v54 = vld [vmem:[%s1623_s4 + $0x58] sm:$0xff]  ;;  %v1032_v62 = vld [vmem:[%s1621_s2 + $0x10] sm:$0xff]  }
   0xa   :  { %v324_v27 = vmul.f32 %v875_v13, %v1104_v2  ;;  %v325_v29 = vmul.f32 %v876_v18, %v1136_v16  ;;  %v879_v41 = vunpack.c.l.bf16 %v1031_v38  ;;  %v943_v42 = vunpack.c.l.bf16 %v1046_v39  ;;  %v1213_v60 = vld [vmem:[%s1623_s4 + $0x78] sm:$0xff]  ;;  %v1047_v7 = vld [vmem:[%s1622_s3 + $0x10] sm:$0xff]  }
   0xb   :  { %v452_v28 = vmul.f32 %v939_v14, %v1109_v3  ;;  %v453_v30 = vmul.f32 %v940_v19, %v1141_v17  ;;  %v228_v34 = vadd.f32 %v196_v21, %v100_v20  ;;  %v229_v35 = vadd.f32 %v197_v23, %v101_v22  ;;  %v1003_v32 = vld [vmem:[%s1619_s0 + $0x18] sm:$0xff]  }
   0xc   :  { %v102_v48 = vmul.f32 %v751_v36, %v1150_v24  ;;  %v198_v49 = vmul.f32 %v815_v37, %v1155_v25  ;;  %v326_v52 = vmul.f32 %v879_v41, %v1160_v26  ;;  %v454_v53 = vmul.f32 %v943_v42, %v1169_v31  ;;  %v1018_v33 = vld [vmem:[%s1620_s1 + $0x18] sm:$0xff]  }
   0xd   :  { %v356_v46 = vadd.f32 %v324_v27, %v228_v34  ;;  %v357_v47 = vadd.f32 %v325_v29, %v229_v35  ;;  %v103_v55 = vmul.f32 %v752_v44, %v1186_v40  ;;  %v199_v56 = vmul.f32 %v816_v45, %v1191_v43  ;;  %v1033_v34 = vld [vmem:[%s1621_s2 + $0x18] sm:$0xff]  }
   0xe   :  { %v230_v59 = vadd.f32 %v198_v49, %v102_v48  ;;  %v880_v61 = vunpack.c.h.bf16 %v1031_v38  ;;  %v944_v4 = vunpack.c.h.bf16 %v1046_v39  ;;  %v755_v5 = vunpack.c.l.bf16 %v1002_v50  ;;  %v1048_v39 = vld [vmem:[%s1622_s3 + $0x18] sm:$0xff]  }
   0xf   :  { %v484_v57 = vadd.f32 %v452_v28, %v356_v46  ;;  %v485_v58 = vadd.f32 %v453_v30, %v357_v47  ;;  %v231_v63 = vadd.f32 %v199_v56, %v103_v55  ;;  %v819_v6 = vunpack.c.l.bf16 %v1017_v51 }
  0x10   :  { %v358_v11 = vadd.f32 %v326_v52, %v230_v59  ;;  %v327_v12 = vmul.f32 %v880_v61, %v1206_v54  ;;  %v455_v13 = vmul.f32 %v944_v4, %v1213_v60  ;;  %v104_v14 = vmul.f32 %v755_v5, %v1094_v0  ;;  %v1004_v59 = vld [vmem:[%s1619_s0 + $0x20] sm:$0xff]  }
  0x11   :  { %v713_v8 = vpack.c.bf16 %v484_v57, %v484_v57  ;;  %v714_v9 = vpack.c.bf16 %v485_v58, %v485_v58  ;;  %v200_v18 = vmul.f32 %v819_v6, %v1099_v1  ;;  %v883_v19 = vunpack.c.l.bf16 %v1032_v62  ;;  %v1019_v61 = vld [vmem:[%s1620_s1 + $0x20] sm:$0xff]  }
  0x12   :  { %v486_v20 = vadd.f32 %v454_v53, %v358_v11  ;;  %v359_v21 = vadd.f32 %v327_v12, %v231_v63  ;;  %v947_v22 = vunpack.c.l.bf16 %v1047_v7  ;;  %v756_v23 = vunpack.c.h.bf16 %v1002_v50  ;;  %v1034_v6 = vld [vmem:[%s1621_s2 + $0x20] sm:$0xff]  }
  0x13   :  { %645 = vst.msk [vmem:[%s1624_s5] sm:$0xf] %vm644_vm0, %v713_v8  ;;  %646 = vst.msk [vmem:[%s1624_s5 + $0x4] sm:$0xf] %vm644_vm0, %v714_v9  ;;  %v232_v27 = vadd.f32 %v200_v18, %v104_v14  ;;  %v328_v28 = vmul.f32 %v883_v19, %v1104_v2  ;;  %v820_v29 = vunpack.c.h.bf16 %v1017_v51  ;;  %v884_v30 = vunpack.c.h.bf16 %v1032_v62  ;;  %v1049_v19 = vld [vmem:[%s1622_s3 + $0x20] sm:$0xff]  }
  0x14   :  { %v715_v35 = vpack.c.bf16 %v486_v20, %v486_v20  ;;  %v487_v36 = vadd.f32 %v455_v13, %v359_v21  ;;  %v456_v37 = vmul.f32 %v947_v22, %v1109_v3  ;;  %v105_v38 = vmul.f32 %v756_v23, %v1126_v10 }
  0x15   :  { %v360_v41 = vadd.f32 %v328_v28, %v232_v27  ;;  %v201_v42 = vmul.f32 %v820_v29, %v1131_v15  ;;  %v329_v44 = vmul.f32 %v884_v30, %v1136_v16  ;;  %v948_v45 = vunpack.c.h.bf16 %v1047_v7 }
  0x16   :  { %647 = vst.msk [vmem:[%s1624_s5 + $0x8] sm:$0xf] %vm644_vm0, %v715_v35  ;;  %v716_v46 = vpack.c.bf16 %v487_v36, %v487_v36  ;;  %v759_v47 = vunpack.c.l.bf16 %v1003_v32  ;;  %v823_v48 = vunpack.c.l.bf16 %v1018_v33  ;;  %v887_v49 = vunpack.c.l.bf16 %v1033_v34 }
  0x17   :  { %v488_v50 = vadd.f32 %v456_v37, %v360_v41  ;;  %v233_v51 = vadd.f32 %v201_v42, %v105_v38  ;;  %v457_v52 = vmul.f32 %v948_v45, %v1141_v17  ;;  %v951_v53 = vunpack.c.l.bf16 %v1048_v39  ;;  %v1005_v41 = vld [vmem:[%s1619_s0 + $0x28] sm:$0xff]  }
  0x18   :  { %648 = vst.msk [vmem:[%s1624_s5 + $0xc] sm:$0xf] %vm644_vm0, %v716_v46  ;;  %v106_v55 = vmul.f32 %v759_v47, %v1150_v24  ;;  %v202_v56 = vmul.f32 %v823_v48, %v1155_v25  ;;  %v330_v57 = vmul.f32 %v887_v49, %v1160_v26  ;;  %v760_v58 = vunpack.c.h.bf16 %v1003_v32  ;;  %v1020_v42 = vld [vmem:[%s1620_s1 + $0x28] sm:$0xff]  }
  0x19   :  { %v717_v62 = vpack.c.bf16 %v488_v50, %v488_v50  ;;  %v361_v63 = vadd.f32 %v329_v44, %v233_v51  ;;  %v458_v4 = vmul.f32 %v951_v53, %v1169_v31  ;;  %v824_v5 = vunpack.c.h.bf16 %v1018_v33  ;;  %v1035_v44 = vld [vmem:[%s1621_s2 + $0x28] sm:$0xff]  }
  0x1a   :  { %v234_v7 = vadd.f32 %v202_v56, %v106_v55  ;;  %v107_v8 = vmul.f32 %v760_v58, %v1186_v40  ;;  %v888_v9 = vunpack.c.h.bf16 %v1033_v34  ;;  %v952_v11 = vunpack.c.h.bf16 %v1048_v39  ;;  %v1050_v49 = vld [vmem:[%s1622_s3 + $0x28] sm:$0xff]  }
  0x1b   :  { %649 = vst.msk [vmem:[%s1624_s5 + $0x10] sm:$0xf] %vm644_vm0, %v717_v62  ;;  %v489_v12 = vadd.f32 %v457_v52, %v361_v63  ;;  %v203_v13 = vmul.f32 %v824_v5, %v1191_v43  ;;  %v763_v14 = vunpack.c.l.bf16 %v1004_v59  ;;  %v827_v18 = vunpack.c.l.bf16 %v1019_v61 }
  0x1c   :  { %v362_v20 = vadd.f32 %v330_v57, %v234_v7  ;;  %v331_v21 = vmul.f32 %v888_v9, %v1206_v54  ;;  %v459_v22 = vmul.f32 %v952_v11, %v1213_v60  ;;  %v891_v23 = vunpack.c.l.bf16 %v1034_v6  ;;  %v1021_v9 = vld [vmem:[%s1620_s1 + $0x30] sm:$0xff]  }
  0x1d   :  { %v718_v27 = vpack.c.bf16 %v489_v12, %v489_v12  ;;  %v235_v28 = vadd.f32 %v203_v13, %v107_v8  ;;  %v108_v29 = vmul.f32 %v763_v14, %v1094_v0  ;;  %v204_v30 = vmul.f32 %v827_v18, %v1099_v1  ;;  %v1006_v8 = vld [vmem:[%s1619_s0 + $0x30] sm:$0xff]  }
  0x1e   :  { %v490_v32 = vadd.f32 %v458_v4, %v362_v20  ;;  %v332_v33 = vmul.f32 %v891_v23, %v1104_v2  ;;  %v955_v34 = vunpack.c.l.bf16 %v1049_v19  ;;  %v764_v35 = vunpack.c.h.bf16 %v1004_v59  ;;  %v1036_v18 = vld [vmem:[%s1621_s2 + $0x30] sm:$0xff]  }
  0x1f   :  { %650 = vst.msk [vmem:[%s1624_s5 + $0x14] sm:$0xf] %vm644_vm0, %v718_v27  ;;  %v363_v36 = vadd.f32 %v331_v21, %v235_v28  ;;  %v236_v37 = vadd.f32 %v204_v30, %v108_v29  ;;  %v828_v38 = vunpack.c.h.bf16 %v1019_v61  ;;  %v892_v39 = vunpack.c.h.bf16 %v1034_v6  ;;  %v1051_v30 = vld [vmem:[%s1622_s3 + $0x30] sm:$0xff]  }
  0x20   :  { %v719_v45 = vpack.c.bf16 %v490_v32, %v490_v32  ;;  %v460_v46 = vmul.f32 %v955_v34, %v1109_v3  ;;  %v109_v47 = vmul.f32 %v764_v35, %v1126_v10  ;;  %v956_v48 = vunpack.c.h.bf16 %v1049_v19 }
  0x21   :  { %v491_v50 = vadd.f32 %v459_v22, %v363_v36  ;;  %v364_v51 = vadd.f32 %v332_v33, %v236_v37  ;;  %v205_v52 = vmul.f32 %v828_v38, %v1131_v15  ;;  %v333_v53 = vmul.f32 %v892_v39, %v1136_v16 }
  0x22   :  { %651 = vst.msk [vmem:[%s1624_s5 + $0x18] sm:$0xf] %vm644_vm0, %v719_v45  ;;  %v461_v55 = vmul.f32 %v956_v48, %v1141_v17  ;;  %v767_v56 = vunpack.c.l.bf16 %v1005_v41  ;;  %v831_v57 = vunpack.c.l.bf16 %v1020_v42  ;;  %v895_v58 = vunpack.c.l.bf16 %v1035_v44 }
  0x23   :  { %v720_v59 = vpack.c.bf16 %v491_v50, %v491_v50  ;;  %v492_v61 = vadd.f32 %v460_v46, %v364_v51  ;;  %v237_v62 = vadd.f32 %v205_v52, %v109_v47  ;;  %v959_v63 = vunpack.c.l.bf16 %v1050_v49  ;;  %v1007_v50 = vld [vmem:[%s1619_s0 + $0x38] sm:$0xff]  }
  0x24   :  { %v110_v4 = vmul.f32 %v767_v56, %v1150_v24  ;;  %v206_v5 = vmul.f32 %v831_v57, %v1155_v25  ;;  %v334_v6 = vmul.f32 %v895_v58, %v1160_v26  ;;  %v768_v7 = vunpack.c.h.bf16 %v1005_v41  ;;  %v1022_v51 = vld [vmem:[%s1620_s1 + $0x38] sm:$0xff]  }
  0x25   :  { %652 = vst.msk [vmem:[%s1624_s5 + $0x1c] sm:$0xf] %vm644_vm0, %v720_v59  ;;  %v721_v11 = vpack.c.bf16 %v492_v61, %v492_v61  ;;  %v365_v12 = vadd.f32 %v333_v53, %v237_v62  ;;  %v462_v13 = vmul.f32 %v959_v63, %v1169_v31  ;;  %v832_v14 = vunpack.c.h.bf16 %v1020_v42  ;;  %v1037_v52 = vld [vmem:[%s1621_s2 + $0x38] sm:$0xff]  }
  0x26   :  { %v238_v19 = vadd.f32 %v206_v5, %v110_v4  ;;  %v111_v20 = vmul.f32 %v768_v7, %v1186_v40  ;;  %v896_v21 = vunpack.c.h.bf16 %v1035_v44  ;;  %v960_v22 = vunpack.c.h.bf16 %v1050_v49  ;;  %v1052_v58 = vld [vmem:[%s1622_s3 + $0x38] sm:$0xff]  }
  0x27   :  { %653 = vst.msk [vmem:[%s1624_s5 + $0x20] sm:$0xf] %vm644_vm0, %v721_v11  ;;  %v493_v23 = vadd.f32 %v461_v55, %v365_v12  ;;  %v207_v27 = vmul.f32 %v832_v14, %v1191_v43  ;;  %v771_v28 = vunpack.c.l.bf16 %v1006_v8  ;;  %v835_v29 = vunpack.c.l.bf16 %v1021_v9 }
  0x28   :  { %v366_v32 = vadd.f32 %v334_v6, %v238_v19  ;;  %v335_v33 = vmul.f32 %v896_v21, %v1206_v54  ;;  %v463_v34 = vmul.f32 %v960_v22, %v1213_v60  ;;  %v899_v35 = vunpack.c.l.bf16 %v1036_v18  ;;  %v1023_v21 = vld [vmem:[%s1620_s1 + $0x40] sm:$0xff]  }
  0x29   :  { %v722_v36 = vpack.c.bf16 %v493_v23, %v493_v23  ;;  %v239_v37 = vadd.f32 %v207_v27, %v111_v20  ;;  %v112_v38 = vmul.f32 %v771_v28, %v1094_v0  ;;  %v208_v39 = vmul.f32 %v835_v29, %v1099_v1  ;;  %v1008_v20 = vld [vmem:[%s1619_s0 + $0x40] sm:$0xff]  }
  0x2a   :  { %v494_v41 = vadd.f32 %v462_v13, %v366_v32  ;;  %v336_v42 = vmul.f32 %v899_v35, %v1104_v2  ;;  %v963_v44 = vunpack.c.l.bf16 %v1051_v30  ;;  %v772_v45 = vunpack.c.h.bf16 %v1006_v8  ;;  %v1038_v29 = vld [vmem:[%s1621_s2 + $0x40] sm:$0xff]  }
  0x2b   :  { %654 = vst.msk [vmem:[%s1624_s5 + $0x24] sm:$0xf] %vm644_vm0, %v722_v36  ;;  %v367_v46 = vadd.f32 %v335_v33, %v239_v37  ;;  %v240_v47 = vadd.f32 %v208_v39, %v112_v38  ;;  %v836_v48 = vunpack.c.h.bf16 %v1021_v9  ;;  %v900_v49 = vunpack.c.h.bf16 %v1036_v18  ;;  %v1053_v39 = vld [vmem:[%s1622_s3 + $0x40] sm:$0xff]  }
  0x2c   :  { %v723_v53 = vpack.c.bf16 %v494_v41, %v494_v41  ;;  %v464_v55 = vmul.f32 %v963_v44, %v1109_v3  ;;  %v113_v56 = vmul.f32 %v772_v45, %v1126_v10  ;;  %v964_v57 = vunpack.c.h.bf16 %v1051_v30 }
  0x2d   :  { %v495_v59 = vadd.f32 %v463_v34, %v367_v46  ;;  %v368_v61 = vadd.f32 %v336_v42, %v240_v47  ;;  %v209_v62 = vmul.f32 %v836_v48, %v1131_v15  ;;  %v337_v63 = vmul.f32 %v900_v49, %v1136_v16 }
  0x2e   :  { %655 = vst.msk [vmem:[%s1624_s5 + $0x28] sm:$0xf] %vm644_vm0, %v723_v53  ;;  %v465_v4 = vmul.f32 %v964_v57, %v1141_v17  ;;  %v775_v5 = vunpack.c.l.bf16 %v1007_v50  ;;  %v839_v6 = vunpack.c.l.bf16 %v1022_v51  ;;  %v903_v7 = vunpack.c.l.bf16 %v1037_v52 }
  0x2f   :  { %v724_v8 = vpack.c.bf16 %v495_v59, %v495_v59  ;;  %v496_v9 = vadd.f32 %v464_v55, %v368_v61  ;;  %v241_v11 = vadd.f32 %v209_v62, %v113_v56  ;;  %v967_v12 = vunpack.c.l.bf16 %v1052_v58  ;;  %v1009_v59 = vld [vmem:[%s1619_s0 + $0x48] sm:$0xff]  }
  0x30   :  { %v114_v13 = vmul.f32 %v775_v5, %v1150_v24  ;;  %v210_v14 = vmul.f32 %v839_v6, %v1155_v25  ;;  %v338_v18 = vmul.f32 %v903_v7, %v1160_v26  ;;  %v776_v19 = vunpack.c.h.bf16 %v1007_v50  ;;  %v1024_v61 = vld [vmem:[%s1620_s1 + $0x48] sm:$0xff]  }
  0x31   :  { %656 = vst.msk [vmem:[%s1624_s5 + $0x2c] sm:$0xf] %vm644_vm0, %v724_v8  ;;  %v725_v22 = vpack.c.bf16 %v496_v9, %v496_v9  ;;  %v369_v23 = vadd.f32 %v337_v63, %v241_v11  ;;  %v466_v27 = vmul.f32 %v967_v12, %v1169_v31  ;;  %v840_v28 = vunpack.c.h.bf16 %v1022_v51  ;;  %v1039_v62 = vld [vmem:[%s1621_s2 + $0x48] sm:$0xff]  }
  0x32   :  { %v242_v30 = vadd.f32 %v210_v14, %v114_v13  ;;  %v115_v32 = vmul.f32 %v776_v19, %v1186_v40  ;;  %v904_v33 = vunpack.c.h.bf16 %v1037_v52  ;;  %v968_v34 = vunpack.c.h.bf16 %v1052_v58  ;;  %v1054_v7 = vld [vmem:[%s1622_s3 + $0x48] sm:$0xff]  }
  0x33   :  { %657 = vst.msk [vmem:[%s1624_s5 + $0x30] sm:$0xf] %vm644_vm0, %v725_v22  ;;  %v497_v35 = vadd.f32 %v465_v4, %v369_v23  ;;  %v211_v36 = vmul.f32 %v840_v28, %v1191_v43  ;;  %v779_v37 = vunpack.c.l.bf16 %v1008_v20  ;;  %v843_v38 = vunpack.c.l.bf16 %v1023_v21 }
  0x34   :  { %v370_v41 = vadd.f32 %v338_v18, %v242_v30  ;;  %v339_v42 = vmul.f32 %v904_v33, %v1206_v54  ;;  %v467_v44 = vmul.f32 %v968_v34, %v1213_v60  ;;  %v907_v45 = vunpack.c.l.bf16 %v1038_v29  ;;  %v1025_v33 = vld [vmem:[%s1620_s1 + $0x50] sm:$0xff]  }
  0x35   :  { %v726_v46 = vpack.c.bf16 %v497_v35, %v497_v35  ;;  %v243_v47 = vadd.f32 %v211_v36, %v115_v32  ;;  %v116_v48 = vmul.f32 %v779_v37, %v1094_v0  ;;  %v212_v49 = vmul.f32 %v843_v38, %v1099_v1  ;;  %v1010_v32 = vld [vmem:[%s1619_s0 + $0x50] sm:$0xff]  }
  0x36   :  { %v498_v50 = vadd.f32 %v466_v27, %v370_v41  ;;  %v340_v51 = vmul.f32 %v907_v45, %v1104_v2  ;;  %v971_v52 = vunpack.c.l.bf16 %v1053_v39  ;;  %v780_v53 = vunpack.c.h.bf16 %v1008_v20  ;;  %v1040_v38 = vld [vmem:[%s1621_s2 + $0x50] sm:$0xff]  }
  0x37   :  { %658 = vst.msk [vmem:[%s1624_s5 + $0x34] sm:$0xf] %vm644_vm0, %v726_v46  ;;  %v371_v55 = vadd.f32 %v339_v42, %v243_v47  ;;  %v244_v56 = vadd.f32 %v212_v49, %v116_v48  ;;  %v844_v57 = vunpack.c.h.bf16 %v1023_v21  ;;  %v908_v58 = vunpack.c.h.bf16 %v1038_v29  ;;  %v1055_v49 = vld [vmem:[%s1622_s3 + $0x50] sm:$0xff]  }
  0x38   :  { %v727_v63 = vpack.c.bf16 %v498_v50, %v498_v50  ;;  %v468_v4 = vmul.f32 %v971_v52, %v1109_v3  ;;  %v117_v5 = vmul.f32 %v780_v53, %v1126_v10  ;;  %v972_v6 = vunpack.c.h.bf16 %v1053_v39 }
  0x39   :  { %v499_v8 = vadd.f32 %v467_v44, %v371_v55  ;;  %v372_v9 = vadd.f32 %v340_v51, %v244_v56  ;;  %v213_v11 = vmul.f32 %v844_v57, %v1131_v15  ;;  %v341_v12 = vmul.f32 %v908_v58, %v1136_v16 }
  0x3a   :  { %659 = vst.msk [vmem:[%s1624_s5 + $0x38] sm:$0xf] %vm644_vm0, %v727_v63  ;;  %v469_v13 = vmul.f32 %v972_v6, %v1141_v17  ;;  %v783_v14 = vunpack.c.l.bf16 %v1009_v59  ;;  %v847_v18 = vunpack.c.l.bf16 %v1024_v61  ;;  %v911_v19 = vunpack.c.l.bf16 %v1039_v62 }
  0x3b   :  { %v728_v20 = vpack.c.bf16 %v499_v8, %v499_v8  ;;  %v500_v21 = vadd.f32 %v468_v4, %v372_v9  ;;  %v245_v22 = vadd.f32 %v213_v11, %v117_v5  ;;  %v975_v23 = vunpack.c.l.bf16 %v1054_v7  ;;  %v1011_v8 = vld [vmem:[%s1619_s0 + $0x58] sm:$0xff]  }
  0x3c   :  { %v118_v27 = vmul.f32 %v783_v14, %v1150_v24  ;;  %v214_v28 = vmul.f32 %v847_v18, %v1155_v25  ;;  %v342_v29 = vmul.f32 %v911_v19, %v1160_v26  ;;  %v784_v30 = vunpack.c.h.bf16 %v1009_v59  ;;  %v1026_v9 = vld [vmem:[%s1620_s1 + $0x58] sm:$0xff]  }
  0x3d   :  { %660 = vst.msk [vmem:[%s1624_s5 + $0x3c] sm:$0xf] %vm644_vm0, %v728_v20  ;;  %v729_v34 = vpack.c.bf16 %v500_v21, %v500_v21  ;;  %v373_v35 = vadd.f32 %v341_v12, %v245_v22  ;;  %v470_v36 = vmul.f32 %v975_v23, %v1169_v31  ;;  %v848_v37 = vunpack.c.h.bf16 %v1024_v61  ;;  %v1041_v11 = vld [vmem:[%s1621_s2 + $0x58] sm:$0xff]  }
  0x3e   :  { %v246_v39 = vadd.f32 %v214_v28, %v118_v27  ;;  %v119_v41 = vmul.f32 %v784_v30, %v1186_v40  ;;  %v912_v42 = vunpack.c.h.bf16 %v1039_v62  ;;  %v976_v44 = vunpack.c.h.bf16 %v1054_v7  ;;  %v1056_v19 = vld [vmem:[%s1622_s3 + $0x58] sm:$0xff]  }
  0x3f   :  { %661 = vst.msk [vmem:[%s1624_s5 + $0x40] sm:$0xf] %vm644_vm0, %v729_v34  ;;  %v501_v45 = vadd.f32 %v469_v13, %v373_v35  ;;  %v215_v46 = vmul.f32 %v848_v37, %v1191_v43  ;;  %v787_v47 = vunpack.c.l.bf16 %v1010_v32  ;;  %v851_v48 = vunpack.c.l.bf16 %v1025_v33 }
  0x40   :  { %v374_v50 = vadd.f32 %v342_v29, %v246_v39  ;;  %v343_v51 = vmul.f32 %v912_v42, %v1206_v54  ;;  %v471_v52 = vmul.f32 %v976_v44, %v1213_v60  ;;  %v915_v53 = vunpack.c.l.bf16 %v1040_v38  ;;  %v1027_v42 = vld [vmem:[%s1620_s1 + $0x60] sm:$0xff]  }
  0x41   :  { %v730_v55 = vpack.c.bf16 %v501_v45, %v501_v45  ;;  %v247_v56 = vadd.f32 %v215_v46, %v119_v41  ;;  %v120_v57 = vmul.f32 %v787_v47, %v1094_v0  ;;  %v216_v58 = vmul.f32 %v851_v48, %v1099_v1  ;;  %v1012_v41 = vld [vmem:[%s1619_s0 + $0x60] sm:$0xff]  }
  0x42   :  { %v502_v59 = vadd.f32 %v470_v36, %v374_v50  ;;  %v344_v61 = vmul.f32 %v915_v53, %v1104_v2  ;;  %v979_v62 = vunpack.c.l.bf16 %v1055_v49  ;;  %v788_v63 = vunpack.c.h.bf16 %v1010_v32  ;;  %v1042_v48 = vld [vmem:[%s1621_s2 + $0x60] sm:$0xff]  }
  0x43   :  { %662 = vst.msk [vmem:[%s1624_s5 + $0x44] sm:$0xf] %vm644_vm0, %v730_v55  ;;  %v375_v4 = vadd.f32 %v343_v51, %v247_v56  ;;  %v248_v5 = vadd.f32 %v216_v58, %v120_v57  ;;  %v852_v6 = vunpack.c.h.bf16 %v1025_v33  ;;  %v916_v7 = vunpack.c.h.bf16 %v1040_v38  ;;  %v1057_v58 = vld [vmem:[%s1622_s3 + $0x60] sm:$0xff]  }
  0x44   :  { %v731_v12 = vpack.c.bf16 %v502_v59, %v502_v59  ;;  %v472_v13 = vmul.f32 %v979_v62, %v1109_v3  ;;  %v121_v14 = vmul.f32 %v788_v63, %v1126_v10  ;;  %v980_v18 = vunpack.c.h.bf16 %v1055_v49 }
  0x45   :  { %v503_v20 = vadd.f32 %v471_v52, %v375_v4  ;;  %v376_v21 = vadd.f32 %v344_v61, %v248_v5  ;;  %v217_v22 = vmul.f32 %v852_v6, %v1131_v15  ;;  %v345_v23 = vmul.f32 %v916_v7, %v1136_v16 }
  0x46   :  { %663 = vst.msk [vmem:[%s1624_s5 + $0x48] sm:$0xf] %vm644_vm0, %v731_v12  ;;  %v473_v27 = vmul.f32 %v980_v18, %v1141_v17  ;;  %v791_v28 = vunpack.c.l.bf16 %v1011_v8  ;;  %v855_v29 = vunpack.c.l.bf16 %v1026_v9  ;;  %v919_v30 = vunpack.c.l.bf16 %v1041_v11 }
  0x47   :  { %v732_v32 = vpack.c.bf16 %v503_v20, %v503_v20  ;;  %v504_v33 = vadd.f32 %v472_v13, %v376_v21  ;;  %v249_v34 = vadd.f32 %v217_v22, %v121_v14  ;;  %v983_v35 = vunpack.c.l.bf16 %v1056_v19  ;;  %v1013_v20 = vld [vmem:[%s1619_s0 + $0x68] sm:$0xff]  }
  0x48   :  { %v122_v36 = vmul.f32 %v791_v28, %v1150_v24  ;;  %v218_v37 = vmul.f32 %v855_v29, %v1155_v25  ;;  %v346_v38 = vmul.f32 %v919_v30, %v1160_v26  ;;  %v792_v39 = vunpack.c.h.bf16 %v1011_v8  ;;  %v1028_v21 = vld [vmem:[%s1620_s1 + $0x68] sm:$0xff]  }
  0x49   :  { %664 = vst.msk [vmem:[%s1624_s5 + $0x4c] sm:$0xf] %vm644_vm0, %v732_v32  ;;  %v733_v44 = vpack.c.bf16 %v504_v33, %v504_v33  ;;  %v377_v45 = vadd.f32 %v345_v23, %v249_v34  ;;  %v474_v46 = vmul.f32 %v983_v35, %v1169_v31  ;;  %v856_v47 = vunpack.c.h.bf16 %v1026_v9  ;;  %v1043_v22 = vld [vmem:[%s1621_s2 + $0x68] sm:$0xff]  }
  0x4a   :  { %v250_v49 = vadd.f32 %v218_v37, %v122_v36  ;;  %v123_v50 = vmul.f32 %v792_v39, %v1186_v40  ;;  %v920_v51 = vunpack.c.h.bf16 %v1041_v11  ;;  %v984_v52 = vunpack.c.h.bf16 %v1056_v19  ;;  %v1058_v30 = vld [vmem:[%s1622_s3 + $0x68] sm:$0xff]  }
  0x4b   :  { %665 = vst.msk [vmem:[%s1624_s5 + $0x50] sm:$0xf] %vm644_vm0, %v733_v44  ;;  %v505_v53 = vadd.f32 %v473_v27, %v377_v45  ;;  %v219_v55 = vmul.f32 %v856_v47, %v1191_v43  ;;  %v795_v56 = vunpack.c.l.bf16 %v1012_v41  ;;  %v859_v57 = vunpack.c.l.bf16 %v1027_v42 }
  0x4c   :  { %v378_v59 = vadd.f32 %v346_v38, %v250_v49  ;;  %v347_v61 = vmul.f32 %v920_v51, %v1206_v54  ;;  %v475_v62 = vmul.f32 %v984_v52, %v1213_v60  ;;  %v923_v63 = vunpack.c.l.bf16 %v1042_v48  ;;  %v1029_v51 = vld [vmem:[%s1620_s1 + $0x70] sm:$0xff]  }
  0x4d   :  { %v734_v4 = vpack.c.bf16 %v505_v53, %v505_v53  ;;  %v251_v5 = vadd.f32 %v219_v55, %v123_v50  ;;  %v124_v6 = vmul.f32 %v795_v56, %v1094_v0  ;;  %v220_v7 = vmul.f32 %v859_v57, %v1099_v1  ;;  %v1014_v50 = vld [vmem:[%s1619_s0 + $0x70] sm:$0xff]  }
  0x4e   :  { %v506_v8 = vadd.f32 %v474_v46, %v378_v59  ;;  %v348_v9 = vmul.f32 %v923_v63, %v1104_v2  ;;  %v987_v11 = vunpack.c.l.bf16 %v1057_v58  ;;  %v796_v12 = vunpack.c.h.bf16 %v1012_v41  ;;  %v1044_v57 = vld [vmem:[%s1621_s2 + $0x70] sm:$0xff]  }
  0x4f   :  { %666 = vst.msk [vmem:[%s1624_s5 + $0x54] sm:$0xf] %vm644_vm0, %v734_v4  ;;  %v379_v13 = vadd.f32 %v347_v61, %v251_v5  ;;  %v252_v14 = vadd.f32 %v220_v7, %v124_v6  ;;  %v860_v18 = vunpack.c.h.bf16 %v1027_v42  ;;  %v924_v19 = vunpack.c.h.bf16 %v1042_v48  ;;  %v1059_v7 = vld [vmem:[%s1622_s3 + $0x70] sm:$0xff]  }
  0x50   :  { %v735_v23 = vpack.c.bf16 %v506_v8, %v506_v8  ;;  %v476_v27 = vmul.f32 %v987_v11, %v1109_v3  ;;  %v125_v28 = vmul.f32 %v796_v12, %v1126_v10  ;;  %v988_v29 = vunpack.c.h.bf16 %v1057_v58 }
  0x51   :  { %v507_v32 = vadd.f32 %v475_v62, %v379_v13  ;;  %v380_v33 = vadd.f32 %v348_v9, %v252_v14  ;;  %v221_v34 = vmul.f32 %v860_v18, %v1131_v15  ;;  %v349_v35 = vmul.f32 %v924_v19, %v1136_v16 }
  0x52   :  { %667 = vst.msk [vmem:[%s1624_s5 + $0x58] sm:$0xf] %vm644_vm0, %v735_v23  ;;  %v477_v36 = vmul.f32 %v988_v29, %v1141_v17  ;;  %v799_v37 = vunpack.c.l.bf16 %v1013_v20  ;;  %v863_v38 = vunpack.c.l.bf16 %v1028_v21  ;;  %v927_v39 = vunpack.c.l.bf16 %v1043_v22 }
  0x53   :  { %v736_v41 = vpack.c.bf16 %v507_v32, %v507_v32  ;;  %v508_v42 = vadd.f32 %v476_v27, %v380_v33  ;;  %v253_v44 = vadd.f32 %v221_v34, %v125_v28  ;;  %v991_v45 = vunpack.c.l.bf16 %v1058_v30 }
  0x54   :  { %v126_v46 = vmul.f32 %v799_v37, %v1150_v24  ;;  %v222_v47 = vmul.f32 %v863_v38, %v1155_v25  ;;  %v350_v48 = vmul.f32 %v927_v39, %v1160_v26  ;;  %v800_v49 = vunpack.c.h.bf16 %v1013_v20 }
  0x55   :  { %668 = vst.msk [vmem:[%s1624_s5 + $0x5c] sm:$0xf] %vm644_vm0, %v736_v41  ;;  %v737_v52 = vpack.c.bf16 %v508_v42, %v508_v42  ;;  %v381_v53 = vadd.f32 %v349_v35, %v253_v44  ;;  %v478_v55 = vmul.f32 %v991_v45, %v1169_v31  ;;  %v864_v56 = vunpack.c.h.bf16 %v1028_v21 }
  0x56   :  { %v254_v58 = vadd.f32 %v222_v47, %v126_v46  ;;  %v127_v59 = vmul.f32 %v800_v49, %v1186_v40  ;;  %v928_v61 = vunpack.c.h.bf16 %v1043_v22  ;;  %v992_v62 = vunpack.c.h.bf16 %v1058_v30 }
  0x57   :  { %669 = vst.msk [vmem:[%s1624_s5 + $0x60] sm:$0xf] %vm644_vm0, %v737_v52  ;;  %v509_v63 = vadd.f32 %v477_v36, %v381_v53  ;;  %v223_v4 = vmul.f32 %v864_v56, %v1191_v43  ;;  %v803_v5 = vunpack.c.l.bf16 %v1014_v50  ;;  %v867_v6 = vunpack.c.l.bf16 %v1029_v51  ;;  %v1060_v36 = vld [vmem:[%s1622_s3 + $0x78] sm:$0xff]  }
  0x58   :  { %v382_v8 = vadd.f32 %v350_v48, %v254_v58  ;;  %v351_v9 = vmul.f32 %v928_v61, %v1206_v54  ;;  %v479_v11 = vmul.f32 %v992_v62, %v1213_v60  ;;  %v931_v12 = vunpack.c.l.bf16 %v1044_v57 }
  0x59   :  { %v738_v13 = vpack.c.bf16 %v509_v63, %v509_v63  ;;  %v255_v14 = vadd.f32 %v223_v4, %v127_v59  ;;  %v128_v18 = vmul.f32 %v803_v5, %v1094_v0  ;;  %v224_v19 = vmul.f32 %v867_v6, %v1099_v1  ;;  %v1015_v0 = vld [vmem:[%s1619_s0 + $0x78] sm:$0xff]  }
  0x5a   :  { %v510_v20 = vadd.f32 %v478_v55, %v382_v8  ;;  %v352_v21 = vmul.f32 %v931_v12, %v1104_v2  ;;  %v995_v22 = vunpack.c.l.bf16 %v1059_v7  ;;  %v804_v23 = vunpack.c.h.bf16 %v1014_v50  ;;  %v1030_v1 = vld [vmem:[%s1620_s1 + $0x78] sm:$0xff]  }
  0x5b   :  { %670 = vst.msk [vmem:[%s1624_s5 + $0x64] sm:$0xf] %vm644_vm0, %v738_v13  ;;  %v383_v27 = vadd.f32 %v351_v9, %v255_v14  ;;  %v256_v28 = vadd.f32 %v224_v19, %v128_v18  ;;  %v868_v29 = vunpack.c.h.bf16 %v1029_v51  ;;  %v932_v30 = vunpack.c.h.bf16 %v1044_v57  ;;  %v1045_v2 = vld [vmem:[%s1621_s2 + $0x78] sm:$0xff]  }
  0x5c   :  { %v739_v32 = vpack.c.bf16 %v510_v20, %v510_v20  ;;  %v480_v33 = vmul.f32 %v995_v22, %v1109_v3  ;;  %v129_v34 = vmul.f32 %v804_v23, %v1126_v10  ;;  %v996_v35 = vunpack.c.h.bf16 %v1059_v7 }
  0x5d   :  { %v511_v37 = vadd.f32 %v479_v11, %v383_v27  ;;  %v384_v38 = vadd.f32 %v352_v21, %v256_v28  ;;  %v225_v39 = vmul.f32 %v868_v29, %v1131_v15  ;;  %v353_v41 = vmul.f32 %v932_v30, %v1136_v16 }
  0x5e   :  { %671 = vst.msk [vmem:[%s1624_s5 + $0x68] sm:$0xf] %vm644_vm0, %v739_v32  ;;  %v481_v3 = vmul.f32 %v996_v35, %v1141_v17  ;;  %v807_v42 = vunpack.c.l.bf16 %v1015_v0  ;;  %v871_v10 = vunpack.c.l.bf16 %v1030_v1  ;;  %v935_v44 = vunpack.c.l.bf16 %v1045_v2 }
  0x5f   :  { %v740_v45 = vpack.c.bf16 %v511_v37, %v511_v37  ;;  %v512_v46 = vadd.f32 %v480_v33, %v384_v38  ;;  %v257_v47 = vadd.f32 %v225_v39, %v129_v34  ;;  %v999_v48 = vunpack.c.l.bf16 %v1060_v36 }
  0x60   :  { %v130_v49 = vmul.f32 %v807_v42, %v1150_v24  ;;  %v226_v15 = vmul.f32 %v871_v10, %v1155_v25  ;;  %v354_v16 = vmul.f32 %v935_v44, %v1160_v26  ;;  %v808_v50 = vunpack.c.h.bf16 %v1015_v0 }
  0x61   :  { %672 = vst.msk [vmem:[%s1624_s5 + $0x6c] sm:$0xf] %vm644_vm0, %v740_v45  ;;  %v741_v17 = vpack.c.bf16 %v512_v46, %v512_v46  ;;  %v385_v51 = vadd.f32 %v353_v41, %v257_v47  ;;  %v482_v52 = vmul.f32 %v999_v48, %v1169_v31  ;;  %v872_v53 = vunpack.c.h.bf16 %v1030_v1 }
  0x62   :  { %v258_v55 = vadd.f32 %v226_v15, %v130_v49  ;;  %v131_v56 = vmul.f32 %v808_v50, %v1186_v40  ;;  %v936_v57 = vunpack.c.h.bf16 %v1045_v2  ;;  %v1000_v24 = vunpack.c.h.bf16 %v1060_v36 }
  0x63   :  { %673 = vst.msk [vmem:[%s1624_s5 + $0x70] sm:$0xf] %vm644_vm0, %v741_v17  ;;  %v513_v25 = vadd.f32 %v481_v3, %v385_v51  ;;  %v227_v26 = vmul.f32 %v872_v53, %v1191_v43 }
  0x64   :  { %v386_v58 = vadd.f32 %v354_v16, %v258_v55  ;;  %v355_v59 = vmul.f32 %v936_v57, %v1206_v54  ;;  %v483_v31 = vmul.f32 %v1000_v24, %v1213_v60 }
  0x65   :  { %v742_v61 = vpack.c.bf16 %v513_v25, %v513_v25  ;;  %v259_v62 = vadd.f32 %v227_v26, %v131_v56 }
  0x66   :  { %v514_v63 = vadd.f32 %v482_v52, %v386_v58 }
  0x67   :  { %674 = vst.msk [vmem:[%s1624_s5 + $0x74] sm:$0xf] %vm644_vm0, %v742_v61  ;;  %v387_v40 = vadd.f32 %v355_v59, %v259_v62 }
  0x68   :  { %v743_v4 = vpack.c.bf16 %v514_v63, %v514_v63 }
  0x69   :  { %v515_v5 = vadd.f32 %v483_v31, %v387_v40 }
  0x6a   :  { %675 = vst.msk [vmem:[%s1624_s5 + $0x78] sm:$0xf] %vm644_vm0, %v743_v4 }
  0x6b   :  { %v744_v43 = vpack.c.bf16 %v515_v5, %v515_v5 }
  0x6d   :  { %676 = vst.msk [vmem:[%s1624_s5 + $0x7c] sm:$0xf] %vm644_vm0, %v744_v43 }

// kernel: d_forward.27
= control target key start
LH: loop header
LB: loop body
LE: loop exit
PB: predicated region body
PF: predicated region fallthrough
CT: control target
= control target key end

     0   :  { %s759_s12 = smov 0   ;;  %s761_s13 = smov 0   ;;  %s901_s0 = inlined_call_operand.vmem [shape: bf16[2,100], index: 0, kind: input, shape index: {}]   ;;  %s902_s1 = inlined_call_operand.vmem [shape: bf16[100,2048], index: 1, kind: input, shape index: {}]   ;;  %s903_s2 = inlined_call_operand.vmem [shape: f32[2,1], index: 2, kind: input, shape index: {}]   ;;  %s904_s3 = inlined_call_operand.vmem [shape: bf16[2,2048], index: 3, kind: output, shape index: {}]  }
   0x1   :  { %s763_s14 = smov 0  }
   0x2 LB: > { %s598_s15 = sadd.s32 4294967295, %s735_s14   ;;  %s776_s16 = sadd.s32 1, %s735_s14   ;;  %s735_s14 = sphi %s763_s14, %s907_s14   ;;  %s731_s13 = sphi %s761_s13, %s906_s13   ;;  %s727_s12 = sphi %s759_s12, %s905_s12  }
   0x3   : > { %s38_s17 = ssub.s32 %s735_s14, %s776_s16  ;;  %s41_s18 = sadd.s32 1, %s731_s13 }
   0x4   : > { %p39_p0 = scmp.eq.s32.totalorder %s38_s17, 0  ;;  %p48_p1 = scmp.ne.s32.totalorder %s731_s13, %s727_s12 }
   0x5   : > { %p49_p2 = scmp.eq.s32.totalorder %s735_s14, 0  ;;  %p601_p4 = scmp.ge.s32.totalorder %s735_s14, 4 }
   0x6   : > { %s785_s19 = scalar_select %p39_p0, %s731_s13, %s41_s18  }
   0x7   : > { %p50_p3 = por %p49_p2, %p48_p1  ;;  %127 = sbr.rel (%p601_p4) target bundleno = 31 (0x1f), region = 24 }
   0xe   : > { %130 = sbr.rel (!%p50_p3) target bundleno = 31 (0x1f), region = 28  ;;  %s132_s20 = sand.u32 (%p50_p3), 1, %s731_s13  }
   0xf   : > { %s643_s21 = sshll.u32 (%p50_p3), %s735_s14, 4  ;;  %s644_s22 = smul.u32 (%p50_p3), 208, %s132_s20 }
  0x10   : > { %s793_s25 = scalar_lea.vmem (%p50_p3), %s902_s1, %s643_s21 }
  0x11   : > { %v150_v0 = vld [vmem:[%s793_s25] sm:$0xff] (%p50_p3)  ;;  %v152_v1 = vld [vmem:[%s793_s25 + $0x8] sm:$0xff] (%p50_p3)  ;;  %s801_s26 = scalar_lea.vmem (%p50_p3), [#allocation2], %s644_s22 }
  0x12   : > { %v154_v2 = vld [vmem:[%s793_s25 + $0x40] sm:$0xff] (%p50_p3)  ;;  %v156_v3 = vld [vmem:[%s793_s25 + $0x48] sm:$0xff] (%p50_p3)  ;;  %151 = vst [vmem:[%s801_s26] sm:$0xff] (%p50_p3), %v150_v0  ;;  %153 = vst [vmem:[%s801_s26 + $0x8] sm:$0xff] (%p50_p3), %v152_v1 }
  0x13   : > { %v158_v4 = vld [vmem:[%s793_s25 + $0x80] sm:$0xff] (%p50_p3)  ;;  %v160_v5 = vld [vmem:[%s793_s25 + $0x88] sm:$0xff] (%p50_p3)  ;;  %155 = vst [vmem:[%s801_s26 + $0x10] sm:$0xff] (%p50_p3), %v154_v2  ;;  %157 = vst [vmem:[%s801_s26 + $0x18] sm:$0xff] (%p50_p3), %v156_v3 }
  0x14   : > { %159 = vst [vmem:[%s801_s26 + $0x20] sm:$0xff] (%p50_p3), %v158_v4  ;;  %161 = vst [vmem:[%s801_s26 + $0x28] sm:$0xff] (%p50_p3), %v160_v5  ;;  %v162_v6 = vld [vmem:[%s793_s25 + $0xc0] sm:$0xff] (%p50_p3)  ;;  %v164_v7 = vld [vmem:[%s793_s25 + $0xc8] sm:$0xff] (%p50_p3) }
  0x15   : > { %v166_v8 = vld [vmem:[%s793_s25 + $0x100] sm:$0xff]  ;;  %163 = vst [vmem:[%s801_s26 + $0x30] sm:$0xff] %v162_v6  ;;  %165 = vst [vmem:[%s801_s26 + $0x38] sm:$0xff] %v164_v7  ;;  %v168_v9 = vld [vmem:[%s793_s25 + $0x108] sm:$0xff] }
  0x16   : > { %167 = vst [vmem:[%s801_s26 + $0x40] sm:$0xff] %v166_v8  ;;  %v170_v10 = vld [vmem:[%s793_s25 + $0x140] sm:$0xff]  ;;  %v172_v11 = vld [vmem:[%s793_s25 + $0x148] sm:$0xff]  ;;  %169 = vst [vmem:[%s801_s26 + $0x48] sm:$0xff] %v168_v9 }
  0x17   : > { %171 = vst [vmem:[%s801_s26 + $0x50] sm:$0xff] %v170_v10  ;;  %173 = vst [vmem:[%s801_s26 + $0x58] sm:$0xff] %v172_v11  ;;  %v174_v12 = vld [vmem:[%s793_s25 + $0x180] sm:$0xff]  ;;  %v176_v13 = vld [vmem:[%s793_s25 + $0x188] sm:$0xff] }
  0x18   : > { %v178_v14 = vld [vmem:[%s793_s25 + $0x1c0] sm:$0xff]  ;;  %175 = vst [vmem:[%s801_s26 + $0x60] sm:$0xff] %v174_v12  ;;  %177 = vst [vmem:[%s801_s26 + $0x68] sm:$0xff] %v176_v13  ;;  %v180_v15 = vld [vmem:[%s793_s25 + $0x1c8] sm:$0xff] }
  0x19   : > { %179 = vst [vmem:[%s801_s26 + $0x70] sm:$0xff] %v178_v14  ;;  %v182_v16 = vld [vmem:[%s793_s25 + $0x200] sm:$0xff]  ;;  %v184_v17 = vld [vmem:[%s793_s25 + $0x208] sm:$0xff]  ;;  %181 = vst [vmem:[%s801_s26 + $0x78] sm:$0xff] %v180_v15 }
  0x1a   : > { %183 = vst [vmem:[%s801_s26 + $0x80] sm:$0xff] %v182_v16  ;;  %185 = vst [vmem:[%s801_s26 + $0x88] sm:$0xff] %v184_v17  ;;  %v186_v18 = vld [vmem:[%s793_s25 + $0x240] sm:$0xff]  ;;  %v188_v19 = vld [vmem:[%s793_s25 + $0x248] sm:$0xff] }
  0x1b   : > { %v190_v20 = vld [vmem:[%s793_s25 + $0x280] sm:$0xff]  ;;  %187 = vst [vmem:[%s801_s26 + $0x90] sm:$0xff] %v186_v18  ;;  %189 = vst [vmem:[%s801_s26 + $0x98] sm:$0xff] %v188_v19  ;;  %v192_v21 = vld [vmem:[%s793_s25 + $0x288] sm:$0xff] }
  0x1c   : > { %191 = vst [vmem:[%s801_s26 + $0xa0] sm:$0xff] %v190_v20  ;;  %v194_v22 = vld [vmem:[%s793_s25 + $0x2c0] sm:$0xff]  ;;  %v196_v23 = vld [vmem:[%s793_s25 + $0x2c8] sm:$0xff]  ;;  %193 = vst [vmem:[%s801_s26 + $0xa8] sm:$0xff] %v192_v21 }
  0x1d   : > { %195 = vst [vmem:[%s801_s26 + $0xb0] sm:$0xff] %v194_v22  ;;  %197 = vst [vmem:[%s801_s26 + $0xb8] sm:$0xff] %v196_v23  ;;  %v198_v24 = vld [vmem:[%s793_s25 + $0x300] sm:$0xff]  ;;  %v200_v25 = vld [vmem:[%s793_s25 + $0x308] sm:$0xff] }
  0x1e   : > { %199 = vst [vmem:[%s801_s26 + $0xc0] sm:$0xff] %v198_v24  ;;  %201 = vst [vmem:[%s801_s26 + $0xc8] sm:$0xff] %v200_v25 }
  0x1f PF: > { %p604_p5 = scmp.ge.s32.totalorder %s735_s14, 1  ;;  %p206_p6 = scmp.lt.s32.totalorder %s735_s14, 5 }
  0x21   : > { %p207_p7 = pnand %p604_p5, %p206_p6 }
  0x22   : > { %s213_s27 = sand.u32 (!%p207_p7), 1, %s727_s12   ;;  %v737_v26 = vmov (!%p207_p7), 0   ;;  %v269_v27 = vld [vmem:[%s903_s2] sm:$0x3] (!%p207_p7)  ;;  %vm409_vm0 = vcmask (!%p207_p7), 1041408   ;;  %vm405_vm1 = vcmask (!%p207_p7), 818176   ;;  %v521_v63 = vlaneseq (!%p207_p7) }
  0x23   : > { %210 = sbr.rel (%p207_p7) target bundleno = 292 (0x124), region = 51  ;;  %454 = vmatprep.mubr.bf16.mxu0 (!%p207_p7), %v737_v26  ;;  %495 = vmatprep.mubr.bf16.mxu1 (!%p207_p7), %v737_v26  ;;  %v242_v60 = vld [vmem:[%s901_s0] sm:$0x1] (!%p207_p7)  ;;  %v738_v61 = vmov (!%p207_p7), 1966171168   ;;  %s605_s7 = sshll.u32 (!%p207_p7), %s598_s15, 2 }
  0x24   : > { %s645_s28 = smul.u32 (!%p207_p7), 208, %s213_s27  ;;  %672 = vset.pattern.permute.xlu0 (!%p207_p7), %v737_v26  ;;  %v519_v62 = vunpack.c.l.s4 (!%p207_p7), %v738_v61  ;;  %v522_v4 = vshrl.u32 (!%p207_p7), %v521_v63, 7  ;;  %p237_p8 = scmp.lt.s32.totalorder (!%p207_p7), %s605_s7, 15 }
  0x25   : > { %272 = vperm.xlu0 (!%p207_p7), %672, %v269_v27  }
  0x26   : > { %s855_s4 = scalar_lea.vmem (!%p207_p7), [#allocation2], %s645_s28  ;;  %v520_v3 = vunpack.c.0.s8 (!%p207_p7), %v519_v62 }
  0x27   : > { %v673_v28 = vld [vmem:[%s855_s4 + $0x4] ss:$16 sps:$4 sm:$0xff] (!%p207_p7)   ;;  %v675_v29 = vld [vmem:[%s855_s4 + $0xc] ss:$16 sps:$4 sm:$0xff] (!%p207_p7)   ;;  %v677_v30 = vld [vmem:[%s855_s4] ss:$16 sps:$4 sm:$0xff] (!%p207_p7)  }
  0x28   : > { %422 = vmatprep.subr.bf16.mxu0 (!%p207_p7), %v673_v28  ;;  %v678_v31 = vld [vmem:[%s855_s4 + $0x8] ss:$16 sps:$4 sm:$0xff] (!%p207_p7)   ;;  %463 = vmatprep.subr.bf16.mxu1 (!%p207_p7), %v675_v29  ;;  %v679_v32 = vld [vmem:[%s855_s4 + $0x24] ss:$16 sps:$4 sm:$0xff] (!%p207_p7)   ;;  %v681_v33 = vld [vmem:[%s855_s4 + $0x2c] ss:$16 sps:$4 sm:$0xff] (!%p207_p7)   ;;  %v523_v18 = vsub.s32 (!%p207_p7), %v520_v3, %v522_v4 }
  0x29   : > { %423 = vmatpush1.bf16.msra.mxu0 (!%p207_p7), %v677_v30  ;;  %464 = vmatpush1.bf16.msra.mxu1 (!%p207_p7), %v678_v31  ;;  %v683_v34 = vld [vmem:[%s855_s4 + $0x20] ss:$16 sps:$4 sm:$0xff] (!%p207_p7)   ;;  %v684_v35 = vld [vmem:[%s855_s4 + $0x28] ss:$16 sps:$4 sm:$0xff] (!%p207_p7)   ;;  %v685_v36 = vld [vmem:[%s855_s4 + $0x44] ss:$16 sps:$4 sm:$0xff] (!%p207_p7)  }
  0x2a   : > { %424 = vmatprep.subr.bf16.mxu0 %v679_v32  ;;  %465 = vmatprep.subr.bf16.mxu1 %v681_v33  ;;  %v687_v37 = vld [vmem:[%s855_s4 + $0x4c] ss:$16 sps:$4 sm:$0xff]   ;;  %v689_v38 = vld [vmem:[%s855_s4 + $0x40] ss:$16 sps:$4 sm:$0xff]   ;;  %v690_v39 = vld [vmem:[%s855_s4 + $0x48] ss:$16 sps:$4 sm:$0xff]  }
  0x2b   : > { %v691_v40 = vld [vmem:[%s855_s4 + $0x64] ss:$16 sps:$4 sm:$0xff]   ;;  %v693_v41 = vld [vmem:[%s855_s4 + $0x6c] ss:$16 sps:$4 sm:$0xff]   ;;  %v695_v42 = vld [vmem:[%s855_s4 + $0x60] ss:$16 sps:$4 sm:$0xff]  }
  0x2c   : > { %v696_v43 = vld [vmem:[%s855_s4 + $0x68] ss:$16 sps:$4 sm:$0xff]   ;;  %v697_v44 = vld [vmem:[%s855_s4 + $0x84] ss:$16 sps:$4 sm:$0xff]   ;;  %v699_v45 = vld [vmem:[%s855_s4 + $0x8c] ss:$16 sps:$4 sm:$0xff]  }
  0x2d   : > { %425 = vmatpush1.bf16.msra.mxu0 %v683_v34  ;;  %466 = vmatpush1.bf16.msra.mxu1 %v684_v35  ;;  %v701_v46 = vld [vmem:[%s855_s4 + $0x80] ss:$16 sps:$4 sm:$0xff]   ;;  %v702_v47 = vld [vmem:[%s855_s4 + $0x88] ss:$16 sps:$4 sm:$0xff]   ;;  %v703_v48 = vld [vmem:[%s855_s4 + $0xa4] ss:$16 sps:$4 sm:$0xff]  }
  0x2e   : > { %426 = vmatprep.subr.bf16.mxu0 %v685_v36  ;;  %467 = vmatprep.subr.bf16.mxu1 %v687_v37  ;;  %v705_v49 = vld [vmem:[%s855_s4 + $0xac] ss:$16 sps:$4 sm:$0xff]   ;;  %v267_v50 = vld [vmem:[%s855_s4 + $0xc0] sm:$0x33]  ;;  %v708_v53 = vld [vmem:[%s855_s4 + $0xa8] ss:$16 sps:$4 sm:$0xff]  }
  0x2f   : > { %v268_v51 = vld [vmem:[%s855_s4 + $0xc8] sm:$0x33]  ;;  %v707_v52 = vld [vmem:[%s855_s4 + $0xa0] ss:$16 sps:$4 sm:$0xff]   ;;  %v631_v54 = vcombine.high %v267_v50, %v267_v50  ;;  %v630_v56 = vcombine.low %v267_v50, %v267_v50  ;;  %s909_s7 = smov (!%p237_p8, %s605_s7), 15 }
  0x30   : > { %v633_v55 = vcombine.high %v268_v51, %v268_v51  ;;  %v632_v57 = vcombine.low %v268_v51, %v268_v51  ;;  %s239_s10 = scalar_lea.vmem %s904_s3, %s909_s7 }
  0x31   : > { %427 = vmatpush1.bf16.msra.mxu0 %v689_v38  ;;  %468 = vmatpush1.bf16.msra.mxu1 %v690_v39  ;;  %v411_v58 = vsel %vm409_vm0, %v630_v56, 0 }
  0x32   : > { %428 = vmatprep.subr.bf16.mxu0 %v691_v40  ;;  %469 = vmatprep.subr.bf16.mxu1 %v693_v41  ;;  %v417_v59 = vsel %vm409_vm0, %v632_v57, 0 }
  0x35   : > { %429 = vmatpush1.bf16.msra.mxu0 %v695_v42  ;;  %470 = vmatpush1.bf16.msra.mxu1 %v696_v43 }
  0x36   : > { %430 = vmatprep.subr.bf16.mxu0 %v697_v44  ;;  %471 = vmatprep.subr.bf16.mxu1 %v699_v45 }
  0x39   : > { %431 = vmatpush1.bf16.msra.mxu0 %v701_v46  ;;  %472 = vmatpush1.bf16.msra.mxu1 %v702_v47 }
  0x3a   : > { %432 = vmatprep.subr.bf16.mxu0 %v703_v48  ;;  %473 = vmatprep.subr.bf16.mxu1 %v705_v49 }
  0x3d   : > { %433 = vmatpush1.bf16.msra.mxu0 %v707_v52  ;;  %474 = vmatpush1.bf16.msra.mxu1 %v708_v53 }
  0x3e   : > { %634 = vmatprep.subr.msk.bf16.mxu0 %vm409_vm0, %v631_v54  ;;  %636 = vmatprep.subr.msk.bf16.mxu1 %vm409_vm0, %v633_v55 }
  0x41   : > { %435 = vmatpush1.bf16.msra.mxu0 %v411_v58  ;;  %476 = vmatpush1.bf16.msra.mxu1 %v417_v59 }
  0x44   : > { %635 = vmatmul.mubr.msk.bf16.vlgmr.msra.gmra.mrb[0].mxu0 %vm405_vm1, %v242_v60  ;;  %637 = vmatmul.mubr.msk.bf16.vlgmr.msra.gmra.mrb[0].mxu1 %vm405_vm1, %v242_v60 }
  0xa4   : > { %v273_v0 = vpop.permute.xlu0 %272 }
 0x117   : > { %v456_v1 = vpop.f32.mrb[0].mxu0  ;;  %v497_v2 = vpop.f32.mrb[0].mxu1 }
 0x118   : > { %v457_v5 = vadd.f32 %v456_v1, %v273_v0  ;;  %v498_v6 = vadd.f32 %v497_v2, %v273_v0  ;;  %v458_v7 = vpop.f32.mrb[1].mxu0  ;;  %v499_v8 = vpop.f32.mrb[1].mxu1 }
 0x119   : > { %v459_v9 = vadd.f32 %v458_v7, %v273_v0  ;;  %v500_v10 = vadd.f32 %v499_v8, %v273_v0  ;;  %v460_v11 = vpop.f32.mrb[2].mxu0  ;;  %v501_v12 = vpop.f32.mrb[2].mxu1 }
 0x11a   : > { %v504_v13 = vmax.f32 %v457_v5, 0.0  ;;  %v506_v14 = vmax.f32 %v498_v6, 0.0  ;;  %v461_v15 = vpop.f32.mrb[3].mxu0  ;;  %v502_v16 = vpop.f32.mrb[3].mxu1 }
 0x11b   : > { %v505_v17 = vmax.f32 %v459_v9, 0.0  ;;  %v507_v19 = vmax.f32 %v500_v10, 0.0 }
 0x11d   : > { %v638_v20 = vpack.c.bf16 %v505_v17, %v504_v13  ;;  %v639_v21 = vpack.c.bf16 %v507_v19, %v506_v14 }
 0x11f   : > { %v524_v22 = vrot.slane %v638_v20, %v523_v18  ;;  %v531_v23 = vrot.slane %v639_v21, %v523_v18 }
 0x121   : > { %v532_v24 = vcombine.low %v524_v22, %v531_v23 }
 0x123   : > { %640 = vst.sshfl [vmem:[%s239_s10] sm:$0x55 pattern:$0x73625140] %v532_v24 }
 0x124 PF: > { %p10_p9 = scmp.ge.s32.totalorder %s776_s16, 6   ;;  %s905_s12 = smov %s731_s13 }
 0x125   : > { %s906_s13 = smov %s785_s19  ;;  %s907_s14 = smov %s776_s16 }
 0x126   :  { %12 = sbr.rel (!%p10_p9) target bundleno = 2 (0x2), region = 90 }

// kernel: d_forward.28
= control target key start
LH: loop header
LB: loop body
LE: loop exit
PB: predicated region body
PF: predicated region fallthrough
CT: control target
= control target key end

     0   :  { %s755_s12 = smov 0   ;;  %s757_s13 = smov 0   ;;  %s897_s0 = inlined_call_operand.vmem [shape: bf16[2,100], index: 0, kind: input, shape index: {}]   ;;  %s898_s1 = inlined_call_operand.vmem [shape: bf16[100,2048], index: 1, kind: input, shape index: {}]   ;;  %s899_s2 = inlined_call_operand.vmem [shape: f32[2,1], index: 2, kind: input, shape index: {}]   ;;  %s900_s3 = inlined_call_operand.vmem [shape: bf16[2,2048], index: 3, kind: output, shape index: {}]  }
   0x1   :  { %s759_s14 = smov 0  }
   0x2 LB: > { %s594_s15 = sadd.s32 4294967295, %s731_s14   ;;  %s772_s16 = sadd.s32 1, %s731_s14   ;;  %s731_s14 = sphi %s759_s14, %s903_s14   ;;  %s727_s13 = sphi %s757_s13, %s902_s13   ;;  %s723_s12 = sphi %s755_s12, %s901_s12  }
   0x3   : > { %s38_s17 = ssub.s32 %s731_s14, %s772_s16  ;;  %s41_s18 = sadd.s32 1, %s727_s13 }
   0x4   : > { %p39_p0 = scmp.eq.s32.totalorder %s38_s17, 0  ;;  %p48_p1 = scmp.ne.s32.totalorder %s727_s13, %s723_s12 }
   0x5   : > { %p49_p2 = scmp.eq.s32.totalorder %s731_s14, 0  ;;  %p597_p4 = scmp.ge.s32.totalorder %s731_s14, 4 }
   0x6   : > { %s781_s19 = scalar_select %p39_p0, %s727_s13, %s41_s18  }
   0x7   : > { %p50_p3 = por %p49_p2, %p48_p1  ;;  %127 = sbr.rel (%p597_p4) target bundleno = 31 (0x1f), region = 24 }
   0xe   : > { %130 = sbr.rel (!%p50_p3) target bundleno = 31 (0x1f), region = 28  ;;  %s132_s20 = sand.u32 (%p50_p3), 1, %s727_s13  }
   0xf   : > { %s639_s21 = sshll.u32 (%p50_p3), %s731_s14, 4  ;;  %s640_s22 = smul.u32 (%p50_p3), 208, %s132_s20 }
  0x10   : > { %s789_s25 = scalar_lea.vmem (%p50_p3), %s898_s1, %s639_s21 }
  0x11   : > { %v150_v0 = vld [vmem:[%s789_s25] sm:$0xff] (%p50_p3)  ;;  %v152_v1 = vld [vmem:[%s789_s25 + $0x8] sm:$0xff] (%p50_p3)  ;;  %s797_s26 = scalar_lea.vmem (%p50_p3), [#allocation2], %s640_s22 }
  0x12   : > { %v154_v2 = vld [vmem:[%s789_s25 + $0x40] sm:$0xff] (%p50_p3)  ;;  %v156_v3 = vld [vmem:[%s789_s25 + $0x48] sm:$0xff] (%p50_p3)  ;;  %151 = vst [vmem:[%s797_s26] sm:$0xff] (%p50_p3), %v150_v0  ;;  %153 = vst [vmem:[%s797_s26 + $0x8] sm:$0xff] (%p50_p3), %v152_v1 }
  0x13   : > { %v158_v4 = vld [vmem:[%s789_s25 + $0x80] sm:$0xff] (%p50_p3)  ;;  %v160_v5 = vld [vmem:[%s789_s25 + $0x88] sm:$0xff] (%p50_p3)  ;;  %155 = vst [vmem:[%s797_s26 + $0x10] sm:$0xff] (%p50_p3), %v154_v2  ;;  %157 = vst [vmem:[%s797_s26 + $0x18] sm:$0xff] (%p50_p3), %v156_v3 }
  0x14   : > { %159 = vst [vmem:[%s797_s26 + $0x20] sm:$0xff] (%p50_p3), %v158_v4  ;;  %161 = vst [vmem:[%s797_s26 + $0x28] sm:$0xff] (%p50_p3), %v160_v5  ;;  %v162_v6 = vld [vmem:[%s789_s25 + $0xc0] sm:$0xff] (%p50_p3)  ;;  %v164_v7 = vld [vmem:[%s789_s25 + $0xc8] sm:$0xff] (%p50_p3) }
  0x15   : > { %v166_v8 = vld [vmem:[%s789_s25 + $0x100] sm:$0xff]  ;;  %163 = vst [vmem:[%s797_s26 + $0x30] sm:$0xff] %v162_v6  ;;  %165 = vst [vmem:[%s797_s26 + $0x38] sm:$0xff] %v164_v7  ;;  %v168_v9 = vld [vmem:[%s789_s25 + $0x108] sm:$0xff] }
  0x16   : > { %167 = vst [vmem:[%s797_s26 + $0x40] sm:$0xff] %v166_v8  ;;  %v170_v10 = vld [vmem:[%s789_s25 + $0x140] sm:$0xff]  ;;  %v172_v11 = vld [vmem:[%s789_s25 + $0x148] sm:$0xff]  ;;  %169 = vst [vmem:[%s797_s26 + $0x48] sm:$0xff] %v168_v9 }
  0x17   : > { %171 = vst [vmem:[%s797_s26 + $0x50] sm:$0xff] %v170_v10  ;;  %173 = vst [vmem:[%s797_s26 + $0x58] sm:$0xff] %v172_v11  ;;  %v174_v12 = vld [vmem:[%s789_s25 + $0x180] sm:$0xff]  ;;  %v176_v13 = vld [vmem:[%s789_s25 + $0x188] sm:$0xff] }
  0x18   : > { %v178_v14 = vld [vmem:[%s789_s25 + $0x1c0] sm:$0xff]  ;;  %175 = vst [vmem:[%s797_s26 + $0x60] sm:$0xff] %v174_v12  ;;  %177 = vst [vmem:[%s797_s26 + $0x68] sm:$0xff] %v176_v13  ;;  %v180_v15 = vld [vmem:[%s789_s25 + $0x1c8] sm:$0xff] }
  0x19   : > { %179 = vst [vmem:[%s797_s26 + $0x70] sm:$0xff] %v178_v14  ;;  %v182_v16 = vld [vmem:[%s789_s25 + $0x200] sm:$0xff]  ;;  %v184_v17 = vld [vmem:[%s789_s25 + $0x208] sm:$0xff]  ;;  %181 = vst [vmem:[%s797_s26 + $0x78] sm:$0xff] %v180_v15 }
  0x1a   : > { %183 = vst [vmem:[%s797_s26 + $0x80] sm:$0xff] %v182_v16  ;;  %185 = vst [vmem:[%s797_s26 + $0x88] sm:$0xff] %v184_v17  ;;  %v186_v18 = vld [vmem:[%s789_s25 + $0x240] sm:$0xff]  ;;  %v188_v19 = vld [vmem:[%s789_s25 + $0x248] sm:$0xff] }
  0x1b   : > { %v190_v20 = vld [vmem:[%s789_s25 + $0x280] sm:$0xff]  ;;  %187 = vst [vmem:[%s797_s26 + $0x90] sm:$0xff] %v186_v18  ;;  %189 = vst [vmem:[%s797_s26 + $0x98] sm:$0xff] %v188_v19  ;;  %v192_v21 = vld [vmem:[%s789_s25 + $0x288] sm:$0xff] }
  0x1c   : > { %191 = vst [vmem:[%s797_s26 + $0xa0] sm:$0xff] %v190_v20  ;;  %v194_v22 = vld [vmem:[%s789_s25 + $0x2c0] sm:$0xff]  ;;  %v196_v23 = vld [vmem:[%s789_s25 + $0x2c8] sm:$0xff]  ;;  %193 = vst [vmem:[%s797_s26 + $0xa8] sm:$0xff] %v192_v21 }
  0x1d   : > { %195 = vst [vmem:[%s797_s26 + $0xb0] sm:$0xff] %v194_v22  ;;  %197 = vst [vmem:[%s797_s26 + $0xb8] sm:$0xff] %v196_v23  ;;  %v198_v24 = vld [vmem:[%s789_s25 + $0x300] sm:$0xff]  ;;  %v200_v25 = vld [vmem:[%s789_s25 + $0x308] sm:$0xff] }
  0x1e   : > { %199 = vst [vmem:[%s797_s26 + $0xc0] sm:$0xff] %v198_v24  ;;  %201 = vst [vmem:[%s797_s26 + $0xc8] sm:$0xff] %v200_v25 }
  0x1f PF: > { %p600_p5 = scmp.ge.s32.totalorder %s731_s14, 1  ;;  %p206_p6 = scmp.lt.s32.totalorder %s731_s14, 5 }
  0x21   : > { %p207_p7 = pnand %p600_p5, %p206_p6 }
  0x22   : > { %s213_s27 = sand.u32 (!%p207_p7), 1, %s723_s12   ;;  %v733_v26 = vmov (!%p207_p7), 0   ;;  %v269_v27 = vld [vmem:[%s899_s2] sm:$0x3] (!%p207_p7)  ;;  %vm409_vm0 = vcmask (!%p207_p7), 1041408   ;;  %vm405_vm1 = vcmask (!%p207_p7), 818176   ;;  %v517_v63 = vlaneseq (!%p207_p7) }
  0x23   : > { %210 = sbr.rel (%p207_p7) target bundleno = 290 (0x122), region = 51  ;;  %454 = vmatprep.mubr.bf16.mxu0 (!%p207_p7), %v733_v26  ;;  %495 = vmatprep.mubr.bf16.mxu1 (!%p207_p7), %v733_v26  ;;  %v242_v60 = vld [vmem:[%s897_s0] sm:$0x1] (!%p207_p7)  ;;  %v734_v61 = vmov (!%p207_p7), 1966171168   ;;  %s601_s7 = sshll.u32 (!%p207_p7), %s594_s15, 2 }
  0x24   : > { %s641_s28 = smul.u32 (!%p207_p7), 208, %s213_s27  ;;  %668 = vset.pattern.permute.xlu0 (!%p207_p7), %v733_v26  ;;  %v515_v62 = vunpack.c.l.s4 (!%p207_p7), %v734_v61  ;;  %v518_v2 = vshrl.u32 (!%p207_p7), %v517_v63, 7  ;;  %p237_p8 = scmp.lt.s32.totalorder (!%p207_p7), %s601_s7, 15 }
  0x25   : > { %272 = vperm.xlu0 (!%p207_p7), %668, %v269_v27  }
  0x26   : > { %s851_s4 = scalar_lea.vmem (!%p207_p7), [#allocation2], %s641_s28  ;;  %v516_v1 = vunpack.c.0.s8 (!%p207_p7), %v515_v62 }
  0x27   : > { %v669_v28 = vld [vmem:[%s851_s4 + $0x4] ss:$16 sps:$4 sm:$0xff] (!%p207_p7)   ;;  %v671_v29 = vld [vmem:[%s851_s4 + $0xc] ss:$16 sps:$4 sm:$0xff] (!%p207_p7)   ;;  %v673_v30 = vld [vmem:[%s851_s4] ss:$16 sps:$4 sm:$0xff] (!%p207_p7)  }
  0x28   : > { %422 = vmatprep.subr.bf16.mxu0 (!%p207_p7), %v669_v28  ;;  %v674_v31 = vld [vmem:[%s851_s4 + $0x8] ss:$16 sps:$4 sm:$0xff] (!%p207_p7)   ;;  %463 = vmatprep.subr.bf16.mxu1 (!%p207_p7), %v671_v29  ;;  %v675_v32 = vld [vmem:[%s851_s4 + $0x24] ss:$16 sps:$4 sm:$0xff] (!%p207_p7)   ;;  %v677_v33 = vld [vmem:[%s851_s4 + $0x2c] ss:$16 sps:$4 sm:$0xff] (!%p207_p7)   ;;  %v519_v10 = vsub.s32 (!%p207_p7), %v516_v1, %v518_v2 }
  0x29   : > { %423 = vmatpush1.bf16.msra.mxu0 (!%p207_p7), %v673_v30  ;;  %464 = vmatpush1.bf16.msra.mxu1 (!%p207_p7), %v674_v31  ;;  %v679_v34 = vld [vmem:[%s851_s4 + $0x20] ss:$16 sps:$4 sm:$0xff] (!%p207_p7)   ;;  %v680_v35 = vld [vmem:[%s851_s4 + $0x28] ss:$16 sps:$4 sm:$0xff] (!%p207_p7)   ;;  %v681_v36 = vld [vmem:[%s851_s4 + $0x44] ss:$16 sps:$4 sm:$0xff] (!%p207_p7)  }
  0x2a   : > { %424 = vmatprep.subr.bf16.mxu0 %v675_v32  ;;  %465 = vmatprep.subr.bf16.mxu1 %v677_v33  ;;  %v683_v37 = vld [vmem:[%s851_s4 + $0x4c] ss:$16 sps:$4 sm:$0xff]   ;;  %v685_v38 = vld [vmem:[%s851_s4 + $0x40] ss:$16 sps:$4 sm:$0xff]   ;;  %v686_v39 = vld [vmem:[%s851_s4 + $0x48] ss:$16 sps:$4 sm:$0xff]  }
  0x2b   : > { %v687_v40 = vld [vmem:[%s851_s4 + $0x64] ss:$16 sps:$4 sm:$0xff]   ;;  %v689_v41 = vld [vmem:[%s851_s4 + $0x6c] ss:$16 sps:$4 sm:$0xff]   ;;  %v691_v42 = vld [vmem:[%s851_s4 + $0x60] ss:$16 sps:$4 sm:$0xff]  }
  0x2c   : > { %v692_v43 = vld [vmem:[%s851_s4 + $0x68] ss:$16 sps:$4 sm:$0xff]   ;;  %v693_v44 = vld [vmem:[%s851_s4 + $0x84] ss:$16 sps:$4 sm:$0xff]   ;;  %v695_v45 = vld [vmem:[%s851_s4 + $0x8c] ss:$16 sps:$4 sm:$0xff]  }
  0x2d   : > { %425 = vmatpush1.bf16.msra.mxu0 %v679_v34  ;;  %466 = vmatpush1.bf16.msra.mxu1 %v680_v35  ;;  %v697_v46 = vld [vmem:[%s851_s4 + $0x80] ss:$16 sps:$4 sm:$0xff]   ;;  %v698_v47 = vld [vmem:[%s851_s4 + $0x88] ss:$16 sps:$4 sm:$0xff]   ;;  %v699_v48 = vld [vmem:[%s851_s4 + $0xa4] ss:$16 sps:$4 sm:$0xff]  }
  0x2e   : > { %426 = vmatprep.subr.bf16.mxu0 %v681_v36  ;;  %467 = vmatprep.subr.bf16.mxu1 %v683_v37  ;;  %v701_v49 = vld [vmem:[%s851_s4 + $0xac] ss:$16 sps:$4 sm:$0xff]   ;;  %v267_v50 = vld [vmem:[%s851_s4 + $0xc0] sm:$0x33]  ;;  %v704_v53 = vld [vmem:[%s851_s4 + $0xa8] ss:$16 sps:$4 sm:$0xff]  }
  0x2f   : > { %v268_v51 = vld [vmem:[%s851_s4 + $0xc8] sm:$0x33]  ;;  %v703_v52 = vld [vmem:[%s851_s4 + $0xa0] ss:$16 sps:$4 sm:$0xff]   ;;  %v627_v54 = vcombine.high %v267_v50, %v267_v50  ;;  %v626_v56 = vcombine.low %v267_v50, %v267_v50  ;;  %s905_s7 = smov (!%p237_p8, %s601_s7), 15 }
  0x30   : > { %v629_v55 = vcombine.high %v268_v51, %v268_v51  ;;  %v628_v57 = vcombine.low %v268_v51, %v268_v51  ;;  %s239_s10 = scalar_lea.vmem %s900_s3, %s905_s7 }
  0x31   : > { %427 = vmatpush1.bf16.msra.mxu0 %v685_v38  ;;  %468 = vmatpush1.bf16.msra.mxu1 %v686_v39  ;;  %v411_v58 = vsel %vm409_vm0, %v626_v56, 0 }
  0x32   : > { %428 = vmatprep.subr.bf16.mxu0 %v687_v40  ;;  %469 = vmatprep.subr.bf16.mxu1 %v689_v41  ;;  %v417_v59 = vsel %vm409_vm0, %v628_v57, 0 }
  0x35   : > { %429 = vmatpush1.bf16.msra.mxu0 %v691_v42  ;;  %470 = vmatpush1.bf16.msra.mxu1 %v692_v43 }
  0x36   : > { %430 = vmatprep.subr.bf16.mxu0 %v693_v44  ;;  %471 = vmatprep.subr.bf16.mxu1 %v695_v45 }
  0x39   : > { %431 = vmatpush1.bf16.msra.mxu0 %v697_v46  ;;  %472 = vmatpush1.bf16.msra.mxu1 %v698_v47 }
  0x3a   : > { %432 = vmatprep.subr.bf16.mxu0 %v699_v48  ;;  %473 = vmatprep.subr.bf16.mxu1 %v701_v49 }
  0x3d   : > { %433 = vmatpush1.bf16.msra.mxu0 %v703_v52  ;;  %474 = vmatpush1.bf16.msra.mxu1 %v704_v53 }
  0x3e   : > { %630 = vmatprep.subr.msk.bf16.mxu0 %vm409_vm0, %v627_v54  ;;  %632 = vmatprep.subr.msk.bf16.mxu1 %vm409_vm0, %v629_v55 }
  0x41   : > { %435 = vmatpush1.bf16.msra.mxu0 %v411_v58  ;;  %476 = vmatpush1.bf16.msra.mxu1 %v417_v59 }
  0x44   : > { %631 = vmatmul.mubr.msk.bf16.vlgmr.msra.gmra.mrb[0].mxu0 %vm405_vm1, %v242_v60  ;;  %633 = vmatmul.mubr.msk.bf16.vlgmr.msra.gmra.mrb[0].mxu1 %vm405_vm1, %v242_v60 }
  0xa4   : > { %v273_v0 = vpop.permute.xlu0 %272 }
 0x117   : > { %v456_v3 = vpop.f32.mrb[0].mxu0  ;;  %v497_v4 = vpop.f32.mrb[0].mxu1 }
 0x118   : > { %v457_v5 = vadd.f32 %v456_v3, %v273_v0  ;;  %v498_v6 = vadd.f32 %v497_v4, %v273_v0  ;;  %v458_v7 = vpop.f32.mrb[1].mxu0  ;;  %v499_v8 = vpop.f32.mrb[1].mxu1 }
 0x119   : > { %v459_v9 = vadd.f32 %v458_v7, %v273_v0  ;;  %v500_v11 = vadd.f32 %v499_v8, %v273_v0  ;;  %v460_v12 = vpop.f32.mrb[2].mxu0  ;;  %v501_v13 = vpop.f32.mrb[2].mxu1 }
 0x11a   : > { %v461_v14 = vpop.f32.mrb[3].mxu0  ;;  %v502_v15 = vpop.f32.mrb[3].mxu1 }
 0x11b   : > { %v634_v16 = vpack.c.bf16 %v459_v9, %v457_v5  ;;  %v635_v17 = vpack.c.bf16 %v500_v11, %v498_v6 }
 0x11d   : > { %v520_v18 = vrot.slane %v634_v16, %v519_v10  ;;  %v527_v19 = vrot.slane %v635_v17, %v519_v10 }
 0x11f   : > { %v528_v20 = vcombine.low %v520_v18, %v527_v19 }
 0x121   : > { %636 = vst.sshfl [vmem:[%s239_s10] sm:$0x55 pattern:$0x73625140] %v528_v20 }
 0x122 PF: > { %p10_p9 = scmp.ge.s32.totalorder %s772_s16, 6   ;;  %s901_s12 = smov %s727_s13 }
 0x123   : > { %s902_s13 = smov %s781_s19  ;;  %s903_s14 = smov %s772_s16 }
 0x124   :  { %12 = sbr.rel (!%p10_p9) target bundleno = 2 (0x2), region = 90 }

// kernel: d_forward.29
= control target key start
LH: loop header
LB: loop body
LE: loop exit
PB: predicated region body
PF: predicated region fallthrough
CT: control target
= control target key end

     0   :  { %s640_s15 = smov 0   ;;  %s642_s16 = smov 0   ;;  %s709_s0 = inlined_call_operand.vmem [shape: bf16[2,18], index: 0, kind: input, shape index: {}]   ;;  %s710_s1 = inlined_call_operand.vmem [shape: bf16[18,2048], index: 1, kind: input, shape index: {}]   ;;  %s711_s2 = inlined_call_operand.vmem [shape: f32[2,1], index: 2, kind: input, shape index: {}]   ;;  %s712_s3 = inlined_call_operand.vmem [shape: bf16[2,2048], index: 3, kind: input, shape index: {}]   ;;  %s713_s4 = inlined_call_operand.vmem [shape: bf16[2,2048], index: 4, kind: output, shape index: {}]  }
   0x1   :  { %s644_s17 = smov 0  }
   0x2 LB: > { %s521_s18 = sadd.s32 4294967295, %s610_s17   ;;  %s657_s19 = sadd.s32 1, %s610_s17   ;;  %s610_s17 = sphi %s644_s17, %s716_s17   ;;  %s606_s16 = sphi %s642_s16, %s715_s16   ;;  %s602_s15 = sphi %s640_s15, %s714_s15  }
   0x3   : > { %s39_s20 = ssub.s32 %s610_s17, %s657_s19  ;;  %s42_s21 = sadd.s32 1, %s606_s16 }
   0x4   : > { %p40_p0 = scmp.eq.s32.totalorder %s39_s20, 0  ;;  %p49_p1 = scmp.ne.s32.totalorder %s606_s16, %s602_s15 }
   0x5   : > { %p50_p2 = scmp.eq.s32.totalorder %s610_s17, 0  ;;  %p524_p4 = scmp.ge.s32.totalorder %s610_s17, 4 }
   0x6   : > { %s666_s22 = scalar_select %p40_p0, %s606_s16, %s42_s21  }
   0x7   : > { %p51_p3 = por %p50_p2, %p49_p1  ;;  %154 = sbr.rel (%p524_p4) target bundleno = 21 (0x15), region = 24 }
   0xe   : > { %157 = sbr.rel (!%p51_p3) target bundleno = 21 (0x15), region = 28  ;;  %s159_s23 = sand.u32 (%p51_p3), 1, %s606_s16  }
   0xf   : > { %s547_s24 = sshll.u32 (%p51_p3), %s610_s17, 4  ;;  %s548_s25 = smul.u32 (%p51_p3), 48, %s159_s23 }
  0x10   : > { %s164_s28 = scalar_lea.vmem (%p51_p3), %s710_s1, %s547_s24 }
  0x11   : > { %v177_v0 = vld [vmem:[%s164_s28] sm:$0xff] (%p51_p3)  ;;  %v179_v1 = vld [vmem:[%s164_s28 + $0x8] sm:$0xff] (%p51_p3)  ;;  %s161_s29 = scalar_lea.vmem (%p51_p3), [#allocation2], %s548_s25 }
  0x12   : > { %v181_v2 = vld [vmem:[%s164_s28 + $0x40] sm:$0xff] (%p51_p3)  ;;  %v183_v3 = vld [vmem:[%s164_s28 + $0x48] sm:$0xff] (%p51_p3)  ;;  %178 = vst [vmem:[%s161_s29] sm:$0xff] (%p51_p3), %v177_v0  ;;  %180 = vst [vmem:[%s161_s29 + $0x8] sm:$0xff] (%p51_p3), %v179_v1 }
  0x13   : > { %v185_v4 = vld [vmem:[%s164_s28 + $0x80] sm:$0xff] (%p51_p3)  ;;  %v187_v5 = vld [vmem:[%s164_s28 + $0x88] sm:$0xff] (%p51_p3)  ;;  %182 = vst [vmem:[%s161_s29 + $0x10] sm:$0xff] (%p51_p3), %v181_v2  ;;  %184 = vst [vmem:[%s161_s29 + $0x18] sm:$0xff] (%p51_p3), %v183_v3 }
  0x14   : > { %186 = vst [vmem:[%s161_s29 + $0x20] sm:$0xff] (%p51_p3), %v185_v4  ;;  %188 = vst [vmem:[%s161_s29 + $0x28] sm:$0xff] (%p51_p3), %v187_v5 }
  0x15 PF: > { %p527_p5 = scmp.ge.s32.totalorder %s610_s17, 1  ;;  %p201_p6 = scmp.lt.s32.totalorder %s610_s17, 5 }
  0x17   : > { %p202_p7 = pnand %p527_p5, %p201_p6 }
  0x18   : > { %s208_s30 = sand.u32 (!%p202_p7), 1, %s602_s15   ;;  %v612_v6 = vmov (!%p202_p7), 0   ;;  %v255_v7 = vld [vmem:[%s711_s2] sm:$0x3] (!%p202_p7)  ;;  %vm295_vm0 = vcmask (!%p202_p7), 1040384   ;;  %vm291_vm1 = vcmask (!%p202_p7), 146432   ;;  %v397_v23 = vlaneseq (!%p202_p7) }
  0x19   : > { %205 = sbr.rel (%p202_p7) target bundleno = 264 (0x108), region = 55  ;;  %340 = vmatprep.mubr.bf16.mxu0 (!%p202_p7), %v612_v6  ;;  %381 = vmatprep.mubr.bf16.mxu1 (!%p202_p7), %v612_v6  ;;  %v248_v20 = vld [vmem:[%s709_s0] sm:$0x1] (!%p202_p7)  ;;  %s528_s11 = sshll.u32 (!%p202_p7), %s521_s18, 2  ;;  %v613_v21 = vmov (!%p202_p7), 1983009808  }
  0x1a   : > { %s549_s5 = smul.u32 (!%p202_p7), 48, %s208_s30  ;;  %577 = vset.pattern.permute.xlu0 (!%p202_p7), %v612_v6  ;;  %p238_p8 = scmp.lt.s32.totalorder (!%p202_p7), %s528_s11, 15  ;;  %v395_v22 = vunpack.c.l.s4 (!%p202_p7), %v613_v21  ;;  %v398_v27 = vshrl.u32 (!%p202_p7), %v397_v23, 7  ;;  %v614_v33 = vmov (!%p202_p7), 1966171168  }
  0x1b   : > { %258 = vperm.xlu0 (!%p202_p7), %577, %v255_v7   ;;  %v433_v34 = vunpack.c.l.s4 (!%p202_p7), %v614_v33 }
  0x1c   : > { %s210_s8 = scalar_lea.vmem (!%p202_p7), [#allocation2], %s549_s5  ;;  %v396_v26 = vunpack.c.0.s8 (!%p202_p7), %v395_v22 }
  0x1d   : > { %v578_v8 = vld [vmem:[%s210_s8 + $0x4] ss:$16 sps:$4 sm:$0xff] (!%p202_p7)   ;;  %v580_v9 = vld [vmem:[%s210_s8 + $0xc] ss:$16 sps:$4 sm:$0xff] (!%p202_p7)   ;;  %v582_v10 = vld [vmem:[%s210_s8] ss:$16 sps:$4 sm:$0xff] (!%p202_p7)   ;;  %v434_v44 = vunpack.c.0.s8 (!%p202_p7), %v433_v34 }
  0x1e   : > { %308 = vmatprep.subr.bf16.mxu0 (!%p202_p7), %v578_v8  ;;  %v583_v11 = vld [vmem:[%s210_s8 + $0x8] ss:$16 sps:$4 sm:$0xff] (!%p202_p7)   ;;  %v253_v12 = vld [vmem:[%s210_s8 + $0x20] sm:$0x11] (!%p202_p7)  ;;  %349 = vmatprep.subr.bf16.mxu1 (!%p202_p7), %v580_v9  ;;  %v399_v28 = vsub.s32 (!%p202_p7), %v396_v26, %v398_v27 }
  0x1f   : > { %v535_v13 = vcombine.high (!%p202_p7), %v253_v12, %v253_v12  ;;  %v254_v14 = vld [vmem:[%s210_s8 + $0x28] sm:$0x11] (!%p202_p7)  ;;  %v534_v15 = vcombine.low (!%p202_p7), %v253_v12, %v253_v12  ;;  %309 = vmatpush1.bf16.msra.mxu0 (!%p202_p7), %v582_v10  ;;  %350 = vmatpush1.bf16.msra.mxu1 (!%p202_p7), %v583_v11  ;;  %v437_v57 = vsub.s32 (!%p202_p7), %v434_v44, %v398_v27 }
  0x20   : > { %v537_v16 = vcombine.high %v254_v14, %v254_v14  ;;  %v536_v17 = vcombine.low %v254_v14, %v254_v14  ;;  %s718_s11 = smov (!%p238_p8, %s528_s11), 15 }
  0x21   : > { %538 = vmatprep.subr.msk.bf16.mxu0 %vm295_vm0, %v535_v13  ;;  %v297_v18 = vsel %vm295_vm0, %v534_v15, 0  ;;  %s240_s14 = scalar_lea.vmem %s712_s3, %s718_s11  ;;  %s245_s18 = scalar_lea.vmem %s713_s4, %s718_s11 }
  0x22   : > { %540 = vmatprep.subr.msk.bf16.mxu1 %vm295_vm0, %v537_v16  ;;  %v303_v19 = vsel %vm295_vm0, %v536_v17, 0  ;;  %v390_v24 = vld [vmem:[%s240_s14] sm:$0xf] }
  0x23   : > { %311 = vmatpush1.bf16.msra.mxu0 %v297_v18  ;;  %352 = vmatpush1.bf16.msra.mxu1 %v303_v19  ;;  %v391_v25 = vunpack.c.l.bf16 %v390_v24 }
  0x25   : > { %v393_v29 = vcombine.high %v391_v25, %v391_v25  ;;  %v400_v30 = vrot.slane %v391_v25, %v399_v28 }
  0x26   : > { %539 = vmatmul.mubr.msk.bf16.vlgmr.msra.gmra.mrb[0].mxu0 %vm291_vm1, %v248_v20  ;;  %541 = vmatmul.mubr.msk.bf16.vlgmr.msra.gmra.mrb[0].mxu1 %vm291_vm1, %v248_v20 }
  0x27   : > { %v407_v31 = vrot.slane %v393_v29, %v399_v28  ;;  %v408_v37 = vcombine.high %v400_v30, %v400_v30 }
  0x29   : > { %v409_v38 = vcombine.high %v407_v31, %v407_v31 }
  0x9a   : > { %v259_v32 = vpop.permute.xlu0 %258 }
  0xf9   : > { %v342_v35 = vpop.f32.mrb[0].mxu0  ;;  %v383_v36 = vpop.f32.mrb[0].mxu1 }
  0xfa   : > { %v343_v39 = vadd.f32 %v342_v35, %v259_v32  ;;  %v384_v40 = vadd.f32 %v383_v36, %v259_v32  ;;  %v344_v41 = vpop.f32.mrb[1].mxu0  ;;  %v385_v42 = vpop.f32.mrb[1].mxu1 }
  0xfb   : > { %v345_v43 = vadd.f32 %v344_v41, %v259_v32  ;;  %v386_v45 = vadd.f32 %v385_v42, %v259_v32  ;;  %v346_v46 = vpop.f32.mrb[2].mxu0  ;;  %v387_v47 = vpop.f32.mrb[2].mxu1 }
  0xfc   : > { %v414_v48 = vadd.f32 %v400_v30, %v343_v39  ;;  %v416_v49 = vadd.f32 %v407_v31, %v384_v40  ;;  %v347_v50 = vpop.f32.mrb[3].mxu0  ;;  %v388_v51 = vpop.f32.mrb[3].mxu1 }
  0xfd   : > { %v415_v52 = vadd.f32 %v408_v37, %v345_v43  ;;  %v417_v53 = vadd.f32 %v409_v38, %v386_v45 }
  0xfe   : > { %v418_v54 = vmax.f32 %v414_v48, 0.0  ;;  %v420_v55 = vmax.f32 %v416_v49, 0.0 }
  0xff   : > { %v419_v56 = vmax.f32 %v415_v52, 0.0  ;;  %v421_v58 = vmax.f32 %v417_v53, 0.0 }
 0x101   : > { %v542_v59 = vpack.c.bf16 %v419_v56, %v418_v54  ;;  %v543_v60 = vpack.c.bf16 %v421_v58, %v420_v55 }
 0x103   : > { %v438_v61 = vrot.slane %v542_v59, %v437_v57  ;;  %v445_v62 = vrot.slane %v543_v60, %v437_v57 }
 0x105   : > { %v446_v63 = vcombine.low %v438_v61, %v445_v62 }
 0x107   : > { %544 = vst.sshfl [vmem:[%s245_s18] sm:$0x55 pattern:$0x73625140] %v446_v63 }
 0x108 PF: > { %p11_p9 = scmp.ge.s32.totalorder %s657_s19, 6   ;;  %s714_s15 = smov %s606_s16 }
 0x109   : > { %s715_s16 = smov %s666_s22  ;;  %s716_s17 = smov %s657_s19 }
 0x10a   :  { %13 = sbr.rel (!%p11_p9) target bundleno = 2 (0x2), region = 97 }

// kernel: d_forward.30
= control target key start
LH: loop header
LB: loop body
LE: loop exit
PB: predicated region body
PF: predicated region fallthrough
CT: control target
= control target key end

     0   :  { %vm660_vm0 = vcmask 519168   ;;  %s1715_s0 = inlined_call_operand.vmem [shape: bf16[4,64,64], index: 0, kind: input, shape index: {}]   ;;  %s1716_s1 = inlined_call_operand.vmem [shape: bf16[4,64,64], index: 1, kind: input, shape index: {}]   ;;  %s1717_s2 = inlined_call_operand.vmem [shape: bf16[4,64,64], index: 2, kind: input, shape index: {}]   ;;  %s1718_s3 = inlined_call_operand.vmem [shape: bf16[4,64,64], index: 3, kind: input, shape index: {}]   ;;  %s1719_s4 = inlined_call_operand.vmem [shape: f32[4,64,64], index: 4, kind: input, shape index: {}]   ;;  %s1720_s5 = inlined_call_operand.vmem [shape: bf16[4,64,64], index: 5, kind: output, shape index: {}]  }
   0x1   :  { %v1110_v0 = vld [vmem:[%s1719_s4] sm:$0xff]  ;;  %v1142_v10 = vld [vmem:[%s1719_s4 + $0x8] sm:$0xff]  ;;  %v1166_v24 = vld [vmem:[%s1719_s4 + $0x10] sm:$0xff] }
   0x2   :  { %v1115_v1 = vld [vmem:[%s1719_s4 + $0x40] sm:$0xff]  ;;  %v1147_v15 = vld [vmem:[%s1719_s4 + $0x48] sm:$0xff]  ;;  %v1171_v25 = vld [vmem:[%s1719_s4 + $0x50] sm:$0xff] }
   0x3   :  { %v1120_v2 = vld [vmem:[%s1719_s4 + $0x80] sm:$0xff]  ;;  %v1152_v16 = vld [vmem:[%s1719_s4 + $0x88] sm:$0xff]  ;;  %v1176_v26 = vld [vmem:[%s1719_s4 + $0x90] sm:$0xff] }
   0x4   :  { %v1125_v3 = vld [vmem:[%s1719_s4 + $0xc0] sm:$0xff]  ;;  %v1157_v17 = vld [vmem:[%s1719_s4 + $0xc8] sm:$0xff]  ;;  %v1185_v31 = vld [vmem:[%s1719_s4 + $0xd0] sm:$0xff] }
   0x5   :  { %v762_v4 = vld [vmem:[%s1715_s0] sm:$0xff]   ;;  %v1017_v32 = vld [vmem:[%s1715_s0 + $0x8] sm:$0xff]   ;;  %v1202_v40 = vld [vmem:[%s1719_s4 + $0x18] sm:$0xff] }
   0x6   :  { %v826_v5 = vld [vmem:[%s1716_s1] sm:$0xff]   ;;  %v763_v6 = vunpack.c.l.bf16 %v762_v4  ;;  %v764_v11 = vunpack.c.h.bf16 %v762_v4  ;;  %v1032_v33 = vld [vmem:[%s1716_s1 + $0x8] sm:$0xff]   ;;  %v767_v36 = vunpack.c.l.bf16 %v1017_v32  ;;  %v1207_v43 = vld [vmem:[%s1719_s4 + $0x58] sm:$0xff]  ;;  %v768_v44 = vunpack.c.h.bf16 %v1017_v32 }
   0x7   :  { %v827_v7 = vunpack.c.l.bf16 %v826_v5  ;;  %v890_v8 = vld [vmem:[%s1717_s2] sm:$0xff]   ;;  %v828_v12 = vunpack.c.h.bf16 %v826_v5  ;;  %v831_v37 = vunpack.c.l.bf16 %v1032_v33  ;;  %v1047_v38 = vld [vmem:[%s1717_s2 + $0x8] sm:$0xff]   ;;  %v832_v45 = vunpack.c.h.bf16 %v1032_v33  ;;  %v1214_v50 = vld [vmem:[%s1719_s4 + $0x98] sm:$0xff] }
   0x8   :  { %v954_v9 = vld [vmem:[%s1718_s3] sm:$0xff]   ;;  %v891_v13 = vunpack.c.l.bf16 %v890_v8  ;;  %v892_v18 = vunpack.c.h.bf16 %v890_v8  ;;  %v116_v20 = vmul.f32 %v763_v6, %v1110_v0  ;;  %v117_v22 = vmul.f32 %v764_v11, %v1142_v10  ;;  %v1062_v39 = vld [vmem:[%s1718_s3 + $0x8] sm:$0xff]   ;;  %v1221_v53 = vld [vmem:[%s1719_s4 + $0xd8] sm:$0xff] }
   0x9   :  { %v955_v14 = vunpack.c.l.bf16 %v954_v9  ;;  %v956_v19 = vunpack.c.h.bf16 %v954_v9  ;;  %v212_v21 = vmul.f32 %v827_v7, %v1115_v1  ;;  %v213_v23 = vmul.f32 %v828_v12, %v1147_v15  ;;  %v1018_v56 = vld [vmem:[%s1715_s0 + $0x10] sm:$0xff]   ;;  %v1234_v62 = vld [vmem:[%s1719_s4 + $0x20] sm:$0xff]  ;;  %v1277_v32 = vld [vmem:[%s1719_s4 + $0x68] sm:$0xff] }
   0xa   :  { %v340_v27 = vmul.f32 %v891_v13, %v1120_v2  ;;  %v341_v29 = vmul.f32 %v892_v18, %v1152_v16  ;;  %v895_v41 = vunpack.c.l.bf16 %v1047_v38  ;;  %v959_v42 = vunpack.c.l.bf16 %v1062_v39  ;;  %v1033_v57 = vld [vmem:[%s1716_s1 + $0x10] sm:$0xff]   ;;  %v1239_v63 = vld [vmem:[%s1719_s4 + $0x60] sm:$0xff]  ;;  %v1282_v33 = vld [vmem:[%s1719_s4 + $0xa8] sm:$0xff] }
   0xb   :  { %v468_v28 = vmul.f32 %v955_v14, %v1125_v3  ;;  %v469_v30 = vmul.f32 %v956_v19, %v1157_v17  ;;  %v244_v34 = vadd.f32 %v212_v21, %v116_v20  ;;  %v245_v35 = vadd.f32 %v213_v23, %v117_v22  ;;  %v1048_v4 = vld [vmem:[%s1717_s2 + $0x10] sm:$0xff]   ;;  %v1251_v18 = vld [vmem:[%s1719_s4 + $0xa0] sm:$0xff] }
   0xc   :  { %v118_v48 = vmul.f32 %v767_v36, %v1166_v24  ;;  %v214_v49 = vmul.f32 %v831_v37, %v1171_v25  ;;  %v342_v51 = vmul.f32 %v895_v41, %v1176_v26  ;;  %v470_v52 = vmul.f32 %v959_v42, %v1185_v31  ;;  %v1063_v9 = vld [vmem:[%s1718_s3 + $0x10] sm:$0xff]   ;;  %v1257_v20 = vld [vmem:[%s1719_s4 + $0xe0] sm:$0xff]  ;;  %v1034_v41 = vld [vmem:[%s1716_s1 + $0x18] sm:$0xff]  }
   0xd   :  { %v372_v46 = vadd.f32 %v340_v27, %v244_v34  ;;  %v373_v47 = vadd.f32 %v341_v29, %v245_v35  ;;  %v119_v54 = vmul.f32 %v768_v44, %v1202_v40  ;;  %v215_v55 = vmul.f32 %v832_v45, %v1207_v43  ;;  %v1264_v27 = vld [vmem:[%s1719_s4 + $0x28] sm:$0xff]  ;;  %v1049_v42 = vld [vmem:[%s1717_s2 + $0x18] sm:$0xff]  }
   0xe   :  { %v246_v60 = vadd.f32 %v214_v49, %v118_v48  ;;  %v896_v61 = vunpack.c.h.bf16 %v1047_v38  ;;  %v960_v6 = vunpack.c.h.bf16 %v1062_v39  ;;  %v771_v7 = vunpack.c.l.bf16 %v1018_v56  ;;  %v1019_v39 = vld [vmem:[%s1715_s0 + $0x18] sm:$0xff]  }
   0xf   :  { %v500_v58 = vadd.f32 %v468_v28, %v372_v46  ;;  %v501_v59 = vadd.f32 %v469_v30, %v373_v47  ;;  %v247_v5 = vadd.f32 %v215_v55, %v119_v54  ;;  %v835_v8 = vunpack.c.l.bf16 %v1033_v57  ;;  %v1298_v47 = vld [vmem:[%s1719_s4 + $0xe8] sm:$0xff]  ;;  %v1064_v49 = vld [vmem:[%s1718_s3 + $0x18] sm:$0xff]  }
  0x10   :  { %v374_v13 = vadd.f32 %v342_v51, %v246_v60  ;;  %v343_v14 = vmul.f32 %v896_v61, %v1214_v50  ;;  %v471_v19 = vmul.f32 %v960_v6, %v1221_v53  ;;  %v120_v21 = vmul.f32 %v771_v7, %v1234_v62  ;;  %v1328_v60 = vld [vmem:[%s1719_s4 + $0xf0] sm:$0xff] }
  0x11   :  { %v729_v11 = vpack.c.bf16 %v500_v58, %v500_v58  ;;  %v730_v12 = vpack.c.bf16 %v501_v59, %v501_v59  ;;  %v216_v22 = vmul.f32 %v835_v8, %v1239_v63  ;;  %v899_v23 = vunpack.c.l.bf16 %v1048_v4  ;;  %v1319_v58 = vld [vmem:[%s1719_s4 + $0xb0] sm:$0xff] }
  0x12   :  { %v502_v28 = vadd.f32 %v470_v52, %v374_v13  ;;  %v375_v29 = vadd.f32 %v343_v14, %v247_v5  ;;  %v963_v30 = vunpack.c.l.bf16 %v1063_v9  ;;  %v772_v34 = vunpack.c.h.bf16 %v1018_v56  ;;  %v1309_v56 = vld [vmem:[%s1719_s4 + $0x30] sm:$0xff] }
  0x13   :  { %661 = vst.msk [vmem:[%s1720_s5] sm:$0xf] %vm660_vm0, %v729_v11  ;;  %662 = vst.msk [vmem:[%s1720_s5 + $0x4] sm:$0xf] %vm660_vm0, %v730_v12  ;;  %v248_v35 = vadd.f32 %v216_v22, %v120_v21  ;;  %v344_v36 = vmul.f32 %v899_v23, %v1251_v18  ;;  %v836_v37 = vunpack.c.h.bf16 %v1033_v57  ;;  %v900_v38 = vunpack.c.h.bf16 %v1048_v4  ;;  %v1314_v57 = vld [vmem:[%s1719_s4 + $0x70] sm:$0xff]  ;;  %v1334_v11 = vld [vmem:[%s1719_s4 + $0x38] sm:$0xff] }
  0x14   :  { %v731_v44 = vpack.c.bf16 %v502_v28, %v502_v28  ;;  %v503_v45 = vadd.f32 %v471_v19, %v375_v29  ;;  %v472_v46 = vmul.f32 %v963_v30, %v1257_v20  ;;  %v121_v48 = vmul.f32 %v772_v34, %v1264_v27  ;;  %v1346_v19 = vld [vmem:[%s1719_s4 + $0x78] sm:$0xff]  ;;  %v1020_v22 = vld [vmem:[%s1715_s0 + $0x20] sm:$0xff]  }
  0x15   :  { %v376_v51 = vadd.f32 %v344_v36, %v248_v35  ;;  %v217_v52 = vmul.f32 %v836_v37, %v1277_v32  ;;  %v345_v54 = vmul.f32 %v900_v38, %v1282_v33  ;;  %v964_v55 = vunpack.c.h.bf16 %v1063_v9  ;;  %v1035_v23 = vld [vmem:[%s1716_s1 + $0x20] sm:$0xff]   ;;  %v1358_v34 = vld [vmem:[%s1719_s4 + $0xb8] sm:$0xff] }
  0x16   :  { %663 = vst.msk [vmem:[%s1720_s5 + $0x8] sm:$0xf] %vm660_vm0, %v731_v44  ;;  %v732_v59 = vpack.c.bf16 %v503_v45, %v503_v45  ;;  %v775_v61 = vunpack.c.l.bf16 %v1019_v39  ;;  %v839_v4 = vunpack.c.l.bf16 %v1034_v41  ;;  %v903_v5 = vunpack.c.l.bf16 %v1049_v42  ;;  %v1363_v35 = vld [vmem:[%s1719_s4 + $0xf8] sm:$0xff]  ;;  %v1050_v37 = vld [vmem:[%s1717_s2 + $0x20] sm:$0xff]  }
  0x17   :  { %v504_v6 = vadd.f32 %v472_v46, %v376_v51  ;;  %v249_v7 = vadd.f32 %v217_v52, %v121_v48  ;;  %v473_v8 = vmul.f32 %v964_v55, %v1298_v47  ;;  %v967_v9 = vunpack.c.l.bf16 %v1064_v49 }
  0x18   :  { %664 = vst.msk [vmem:[%s1720_s5 + $0xc] sm:$0xf] %vm660_vm0, %v732_v59  ;;  %v122_v12 = vmul.f32 %v775_v61, %v1309_v56  ;;  %v218_v13 = vmul.f32 %v839_v4, %v1314_v57  ;;  %v346_v14 = vmul.f32 %v903_v5, %v1319_v58  ;;  %v776_v21 = vunpack.c.h.bf16 %v1019_v39 }
  0x19   :  { %v733_v28 = vpack.c.bf16 %v504_v6, %v504_v6  ;;  %v377_v29 = vadd.f32 %v345_v54, %v249_v7  ;;  %v474_v30 = vmul.f32 %v967_v9, %v1328_v60  ;;  %v840_v36 = vunpack.c.h.bf16 %v1034_v41  ;;  %v1065_v41 = vld [vmem:[%s1718_s3 + $0x20] sm:$0xff]  }
  0x1a   :  { %v250_v38 = vadd.f32 %v218_v13, %v122_v12  ;;  %v123_v39 = vmul.f32 %v776_v21, %v1334_v11  ;;  %v904_v44 = vunpack.c.h.bf16 %v1049_v42  ;;  %v968_v45 = vunpack.c.h.bf16 %v1064_v49 }
  0x1b   :  { %665 = vst.msk [vmem:[%s1720_s5 + $0x10] sm:$0xf] %vm660_vm0, %v733_v28  ;;  %v505_v46 = vadd.f32 %v473_v8, %v377_v29  ;;  %v219_v48 = vmul.f32 %v840_v36, %v1346_v19  ;;  %v779_v51 = vunpack.c.l.bf16 %v1020_v22  ;;  %v843_v52 = vunpack.c.l.bf16 %v1035_v23  ;;  %v1021_v28 = vld [vmem:[%s1715_s0 + $0x28] sm:$0xff]  }
  0x1c   :  { %v378_v54 = vadd.f32 %v346_v14, %v250_v38  ;;  %v347_v55 = vmul.f32 %v904_v44, %v1358_v34  ;;  %v475_v42 = vmul.f32 %v968_v45, %v1363_v35  ;;  %v907_v49 = vunpack.c.l.bf16 %v1050_v37  ;;  %v1036_v29 = vld [vmem:[%s1716_s1 + $0x28] sm:$0xff]  }
  0x1d   :  { %v734_v59 = vpack.c.bf16 %v505_v46, %v505_v46  ;;  %v251_v61 = vadd.f32 %v219_v48, %v123_v39  ;;  %v124_v4 = vmul.f32 %v779_v51, %v1110_v0  ;;  %v220_v5 = vmul.f32 %v843_v52, %v1115_v1 }
  0x1e   :  { %v506_v6 = vadd.f32 %v474_v30, %v378_v54  ;;  %v348_v7 = vmul.f32 %v907_v49, %v1120_v2  ;;  %v971_v8 = vunpack.c.l.bf16 %v1065_v41  ;;  %v780_v9 = vunpack.c.h.bf16 %v1020_v22  ;;  %v1051_v22 = vld [vmem:[%s1717_s2 + $0x28] sm:$0xff]  }
  0x1f   :  { %666 = vst.msk [vmem:[%s1720_s5 + $0x14] sm:$0xf] %vm660_vm0, %v734_v59  ;;  %v379_v12 = vadd.f32 %v347_v55, %v251_v61  ;;  %v252_v13 = vadd.f32 %v220_v5, %v124_v4  ;;  %v844_v14 = vunpack.c.h.bf16 %v1035_v23  ;;  %v908_v21 = vunpack.c.h.bf16 %v1050_v37  ;;  %v1066_v23 = vld [vmem:[%s1718_s3 + $0x28] sm:$0xff]  }
  0x20   :  { %v735_v30 = vpack.c.bf16 %v506_v6, %v506_v6  ;;  %v476_v36 = vmul.f32 %v971_v8, %v1125_v3  ;;  %v125_v38 = vmul.f32 %v780_v9, %v1142_v10  ;;  %v972_v39 = vunpack.c.h.bf16 %v1065_v41  ;;  %v1022_v6 = vld [vmem:[%s1715_s0 + $0x30] sm:$0xff]  }
  0x21   :  { %v507_v37 = vadd.f32 %v475_v42, %v379_v12  ;;  %v380_v44 = vadd.f32 %v348_v7, %v252_v13  ;;  %v221_v45 = vmul.f32 %v844_v14, %v1147_v15  ;;  %v349_v46 = vmul.f32 %v908_v21, %v1152_v16  ;;  %v1037_v7 = vld [vmem:[%s1716_s1 + $0x30] sm:$0xff]  }
  0x22   :  { %667 = vst.msk [vmem:[%s1720_s5 + $0x18] sm:$0xf] %vm660_vm0, %v735_v30  ;;  %v477_v48 = vmul.f32 %v972_v39, %v1157_v17  ;;  %v783_v51 = vunpack.c.l.bf16 %v1021_v28  ;;  %v847_v52 = vunpack.c.l.bf16 %v1036_v29  ;;  %v911_v41 = vunpack.c.l.bf16 %v1051_v22  ;;  %v1052_v14 = vld [vmem:[%s1717_s2 + $0x30] sm:$0xff]  }
  0x23   :  { %v736_v54 = vpack.c.bf16 %v507_v37, %v507_v37  ;;  %v508_v55 = vadd.f32 %v476_v36, %v380_v44  ;;  %v253_v49 = vadd.f32 %v221_v45, %v125_v38  ;;  %v975_v59 = vunpack.c.l.bf16 %v1066_v23 }
  0x24   :  { %v126_v42 = vmul.f32 %v783_v51, %v1166_v24  ;;  %v222_v61 = vmul.f32 %v847_v52, %v1171_v25  ;;  %v350_v4 = vmul.f32 %v911_v41, %v1176_v26  ;;  %v784_v5 = vunpack.c.h.bf16 %v1021_v28 }
  0x25   :  { %668 = vst.msk [vmem:[%s1720_s5 + $0x1c] sm:$0xf] %vm660_vm0, %v736_v54  ;;  %v737_v8 = vpack.c.bf16 %v508_v55, %v508_v55  ;;  %v381_v9 = vadd.f32 %v349_v46, %v253_v49  ;;  %v478_v12 = vmul.f32 %v975_v59, %v1185_v31  ;;  %v848_v13 = vunpack.c.h.bf16 %v1036_v29  ;;  %v1067_v29 = vld [vmem:[%s1718_s3 + $0x30] sm:$0xff]  }
  0x26   :  { %v254_v21 = vadd.f32 %v222_v61, %v126_v42  ;;  %v127_v28 = vmul.f32 %v784_v5, %v1202_v40  ;;  %v912_v30 = vunpack.c.h.bf16 %v1051_v22  ;;  %v976_v36 = vunpack.c.h.bf16 %v1066_v23 }
  0x27   :  { %669 = vst.msk [vmem:[%s1720_s5 + $0x20] sm:$0xf] %vm660_vm0, %v737_v8  ;;  %v509_v38 = vadd.f32 %v477_v48, %v381_v9  ;;  %v223_v39 = vmul.f32 %v848_v13, %v1207_v43  ;;  %v787_v37 = vunpack.c.l.bf16 %v1022_v6  ;;  %v851_v44 = vunpack.c.l.bf16 %v1037_v7  ;;  %v1023_v8 = vld [vmem:[%s1715_s0 + $0x38] sm:$0xff]  }
  0x28   :  { %v382_v45 = vadd.f32 %v350_v4, %v254_v21  ;;  %v351_v46 = vmul.f32 %v912_v30, %v1214_v50  ;;  %v479_v22 = vmul.f32 %v976_v36, %v1221_v53  ;;  %v915_v23 = vunpack.c.l.bf16 %v1052_v14  ;;  %v1038_v9 = vld [vmem:[%s1716_s1 + $0x38] sm:$0xff]  }
  0x29   :  { %v738_v51 = vpack.c.bf16 %v509_v38, %v509_v38  ;;  %v255_v52 = vadd.f32 %v223_v39, %v127_v28  ;;  %v128_v41 = vmul.f32 %v787_v37, %v1234_v62  ;;  %v224_v48 = vmul.f32 %v851_v44, %v1239_v63 }
  0x2a   :  { %v510_v54 = vadd.f32 %v478_v12, %v382_v45  ;;  %v352_v55 = vmul.f32 %v915_v23, %v1251_v18  ;;  %v979_v49 = vunpack.c.l.bf16 %v1067_v29  ;;  %v788_v59 = vunpack.c.h.bf16 %v1022_v6  ;;  %v1053_v6 = vld [vmem:[%s1717_s2 + $0x38] sm:$0xff]  }
  0x2b   :  { %670 = vst.msk [vmem:[%s1720_s5 + $0x24] sm:$0xf] %vm660_vm0, %v738_v51  ;;  %v383_v42 = vadd.f32 %v351_v46, %v255_v52  ;;  %v256_v61 = vadd.f32 %v224_v48, %v128_v41  ;;  %v852_v4 = vunpack.c.h.bf16 %v1037_v7  ;;  %v916_v5 = vunpack.c.h.bf16 %v1052_v14  ;;  %v1068_v7 = vld [vmem:[%s1718_s3 + $0x38] sm:$0xff]  }
  0x2c   :  { %v739_v12 = vpack.c.bf16 %v510_v54, %v510_v54  ;;  %v480_v13 = vmul.f32 %v979_v49, %v1257_v20  ;;  %v129_v21 = vmul.f32 %v788_v59, %v1264_v27  ;;  %v980_v28 = vunpack.c.h.bf16 %v1067_v29  ;;  %v1024_v54 = vld [vmem:[%s1715_s0 + $0x40] sm:$0xff]  }
  0x2d   :  { %v511_v14 = vadd.f32 %v479_v22, %v383_v42  ;;  %v384_v30 = vadd.f32 %v352_v55, %v256_v61  ;;  %v225_v36 = vmul.f32 %v852_v4, %v1277_v32  ;;  %v353_v38 = vmul.f32 %v916_v5, %v1282_v33  ;;  %v1039_v55 = vld [vmem:[%s1716_s1 + $0x40] sm:$0xff]  }
  0x2e   :  { %671 = vst.msk [vmem:[%s1720_s5 + $0x28] sm:$0xf] %vm660_vm0, %v739_v12  ;;  %v481_v39 = vmul.f32 %v980_v28, %v1298_v47  ;;  %v791_v37 = vunpack.c.l.bf16 %v1023_v8  ;;  %v855_v44 = vunpack.c.l.bf16 %v1038_v9  ;;  %v919_v29 = vunpack.c.l.bf16 %v1053_v6  ;;  %v1054_v4 = vld [vmem:[%s1717_s2 + $0x40] sm:$0xff]  }
  0x2f   :  { %v740_v45 = vpack.c.bf16 %v511_v14, %v511_v14  ;;  %v512_v46 = vadd.f32 %v480_v13, %v384_v30  ;;  %v257_v23 = vadd.f32 %v225_v36, %v129_v21  ;;  %v983_v51 = vunpack.c.l.bf16 %v1068_v7 }
  0x30   :  { %v130_v22 = vmul.f32 %v791_v37, %v1309_v56  ;;  %v226_v52 = vmul.f32 %v855_v44, %v1314_v57  ;;  %v354_v41 = vmul.f32 %v919_v29, %v1319_v58  ;;  %v792_v48 = vunpack.c.h.bf16 %v1023_v8 }
  0x31   :  { %672 = vst.msk [vmem:[%s1720_s5 + $0x2c] sm:$0xf] %vm660_vm0, %v740_v45  ;;  %v741_v49 = vpack.c.bf16 %v512_v46, %v512_v46  ;;  %v385_v59 = vadd.f32 %v353_v38, %v257_v23  ;;  %v482_v42 = vmul.f32 %v983_v51, %v1328_v60  ;;  %v856_v61 = vunpack.c.h.bf16 %v1038_v9  ;;  %v1069_v9 = vld [vmem:[%s1718_s3 + $0x40] sm:$0xff]  }
  0x32   :  { %v258_v5 = vadd.f32 %v226_v52, %v130_v22  ;;  %v131_v8 = vmul.f32 %v792_v48, %v1334_v11  ;;  %v920_v12 = vunpack.c.h.bf16 %v1053_v6  ;;  %v984_v13 = vunpack.c.h.bf16 %v1068_v7 }
  0x33   :  { %673 = vst.msk [vmem:[%s1720_s5 + $0x30] sm:$0xf] %vm660_vm0, %v741_v49  ;;  %v513_v21 = vadd.f32 %v481_v39, %v385_v59  ;;  %v227_v28 = vmul.f32 %v856_v61, %v1346_v19  ;;  %v795_v14 = vunpack.c.l.bf16 %v1024_v54  ;;  %v859_v30 = vunpack.c.l.bf16 %v1039_v55  ;;  %v1025_v49 = vld [vmem:[%s1715_s0 + $0x48] sm:$0xff]  }
  0x34   :  { %v386_v36 = vadd.f32 %v354_v41, %v258_v5  ;;  %v355_v38 = vmul.f32 %v920_v12, %v1358_v34  ;;  %v483_v6 = vmul.f32 %v984_v13, %v1363_v35  ;;  %v923_v7 = vunpack.c.l.bf16 %v1054_v4  ;;  %v1040_v59 = vld [vmem:[%s1716_s1 + $0x48] sm:$0xff]  }
  0x35   :  { %v742_v37 = vpack.c.bf16 %v513_v21, %v513_v21  ;;  %v259_v44 = vadd.f32 %v227_v28, %v131_v8  ;;  %v132_v29 = vmul.f32 %v795_v14, %v1110_v0  ;;  %v228_v39 = vmul.f32 %v859_v30, %v1115_v1 }
  0x36   :  { %v514_v45 = vadd.f32 %v482_v42, %v386_v36  ;;  %v356_v46 = vmul.f32 %v923_v7, %v1120_v2  ;;  %v987_v23 = vunpack.c.l.bf16 %v1069_v9  ;;  %v796_v51 = vunpack.c.h.bf16 %v1024_v54  ;;  %v1055_v54 = vld [vmem:[%s1717_s2 + $0x48] sm:$0xff]  }
  0x37   :  { %674 = vst.msk [vmem:[%s1720_s5 + $0x34] sm:$0xf] %vm660_vm0, %v742_v37  ;;  %v387_v22 = vadd.f32 %v355_v38, %v259_v44  ;;  %v260_v52 = vadd.f32 %v228_v39, %v132_v29  ;;  %v860_v41 = vunpack.c.h.bf16 %v1039_v55  ;;  %v924_v48 = vunpack.c.h.bf16 %v1054_v4  ;;  %v1070_v55 = vld [vmem:[%s1718_s3 + $0x48] sm:$0xff]  }
  0x38   :  { %v743_v42 = vpack.c.bf16 %v514_v45, %v514_v45  ;;  %v484_v61 = vmul.f32 %v987_v23, %v1125_v3  ;;  %v133_v5 = vmul.f32 %v796_v51, %v1142_v10  ;;  %v988_v8 = vunpack.c.h.bf16 %v1069_v9  ;;  %v1026_v45 = vld [vmem:[%s1715_s0 + $0x50] sm:$0xff]  }
  0x39   :  { %v515_v4 = vadd.f32 %v483_v6, %v387_v22  ;;  %v388_v12 = vadd.f32 %v356_v46, %v260_v52  ;;  %v229_v13 = vmul.f32 %v860_v41, %v1147_v15  ;;  %v357_v21 = vmul.f32 %v924_v48, %v1152_v16  ;;  %v1041_v46 = vld [vmem:[%s1716_s1 + $0x50] sm:$0xff]  }
  0x3a   :  { %675 = vst.msk [vmem:[%s1720_s5 + $0x38] sm:$0xf] %vm660_vm0, %v743_v42  ;;  %v485_v28 = vmul.f32 %v988_v8, %v1157_v17  ;;  %v799_v14 = vunpack.c.l.bf16 %v1025_v49  ;;  %v863_v30 = vunpack.c.l.bf16 %v1040_v59  ;;  %v927_v9 = vunpack.c.l.bf16 %v1055_v54  ;;  %v1056_v41 = vld [vmem:[%s1717_s2 + $0x50] sm:$0xff]  }
  0x3b   :  { %v744_v36 = vpack.c.bf16 %v515_v4, %v515_v4  ;;  %v516_v38 = vadd.f32 %v484_v61, %v388_v12  ;;  %v261_v7 = vadd.f32 %v229_v13, %v133_v5  ;;  %v991_v37 = vunpack.c.l.bf16 %v1070_v55 }
  0x3c   :  { %v134_v6 = vmul.f32 %v799_v14, %v1166_v24  ;;  %v230_v44 = vmul.f32 %v863_v30, %v1171_v25  ;;  %v358_v29 = vmul.f32 %v927_v9, %v1176_v26  ;;  %v800_v39 = vunpack.c.h.bf16 %v1025_v49 }
  0x3d   :  { %676 = vst.msk [vmem:[%s1720_s5 + $0x3c] sm:$0xf] %vm660_vm0, %v744_v36  ;;  %v745_v23 = vpack.c.bf16 %v516_v38, %v516_v38  ;;  %v389_v51 = vadd.f32 %v357_v21, %v261_v7  ;;  %v486_v22 = vmul.f32 %v991_v37, %v1185_v31  ;;  %v864_v52 = vunpack.c.h.bf16 %v1040_v59  ;;  %v1071_v59 = vld [vmem:[%s1718_s3 + $0x50] sm:$0xff]  }
  0x3e   :  { %v262_v48 = vadd.f32 %v230_v44, %v134_v6  ;;  %v135_v49 = vmul.f32 %v800_v39, %v1202_v40  ;;  %v928_v42 = vunpack.c.h.bf16 %v1055_v54  ;;  %v992_v61 = vunpack.c.h.bf16 %v1070_v55 }
  0x3f   :  { %677 = vst.msk [vmem:[%s1720_s5 + $0x40] sm:$0xf] %vm660_vm0, %v745_v23  ;;  %v517_v5 = vadd.f32 %v485_v28, %v389_v51  ;;  %v231_v8 = vmul.f32 %v864_v52, %v1207_v43  ;;  %v803_v4 = vunpack.c.l.bf16 %v1026_v45  ;;  %v867_v12 = vunpack.c.l.bf16 %v1041_v46  ;;  %v1027_v23 = vld [vmem:[%s1715_s0 + $0x58] sm:$0xff]  }
  0x40   :  { %v390_v13 = vadd.f32 %v358_v29, %v262_v48  ;;  %v359_v21 = vmul.f32 %v928_v42, %v1214_v50  ;;  %v487_v54 = vmul.f32 %v992_v61, %v1221_v53  ;;  %v931_v55 = vunpack.c.l.bf16 %v1056_v41  ;;  %v1042_v51 = vld [vmem:[%s1716_s1 + $0x58] sm:$0xff]  }
  0x41   :  { %v746_v14 = vpack.c.bf16 %v517_v5, %v517_v5  ;;  %v263_v30 = vadd.f32 %v231_v8, %v135_v49  ;;  %v136_v9 = vmul.f32 %v803_v4, %v1234_v62  ;;  %v232_v28 = vmul.f32 %v867_v12, %v1239_v63 }
  0x42   :  { %v518_v36 = vadd.f32 %v486_v22, %v390_v13  ;;  %v360_v38 = vmul.f32 %v931_v55, %v1251_v18  ;;  %v995_v7 = vunpack.c.l.bf16 %v1071_v59  ;;  %v804_v37 = vunpack.c.h.bf16 %v1026_v45  ;;  %v1057_v45 = vld [vmem:[%s1717_s2 + $0x58] sm:$0xff]  }
  0x43   :  { %678 = vst.msk [vmem:[%s1720_s5 + $0x44] sm:$0xf] %vm660_vm0, %v746_v14  ;;  %v391_v6 = vadd.f32 %v359_v21, %v263_v30  ;;  %v264_v44 = vadd.f32 %v232_v28, %v136_v9  ;;  %v868_v29 = vunpack.c.h.bf16 %v1041_v46  ;;  %v932_v39 = vunpack.c.h.bf16 %v1056_v41  ;;  %v1072_v46 = vld [vmem:[%s1718_s3 + $0x58] sm:$0xff]  }
  0x44   :  { %v747_v22 = vpack.c.bf16 %v518_v36, %v518_v36  ;;  %v488_v52 = vmul.f32 %v995_v7, %v1257_v20  ;;  %v137_v48 = vmul.f32 %v804_v37, %v1264_v27  ;;  %v996_v49 = vunpack.c.h.bf16 %v1071_v59  ;;  %v1028_v36 = vld [vmem:[%s1715_s0 + $0x60] sm:$0xff]  }
  0x45   :  { %v519_v41 = vadd.f32 %v487_v54, %v391_v6  ;;  %v392_v42 = vadd.f32 %v360_v38, %v264_v44  ;;  %v233_v61 = vmul.f32 %v868_v29, %v1277_v32  ;;  %v361_v5 = vmul.f32 %v932_v39, %v1282_v33  ;;  %v1043_v38 = vld [vmem:[%s1716_s1 + $0x60] sm:$0xff]  }
  0x46   :  { %679 = vst.msk [vmem:[%s1720_s5 + $0x48] sm:$0xf] %vm660_vm0, %v747_v22  ;;  %v489_v8 = vmul.f32 %v996_v49, %v1298_v47  ;;  %v807_v4 = vunpack.c.l.bf16 %v1027_v23  ;;  %v871_v12 = vunpack.c.l.bf16 %v1042_v51  ;;  %v935_v59 = vunpack.c.l.bf16 %v1057_v45  ;;  %v1058_v29 = vld [vmem:[%s1717_s2 + $0x60] sm:$0xff]  }
  0x47   :  { %v748_v13 = vpack.c.bf16 %v519_v41, %v519_v41  ;;  %v520_v21 = vadd.f32 %v488_v52, %v392_v42  ;;  %v265_v55 = vadd.f32 %v233_v61, %v137_v48  ;;  %v999_v14 = vunpack.c.l.bf16 %v1072_v46 }
  0x48   :  { %v138_v54 = vmul.f32 %v807_v4, %v1309_v56  ;;  %v234_v30 = vmul.f32 %v871_v12, %v1314_v57  ;;  %v362_v9 = vmul.f32 %v935_v59, %v1319_v58  ;;  %v808_v28 = vunpack.c.h.bf16 %v1027_v23 }
  0x49   :  { %680 = vst.msk [vmem:[%s1720_s5 + $0x4c] sm:$0xf] %vm660_vm0, %v748_v13  ;;  %v749_v7 = vpack.c.bf16 %v520_v21, %v520_v21  ;;  %v393_v37 = vadd.f32 %v361_v5, %v265_v55  ;;  %v490_v6 = vmul.f32 %v999_v14, %v1328_v60  ;;  %v872_v44 = vunpack.c.h.bf16 %v1042_v51  ;;  %v1073_v51 = vld [vmem:[%s1718_s3 + $0x60] sm:$0xff]  }
  0x4a   :  { %v266_v39 = vadd.f32 %v234_v30, %v138_v54  ;;  %v139_v23 = vmul.f32 %v808_v28, %v1334_v11  ;;  %v936_v22 = vunpack.c.h.bf16 %v1057_v45  ;;  %v1000_v52 = vunpack.c.h.bf16 %v1072_v46 }
  0x4b   :  { %681 = vst.msk [vmem:[%s1720_s5 + $0x50] sm:$0xf] %vm660_vm0, %v749_v7  ;;  %v521_v48 = vadd.f32 %v489_v8, %v393_v37  ;;  %v235_v49 = vmul.f32 %v872_v44, %v1346_v19  ;;  %v811_v41 = vunpack.c.l.bf16 %v1028_v36  ;;  %v875_v42 = vunpack.c.l.bf16 %v1043_v38 }
  0x4c   :  { %v394_v61 = vadd.f32 %v362_v9, %v266_v39  ;;  %v363_v5 = vmul.f32 %v936_v22, %v1358_v34  ;;  %v491_v45 = vmul.f32 %v1000_v52, %v1363_v35  ;;  %v939_v46 = vunpack.c.l.bf16 %v1058_v29 }
  0x4d   :  { %v750_v4 = vpack.c.bf16 %v521_v48, %v521_v48  ;;  %v267_v12 = vadd.f32 %v235_v49, %v139_v23  ;;  %v140_v59 = vmul.f32 %v811_v41, %v1110_v0  ;;  %v236_v8 = vmul.f32 %v875_v42, %v1115_v1  ;;  %v1029_v0 = vld [vmem:[%s1715_s0 + $0x68] sm:$0xff]  }
  0x4e   :  { %v522_v13 = vadd.f32 %v490_v6, %v394_v61  ;;  %v364_v21 = vmul.f32 %v939_v46, %v1120_v2  ;;  %v1003_v55 = vunpack.c.l.bf16 %v1073_v51  ;;  %v812_v14 = vunpack.c.h.bf16 %v1028_v36  ;;  %v1044_v1 = vld [vmem:[%s1716_s1 + $0x68] sm:$0xff]  }
  0x4f   :  { %682 = vst.msk [vmem:[%s1720_s5 + $0x54] sm:$0xf] %vm660_vm0, %v750_v4  ;;  %v395_v54 = vadd.f32 %v363_v5, %v267_v12  ;;  %v268_v30 = vadd.f32 %v236_v8, %v140_v59  ;;  %v876_v9 = vunpack.c.h.bf16 %v1043_v38  ;;  %v940_v28 = vunpack.c.h.bf16 %v1058_v29  ;;  %v1059_v2 = vld [vmem:[%s1717_s2 + $0x68] sm:$0xff]   ;;  %v1030_v5 = vld [vmem:[%s1715_s0 + $0x70] sm:$0xff]  }
  0x50   :  { %v751_v36 = vpack.c.bf16 %v522_v13, %v522_v13  ;;  %v492_v7 = vmul.f32 %v1003_v55, %v1125_v3  ;;  %v141_v37 = vmul.f32 %v812_v14, %v1142_v10  ;;  %v1004_v6 = vunpack.c.h.bf16 %v1073_v51  ;;  %v1074_v38 = vld [vmem:[%s1718_s3 + $0x68] sm:$0xff]   ;;  %v1075_v14 = vld [vmem:[%s1718_s3 + $0x70] sm:$0xff]  }
  0x51   :  { %v523_v44 = vadd.f32 %v491_v45, %v395_v54  ;;  %v396_v29 = vadd.f32 %v364_v21, %v268_v30  ;;  %v237_v39 = vmul.f32 %v876_v9, %v1147_v15  ;;  %v365_v23 = vmul.f32 %v940_v28, %v1152_v16 }
  0x52   :  { %683 = vst.msk [vmem:[%s1720_s5 + $0x58] sm:$0xf] %vm660_vm0, %v751_v36  ;;  %v493_v3 = vmul.f32 %v1004_v6, %v1157_v17  ;;  %v815_v22 = vunpack.c.l.bf16 %v1029_v0  ;;  %v879_v10 = vunpack.c.l.bf16 %v1044_v1  ;;  %v943_v52 = vunpack.c.l.bf16 %v1059_v2  ;;  %v1045_v17 = vld [vmem:[%s1716_s1 + $0x70] sm:$0xff]  }
  0x53   :  { %v752_v48 = vpack.c.bf16 %v523_v44, %v523_v44  ;;  %v524_v49 = vadd.f32 %v492_v7, %v396_v29  ;;  %v269_v41 = vadd.f32 %v237_v39, %v141_v37  ;;  %v1007_v42 = vunpack.c.l.bf16 %v1074_v38 }
  0x54   :  { %v142_v51 = vmul.f32 %v815_v22, %v1166_v24  ;;  %v238_v15 = vmul.f32 %v879_v10, %v1171_v25  ;;  %v366_v16 = vmul.f32 %v943_v52, %v1176_v26  ;;  %v816_v61 = vunpack.c.h.bf16 %v1029_v0  ;;  %v1060_v26 = vld [vmem:[%s1717_s2 + $0x70] sm:$0xff]  }
  0x55   :  { %684 = vst.msk [vmem:[%s1720_s5 + $0x5c] sm:$0xf] %vm660_vm0, %v752_v48  ;;  %v753_v45 = vpack.c.bf16 %v524_v49, %v524_v49  ;;  %v397_v24 = vadd.f32 %v365_v23, %v269_v41  ;;  %v494_v25 = vmul.f32 %v1007_v42, %v1185_v31  ;;  %v880_v46 = vunpack.c.h.bf16 %v1044_v1 }
  0x56   :  { %v270_v4 = vadd.f32 %v238_v15, %v142_v51  ;;  %v143_v12 = vmul.f32 %v816_v61, %v1202_v40  ;;  %v944_v59 = vunpack.c.h.bf16 %v1059_v2  ;;  %v1008_v8 = vunpack.c.h.bf16 %v1074_v38 }
  0x57   :  { %685 = vst.msk [vmem:[%s1720_s5 + $0x60] sm:$0xf] %vm660_vm0, %v753_v45  ;;  %v525_v13 = vadd.f32 %v493_v3, %v397_v24  ;;  %v239_v21 = vmul.f32 %v880_v46, %v1207_v43  ;;  %v819_v55 = vunpack.c.l.bf16 %v1030_v5  ;;  %v883_v31 = vunpack.c.l.bf16 %v1045_v17  ;;  %v1076_v3 = vld [vmem:[%s1718_s3 + $0x78] sm:$0xff]  }
  0x58   :  { %v398_v54 = vadd.f32 %v366_v16, %v270_v4  ;;  %v367_v30 = vmul.f32 %v944_v59, %v1214_v50  ;;  %v495_v40 = vmul.f32 %v1008_v8, %v1221_v53  ;;  %v947_v9 = vunpack.c.l.bf16 %v1060_v26 }
  0x59   :  { %v754_v28 = vpack.c.bf16 %v525_v13, %v525_v13  ;;  %v271_v0 = vadd.f32 %v239_v21, %v143_v12  ;;  %v144_v1 = vmul.f32 %v819_v55, %v1234_v62  ;;  %v240_v2 = vmul.f32 %v883_v31, %v1239_v63  ;;  %v1031_v62 = vld [vmem:[%s1715_s0 + $0x78] sm:$0xff]  }
  0x5a   :  { %v526_v36 = vadd.f32 %v494_v25, %v398_v54  ;;  %v368_v43 = vmul.f32 %v947_v9, %v1251_v18  ;;  %v1011_v7 = vunpack.c.l.bf16 %v1075_v14  ;;  %v820_v37 = vunpack.c.h.bf16 %v1030_v5  ;;  %v1046_v63 = vld [vmem:[%s1716_s1 + $0x78] sm:$0xff]  }
  0x5b   :  { %686 = vst.msk [vmem:[%s1720_s5 + $0x64] sm:$0xf] %vm660_vm0, %v754_v28  ;;  %v399_v50 = vadd.f32 %v367_v30, %v271_v0  ;;  %v272_v6 = vadd.f32 %v240_v2, %v144_v1  ;;  %v884_v53 = vunpack.c.h.bf16 %v1045_v17  ;;  %v948_v38 = vunpack.c.h.bf16 %v1060_v26  ;;  %v1061_v18 = vld [vmem:[%s1717_s2 + $0x78] sm:$0xff]  }
  0x5c   :  { %v755_v44 = vpack.c.bf16 %v526_v36, %v526_v36  ;;  %v496_v29 = vmul.f32 %v1011_v7, %v1257_v20  ;;  %v145_v39 = vmul.f32 %v820_v37, %v1264_v27  ;;  %v1012_v23 = vunpack.c.h.bf16 %v1075_v14 }
  0x5d   :  { %v527_v22 = vadd.f32 %v495_v40, %v399_v50  ;;  %v400_v10 = vadd.f32 %v368_v43, %v272_v6  ;;  %v241_v52 = vmul.f32 %v884_v53, %v1277_v32  ;;  %v369_v48 = vmul.f32 %v948_v38, %v1282_v33 }
  0x5e   :  { %687 = vst.msk [vmem:[%s1720_s5 + $0x68] sm:$0xf] %vm660_vm0, %v755_v44  ;;  %v497_v20 = vmul.f32 %v1012_v23, %v1298_v47  ;;  %v823_v49 = vunpack.c.l.bf16 %v1031_v62  ;;  %v887_v27 = vunpack.c.l.bf16 %v1046_v63  ;;  %v951_v41 = vunpack.c.l.bf16 %v1061_v18 }
  0x5f   :  { %v756_v42 = vpack.c.bf16 %v527_v22, %v527_v22  ;;  %v528_v51 = vadd.f32 %v496_v29, %v400_v10  ;;  %v273_v15 = vadd.f32 %v241_v52, %v145_v39  ;;  %v1015_v16 = vunpack.c.l.bf16 %v1076_v3 }
  0x60   :  { %v146_v61 = vmul.f32 %v823_v49, %v1309_v56  ;;  %v242_v32 = vmul.f32 %v887_v27, %v1314_v57  ;;  %v370_v33 = vmul.f32 %v951_v41, %v1319_v58  ;;  %v824_v5 = vunpack.c.h.bf16 %v1031_v62 }
  0x61   :  { %688 = vst.msk [vmem:[%s1720_s5 + $0x6c] sm:$0xf] %vm660_vm0, %v756_v42  ;;  %v757_v47 = vpack.c.bf16 %v528_v51, %v528_v51  ;;  %v401_v17 = vadd.f32 %v369_v48, %v273_v15  ;;  %v498_v45 = vmul.f32 %v1015_v16, %v1328_v60  ;;  %v888_v24 = vunpack.c.h.bf16 %v1046_v63 }
  0x62   :  { %v274_v25 = vadd.f32 %v242_v32, %v146_v61  ;;  %v147_v46 = vmul.f32 %v824_v5, %v1334_v11  ;;  %v952_v26 = vunpack.c.h.bf16 %v1061_v18  ;;  %v1016_v56 = vunpack.c.h.bf16 %v1076_v3 }
  0x63   :  { %689 = vst.msk [vmem:[%s1720_s5 + $0x70] sm:$0xf] %vm660_vm0, %v757_v47  ;;  %v529_v57 = vadd.f32 %v497_v20, %v401_v17  ;;  %v243_v58 = vmul.f32 %v888_v24, %v1346_v19 }
  0x64   :  { %v402_v4 = vadd.f32 %v370_v33, %v274_v25  ;;  %v371_v12 = vmul.f32 %v952_v26, %v1358_v34  ;;  %v499_v60 = vmul.f32 %v1016_v56, %v1363_v35 }
  0x65   :  { %v758_v59 = vpack.c.bf16 %v529_v57, %v529_v57  ;;  %v275_v8 = vadd.f32 %v243_v58, %v147_v46 }
  0x66   :  { %v530_v13 = vadd.f32 %v498_v45, %v402_v4 }
  0x67   :  { %690 = vst.msk [vmem:[%s1720_s5 + $0x74] sm:$0xf] %vm660_vm0, %v758_v59  ;;  %v403_v11 = vadd.f32 %v371_v12, %v275_v8 }
  0x68   :  { %v759_v21 = vpack.c.bf16 %v530_v13, %v530_v13 }
  0x69   :  { %v531_v55 = vadd.f32 %v499_v60, %v403_v11 }
  0x6a   :  { %691 = vst.msk [vmem:[%s1720_s5 + $0x78] sm:$0xf] %vm660_vm0, %v759_v21 }
  0x6b   :  { %v760_v19 = vpack.c.bf16 %v531_v55, %v531_v55 }
  0x6d   :  { %692 = vst.msk [vmem:[%s1720_s5 + $0x7c] sm:$0xf] %vm660_vm0, %v760_v19 }

// kernel: d_forward.31
= control target key start
LH: loop header
LB: loop body
LE: loop exit
PB: predicated region body
PF: predicated region fallthrough
CT: control target
= control target key end

     0   :  { %s732_s0 = inlined_call_operand.vmem [shape: bf16[1,50], index: 0, kind: input, shape index: {}]   ;;  %s733_s1 = inlined_call_operand.vmem [shape: bf16[50,8192], index: 1, kind: input, shape index: {}]   ;;  %s734_s2 = inlined_call_operand.<no memory space> [shape: f32[1,1], index: 2, kind: input, shape index: {}]   ;;  %s735_s3 = inlined_call_operand.vmem [shape: bf16[1,8192], index: 3, kind: output, shape index: {}]  }
   0x1   :  { %v8_v0 = vstv %s734_s2 }
   0x2   :  { %9 = vst [vmem:[#allocation2] sm:$0x1] %v8_v0 }
   0x3   :  { %s658_s14 = smov 0   ;;  %s660_s15 = smov 0  }
   0x4   :  { %s662_s16 = smov 0  }
   0x5 LB: > { %s525_s2 = sadd.s32 4294967295, %s631_s16   ;;  %s675_s17 = sadd.s32 1, %s631_s16   ;;  %s631_s16 = sphi %s662_s16, %s742_s16   ;;  %s627_s15 = sphi %s660_s15, %s741_s15   ;;  %s623_s14 = sphi %s658_s14, %s740_s14  }
   0x6   : > { %s40_s18 = ssub.s32 %s631_s16, %s675_s17  ;;  %s43_s19 = sadd.s32 1, %s627_s15 }
   0x7   : > { %p41_p0 = scmp.eq.s32.totalorder %s40_s18, 0  ;;  %p50_p1 = scmp.ne.s32.totalorder %s627_s15, %s623_s14 }
   0x8   : > { %p51_p2 = scmp.eq.s32.totalorder %s631_s16, 0  ;;  %p528_p4 = scmp.ge.s32.totalorder %s631_s16, 16 }
   0x9   : > { %s684_s20 = scalar_select %p41_p0, %s627_s15, %s43_s19  }
   0xa   : > { %p52_p3 = por %p51_p2, %p50_p1  ;;  %129 = sbr.rel (%p528_p4) target bundleno = 28 (0x1c), region = 24 }
  0x11   : > { %132 = sbr.rel (!%p52_p3) target bundleno = 28 (0x1c), region = 28  ;;  %s134_s21 = sand.u32 (%p52_p3), 1, %s627_s15  }
  0x12   : > { %s557_s22 = sshll.u32 (%p52_p3), %s631_s16, 4  ;;  %s558_s23 = smul.u32 (%p52_p3), 112, %s134_s21 }
  0x13   : > { %s139_s26 = scalar_lea.vmem (%p52_p3), %s733_s1, %s557_s22 }
  0x14   : > { %v152_v1 = vld [vmem:[%s139_s26] sm:$0xff] (%p52_p3)  ;;  %v154_v2 = vld [vmem:[%s139_s26 + $0x8] sm:$0xff] (%p52_p3)  ;;  %s136_s27 = scalar_lea.vmem (%p52_p3), [#allocation3], %s558_s23 }
  0x15   : > { %v156_v3 = vld [vmem:[%s139_s26 + $0x100] sm:$0xff] (%p52_p3)  ;;  %v158_v4 = vld [vmem:[%s139_s26 + $0x108] sm:$0xff] (%p52_p3)  ;;  %153 = vst [vmem:[%s136_s27] sm:$0xff] (%p52_p3), %v152_v1  ;;  %155 = vst [vmem:[%s136_s27 + $0x8] sm:$0xff] (%p52_p3), %v154_v2 }
  0x16   : > { %v160_v5 = vld [vmem:[%s139_s26 + $0x200] sm:$0xff] (%p52_p3)  ;;  %v162_v6 = vld [vmem:[%s139_s26 + $0x208] sm:$0xff] (%p52_p3)  ;;  %157 = vst [vmem:[%s136_s27 + $0x10] sm:$0xff] (%p52_p3), %v156_v3  ;;  %159 = vst [vmem:[%s136_s27 + $0x18] sm:$0xff] (%p52_p3), %v158_v4 }
  0x17   : > { %161 = vst [vmem:[%s136_s27 + $0x20] sm:$0xff] (%p52_p3), %v160_v5  ;;  %163 = vst [vmem:[%s136_s27 + $0x28] sm:$0xff] (%p52_p3), %v162_v6  ;;  %v164_v7 = vld [vmem:[%s139_s26 + $0x300] sm:$0xff] (%p52_p3)  ;;  %v166_v8 = vld [vmem:[%s139_s26 + $0x308] sm:$0xff] (%p52_p3) }
  0x18   : > { %v168_v9 = vld [vmem:[%s139_s26 + $0x400] sm:$0xff]  ;;  %165 = vst [vmem:[%s136_s27 + $0x30] sm:$0xff] %v164_v7  ;;  %167 = vst [vmem:[%s136_s27 + $0x38] sm:$0xff] %v166_v8  ;;  %v170_v10 = vld [vmem:[%s139_s26 + $0x408] sm:$0xff] }
  0x19   : > { %169 = vst [vmem:[%s136_s27 + $0x40] sm:$0xff] %v168_v9  ;;  %v172_v11 = vld [vmem:[%s139_s26 + $0x500] sm:$0xff]  ;;  %v174_v12 = vld [vmem:[%s139_s26 + $0x508] sm:$0xff]  ;;  %171 = vst [vmem:[%s136_s27 + $0x48] sm:$0xff] %v170_v10 }
  0x1a   : > { %173 = vst [vmem:[%s136_s27 + $0x50] sm:$0xff] %v172_v11  ;;  %175 = vst [vmem:[%s136_s27 + $0x58] sm:$0xff] %v174_v12  ;;  %v176_v13 = vld [vmem:[%s139_s26 + $0x600] sm:$0xff]  ;;  %v178_v14 = vld [vmem:[%s139_s26 + $0x608] sm:$0xff] }
  0x1b   : > { %177 = vst [vmem:[%s136_s27 + $0x60] sm:$0xff] %v176_v13  ;;  %179 = vst [vmem:[%s136_s27 + $0x68] sm:$0xff] %v178_v14 }
  0x1c PF: > { %p531_p5 = scmp.ge.s32.totalorder %s631_s16, 1  ;;  %p184_p6 = scmp.lt.s32.totalorder %s631_s16, 17 }
  0x1e   : > { %p185_p7 = pnand %p531_p5, %p184_p6 }
  0x1f   : > { %s191_s28 = sand.u32 (!%p185_p7), 1, %s623_s14   ;;  %v633_v15 = vmov (!%p185_p7), 0   ;;  %v235_v16 = vld [vmem:[#allocation2] sm:$0x1] (!%p185_p7)  ;;  %vm319_vm0 = vcmask (!%p185_p7), 1040384   ;;  %vm315_vm1 = vcmask (!%p185_p7), 408576   ;;  %v241_v38 = vlaneseq (!%p185_p7) }
  0x20   : > { %188 = sbr.rel (%p185_p7) target bundleno = 280 (0x118), region = 51  ;;  %364 = vmatprep.mubr.bf16.mxu0 (!%p185_p7), %v633_v15  ;;  %405 = vmatprep.mubr.bf16.mxu1 (!%p185_p7), %v633_v15  ;;  %v220_v37 = vld [vmem:[%s732_s0] sm:$0x1] (!%p185_p7)  ;;  %vm452_vm2 = vsmask.f32 (!%p185_p7), 256  ;;  %vm454_vm3 = vcmask (!%p185_p7), 1041409  }
  0x21   : > { %s559_s29 = smul.u32 (!%p185_p7), 112, %s191_s28  ;;  %586 = vset.pattern.permute.xlu0 (!%p185_p7), %v633_v15  ;;  %v242_v39 = vshrl.u32 (!%p185_p7), %v241_v38, 7  ;;  %v634_v42 = vmov (!%p185_p7), 1966171168   ;;  %vm455_vm4 = vsmask.f32 (!%p185_p7), 1280  ;;  %vm705_vm5 = vmand (!%p185_p7), %vm319_vm0, %vm452_vm2 }
  0x22   : > { %238 = vperm.xlu0 (!%p185_p7), %586, %v235_v16   ;;  %v429_v43 = vunpack.c.l.s4 (!%p185_p7), %v634_v42  ;;  %s532_s6 = sshll.u32 (!%p185_p7), %s525_s2, 2  ;;  %vm709_vm6 = vmand (!%p185_p7), %vm454_vm3, %vm455_vm4  ;;  %vm458_vm7 = vcmask (!%p185_p7), 1042434   ;;  %vm459_vm8 = vsmask.f32 (!%p185_p7), 2304  ;;  %vm462_vm11 = vcmask (!%p185_p7), 1043459  }
  0x23   : > { %s193_s30 = scalar_lea.vmem (!%p185_p7), [#allocation3], %s559_s29  ;;  %v243_v40 = vsub.s32 (!%p185_p7), 0, %v242_v39  ;;  %p215_p8 = scmp.lt.s32.totalorder (!%p185_p7), %s532_s6, 63  ;;  %vm457_vm9 = vmor (!%p185_p7), %vm709_vm6, %vm705_vm5  ;;  %vm463_vm12 = vsmask.f32 (!%p185_p7), 3328 }
  0x24   : > { %v587_v17 = vld [vmem:[%s193_s30 + $0x4] ss:$16 sps:$4 sm:$0xff] (!%p185_p7)   ;;  %v589_v18 = vld [vmem:[%s193_s30 + $0xc] ss:$16 sps:$4 sm:$0xff] (!%p185_p7)   ;;  %v591_v19 = vld [vmem:[%s193_s30] ss:$16 sps:$4 sm:$0xff] (!%p185_p7)   ;;  %v430_v47 = vunpack.c.0.s8 (!%p185_p7), %v429_v43 }
  0x25   : > { %332 = vmatprep.subr.bf16.mxu0 (!%p185_p7), %v587_v17  ;;  %v592_v20 = vld [vmem:[%s193_s30 + $0x8] ss:$16 sps:$4 sm:$0xff] (!%p185_p7)   ;;  %373 = vmatprep.subr.bf16.mxu1 (!%p185_p7), %v589_v18  ;;  %v593_v21 = vld [vmem:[%s193_s30 + $0x24] ss:$16 sps:$4 sm:$0xff] (!%p185_p7)   ;;  %v595_v22 = vld [vmem:[%s193_s30 + $0x2c] ss:$16 sps:$4 sm:$0xff] (!%p185_p7)  }
  0x26   : > { %333 = vmatpush1.bf16.msra.mxu0 (!%p185_p7), %v591_v19  ;;  %374 = vmatpush1.bf16.msra.mxu1 (!%p185_p7), %v592_v20  ;;  %v597_v23 = vld [vmem:[%s193_s30 + $0x20] ss:$16 sps:$4 sm:$0xff] (!%p185_p7)   ;;  %v598_v24 = vld [vmem:[%s193_s30 + $0x28] ss:$16 sps:$4 sm:$0xff] (!%p185_p7)   ;;  %v599_v25 = vld [vmem:[%s193_s30 + $0x44] ss:$16 sps:$4 sm:$0xff] (!%p185_p7)   ;;  %v433_v62 = vsub.s32 (!%p185_p7), %v430_v47, %v242_v39 }
  0x27   : > { %334 = vmatprep.subr.bf16.mxu0 %v593_v21  ;;  %375 = vmatprep.subr.bf16.mxu1 %v595_v22  ;;  %v601_v26 = vld [vmem:[%s193_s30 + $0x4c] ss:$16 sps:$4 sm:$0xff]   ;;  %v603_v27 = vld [vmem:[%s193_s30 + $0x40] ss:$16 sps:$4 sm:$0xff]   ;;  %v604_v28 = vld [vmem:[%s193_s30 + $0x48] ss:$16 sps:$4 sm:$0xff]  }
  0x28   : > { %v233_v29 = vld [vmem:[%s193_s30 + $0x60] sm:$0x11]  ;;  %v234_v30 = vld [vmem:[%s193_s30 + $0x68] sm:$0x11]  ;;  %vm460_vm10 = vmand %vm458_vm7, %vm459_vm8  ;;  %s744_s6 = smov (!%p215_p8, %s532_s6), 63 }
  0x29   : > { %v546_v31 = vcombine.high %v233_v29, %v233_v29  ;;  %v548_v32 = vcombine.high %v234_v30, %v234_v30  ;;  %v545_v33 = vcombine.low %v233_v29, %v233_v29  ;;  %v547_v34 = vcombine.low %v234_v30, %v234_v30  ;;  %vm461_vm13 = vmor %vm460_vm10, %vm457_vm9  ;;  %s217_s9 = scalar_lea.vmem %s735_s3, %s744_s6 }
  0x2a   : > { %335 = vmatpush1.bf16.msra.mxu0 %v597_v23  ;;  %376 = vmatpush1.bf16.msra.mxu1 %v598_v24  ;;  %vm464_vm14 = vmand %vm462_vm11, %vm463_vm12  ;;  %v466_v6 = vld [vmem:[%s217_s9] sm:$0xf] }
  0x2b   : > { %336 = vmatprep.subr.bf16.mxu0 %v599_v25  ;;  %377 = vmatprep.subr.bf16.mxu1 %v601_v26  ;;  %v321_v35 = vsel %vm319_vm0, %v545_v33, 0  ;;  %v327_v36 = vsel %vm319_vm0, %v547_v34, 0  ;;  %vm465_vm15 = vmor %vm464_vm14, %vm461_vm13 }
  0x2e   : > { %337 = vmatpush1.bf16.msra.mxu0 %v603_v27  ;;  %378 = vmatpush1.bf16.msra.mxu1 %v604_v28 }
  0x2f   : > { %549 = vmatprep.subr.msk.bf16.mxu0 %vm319_vm0, %v546_v31  ;;  %551 = vmatprep.subr.msk.bf16.mxu1 %vm319_vm0, %v548_v32 }
  0x32   : > { %339 = vmatpush1.bf16.msra.mxu0 %v321_v35  ;;  %380 = vmatpush1.bf16.msra.mxu1 %v327_v36 }
  0x35   : > { %550 = vmatmul.mubr.msk.bf16.vlgmr.msra.gmra.mrb[0].mxu0 %vm315_vm1, %v220_v37  ;;  %552 = vmatmul.mubr.msk.bf16.vlgmr.msra.gmra.mrb[0].mxu1 %vm315_vm1, %v220_v37 }
  0xa1   : > { %v239_v41 = vpop.permute.xlu0 %238 }
  0xa2   : > { %v244_v44 = vrot.slane %v239_v41, %v243_v40 }
 0x108   : > { %v366_v48 = vpop.f32.mrb[0].mxu0  ;;  %v407_v49 = vpop.f32.mrb[0].mxu1 }
 0x109   : > { %v367_v50 = vadd.f32 %v366_v48, %v244_v44  ;;  %v408_v51 = vadd.f32 %v407_v49, %v244_v44  ;;  %v368_v52 = vpop.f32.mrb[1].mxu0  ;;  %v409_v53 = vpop.f32.mrb[1].mxu1 }
 0x10a   : > { %v369_v54 = vadd.f32 %v368_v52, %v244_v44  ;;  %v410_v55 = vadd.f32 %v409_v53, %v244_v44  ;;  %v370_v56 = vpop.f32.mrb[2].mxu0  ;;  %v411_v57 = vpop.f32.mrb[2].mxu1 }
 0x10b   : > { %v414_v58 = vmax.f32 %v367_v50, 0.0  ;;  %v416_v59 = vmax.f32 %v408_v51, 0.0  ;;  %v371_v60 = vpop.f32.mrb[3].mxu0  ;;  %v412_v61 = vpop.f32.mrb[3].mxu1 }
 0x10c   : > { %v415_v63 = vmax.f32 %v369_v54, 0.0  ;;  %v417_v0 = vmax.f32 %v410_v55, 0.0 }
 0x10e   : > { %v553_v1 = vpack.c.bf16 %v415_v63, %v414_v58  ;;  %v554_v2 = vpack.c.bf16 %v417_v0, %v416_v59 }
 0x110   : > { %v434_v3 = vrot.slane %v553_v1, %v433_v62  ;;  %v441_v4 = vrot.slane %v554_v2, %v433_v62 }
 0x112   : > { %v442_v5 = vcombine.low %v434_v3, %v441_v4 }
 0x114   : > { %v449_v7 = vrot.slane %v442_v5, %v433_v62 }
 0x116   : > { %v467_v8 = vsel %vm465_vm15, %v449_v7, %v466_v6 }
 0x117   : > { %468 = vst [vmem:[%s217_s9] sm:$0xf] %v467_v8 }
 0x118 PF: > { %p12_p9 = scmp.ge.s32.totalorder %s675_s17, 18   ;;  %s740_s14 = smov %s627_s15 }
 0x119   : > { %s741_s15 = smov %s684_s20  ;;  %s742_s16 = smov %s675_s17 }
 0x11a   :  { %14 = sbr.rel (!%p12_p9) target bundleno = 5 (0x5), region = 90 }

// kernel: d_forward.32
= control target key start
LH: loop header
LB: loop body
LE: loop exit
PB: predicated region body
PF: predicated region fallthrough
CT: control target
= control target key end

     0   :  { %s731_s0 = inlined_call_operand.vmem [shape: bf16[1,50], index: 0, kind: input, shape index: {}]   ;;  %s732_s1 = inlined_call_operand.vmem [shape: bf16[50,8192], index: 1, kind: input, shape index: {}]   ;;  %s733_s2 = inlined_call_operand.<no memory space> [shape: f32[1,1], index: 2, kind: input, shape index: {}]   ;;  %s734_s3 = inlined_call_operand.vmem [shape: bf16[1,8192], index: 3, kind: output, shape index: {}]  }
   0x1   :  { %v8_v0 = vstv %s733_s2 }
   0x2   :  { %9 = vst [vmem:[#allocation2] sm:$0x1] %v8_v0 }
   0x3   :  { %s654_s14 = smov 0   ;;  %s656_s15 = smov 0  }
   0x4   :  { %s658_s16 = smov 0  }
   0x5 LB: > { %s521_s2 = sadd.s32 4294967295, %s627_s16   ;;  %s671_s17 = sadd.s32 1, %s627_s16   ;;  %s627_s16 = sphi %s658_s16, %s741_s16   ;;  %s623_s15 = sphi %s656_s15, %s740_s15   ;;  %s619_s14 = sphi %s654_s14, %s739_s14  }
   0x6   : > { %s40_s18 = ssub.s32 %s627_s16, %s671_s17  ;;  %s43_s19 = sadd.s32 1, %s623_s15 }
   0x7   : > { %p41_p0 = scmp.eq.s32.totalorder %s40_s18, 0  ;;  %p50_p1 = scmp.ne.s32.totalorder %s623_s15, %s619_s14 }
   0x8   : > { %p51_p2 = scmp.eq.s32.totalorder %s627_s16, 0  ;;  %p524_p4 = scmp.ge.s32.totalorder %s627_s16, 16 }
   0x9   : > { %s680_s20 = scalar_select %p41_p0, %s623_s15, %s43_s19  }
   0xa   : > { %p52_p3 = por %p51_p2, %p50_p1  ;;  %129 = sbr.rel (%p524_p4) target bundleno = 28 (0x1c), region = 24 }
  0x11   : > { %132 = sbr.rel (!%p52_p3) target bundleno = 28 (0x1c), region = 28  ;;  %s134_s21 = sand.u32 (%p52_p3), 1, %s623_s15  }
  0x12   : > { %s553_s22 = sshll.u32 (%p52_p3), %s627_s16, 4  ;;  %s554_s23 = smul.u32 (%p52_p3), 112, %s134_s21 }
  0x13   : > { %s139_s26 = scalar_lea.vmem (%p52_p3), %s732_s1, %s553_s22 }
  0x14   : > { %v152_v1 = vld [vmem:[%s139_s26] sm:$0xff] (%p52_p3)  ;;  %v154_v2 = vld [vmem:[%s139_s26 + $0x8] sm:$0xff] (%p52_p3)  ;;  %s136_s27 = scalar_lea.vmem (%p52_p3), [#allocation3], %s554_s23 }
  0x15   : > { %v156_v3 = vld [vmem:[%s139_s26 + $0x100] sm:$0xff] (%p52_p3)  ;;  %v158_v4 = vld [vmem:[%s139_s26 + $0x108] sm:$0xff] (%p52_p3)  ;;  %153 = vst [vmem:[%s136_s27] sm:$0xff] (%p52_p3), %v152_v1  ;;  %155 = vst [vmem:[%s136_s27 + $0x8] sm:$0xff] (%p52_p3), %v154_v2 }
  0x16   : > { %v160_v5 = vld [vmem:[%s139_s26 + $0x200] sm:$0xff] (%p52_p3)  ;;  %v162_v6 = vld [vmem:[%s139_s26 + $0x208] sm:$0xff] (%p52_p3)  ;;  %157 = vst [vmem:[%s136_s27 + $0x10] sm:$0xff] (%p52_p3), %v156_v3  ;;  %159 = vst [vmem:[%s136_s27 + $0x18] sm:$0xff] (%p52_p3), %v158_v4 }
  0x17   : > { %161 = vst [vmem:[%s136_s27 + $0x20] sm:$0xff] (%p52_p3), %v160_v5  ;;  %163 = vst [vmem:[%s136_s27 + $0x28] sm:$0xff] (%p52_p3), %v162_v6  ;;  %v164_v7 = vld [vmem:[%s139_s26 + $0x300] sm:$0xff] (%p52_p3)  ;;  %v166_v8 = vld [vmem:[%s139_s26 + $0x308] sm:$0xff] (%p52_p3) }
  0x18   : > { %v168_v9 = vld [vmem:[%s139_s26 + $0x400] sm:$0xff]  ;;  %165 = vst [vmem:[%s136_s27 + $0x30] sm:$0xff] %v164_v7  ;;  %167 = vst [vmem:[%s136_s27 + $0x38] sm:$0xff] %v166_v8  ;;  %v170_v10 = vld [vmem:[%s139_s26 + $0x408] sm:$0xff] }
  0x19   : > { %169 = vst [vmem:[%s136_s27 + $0x40] sm:$0xff] %v168_v9  ;;  %v172_v11 = vld [vmem:[%s139_s26 + $0x500] sm:$0xff]  ;;  %v174_v12 = vld [vmem:[%s139_s26 + $0x508] sm:$0xff]  ;;  %171 = vst [vmem:[%s136_s27 + $0x48] sm:$0xff] %v170_v10 }
  0x1a   : > { %173 = vst [vmem:[%s136_s27 + $0x50] sm:$0xff] %v172_v11  ;;  %175 = vst [vmem:[%s136_s27 + $0x58] sm:$0xff] %v174_v12  ;;  %v176_v13 = vld [vmem:[%s139_s26 + $0x600] sm:$0xff]  ;;  %v178_v14 = vld [vmem:[%s139_s26 + $0x608] sm:$0xff] }
  0x1b   : > { %177 = vst [vmem:[%s136_s27 + $0x60] sm:$0xff] %v176_v13  ;;  %179 = vst [vmem:[%s136_s27 + $0x68] sm:$0xff] %v178_v14 }
  0x1c PF: > { %p527_p5 = scmp.ge.s32.totalorder %s627_s16, 1  ;;  %p184_p6 = scmp.lt.s32.totalorder %s627_s16, 17 }
  0x1e   : > { %p185_p7 = pnand %p527_p5, %p184_p6 }
  0x1f   : > { %s191_s28 = sand.u32 (!%p185_p7), 1, %s619_s14   ;;  %v629_v15 = vmov (!%p185_p7), 0   ;;  %v235_v16 = vld [vmem:[#allocation2] sm:$0x1] (!%p185_p7)  ;;  %vm319_vm0 = vcmask (!%p185_p7), 1040384   ;;  %vm315_vm1 = vcmask (!%p185_p7), 408576   ;;  %v241_v38 = vlaneseq (!%p185_p7) }
  0x20   : > { %188 = sbr.rel (%p185_p7) target bundleno = 278 (0x116), region = 51  ;;  %364 = vmatprep.mubr.bf16.mxu0 (!%p185_p7), %v629_v15  ;;  %405 = vmatprep.mubr.bf16.mxu1 (!%p185_p7), %v629_v15  ;;  %v220_v37 = vld [vmem:[%s731_s0] sm:$0x1] (!%p185_p7)  ;;  %vm448_vm2 = vsmask.f32 (!%p185_p7), 256  ;;  %vm450_vm3 = vcmask (!%p185_p7), 1041409  }
  0x21   : > { %s555_s29 = smul.u32 (!%p185_p7), 112, %s191_s28  ;;  %582 = vset.pattern.permute.xlu0 (!%p185_p7), %v629_v15  ;;  %v242_v39 = vshrl.u32 (!%p185_p7), %v241_v38, 7  ;;  %v630_v41 = vmov (!%p185_p7), 1966171168   ;;  %vm451_vm4 = vsmask.f32 (!%p185_p7), 1280  ;;  %vm701_vm5 = vmand (!%p185_p7), %vm319_vm0, %vm448_vm2 }
  0x22   : > { %238 = vperm.xlu0 (!%p185_p7), %582, %v235_v16   ;;  %v425_v42 = vunpack.c.l.s4 (!%p185_p7), %v630_v41  ;;  %s528_s6 = sshll.u32 (!%p185_p7), %s521_s2, 2  ;;  %vm705_vm6 = vmand (!%p185_p7), %vm450_vm3, %vm451_vm4  ;;  %vm454_vm7 = vcmask (!%p185_p7), 1042434   ;;  %vm455_vm8 = vsmask.f32 (!%p185_p7), 2304  ;;  %vm458_vm11 = vcmask (!%p185_p7), 1043459  }
  0x23   : > { %s193_s30 = scalar_lea.vmem (!%p185_p7), [#allocation3], %s555_s29  ;;  %v243_v40 = vsub.s32 (!%p185_p7), 0, %v242_v39  ;;  %p215_p8 = scmp.lt.s32.totalorder (!%p185_p7), %s528_s6, 63  ;;  %vm453_vm9 = vmor (!%p185_p7), %vm705_vm6, %vm701_vm5  ;;  %vm459_vm12 = vsmask.f32 (!%p185_p7), 3328 }
  0x24   : > { %v583_v17 = vld [vmem:[%s193_s30 + $0x4] ss:$16 sps:$4 sm:$0xff] (!%p185_p7)   ;;  %v585_v18 = vld [vmem:[%s193_s30 + $0xc] ss:$16 sps:$4 sm:$0xff] (!%p185_p7)   ;;  %v587_v19 = vld [vmem:[%s193_s30] ss:$16 sps:$4 sm:$0xff] (!%p185_p7)   ;;  %v426_v47 = vunpack.c.0.s8 (!%p185_p7), %v425_v42 }
  0x25   : > { %332 = vmatprep.subr.bf16.mxu0 (!%p185_p7), %v583_v17  ;;  %v588_v20 = vld [vmem:[%s193_s30 + $0x8] ss:$16 sps:$4 sm:$0xff] (!%p185_p7)   ;;  %373 = vmatprep.subr.bf16.mxu1 (!%p185_p7), %v585_v18  ;;  %v589_v21 = vld [vmem:[%s193_s30 + $0x24] ss:$16 sps:$4 sm:$0xff] (!%p185_p7)   ;;  %v591_v22 = vld [vmem:[%s193_s30 + $0x2c] ss:$16 sps:$4 sm:$0xff] (!%p185_p7)  }
  0x26   : > { %333 = vmatpush1.bf16.msra.mxu0 (!%p185_p7), %v587_v19  ;;  %374 = vmatpush1.bf16.msra.mxu1 (!%p185_p7), %v588_v20  ;;  %v593_v23 = vld [vmem:[%s193_s30 + $0x20] ss:$16 sps:$4 sm:$0xff] (!%p185_p7)   ;;  %v594_v24 = vld [vmem:[%s193_s30 + $0x28] ss:$16 sps:$4 sm:$0xff] (!%p185_p7)   ;;  %v595_v25 = vld [vmem:[%s193_s30 + $0x44] ss:$16 sps:$4 sm:$0xff] (!%p185_p7)   ;;  %v429_v54 = vsub.s32 (!%p185_p7), %v426_v47, %v242_v39 }
  0x27   : > { %334 = vmatprep.subr.bf16.mxu0 %v589_v21  ;;  %375 = vmatprep.subr.bf16.mxu1 %v591_v22  ;;  %v597_v26 = vld [vmem:[%s193_s30 + $0x4c] ss:$16 sps:$4 sm:$0xff]   ;;  %v599_v27 = vld [vmem:[%s193_s30 + $0x40] ss:$16 sps:$4 sm:$0xff]   ;;  %v600_v28 = vld [vmem:[%s193_s30 + $0x48] ss:$16 sps:$4 sm:$0xff]  }
  0x28   : > { %v233_v29 = vld [vmem:[%s193_s30 + $0x60] sm:$0x11]  ;;  %v234_v30 = vld [vmem:[%s193_s30 + $0x68] sm:$0x11]  ;;  %vm456_vm10 = vmand %vm454_vm7, %vm455_vm8  ;;  %s743_s6 = smov (!%p215_p8, %s528_s6), 63 }
  0x29   : > { %v542_v31 = vcombine.high %v233_v29, %v233_v29  ;;  %v544_v32 = vcombine.high %v234_v30, %v234_v30  ;;  %v541_v33 = vcombine.low %v233_v29, %v233_v29  ;;  %v543_v34 = vcombine.low %v234_v30, %v234_v30  ;;  %vm457_vm13 = vmor %vm456_vm10, %vm453_vm9  ;;  %s217_s9 = scalar_lea.vmem %s734_s3, %s743_s6 }
  0x2a   : > { %335 = vmatpush1.bf16.msra.mxu0 %v593_v23  ;;  %376 = vmatpush1.bf16.msra.mxu1 %v594_v24  ;;  %vm460_vm14 = vmand %vm458_vm11, %vm459_vm12  ;;  %v462_v2 = vld [vmem:[%s217_s9] sm:$0xf] }
  0x2b   : > { %336 = vmatprep.subr.bf16.mxu0 %v595_v25  ;;  %377 = vmatprep.subr.bf16.mxu1 %v597_v26  ;;  %v321_v35 = vsel %vm319_vm0, %v541_v33, 0  ;;  %v327_v36 = vsel %vm319_vm0, %v543_v34, 0  ;;  %vm461_vm15 = vmor %vm460_vm14, %vm457_vm13 }
  0x2e   : > { %337 = vmatpush1.bf16.msra.mxu0 %v599_v27  ;;  %378 = vmatpush1.bf16.msra.mxu1 %v600_v28 }
  0x2f   : > { %545 = vmatprep.subr.msk.bf16.mxu0 %vm319_vm0, %v542_v31  ;;  %547 = vmatprep.subr.msk.bf16.mxu1 %vm319_vm0, %v544_v32 }
  0x32   : > { %339 = vmatpush1.bf16.msra.mxu0 %v321_v35  ;;  %380 = vmatpush1.bf16.msra.mxu1 %v327_v36 }
  0x35   : > { %546 = vmatmul.mubr.msk.bf16.vlgmr.msra.gmra.mrb[0].mxu0 %vm315_vm1, %v220_v37  ;;  %548 = vmatmul.mubr.msk.bf16.vlgmr.msra.gmra.mrb[0].mxu1 %vm315_vm1, %v220_v37 }
  0xa1   : > { %v239_v43 = vpop.permute.xlu0 %238 }
  0xa2   : > { %v244_v45 = vrot.slane %v239_v43, %v243_v40 }
 0x108   : > { %v366_v48 = vpop.f32.mrb[0].mxu0  ;;  %v407_v49 = vpop.f32.mrb[0].mxu1 }
 0x109   : > { %v367_v50 = vadd.f32 %v366_v48, %v244_v45  ;;  %v408_v51 = vadd.f32 %v407_v49, %v244_v45  ;;  %v368_v52 = vpop.f32.mrb[1].mxu0  ;;  %v409_v53 = vpop.f32.mrb[1].mxu1 }
 0x10a   : > { %v369_v55 = vadd.f32 %v368_v52, %v244_v45  ;;  %v410_v56 = vadd.f32 %v409_v53, %v244_v45  ;;  %v370_v57 = vpop.f32.mrb[2].mxu0  ;;  %v411_v58 = vpop.f32.mrb[2].mxu1 }
 0x10b   : > { %v371_v59 = vpop.f32.mrb[3].mxu0  ;;  %v412_v60 = vpop.f32.mrb[3].mxu1 }
 0x10c   : > { %v549_v61 = vpack.c.bf16 %v369_v55, %v367_v50  ;;  %v550_v62 = vpack.c.bf16 %v410_v56, %v408_v51 }
 0x10e   : > { %v430_v63 = vrot.slane %v549_v61, %v429_v54  ;;  %v437_v0 = vrot.slane %v550_v62, %v429_v54 }
 0x110   : > { %v438_v1 = vcombine.low %v430_v63, %v437_v0 }
 0x112   : > { %v445_v3 = vrot.slane %v438_v1, %v429_v54 }
 0x114   : > { %v463_v4 = vsel %vm461_vm15, %v445_v3, %v462_v2 }
 0x115   : > { %464 = vst [vmem:[%s217_s9] sm:$0xf] %v463_v4 }
 0x116 PF: > { %p12_p9 = scmp.ge.s32.totalorder %s671_s17, 18   ;;  %s739_s14 = smov %s623_s15 }
 0x117   : > { %s740_s15 = smov %s680_s20  ;;  %s741_s16 = smov %s671_s17 }
 0x118   :  { %14 = sbr.rel (!%p12_p9) target bundleno = 5 (0x5), region = 90 }

// kernel: d_forward.33
= control target key start
LH: loop header
LB: loop body
LE: loop exit
PB: predicated region body
PF: predicated region fallthrough
CT: control target
= control target key end

     0   :  { %s711_s0 = inlined_call_operand.vmem [shape: bf16[1,9], index: 0, kind: input, shape index: {}]   ;;  %s712_s1 = inlined_call_operand.vmem [shape: bf16[9,8192], index: 1, kind: input, shape index: {}]   ;;  %s713_s2 = inlined_call_operand.<no memory space> [shape: f32[1,1], index: 2, kind: input, shape index: {}]   ;;  %s714_s3 = inlined_call_operand.vmem [shape: bf16[1,8192], index: 3, kind: input, shape index: {}]   ;;  %s715_s4 = inlined_call_operand.vmem [shape: bf16[1,8192], index: 4, kind: output, shape index: {}]  }
   0x1   :  { %v9_v0 = vstv %s713_s2 }
   0x2   :  { %10 = vst [vmem:[#allocation2] sm:$0x1] %v9_v0 }
   0x3   :  { %s637_s17 = smov 0   ;;  %s639_s18 = smov 0  }
   0x4   :  { %s641_s19 = smov 0  }
   0x5 LB: > { %s526_s2 = sadd.s32 4294967295, %s604_s19   ;;  %s654_s20 = sadd.s32 1, %s604_s19   ;;  %s604_s19 = sphi %s641_s19, %s722_s19   ;;  %s600_s18 = sphi %s639_s18, %s721_s18   ;;  %s596_s17 = sphi %s637_s17, %s720_s17  }
   0x6   : > { %s41_s21 = ssub.s32 %s604_s19, %s654_s20  ;;  %s44_s22 = sadd.s32 1, %s600_s18 }
   0x7   : > { %p42_p0 = scmp.eq.s32.totalorder %s41_s21, 0  ;;  %p51_p1 = scmp.ne.s32.totalorder %s600_s18, %s596_s17 }
   0x8   : > { %p52_p2 = scmp.eq.s32.totalorder %s604_s19, 0  ;;  %p529_p4 = scmp.ge.s32.totalorder %s604_s19, 16 }
   0x9   : > { %s663_s23 = scalar_select %p42_p0, %s600_s18, %s44_s22  }
   0xa   : > { %p53_p3 = por %p52_p2, %p51_p1  ;;  %156 = sbr.rel (%p529_p4) target bundleno = 24 (0x18), region = 24 }
  0x11   : > { %159 = sbr.rel (!%p53_p3) target bundleno = 24 (0x18), region = 28  ;;  %s161_s24 = sand.u32 (%p53_p3), 1, %s600_s18  }
  0x12   : > { %s547_s25 = sshll.u32 (%p53_p3), %s604_s19, 4  ;;  %s530_s26 = sshll.u32 (%p53_p3), %s161_s24, 5 }
  0x13   : > { %s166_s29 = scalar_lea.vmem (%p53_p3), %s712_s1, %s547_s25  ;;  %s163_s30 = scalar_lea.vmem (%p53_p3), [#allocation3], %s530_s26 }
  0x14   : > { %v179_v1 = vld [vmem:[%s166_s29] sm:$0xff] (%p53_p3)  ;;  %v181_v2 = vld [vmem:[%s166_s29 + $0x8] sm:$0xff] (%p53_p3) }
  0x15   : > { %v183_v3 = vld [vmem:[%s166_s29 + $0x100] sm:$0xff] (%p53_p3)  ;;  %180 = vst [vmem:[%s163_s30] sm:$0xff] (%p53_p3), %v179_v1  ;;  %182 = vst [vmem:[%s163_s30 + $0x8] sm:$0xff] (%p53_p3), %v181_v2  ;;  %v185_v4 = vld [vmem:[%s166_s29 + $0x108] sm:$0xff] (%p53_p3) }
  0x16   : > { %184 = vst [vmem:[%s163_s30 + $0x10] sm:$0xff] (%p53_p3), %v183_v3  ;;  %186 = vst [vmem:[%s163_s30 + $0x18] sm:$0xff] (%p53_p3), %v185_v4 }
  0x18 PF: > { %p533_p5 = scmp.ge.s32.totalorder %s604_s19, 1  ;;  %p199_p6 = scmp.lt.s32.totalorder %s604_s19, 17 }
  0x1a   : > { %p200_p7 = pnand %p533_p5, %p199_p6 }
  0x1b   : > { %s206_s5 = sand.u32 (!%p200_p7), 1, %s596_s17   ;;  %vm281_vm0 = vcmask (!%p200_p7), 1043456   ;;  %vm282_vm1 = vcmask (!%p200_p7), 1044480   ;;  %v606_v5 = vmov (!%p200_p7), 65535   ;;  %v607_v7 = vmov (!%p200_p7), 0   ;;  %s535_s10 = sshll.u32 (!%p200_p7), %s526_s2, 2 }
  0x1c   : > { %203 = sbr.rel (%p200_p7) target bundleno = 266 (0x10a), region = 55  ;;  %s534_s6 = sshll.u32 (!%p200_p7), %s206_s5, 5  ;;  %v283_v6 = vsel (!%p200_p7), %vm281_vm0, 4294967295, %v606_v5  ;;  %329 = vmatprep.mubr.bf16.mxu0 (!%p200_p7), %v607_v7  ;;  %370 = vmatprep.mubr.bf16.mxu1 (!%p200_p7), %v607_v7  ;;  %v251_v9 = vld [vmem:[#allocation2] sm:$0x1] (!%p200_p7)  ;;  %vm277_vm2 = vcmask (!%p200_p7), 72704   ;;  %v257_v19 = vlaneseq (!%p200_p7) }
  0x1d   : > { %v284_v8 = vsel (!%p200_p7), %vm282_vm1, %v283_v6, 0  ;;  %575 = vset.pattern.permute.xlu0 (!%p200_p7), %v607_v7  ;;  %s208_s7 = scalar_lea.vmem (!%p200_p7), [#allocation3], %s534_s6  ;;  %v246_v18 = vld [vmem:[%s711_s0] sm:$0x1] (!%p200_p7)  ;;  %p236_p8 = scmp.lt.s32.totalorder (!%p200_p7), %s535_s10, 63  ;;  %vm443_vm3 = vcmask (!%p200_p7), 1040384  }
  0x1e   : > { %v576_v10 = vld [vmem:[%s208_s7 + $0x4] ss:$16 sps:$4 sm:$0x1f] (!%p200_p7)   ;;  %254 = vperm.xlu0 (!%p200_p7), %575, %v251_v9   ;;  %v578_v11 = vld [vmem:[%s208_s7 + $0xc] ss:$16 sps:$4 sm:$0x1f] (!%p200_p7)  }
  0x1f   : > { %v289_v12 = vand.u32 (!%p200_p7), %v576_v10, %v284_v8  ;;  %v580_v13 = vld [vmem:[%s208_s7] ss:$16 sps:$4 sm:$0x1f] (!%p200_p7)   ;;  %v581_v14 = vld [vmem:[%s208_s7 + $0x8] ss:$16 sps:$4 sm:$0x1f] (!%p200_p7)   ;;  %v295_v15 = vand.u32 (!%p200_p7), %v578_v11, %v284_v8 }
  0x20   : > { %v286_v16 = vand.u32 (!%p200_p7), %v580_v13, %v284_v8  ;;  %v292_v17 = vand.u32 (!%p200_p7), %v581_v14, %v284_v8  ;;  %v258_v20 = vshrl.u32 (!%p200_p7), %v257_v19, 7  ;;  %v608_v29 = vmov (!%p200_p7), 1966171168  }
  0x21   : > { %297 = vmatprep.subr.bf16.mxu0 (!%p200_p7), %v289_v12  ;;  %338 = vmatprep.subr.bf16.mxu1 (!%p200_p7), %v295_v15  ;;  %v421_v30 = vunpack.c.l.s4 (!%p200_p7), %v608_v29  ;;  %vm444_vm4 = vsmask.f32 (!%p200_p7), 256  ;;  %vm446_vm5 = vcmask (!%p200_p7), 1041409   ;;  %vm447_vm6 = vsmask.f32 (!%p200_p7), 1280 }
  0x22   : > { %298 = vmatpush1.bf16.msra.mxu0 (!%p200_p7), %v286_v16  ;;  %339 = vmatpush1.bf16.msra.mxu1 (!%p200_p7), %v292_v17  ;;  %v259_v22 = vsub.s32 (!%p200_p7), 0, %v258_v20  ;;  %v392_v25 = vsub.s32 (!%p200_p7), 4, %v258_v20  ;;  %v388_v26 = vsub.s32 (!%p200_p7), 2, %v258_v20  ;;  %v396_v27 = vsub.s32 (!%p200_p7), 6, %v258_v20  ;;  %vm685_vm7 = vmand (!%p200_p7), %vm443_vm3, %vm444_vm4 }
  0x23   : > { %s724_s10 = smov (!%p236_p8, %s535_s10), 63  ;;  %v422_v43 = vunpack.c.0.s8 %v421_v30  ;;  %vm689_vm8 = vmand %vm446_vm5, %vm447_vm6  ;;  %vm450_vm9 = vcmask 1042434   ;;  %vm451_vm10 = vsmask.f32 2304  ;;  %vm454_vm13 = vcmask 1043459  }
  0x24   : > { %s238_s13 = scalar_lea.vmem %s714_s3, %s724_s10  ;;  %vm449_vm11 = vmor %vm689_vm8, %vm685_vm7  ;;  %vm455_vm14 = vsmask.f32 3328  ;;  %s243_s16 = scalar_lea.vmem %s715_s4, %s724_s10 }
  0x25   : > { %541 = vmatmul.mubr.msk.bf16.vlgmr.msra.gmra.mrb[0].mxu0 %vm277_vm2, %v246_v18  ;;  %542 = vmatmul.mubr.msk.bf16.vlgmr.msra.gmra.mrb[0].mxu1 %vm277_vm2, %v246_v18  ;;  %v379_v21 = vld [vmem:[%s238_s13] sm:$0xf]  ;;  %v425_v57 = vsub.s32 %v422_v43, %v258_v20  ;;  %vm452_vm12 = vmand %vm450_vm9, %vm451_vm10 }
  0x26   : > { %v380_v24 = vunpack.c.l.bf16 %v379_v21  ;;  %vm453_vm15 = vmor %vm452_vm12, %vm449_vm11  ;;  %v458_v0 = vld [vmem:[%s243_s16] sm:$0xf] }
  0x27   : > { %vm456_vm0 = vmand %vm454_vm13, %vm455_vm14 }
  0x28   : > { %v385_v31 = vrot.slane %v380_v24, %v259_v22  ;;  %v393_v32 = vrot.slane %v380_v24, %v392_v25  ;;  %v389_v35 = vrot.slane %v380_v24, %v388_v26  ;;  %v397_v36 = vrot.slane %v380_v24, %v396_v27  ;;  %vm457_vm1 = vmor %vm456_vm0, %vm453_vm15 }
  0x9d   : > { %v255_v23 = vpop.permute.xlu0 %254 }
  0x9e   : > { %v260_v28 = vrot.slane %v255_v23, %v259_v22 }
  0xf8   : > { %v331_v33 = vpop.f32.mrb[0].mxu0  ;;  %v372_v34 = vpop.f32.mrb[0].mxu1 }
  0xf9   : > { %v332_v37 = vadd.f32 %v331_v33, %v260_v28  ;;  %v373_v38 = vadd.f32 %v372_v34, %v260_v28  ;;  %v333_v39 = vpop.f32.mrb[1].mxu0  ;;  %v374_v40 = vpop.f32.mrb[1].mxu1 }
  0xfa   : > { %v334_v42 = vadd.f32 %v333_v39, %v260_v28  ;;  %v375_v44 = vadd.f32 %v374_v40, %v260_v28  ;;  %v335_v46 = vpop.f32.mrb[2].mxu0  ;;  %v376_v47 = vpop.f32.mrb[2].mxu1 }
  0xfb   : > { %v402_v48 = vadd.f32 %v385_v31, %v332_v37  ;;  %v404_v49 = vadd.f32 %v393_v32, %v373_v38  ;;  %v336_v50 = vpop.f32.mrb[3].mxu0  ;;  %v377_v51 = vpop.f32.mrb[3].mxu1 }
  0xfc   : > { %v403_v52 = vadd.f32 %v389_v35, %v334_v42  ;;  %v405_v53 = vadd.f32 %v397_v36, %v375_v44 }
  0xfd   : > { %v406_v54 = vmax.f32 %v402_v48, 0.0  ;;  %v408_v55 = vmax.f32 %v404_v49, 0.0 }
  0xfe   : > { %v407_v56 = vmax.f32 %v403_v52, 0.0  ;;  %v409_v58 = vmax.f32 %v405_v53, 0.0 }
 0x100   : > { %v543_v59 = vpack.c.bf16 %v407_v56, %v406_v54  ;;  %v544_v60 = vpack.c.bf16 %v409_v58, %v408_v55 }
 0x102   : > { %v426_v61 = vrot.slane %v543_v59, %v425_v57  ;;  %v433_v62 = vrot.slane %v544_v60, %v425_v57 }
 0x104   : > { %v434_v63 = vcombine.low %v426_v61, %v433_v62 }
 0x106   : > { %v441_v1 = vrot.slane %v434_v63, %v425_v57 }
 0x108   : > { %v459_v2 = vsel %vm457_vm1, %v441_v1, %v458_v0 }
 0x109   : > { %460 = vst [vmem:[%s243_s16] sm:$0xf] %v459_v2 }
 0x10a PF: > { %p13_p9 = scmp.ge.s32.totalorder %s654_s20, 18   ;;  %s720_s17 = smov %s600_s18 }
 0x10b   : > { %s721_s18 = smov %s663_s23  ;;  %s722_s19 = smov %s654_s20 }
 0x10c   :  { %15 = sbr.rel (!%p13_p9) target bundleno = 5 (0x5), region = 97 }

</bundles_post_ra>
